<compile_context>
chip_gen: v6e
topology: v6e:2x2x1
jax: 0.10.0
libtpu: 0.0.40
codegen_flags: <defaults>
</compile_context>

<pallas_src>
import functools

import jax
import jax.numpy as jnp
import numpy as np
from jax.experimental import pallas as pl
from jax.experimental.pallas import tpu as pltpu

_MIB = 1024 * 1024


def _window_attention_kernel(x_ref, wqkv_ref, bqkv_ref, wp_ref, bp_ref,
                             bias_ref, o_ref, ctx_ref, *, windows_per_block,
                             tokens, num_heads, head_dim, mxu_dtype):
    """Processes WB windows per grid step; blocks are (WB*N, C) row slabs.

    NOTE(perf): before further MXU-side work, profile with a bundle dump —
    the score/softmax section (lane reductions on a <=128-lane scores tile,
    exp on the single EUP) is the likely saturated slot, not the MXU.
    """
    WB, N, H, hd = windows_per_block, tokens, num_heads, head_dim
    C = H * hd
    rows = WB * N

    x = x_ref[...].astype(mxu_dtype)                            # (rows, C)

    # Fused qkv projection (`scale` already folded into the q columns of the
    # weights).  Bias-add in f32, then a single cast of the whole slab to the
    # MXU operand dtype; every later slice / matmul works on that slab.
    qkv = jnp.dot(x, wqkv_ref[...].astype(mxu_dtype),
                  preferred_element_type=jnp.float32)           # (rows, 3C) f32
    qkv = (qkv + bqkv_ref[...]).astype(mxu_dtype)               # single cast

    # Gather per-head q/k/v into one head-major batch (H*WB, N, hd) so the
    # attention core runs as ONE batched dot_general per stage (scores / PV)
    # instead of H tiny unrolled matmuls.  Only static lane slices and
    # major-axis reshape/concat are used (no lane relayout).
    def gather(col_base):
        parts = [
            qkv[:, col_base + h * hd: col_base + (h + 1) * hd].reshape(WB, N, hd)
            for h in range(H)
        ]
        return jnp.concatenate(parts, axis=0)                   # (H*WB, N, hd)

    q = gather(0)
    k = gather(C)
    v = gather(2 * C)

    # Batched attention scores for all windows x heads: (H*WB, N, N) f32.
    s = jnp.einsum('bnd,bmd->bnm', q, k, preferred_element_type=jnp.float32)

    # Relative-position bias (H, N, N) broadcast over the WB windows of each
    # head (batch is head-major, so split the batch dim and broadcast).
    s = (s.reshape(H, WB, N, N) + bias_ref[...][:, None, :, :]).reshape(H * WB, N, N)

    # Numerically-stable softmax in f32.  The 1/denom normalization is applied
    # AFTER the PV matmul (hd-lane tile instead of the N-lane scores tile) and
    # uses the EUP reciprocal.
    s = s - jnp.max(s, axis=-1, keepdims=True)
    p = jnp.exp(s)
    denom = jnp.sum(p, axis=-1, keepdims=True)                  # (H*WB, N, 1)

    o = jnp.einsum('bnm,bmd->bnd', p.astype(mxu_dtype), v,
                   preferred_element_type=jnp.float32)          # (H*WB, N, hd)
    o = o * pl.reciprocal(denom, approx=True)

    # Scatter heads back into the (rows, C) VMEM scratch at static column
    # offsets (replaces the lane-concat + Python-list live ranges of the
    # previous version); the output projection reads the full slab.
    for h in range(H):
        ctx_ref[:, h * hd:(h + 1) * hd] = o[h * WB:(h + 1) * WB].reshape(rows, hd)

    y = jnp.dot(ctx_ref[...].astype(mxu_dtype), wp_ref[...].astype(mxu_dtype),
                preferred_element_type=jnp.float32)             # (rows, C) f32
    o_ref[...] = (y + bp_ref[...]).astype(o_ref.dtype)


def fold_scale_into_qkv(w_qkv, b_qkv, scale, dim):
    """One-time parameter transform: fold the attention scale into the q
    columns of the qkv projection (free at run time)."""
    w = w_qkv.at[:, :dim].multiply(scale)
    b = b_qkv.at[:dim].multiply(scale)
    return w, b


def _device_info():
    """Best-effort (vmem_bytes_per_tensorcore, num_tensorcores)."""
    try:
        kind = jax.devices()[0].device_kind.lower()
    except Exception:
        return 64 * _MIB, 1                    # conservative fallback
    if "v7" in kind:
        return 64 * _MIB, 2                    # v7x: 64 MiB / TC, 2 TCs
    if ("v4" in kind) or ("v5p" in kind):
        return 128 * _MIB, 2                   # megacore chips
    return 128 * _MIB, 1                       # v5e / v6e


def _sublane_multiple(*dtypes):
    """Sublane alignment required by the row dim of the x / out blocks."""
    req = 8
    for dt in dtypes:
        size = jnp.dtype(dt).itemsize
        if size == 2:
            req = max(req, 16)
        elif size == 1:
            req = max(req, 32)
    return req


def _choose_windows_per_block(num_windows, tokens, target_rows, sublane,
                              num_cores):
    """Largest divisor WB of num_windows with WB*tokens <= target_rows and
    WB*tokens sublane-aligned; prefer a grid-step count that load-balances
    across the TensorCores (even #steps on 2-TC chips)."""
    divisors = [d for d in range(1, num_windows + 1) if num_windows % d == 0]
    fits = [d for d in divisors
            if d * tokens <= target_rows and (d * tokens) % sublane == 0]
    if not fits:
        aligned = [d for d in divisors if (d * tokens) % sublane == 0]
        # Fall back: smallest aligned divisor, else one full-array block
        # (block dims equal to the full array dims are always legal).
        return min(aligned) if aligned else num_windows
    balanced = [d for d in fits if (num_windows // d) % num_cores == 0]
    return max(balanced) if balanced else max(fits)


def window_attention(x, w_qkv_scaled, b_qkv_scaled, w_proj, b_proj,
                     rel_pos_bias, *, num_heads, mxu_dtype=jnp.bfloat16,
                     windows_per_block=None):
    """x: (B_, N, C); rel_pos_bias: (H, N, N).  mask=None / eval-mode path.

    w_qkv_scaled / b_qkv_scaled must already have the attention scale folded
    into their q part (see fold_scale_into_qkv).  bf16 MXU operands are the
    recommended default on every generation (v5e included: its peak is the
    bf16 rate); softmax / accumulation always stay f32.  Use
    mxu_dtype=jnp.float32 for bit-closer parity with an f32 reference.
    """
    B_, N, C = x.shape
    assert C % num_heads == 0
    head_dim = C // num_heads
    out_dtype = x.dtype
    H = num_heads

    vmem_bytes, num_cores = _device_info()
    # v7x (64 MiB/TC): smaller row slabs + headroom; v5e/v6e (128 MiB): larger
    # row slabs to fill MXU M and amortize the ~0.35us/step grid overhead.
    target_rows = 512 if vmem_bytes <= 64 * _MIB else 2048
    vmem_cap = vmem_bytes - 16 * _MIB          # leave compiler headroom

    # 2-D (rows, C) presentation: contiguous row stores, lane-dense when
    # C % 128 == 0 (e.g. Swin C=768).
    x2d = x.reshape(B_ * N, C)
    if mxu_dtype != jnp.float32:
        # In real use the params would be stored in bf16; cast here for demo.
        x2d = x2d.astype(mxu_dtype)
        w_qkv_scaled = w_qkv_scaled.astype(mxu_dtype)
        w_proj = w_proj.astype(mxu_dtype)
    rel_pos_bias = rel_pos_bias.astype(jnp.float32)
    b_qkv2d = b_qkv_scaled.reshape(1, 3 * C).astype(jnp.float32)
    b_proj2d = b_proj.reshape(1, C).astype(jnp.float32)

    sublane = _sublane_multiple(x2d.dtype, out_dtype)
    if windows_per_block is None:
        windows_per_block = _choose_windows_per_block(
            B_, N, target_rows, sublane, num_cores)
    WB = windows_per_block
    assert B_ % WB == 0
    num_blocks = B_ // WB
    rows = WB * N

    kernel = functools.partial(
        _window_attention_kernel, windows_per_block=WB, tokens=N,
        num_heads=H, head_dim=head_dim, mxu_dtype=mxu_dtype)

    # Advisory cost estimate for XLA scheduling around the custom call.
    flops_per_window = 2 * N * C * 3 * C + 4 * N * N * C + 2 * N * C * C
    it_in = jnp.dtype(x2d.dtype).itemsize
    it_w = jnp.dtype(w_qkv_scaled.dtype).itemsize
    it_out = jnp.dtype(out_dtype).itemsize
    it_mxu = jnp.dtype(mxu_dtype).itemsize
    bytes_accessed = int(B_ * N * C * (it_in + it_out)
                         + 4 * C * C * it_w + H * N * N * 4 + 4 * C * 4)
    cost = pl.CostEstimate(flops=int(B_ * flops_per_window),
                           transcendentals=int(B_ * H * N * N),
                           bytes_accessed=bytes_accessed)

    def build_specs(weight_mode):
        kw = {} if weight_mode is None else {"pipeline_mode": weight_mode}
        in_specs = [
            pl.BlockSpec((rows, C), lambda b: (b, 0)),                 # x
            pl.BlockSpec((C, 3 * C), lambda b: (0, 0), **kw),          # W_qkv
            pl.BlockSpec((1, 3 * C), lambda b: (0, 0), **kw),          # b_qkv
            pl.BlockSpec((C, C), lambda b: (0, 0), **kw),              # W_proj
            pl.BlockSpec((1, C), lambda b: (0, 0), **kw),              # b_proj
            pl.BlockSpec((H, N, N), lambda b: (0, 0, 0), **kw),        # bias
        ]
        out_spec = pl.BlockSpec((rows, C), lambda b: (b, 0))
        return in_specs, out_spec

    def run(weight_mode):
        weight_bufs = 1 if weight_mode is not None else 2
        # Rough VMEM budget (blocks + live intermediates), clamped below the
        # per-generation cap so compiler scratch always has headroom.
        est = (2 * rows * C * it_in                       # x blocks
               + 2 * rows * C * it_out                    # out blocks
               + weight_bufs * 4 * C * C * it_w           # W_qkv + W_proj
               + weight_bufs * (H * N * N + 4 * C) * 4    # bias blocks
               + rows * C * 4                             # ctx scratch
               + rows * 3 * C * (4 + it_mxu)              # qkv f32 + cast
               + 3 * rows * C * it_mxu                    # q / k / v
               + 2 * WB * H * N * N * 4                   # scores / probs
               + rows * C * 4)                            # attention output
        vmem_limit = int(min(vmem_cap, max(32 * _MIB, int(1.25 * est))))
        in_specs, out_spec = build_specs(weight_mode)
        return pl.pallas_call(
            kernel,
            out_shape=jax.ShapeDtypeStruct((B_ * N, C), out_dtype),
            grid_spec=pltpu.PrefetchScalarGridSpec(
                num_scalar_prefetch=0,
                grid=(num_blocks,),
                in_specs=in_specs,
                out_specs=out_spec,
                scratch_shapes=[pltpu.VMEM((rows, C), jnp.float32)],
            ),
            compiler_params=pltpu.CompilerParams(
                dimension_semantics=("parallel",),
                vmem_limit_bytes=vmem_limit),
            cost_estimate=cost,
        )(x2d, w_qkv_scaled, b_qkv2d, w_proj, b_proj2d, rel_pos_bias)

    # Constant-index weight/bias blocks never change index, so their second
    # pipeline buffer is pure VMEM waste; single-buffer them when this JAX
    # supports pipeline_mode=pl.Buffered(1), otherwise fall back cleanly to
    # the default double-buffered constants (small VMEM waste only).
    try:
        out2d = jax.block_until_ready(run(pl.Buffered(1)))
    except Exception:
        out2d = run(None)

    return out2d.reshape(B_, N, C)


def make_relative_position_index(window_size):
    """Same construction as the PyTorch __init__ buffer."""
    Wh, Ww = window_size
    coords = np.stack(np.meshgrid(np.arange(Wh), np.arange(Ww), indexing="ij"))
    coords_flatten = coords.reshape(2, -1)                              # (2, N)
    relative_coords = coords_flatten[:, :, None] - coords_flatten[:, None, :]
    relative_coords = relative_coords.transpose(1, 2, 0).copy()         # (N, N, 2)
    relative_coords[:, :, 0] += Wh - 1
    relative_coords[:, :, 1] += Ww - 1
    relative_coords[:, :, 0] *= 2 * Ww - 1
    return relative_coords.sum(-1)                                      # (N, N)


def reference_window_attention(x, w_qkv, b_qkv, w_proj, b_proj, rel_pos_bias,
                               *, num_heads, scale):
    """Pure-JAX reference mirroring the PyTorch forward (mask=None)."""
    B_, N, C = x.shape
    hd = C // num_heads
    qkv = x @ w_qkv + b_qkv[None, None, :]                 # (B_, N, 3C)
    qkv = qkv.reshape(B_, N, 3, num_heads, hd).transpose(2, 0, 3, 1, 4)
    q, k, v = qkv[0], qkv[1], qkv[2]                       # (B_, H, N, hd)
    q = q * scale
    attn = jnp.einsum("bhnd,bhmd->bhnm", q, k)
    attn = attn + rel_pos_bias[None]
    attn = jax.nn.softmax(attn, axis=-1)
    out = jnp.einsum("bhnm,bhmd->bhnd", attn, v)
    out = out.transpose(0, 2, 1, 3).reshape(B_, N, C)
    return out @ w_proj + b_proj[None, None, :]


if __name__ == "__main__":
    # Small, deterministic configuration.
    dim = 32
    window_size = (4, 4)
    num_heads = 4
    head_dim = dim // num_heads
    scale = head_dim ** (-0.5)
    N = window_size[0] * window_size[1]          # 16 tokens per window
    B_ = 8                                       # number of windows

    key = jax.random.PRNGKey(0)
    k_x, k_tab, k_wqkv, k_bqkv, k_wp, k_bp = jax.random.split(key, 6)

    x = jax.random.normal(k_x, (B_, N, dim), dtype=jnp.float32)

    # Parameters (deterministic synthetic init; mirrors shapes in __init__).
    num_rel = (2 * window_size[0] - 1) * (2 * window_size[1] - 1)
    rel_pos_bias_table = 0.02 * jax.random.normal(
        k_tab, (num_rel, num_heads), dtype=jnp.float32)
    w_qkv = 0.05 * jax.random.normal(k_wqkv, (dim, 3 * dim), dtype=jnp.float32)
    b_qkv = 0.05 * jax.random.normal(k_bqkv, (3 * dim,), dtype=jnp.float32)
    w_proj = 0.05 * jax.random.normal(k_wp, (dim, dim), dtype=jnp.float32)
    b_proj = 0.05 * jax.random.normal(k_bp, (dim,), dtype=jnp.float32)

    # Relative-position bias gather (glue, done once in JAX).
    rel_idx = jnp.asarray(make_relative_position_index(window_size))    # (N, N)
    rel_pos_bias = rel_pos_bias_table[rel_idx.reshape(-1)]
    rel_pos_bias = rel_pos_bias.reshape(N, N, num_heads).transpose(2, 0, 1)

    # One-time parameter prep: fold scale into the q part of the qkv weights.
    w_qkv_s, b_qkv_s = fold_scale_into_qkv(w_qkv, b_qkv, scale, dim)

    ref = reference_window_attention(
        x, w_qkv, b_qkv, w_proj, b_proj, rel_pos_bias,
        num_heads=num_heads, scale=scale)

    # f32 MXU path (tolerance loosened slightly for the EUP approx reciprocal).
    out_f32 = window_attention(
        x, w_qkv_s, b_qkv_s, w_proj, b_proj, rel_pos_bias,
        num_heads=num_heads, mxu_dtype=jnp.float32)
    out_f32 = jax.block_until_ready(out_f32)
    assert out_f32.shape == (B_, N, dim)
    np.testing.assert_allclose(np.asarray(out_f32), np.asarray(ref),
                               rtol=2e-3, atol=2e-3)

    # bf16 MXU-operand path (recommended default on v5e/v6e/v7x); f32
    # accumulation/softmax.
    out_bf16 = window_attention(
        x, w_qkv_s, b_qkv_s, w_proj, b_proj, rel_pos_bias,
        num_heads=num_heads, mxu_dtype=jnp.bfloat16)
    out_bf16 = jax.block_until_ready(out_bf16)
    np.testing.assert_allclose(np.asarray(out_bf16), np.asarray(ref),
                               rtol=5e-2, atol=5e-2)

    print("KERNEL_OK")
</pallas_src>

<mosaic_0001>
module attributes {stable_mosaic.version = 11 : i64} {
  func.func @_window_attention_kernel(%arg0: i32, %arg1: memref<128x32xf32, #tpu.memory_space<vmem>>, %arg2: memref<32x96xf32, #tpu.memory_space<vmem>>, %arg3: memref<1x96xf32, #tpu.memory_space<vmem>>, %arg4: memref<32x32xf32, #tpu.memory_space<vmem>>, %arg5: memref<1x32xf32, #tpu.memory_space<vmem>>, %arg6: memref<4x16x16xf32, #tpu.memory_space<vmem>>, %arg7: memref<128x32xf32, #tpu.memory_space<vmem>>, %arg8: memref<128x32xf32, #tpu.memory_space<vmem>>) attributes {dimension_semantics = [#tpu.dimension_semantics<parallel>], iteration_bounds = array<i64: 1>, scalar_prefetch = 0 : i64, scratch_operands = 1 : i64, tpu.core_type = #tpu.core_type<tc>, window_params = [{transform_indices = @transform_0, window_bounds = array<i64: 128, 32>}, {pipeline_mode = #tpu.pipeline_mode<synchronous>, transform_indices = @transform_1, window_bounds = array<i64: 32, 96>}, {pipeline_mode = #tpu.pipeline_mode<synchronous>, transform_indices = @transform_2, window_bounds = array<i64: 1, 96>}, {pipeline_mode = #tpu.pipeline_mode<synchronous>, transform_indices = @transform_3, window_bounds = array<i64: 32, 32>}, {pipeline_mode = #tpu.pipeline_mode<synchronous>, transform_indices = @transform_4, window_bounds = array<i64: 1, 32>}, {pipeline_mode = #tpu.pipeline_mode<synchronous>, transform_indices = @transform_5, window_bounds = array<i64: 4, 16, 16>}, {transform_indices = @transform_6, window_bounds = array<i64: 128, 32>}]} {
    %c0 = arith.constant 0 : index
    %c0_0 = arith.constant 0 : index
    %0 = vector.load %arg1[%c0, %c0_0] : memref<128x32xf32, #tpu.memory_space<vmem>>, vector<128x32xf32>
    %c0_1 = arith.constant 0 : index
    %c0_2 = arith.constant 0 : index
    %1 = vector.load %arg2[%c0_1, %c0_2] : memref<32x96xf32, #tpu.memory_space<vmem>>, vector<32x96xf32>
    %cst = arith.constant dense<0.000000e+00> : vector<128x96xf32>
    %2 = tpu.matmul %0, %1, %cst {dimension_numbers = #tpu.dot_dimension_numbers<[1], [0], [0], [1], [0, 0, 1, 1], [], []>} : vector<128x32xf32>, vector<32x96xf32>, vector<128x96xf32> -> vector<128x96xf32>
    %c0_3 = arith.constant 0 : index
    %c0_4 = arith.constant 0 : index
    %3 = vector.load %arg3[%c0_3, %c0_4] : memref<1x96xf32, #tpu.memory_space<vmem>>, vector<1x96xf32>
    %4 = vector.broadcast %3 : vector<1x96xf32> to vector<128x96xf32>
    %5 = arith.addf %2, %4 : vector<128x96xf32>
    %6 = vector.extract_strided_slice %5 {offsets = [0, 0], sizes = [128, 8], strides = [1, 1]} : vector<128x96xf32> to vector<128x8xf32>
    %7 = vector.shape_cast %6 : vector<128x8xf32> to vector<8x16x8xf32>
    %8 = vector.extract_strided_slice %5 {offsets = [0, 8], sizes = [128, 8], strides = [1, 1]} : vector<128x96xf32> to vector<128x8xf32>
    %9 = vector.shape_cast %8 : vector<128x8xf32> to vector<8x16x8xf32>
    %10 = vector.extract_strided_slice %5 {offsets = [0, 16], sizes = [128, 8], strides = [1, 1]} : vector<128x96xf32> to vector<128x8xf32>
    %11 = vector.shape_cast %10 : vector<128x8xf32> to vector<8x16x8xf32>
    %12 = vector.extract_strided_slice %5 {offsets = [0, 24], sizes = [128, 8], strides = [1, 1]} : vector<128x96xf32> to vector<128x8xf32>
    %13 = vector.shape_cast %12 : vector<128x8xf32> to vector<8x16x8xf32>
    %14 = tpu.concatenate %7, %9, %11, %13 in 0 : vector<8x16x8xf32>, vector<8x16x8xf32>, vector<8x16x8xf32>, vector<8x16x8xf32> -> vector<32x16x8xf32>
    %15 = vector.extract_strided_slice %5 {offsets = [0, 32], sizes = [128, 8], strides = [1, 1]} : vector<128x96xf32> to vector<128x8xf32>
    %16 = vector.shape_cast %15 : vector<128x8xf32> to vector<8x16x8xf32>
    %17 = vector.extract_strided_slice %5 {offsets = [0, 40], sizes = [128, 8], strides = [1, 1]} : vector<128x96xf32> to vector<128x8xf32>
    %18 = vector.shape_cast %17 : vector<128x8xf32> to vector<8x16x8xf32>
    %19 = vector.extract_strided_slice %5 {offsets = [0, 48], sizes = [128, 8], strides = [1, 1]} : vector<128x96xf32> to vector<128x8xf32>
    %20 = vector.shape_cast %19 : vector<128x8xf32> to vector<8x16x8xf32>
    %21 = vector.extract_strided_slice %5 {offsets = [0, 56], sizes = [128, 8], strides = [1, 1]} : vector<128x96xf32> to vector<128x8xf32>
    %22 = vector.shape_cast %21 : vector<128x8xf32> to vector<8x16x8xf32>
    %23 = tpu.concatenate %16, %18, %20, %22 in 0 : vector<8x16x8xf32>, vector<8x16x8xf32>, vector<8x16x8xf32>, vector<8x16x8xf32> -> vector<32x16x8xf32>
    %24 = vector.extract_strided_slice %5 {offsets = [0, 64], sizes = [128, 8], strides = [1, 1]} : vector<128x96xf32> to vector<128x8xf32>
    %25 = vector.shape_cast %24 : vector<128x8xf32> to vector<8x16x8xf32>
    %26 = vector.extract_strided_slice %5 {offsets = [0, 72], sizes = [128, 8], strides = [1, 1]} : vector<128x96xf32> to vector<128x8xf32>
    %27 = vector.shape_cast %26 : vector<128x8xf32> to vector<8x16x8xf32>
    %28 = vector.extract_strided_slice %5 {offsets = [0, 80], sizes = [128, 8], strides = [1, 1]} : vector<128x96xf32> to vector<128x8xf32>
    %29 = vector.shape_cast %28 : vector<128x8xf32> to vector<8x16x8xf32>
    %30 = vector.extract_strided_slice %5 {offsets = [0, 88], sizes = [128, 8], strides = [1, 1]} : vector<128x96xf32> to vector<128x8xf32>
    %31 = vector.shape_cast %30 : vector<128x8xf32> to vector<8x16x8xf32>
    %32 = tpu.concatenate %25, %27, %29, %31 in 0 : vector<8x16x8xf32>, vector<8x16x8xf32>, vector<8x16x8xf32>, vector<8x16x8xf32> -> vector<32x16x8xf32>
    "tpu.trace_start"() <{level = 10 : i32, message = "bnd,bmd->bnm"}> : () -> ()
    %cst_5 = arith.constant dense<0.000000e+00> : vector<32x16x16xf32>
    %33 = tpu.matmul %14, %23, %cst_5 {dimension_numbers = #tpu.dot_dimension_numbers<[2], [2], [1], [1], [0, 0, 0, 1, 1, 1], [0], [0]>} : vector<32x16x8xf32>, vector<32x16x8xf32>, vector<32x16x16xf32> -> vector<32x16x16xf32>
    "tpu.trace_stop"() : () -> ()
    %34 = vector.shape_cast %33 : vector<32x16x16xf32> to vector<4x8x16x16xf32>
    %c0_6 = arith.constant 0 : index
    %c0_7 = arith.constant 0 : index
    %c0_8 = arith.constant 0 : index
    %35 = vector.load %arg6[%c0_6, %c0_7, %c0_8] : memref<4x16x16xf32, #tpu.memory_space<vmem>>, vector<4x16x16xf32>
    %36 = vector.shape_cast %35 : vector<4x16x16xf32> to vector<4x1x16x16xf32>
    %37 = vector.broadcast %36 : vector<4x1x16x16xf32> to vector<4x8x16x16xf32>
    %38 = arith.addf %34, %37 : vector<4x8x16x16xf32>
    %39 = vector.shape_cast %38 : vector<4x8x16x16xf32> to vector<32x16x16xf32>
    %cst_9 = arith.constant dense<0xFF800000> : vector<32x16xf32>
    %40 = vector.multi_reduction <maximumf>, %39, %cst_9 [2] : vector<32x16x16xf32> to vector<32x16xf32>
    %41 = vector.shape_cast %40 : vector<32x16xf32> to vector<32x16x1xf32>
    %42 = vector.broadcast %41 : vector<32x16x1xf32> to vector<32x16x16xf32>
    %43 = arith.subf %39, %42 : vector<32x16x16xf32>
    %44 = math.exp %43 : vector<32x16x16xf32>
    %cst_10 = arith.constant dense<0.000000e+00> : vector<32x16xf32>
    %45 = vector.multi_reduction <add>, %44, %cst_10 [2] : vector<32x16x16xf32> to vector<32x16xf32>
    %46 = vector.shape_cast %45 : vector<32x16xf32> to vector<32x16x1xf32>
    "tpu.trace_start"() <{level = 10 : i32, message = "bnm,bmd->bnd"}> : () -> ()
    %cst_11 = arith.constant dense<0.000000e+00> : vector<32x16x8xf32>
    %47 = tpu.matmul %44, %32, %cst_11 {dimension_numbers = #tpu.dot_dimension_numbers<[2], [1], [1], [2], [0, 0, 0, 1, 1, 2], [0], [0]>} : vector<32x16x16xf32>, vector<32x16x8xf32>, vector<32x16x8xf32> -> vector<32x16x8xf32>
    "tpu.trace_stop"() : () -> ()
    %48 = tpu.reciprocal %46 {approx = true} : vector<32x16x1xf32> -> vector<32x16x1xf32>
    %49 = vector.broadcast %48 : vector<32x16x1xf32> to vector<32x16x8xf32>
    %50 = arith.mulf %47, %49 : vector<32x16x8xf32>
    %51 = vector.extract_strided_slice %50 {offsets = [0, 0, 0], sizes = [8, 16, 8], strides = [1, 1, 1]} : vector<32x16x8xf32> to vector<8x16x8xf32>
    %52 = vector.shape_cast %51 : vector<8x16x8xf32> to vector<128x8xf32>
    %c0_12 = arith.constant 0 : index
    %c0_13 = arith.constant 0 : index
    %53 = vector.load %arg8[%c0_12, %c0_13] : memref<128x32xf32, #tpu.memory_space<vmem>>, vector<128x8xf32>
    tpu.vector_store %arg8[%c0_12, %c0_13], %52 {strides = array<i32>} : memref<128x32xf32, #tpu.memory_space<vmem>>, vector<128x8xf32>,
    %54 = vector.extract_strided_slice %50 {offsets = [8, 0, 0], sizes = [8, 16, 8], strides = [1, 1, 1]} : vector<32x16x8xf32> to vector<8x16x8xf32>
    %55 = vector.shape_cast %54 : vector<8x16x8xf32> to vector<128x8xf32>
    %c0_14 = arith.constant 0 : index
    %c8 = arith.constant 8 : index
    %56 = vector.load %arg8[%c0_14, %c8] : memref<128x32xf32, #tpu.memory_space<vmem>>, vector<128x8xf32>
    tpu.vector_store %arg8[%c0_14, %c8], %55 {strides = array<i32>} : memref<128x32xf32, #tpu.memory_space<vmem>>, vector<128x8xf32>,
    %57 = vector.extract_strided_slice %50 {offsets = [16, 0, 0], sizes = [8, 16, 8], strides = [1, 1, 1]} : vector<32x16x8xf32> to vector<8x16x8xf32>
    %58 = vector.shape_cast %57 : vector<8x16x8xf32> to vector<128x8xf32>
    %c0_15 = arith.constant 0 : index
    %c16 = arith.constant 16 : index
    %59 = vector.load %arg8[%c0_15, %c16] : memref<128x32xf32, #tpu.memory_space<vmem>>, vector<128x8xf32>
    tpu.vector_store %arg8[%c0_15, %c16], %58 {strides = array<i32>} : memref<128x32xf32, #tpu.memory_space<vmem>>, vector<128x8xf32>,
    %60 = vector.extract_strided_slice %50 {offsets = [24, 0, 0], sizes = [8, 16, 8], strides = [1, 1, 1]} : vector<32x16x8xf32> to vector<8x16x8xf32>
    %61 = vector.shape_cast %60 : vector<8x16x8xf32> to vector<128x8xf32>
    %c0_16 = arith.constant 0 : index
    %c24 = arith.constant 24 : index
    %62 = vector.load %arg8[%c0_16, %c24] : memref<128x32xf32, #tpu.memory_space<vmem>>, vector<128x8xf32>
    tpu.vector_store %arg8[%c0_16, %c24], %61 {strides = array<i32>} : memref<128x32xf32, #tpu.memory_space<vmem>>, vector<128x8xf32>,
    %c0_17 = arith.constant 0 : index
    %c0_18 = arith.constant 0 : index
    %63 = vector.load %arg8[%c0_17, %c0_18] : memref<128x32xf32, #tpu.memory_space<vmem>>, vector<128x32xf32>
    %c0_19 = arith.constant 0 : index
    %c0_20 = arith.constant 0 : index
    %64 = vector.load %arg4[%c0_19, %c0_20] : memref<32x32xf32, #tpu.memory_space<vmem>>, vector<32x32xf32>
    %cst_21 = arith.constant dense<0.000000e+00> : vector<128x32xf32>
    %65 = tpu.matmul %63, %64, %cst_21 {dimension_numbers = #tpu.dot_dimension_numbers<[1], [0], [0], [1], [0, 0, 1, 1], [], []>} : vector<128x32xf32>, vector<32x32xf32>, vector<128x32xf32> -> vector<128x32xf32>
    %c0_22 = arith.constant 0 : index
    %c0_23 = arith.constant 0 : index
    %66 = vector.load %arg5[%c0_22, %c0_23] : memref<1x32xf32, #tpu.memory_space<vmem>>, vector<1x32xf32>
    %67 = vector.broadcast %66 : vector<1x32xf32> to vector<128x32xf32>
    %68 = arith.addf %65, %67 : vector<128x32xf32>
    %c0_24 = arith.constant 0 : index
    %c0_25 = arith.constant 0 : index
    %69 = vector.load %arg7[%c0_24, %c0_25] : memref<128x32xf32, #tpu.memory_space<vmem>>, vector<128x32xf32>
    tpu.vector_store %arg7[%c0_24, %c0_25], %68 {strides = array<i32>} : memref<128x32xf32, #tpu.memory_space<vmem>>, vector<128x32xf32>,
    return
  }
  func.func @transform_0(%arg0: i32) -> (i32, i32) {
    %c0_i32 = arith.constant 0 : i32
    %c0_i32_0 = arith.constant 0 : i32
    return %arg0, %c0_i32 : i32, i32
  }
  func.func @transform_1(%arg0: i32) -> (i32, i32) {
    %c0_i32 = arith.constant 0 : i32
    %c0_i32_0 = arith.constant 0 : i32
    %c0_i32_1 = arith.constant 0 : i32
    return %c0_i32, %c0_i32_0 : i32, i32
  }
  func.func @transform_2(%arg0: i32) -> (i32, i32) {
    %c0_i32 = arith.constant 0 : i32
    %c0_i32_0 = arith.constant 0 : i32
    %c0_i32_1 = arith.constant 0 : i32
    return %c0_i32, %c0_i32_0 : i32, i32
  }
  func.func @transform_3(%arg0: i32) -> (i32, i32) {
    %c0_i32 = arith.constant 0 : i32
    %c0_i32_0 = arith.constant 0 : i32
    %c0_i32_1 = arith.constant 0 : i32
    return %c0_i32, %c0_i32_0 : i32, i32
  }
  func.func @transform_4(%arg0: i32) -> (i32, i32) {
    %c0_i32 = arith.constant 0 : i32
    %c0_i32_0 = arith.constant 0 : i32
    %c0_i32_1 = arith.constant 0 : i32
    return %c0_i32, %c0_i32_0 : i32, i32
  }
  func.func @transform_5(%arg0: i32) -> (i32, i32, i32) {
    %c0_i32 = arith.constant 0 : i32
    %c0_i32_0 = arith.constant 0 : i32
    %c0_i32_1 = arith.constant 0 : i32
    %c0_i32_2 = arith.constant 0 : i32
    return %c0_i32, %c0_i32_0, %c0_i32_1 : i32, i32, i32
  }
  func.func @transform_6(%arg0: i32) -> (i32, i32) {
    %c0_i32 = arith.constant 0 : i32
    %c0_i32_0 = arith.constant 0 : i32
    return %arg0, %c0_i32 : i32, i32
  }
}

module attributes {stable_mosaic.version = 11 : i64} {
  func.func @_window_attention_kernel(%arg0: i32, %arg1: memref<128x32xf32, #tpu.memory_space<vmem>>, %arg2: memref<32x96xf32, #tpu.memory_space<vmem>>, %arg3: memref<1x96xf32, #tpu.memory_space<vmem>>, %arg4: memref<32x32xf32, #tpu.memory_space<vmem>>, %arg5: memref<1x32xf32, #tpu.memory_space<vmem>>, %arg6: memref<4x16x16xf32, #tpu.memory_space<vmem>>, %arg7: memref<128x32xf32, #tpu.memory_space<vmem>>, %arg8: memref<128x32xf32, #tpu.memory_space<vmem>>) attributes {dimension_semantics = [#tpu.dimension_semantics<parallel>], iteration_bounds = array<i64: 1>, scalar_prefetch = 0 : i64, scratch_operands = 1 : i64, tpu.core_type = #tpu.core_type<tc>, window_params = [{transform_indices = @transform_0, window_bounds = array<i64: 128, 32>}, {pipeline_mode = #tpu.pipeline_mode<synchronous>, transform_indices = @transform_1, window_bounds = array<i64: 32, 96>}, {pipeline_mode = #tpu.pipeline_mode<synchronous>, transform_indices = @transform_2, window_bounds = array<i64: 1, 96>}, {pipeline_mode = #tpu.pipeline_mode<synchronous>, transform_indices = @transform_3, window_bounds = array<i64: 32, 32>}, {pipeline_mode = #tpu.pipeline_mode<synchronous>, transform_indices = @transform_4, window_bounds = array<i64: 1, 32>}, {pipeline_mode = #tpu.pipeline_mode<synchronous>, transform_indices = @transform_5, window_bounds = array<i64: 4, 16, 16>}, {transform_indices = @transform_6, window_bounds = array<i64: 128, 32>}]} {
    %c0 = arith.constant 0 : index
    %c0_0 = arith.constant 0 : index
    %0 = vector.load %arg1[%c0, %c0_0] : memref<128x32xf32, #tpu.memory_space<vmem>>, vector<128x32xf32>
    %c0_1 = arith.constant 0 : index
    %c0_2 = arith.constant 0 : index
    %1 = vector.load %arg2[%c0_1, %c0_2] : memref<32x96xf32, #tpu.memory_space<vmem>>, vector<32x96xf32>
    %cst = arith.constant dense<0.000000e+00> : vector<128x96xf32>
    %2 = tpu.matmul %0, %1, %cst {dimension_numbers = #tpu.dot_dimension_numbers<[1], [0], [0], [1], [0, 0, 1, 1], [], []>} : vector<128x32xf32>, vector<32x96xf32>, vector<128x96xf32> -> vector<128x96xf32>
    %c0_3 = arith.constant 0 : index
    %c0_4 = arith.constant 0 : index
    %3 = vector.load %arg3[%c0_3, %c0_4] : memref<1x96xf32, #tpu.memory_space<vmem>>, vector<1x96xf32>
    %4 = vector.broadcast %3 : vector<1x96xf32> to vector<128x96xf32>
    %5 = arith.addf %2, %4 : vector<128x96xf32>
    %6 = vector.extract_strided_slice %5 {offsets = [0, 0], sizes = [128, 8], strides = [1, 1]} : vector<128x96xf32> to vector<128x8xf32>
    %7 = vector.shape_cast %6 : vector<128x8xf32> to vector<8x16x8xf32>
    %8 = vector.extract_strided_slice %5 {offsets = [0, 8], sizes = [128, 8], strides = [1, 1]} : vector<128x96xf32> to vector<128x8xf32>
    %9 = vector.shape_cast %8 : vector<128x8xf32> to vector<8x16x8xf32>
    %10 = vector.extract_strided_slice %5 {offsets = [0, 16], sizes = [128, 8], strides = [1, 1]} : vector<128x96xf32> to vector<128x8xf32>
    %11 = vector.shape_cast %10 : vector<128x8xf32> to vector<8x16x8xf32>
    %12 = vector.extract_strided_slice %5 {offsets = [0, 24], sizes = [128, 8], strides = [1, 1]} : vector<128x96xf32> to vector<128x8xf32>
    %13 = vector.shape_cast %12 : vector<128x8xf32> to vector<8x16x8xf32>
    %14 = tpu.concatenate %7, %9, %11, %13 in 0 : vector<8x16x8xf32>, vector<8x16x8xf32>, vector<8x16x8xf32>, vector<8x16x8xf32> -> vector<32x16x8xf32>
    %15 = vector.extract_strided_slice %5 {offsets = [0, 32], sizes = [128, 8], strides = [1, 1]} : vector<128x96xf32> to vector<128x8xf32>
    %16 = vector.shape_cast %15 : vector<128x8xf32> to vector<8x16x8xf32>
    %17 = vector.extract_strided_slice %5 {offsets = [0, 40], sizes = [128, 8], strides = [1, 1]} : vector<128x96xf32> to vector<128x8xf32>
    %18 = vector.shape_cast %17 : vector<128x8xf32> to vector<8x16x8xf32>
    %19 = vector.extract_strided_slice %5 {offsets = [0, 48], sizes = [128, 8], strides = [1, 1]} : vector<128x96xf32> to vector<128x8xf32>
    %20 = vector.shape_cast %19 : vector<128x8xf32> to vector<8x16x8xf32>
    %21 = vector.extract_strided_slice %5 {offsets = [0, 56], sizes = [128, 8], strides = [1, 1]} : vector<128x96xf32> to vector<128x8xf32>
    %22 = vector.shape_cast %21 : vector<128x8xf32> to vector<8x16x8xf32>
    %23 = tpu.concatenate %16, %18, %20, %22 in 0 : vector<8x16x8xf32>, vector<8x16x8xf32>, vector<8x16x8xf32>, vector<8x16x8xf32> -> vector<32x16x8xf32>
    %24 = vector.extract_strided_slice %5 {offsets = [0, 64], sizes = [128, 8], strides = [1, 1]} : vector<128x96xf32> to vector<128x8xf32>
    %25 = vector.shape_cast %24 : vector<128x8xf32> to vector<8x16x8xf32>
    %26 = vector.extract_strided_slice %5 {offsets = [0, 72], sizes = [128, 8], strides = [1, 1]} : vector<128x96xf32> to vector<128x8xf32>
    %27 = vector.shape_cast %26 : vector<128x8xf32> to vector<8x16x8xf32>
    %28 = vector.extract_strided_slice %5 {offsets = [0, 80], sizes = [128, 8], strides = [1, 1]} : vector<128x96xf32> to vector<128x8xf32>
    %29 = vector.shape_cast %28 : vector<128x8xf32> to vector<8x16x8xf32>
    %30 = vector.extract_strided_slice %5 {offsets = [0, 88], sizes = [128, 8], strides = [1, 1]} : vector<128x96xf32> to vector<128x8xf32>
    %31 = vector.shape_cast %30 : vector<128x8xf32> to vector<8x16x8xf32>
    %32 = tpu.concatenate %25, %27, %29, %31 in 0 : vector<8x16x8xf32>, vector<8x16x8xf32>, vector<8x16x8xf32>, vector<8x16x8xf32> -> vector<32x16x8xf32>
    "tpu.trace_start"() <{level = 10 : i32, message = "bnd,bmd->bnm"}> : () -> ()
    %cst_5 = arith.constant dense<0.000000e+00> : vector<32x16x16xf32>
    %33 = tpu.matmul %14, %23, %cst_5 {dimension_numbers = #tpu.dot_dimension_numbers<[2], [2], [1], [1], [0, 0, 0, 1, 1, 1], [0], [0]>} : vector<32x16x8xf32>, vector<32x16x8xf32>, vector<32x16x16xf32> -> vector<32x16x16xf32>
    "tpu.trace_stop"() : () -> ()
    %34 = vector.shape_cast %33 : vector<32x16x16xf32> to vector<4x8x16x16xf32>
    %c0_6 = arith.constant 0 : index
    %c0_7 = arith.constant 0 : index
    %c0_8 = arith.constant 0 : index
    %35 = vector.load %arg6[%c0_6, %c0_7, %c0_8] : memref<4x16x16xf32, #tpu.memory_space<vmem>>, vector<4x16x16xf32>
    %36 = vector.shape_cast %35 : vector<4x16x16xf32> to vector<4x1x16x16xf32>
    %37 = vector.broadcast %36 : vector<4x1x16x16xf32> to vector<4x8x16x16xf32>
    %38 = arith.addf %34, %37 : vector<4x8x16x16xf32>
    %39 = vector.shape_cast %38 : vector<4x8x16x16xf32> to vector<32x16x16xf32>
    %cst_9 = arith.constant dense<0xFF800000> : vector<32x16xf32>
    %40 = vector.multi_reduction <maximumf>, %39, %cst_9 [2] : vector<32x16x16xf32> to vector<32x16xf32>
    %41 = vector.shape_cast %40 : vector<32x16xf32> to vector<32x16x1xf32>
    %42 = vector.broadcast %41 : vector<32x16x1xf32> to vector<32x16x16xf32>
    %43 = arith.subf %39, %42 : vector<32x16x16xf32>
    %44 = math.exp %43 : vector<32x16x16xf32>
    %cst_10 = arith.constant dense<0.000000e+00> : vector<32x16xf32>
    %45 = vector.multi_reduction <add>, %44, %cst_10 [2] : vector<32x16x16xf32> to vector<32x16xf32>
    %46 = vector.shape_cast %45 : vector<32x16xf32> to vector<32x16x1xf32>
    "tpu.trace_start"() <{level = 10 : i32, message = "bnm,bmd->bnd"}> : () -> ()
    %cst_11 = arith.constant dense<0.000000e+00> : vector<32x16x8xf32>
    %47 = tpu.matmul %44, %32, %cst_11 {dimension_numbers = #tpu.dot_dimension_numbers<[2], [1], [1], [2], [0, 0, 0, 1, 1, 2], [0], [0]>} : vector<32x16x16xf32>, vector<32x16x8xf32>, vector<32x16x8xf32> -> vector<32x16x8xf32>
    "tpu.trace_stop"() : () -> ()
    %48 = tpu.reciprocal %46 {approx = true} : vector<32x16x1xf32> -> vector<32x16x1xf32>
    %49 = vector.broadcast %48 : vector<32x16x1xf32> to vector<32x16x8xf32>
    %50 = arith.mulf %47, %49 : vector<32x16x8xf32>
    %51 = vector.extract_strided_slice %50 {offsets = [0, 0, 0], sizes = [8, 16, 8], strides = [1, 1, 1]} : vector<32x16x8xf32> to vector<8x16x8xf32>
    %52 = vector.shape_cast %51 : vector<8x16x8xf32> to vector<128x8xf32>
    %c0_12 = arith.constant 0 : index
    %c0_13 = arith.constant 0 : index
    %53 = vector.load %arg8[%c0_12, %c0_13] : memref<128x32xf32, #tpu.memory_space<vmem>>, vector<128x8xf32>
    tpu.vector_store %arg8[%c0_12, %c0_13], %52 {strides = array<i32>} : memref<128x32xf32, #tpu.memory_space<vmem>>, vector<128x8xf32>,
    %54 = vector.extract_strided_slice %50 {offsets = [8, 0, 0], sizes = [8, 16, 8], strides = [1, 1, 1]} : vector<32x16x8xf32> to vector<8x16x8xf32>
    %55 = vector.shape_cast %54 : vector<8x16x8xf32> to vector<128x8xf32>
    %c0_14 = arith.constant 0 : index
    %c8 = arith.constant 8 : index
    %56 = vector.load %arg8[%c0_14, %c8] : memref<128x32xf32, #tpu.memory_space<vmem>>, vector<128x8xf32>
    tpu.vector_store %arg8[%c0_14, %c8], %55 {strides = array<i32>} : memref<128x32xf32, #tpu.memory_space<vmem>>, vector<128x8xf32>,
    %57 = vector.extract_strided_slice %50 {offsets = [16, 0, 0], sizes = [8, 16, 8], strides = [1, 1, 1]} : vector<32x16x8xf32> to vector<8x16x8xf32>
    %58 = vector.shape_cast %57 : vector<8x16x8xf32> to vector<128x8xf32>
    %c0_15 = arith.constant 0 : index
    %c16 = arith.constant 16 : index
    %59 = vector.load %arg8[%c0_15, %c16] : memref<128x32xf32, #tpu.memory_space<vmem>>, vector<128x8xf32>
    tpu.vector_store %arg8[%c0_15, %c16], %58 {strides = array<i32>} : memref<128x32xf32, #tpu.memory_space<vmem>>, vector<128x8xf32>,
    %60 = vector.extract_strided_slice %50 {offsets = [24, 0, 0], sizes = [8, 16, 8], strides = [1, 1, 1]} : vector<32x16x8xf32> to vector<8x16x8xf32>
    %61 = vector.shape_cast %60 : vector<8x16x8xf32> to vector<128x8xf32>
    %c0_16 = arith.constant 0 : index
    %c24 = arith.constant 24 : index
    %62 = vector.load %arg8[%c0_16, %c24] : memref<128x32xf32, #tpu.memory_space<vmem>>, vector<128x8xf32>
    tpu.vector_store %arg8[%c0_16, %c24], %61 {strides = array<i32>} : memref<128x32xf32, #tpu.memory_space<vmem>>, vector<128x8xf32>,
    %c0_17 = arith.constant 0 : index
    %c0_18 = arith.constant 0 : index
    %63 = vector.load %arg8[%c0_17, %c0_18] : memref<128x32xf32, #tpu.memory_space<vmem>>, vector<128x32xf32>
    %c0_19 = arith.constant 0 : index
    %c0_20 = arith.constant 0 : index
    %64 = vector.load %arg4[%c0_19, %c0_20] : memref<32x32xf32, #tpu.memory_space<vmem>>, vector<32x32xf32>
    %cst_21 = arith.constant dense<0.000000e+00> : vector<128x32xf32>
    %65 = tpu.matmul %63, %64, %cst_21 {dimension_numbers = #tpu.dot_dimension_numbers<[1], [0], [0], [1], [0, 0, 1, 1], [], []>} : vector<128x32xf32>, vector<32x32xf32>, vector<128x32xf32> -> vector<128x32xf32>
    %c0_22 = arith.constant 0 : index
    %c0_23 = arith.constant 0 : index
    %66 = vector.load %arg5[%c0_22, %c0_23] : memref<1x32xf32, #tpu.memory_space<vmem>>, vector<1x32xf32>
    %67 = vector.broadcast %66 : vector<1x32xf32> to vector<128x32xf32>
    %68 = arith.addf %65, %67 : vector<128x32xf32>
    %c0_24 = arith.constant 0 : index
    %c0_25 = arith.constant 0 : index
    %69 = vector.load %arg7[%c0_24, %c0_25] : memref<128x32xf32, #tpu.memory_space<vmem>>, vector<128x32xf32>
    tpu.vector_store %arg7[%c0_24, %c0_25], %68 {strides = array<i32>} : memref<128x32xf32, #tpu.memory_space<vmem>>, vector<128x32xf32>,
    return
  }
  func.func @transform_0(%arg0: i32) -> (i32, i32) {
    %c0_i32 = arith.constant 0 : i32
    %c0_i32_0 = arith.constant 0 : i32
    return %arg0, %c0_i32 : i32, i32
  }
  func.func @transform_1(%arg0: i32) -> (i32, i32) {
    %c0_i32 = arith.constant 0 : i32
    %c0_i32_0 = arith.constant 0 : i32
    %c0_i32_1 = arith.constant 0 : i32
    return %c0_i32, %c0_i32_0 : i32, i32
  }
  func.func @transform_2(%arg0: i32) -> (i32, i32) {
    %c0_i32 = arith.constant 0 : i32
    %c0_i32_0 = arith.constant 0 : i32
    %c0_i32_1 = arith.constant 0 : i32
    return %c0_i32, %c0_i32_0 : i32, i32
  }
  func.func @transform_3(%arg0: i32) -> (i32, i32) {
    %c0_i32 = arith.constant 0 : i32
    %c0_i32_0 = arith.constant 0 : i32
    %c0_i32_1 = arith.constant 0 : i32
    return %c0_i32, %c0_i32_0 : i32, i32
  }
  func.func @transform_4(%arg0: i32) -> (i32, i32) {
    %c0_i32 = arith.constant 0 : i32
    %c0_i32_0 = arith.constant 0 : i32
    %c0_i32_1 = arith.constant 0 : i32
    return %c0_i32, %c0_i32_0 : i32, i32
  }
  func.func @transform_5(%arg0: i32) -> (i32, i32, i32) {
    %c0_i32 = arith.constant 0 : i32
    %c0_i32_0 = arith.constant 0 : i32
    %c0_i32_1 = arith.constant 0 : i32
    %c0_i32_2 = arith.constant 0 : i32
    return %c0_i32, %c0_i32_0, %c0_i32_1 : i32, i32, i32
  }
  func.func @transform_6(%arg0: i32) -> (i32, i32) {
    %c0_i32 = arith.constant 0 : i32
    %c0_i32_0 = arith.constant 0 : i32
    return %arg0, %c0_i32 : i32, i32
  }
}

</mosaic_0001>

<bundles_post_ra>
// kernel: tpu_custom_call.1
= control target key start
LH: loop header
LB: loop body
LE: loop exit
PB: predicated region body
PF: predicated region fallthrough
CT: control target
= control target key end

     0   :  { %vm50_vm0 = vcmask 261120   ;;  %vm360_vm1 = vcmask 64512   ;;  %s8508_s13 = smov 120   ;;  %s8510_s14 = smov 104   ;;  %vm3213_vm2 = vcmask 130048   ;;  %vm6782_vm3 = vcmask 130112   ;;  %s10955_s1 = inlined_call_operand.vmem [shape: f32[32,96], index: 1, kind: input, shape index: {}]   ;;  %s10956_s0 = inlined_call_operand.vmem [shape: f32[128,32], index: 0, kind: input, shape index: {}]   ;;  %s10957_s2 = inlined_call_operand.vmem [shape: f32[1,96], index: 2, kind: input, shape index: {}]   ;;  %s10958_s5 = inlined_call_operand.vmem [shape: f32[4,16,16], index: 5, kind: input, shape index: {}]   ;;  %s10959_s3 = inlined_call_operand.vmem [shape: f32[32,32], index: 3, kind: input, shape index: {}]   ;;  %s10960_s4 = inlined_call_operand.vmem [shape: f32[1,32], index: 4, kind: input, shape index: {}]   ;;  %s10961_s6 = inlined_call_operand.vmem [shape: f32[128,32], index: 6, kind: output, shape index: {}]  }
   0x1   :  { %v42_v0 = vld [vmem:[%s10955_s1 + $0x18] sm:$0xff]  ;;  %v41_v1 = vld [vmem:[%s10955_s1 + $0x10] sm:$0xff]  ;;  %v40_v2 = vld [vmem:[%s10955_s1 + $0x8] sm:$0xff]  ;;  %s8511_s15 = smov 64   ;;  %s8513_s8 = smov 16   ;;  %vm6863_vm4 = vcmask 195712  }
   0x2   :  { %7723 = vmatprep.subr.mxu0 %v42_v0  ;;  %8235 = vmatprep.subr.mxu1 %v42_v0  ;;  %v39_v3 = vld [vmem:[%s10955_s1] sm:$0xff]  ;;  %v24_v5 = vld [vmem:[%s10956_s0 + $0x8] sm:$0xff]  ;;  %v25_v7 = vld [vmem:[%s10956_s0 + $0x10] sm:$0xff]  ;;  %vm6944_vm5 = vcmask 261312  }
   0x3   :  { %7724 = vmatpush3.msra.mxu0 %v42_v0  ;;  %8239 = vmatpush3.msra.mxu1 %v42_v0  ;;  %v23_v4 = vld [vmem:[%s10956_s0] sm:$0xff]  ;;  %v32_v8 = vld [vmem:[%s10956_s0 + $0x48] sm:$0xff]  ;;  %v33_v9 = vld [vmem:[%s10956_s0 + $0x50] sm:$0xff] }
   0x4   :  { %7725 = vmatprep.subr.mxu0 %v41_v1  ;;  %8236 = vmatprep.subr.mxu1 %v41_v1  ;;  %v31_v6 = vld [vmem:[%s10956_s0 + $0x40] sm:$0xff]  ;;  %v26_v10 = vld [vmem:[%s10956_s0 + $0x18] sm:$0xff]  ;;  %v28_v14 = vld [vmem:[%s10956_s0 + $0x28] sm:$0xff] }
   0x5   :  { %7726 = vmatpush3.msra.mxu0 %v41_v1  ;;  %8240 = vmatpush3.msra.mxu1 %v41_v1  ;;  %v27_v11 = vld [vmem:[%s10956_s0 + $0x20] sm:$0xff]  ;;  %v34_v12 = vld [vmem:[%s10956_s0 + $0x58] sm:$0xff]  ;;  %v29_v15 = vld [vmem:[%s10956_s0 + $0x30] sm:$0xff] }
   0x6   :  { %7727 = vmatprep.subr.mxu0 %v40_v2  ;;  %8237 = vmatprep.subr.mxu1 %v40_v2  ;;  %v35_v13 = vld [vmem:[%s10956_s0 + $0x60] sm:$0xff]  ;;  %v36_v16 = vld [vmem:[%s10956_s0 + $0x68] sm:$0xff]  ;;  %v37_v17 = vld [vmem:[%s10956_s0 + $0x70] sm:$0xff] }
   0x7   :  { %7728 = vmatpush3.msra.mxu0 %v40_v2  ;;  %8241 = vmatpush3.msra.mxu1 %v40_v2  ;;  %v30_v18 = vld [vmem:[%s10956_s0 + $0x38] sm:$0xff]  ;;  %v8629_v20 = vld [vmem:[%s10957_s2] ss:$0 sm:$0xff]  ;;  %s8509_s2 = smov 112  }
   0x8   :  { %7729 = vmatprep.subr.mxu0 %v39_v3  ;;  %7731 = vmatprep.mubr.msk.f32.mxu0 %vm50_vm0, %v23_v4  ;;  %v38_v19 = vld [vmem:[%s10956_s0 + $0x78] sm:$0xff]  ;;  %s8507_s0 = smov 96  }
   0x9   :  { %7730 = vmatpush3.msra.mxu0 %v39_v3  ;;  %8238 = vmatprep.subr.mxu1 %v39_v3 }
   0xa   :  { %7732 = vmatmul.mubr.msk.f32.vlgmr.msra.gmra.mxu0 %vm50_vm0, %v24_v5  ;;  %8242 = vmatpush3.msra.mxu1 %v39_v3 }
   0xb   :  { %7743 = vmatprep.mubr.msk.f32.mxu1 %vm50_vm0, %v31_v6  ;;  %7734 = vmatprep.mubr.msk.f32.mxu0 %vm50_vm0, %v25_v7 }
   0xc   :  { %7744 = vmatmul.mubr.msk.f32.vlgmr.msra.gmra.mxu1 %vm50_vm0, %v32_v8 }
   0xd   :  { %7746 = vmatprep.mubr.msk.f32.mxu1 %vm50_vm0, %v33_v9 }
   0xe   :  { %7735 = vmatmul.mubr.msk.f32.gmra.mxu0 %vm50_vm0, %v26_v10 }
   0xf   :  { %7737 = vmatprep.mubr.msk.f32.mxu0 %vm50_vm0, %v27_v11 }
  0x10   :  { %7747 = vmatmul.mubr.msk.f32.gmra.mxu1 %vm50_vm0, %v34_v12 }
  0x11   :  { %7749 = vmatprep.mubr.msk.f32.mxu1 %vm50_vm0, %v35_v13 }
  0x12   :  { %7738 = vmatmul.mubr.msk.f32.gmra.mxu0 %vm50_vm0, %v28_v14 }
  0x13   :  { %7740 = vmatprep.mubr.msk.f32.mxu0 %vm50_vm0, %v29_v15 }
  0x14   :  { %7750 = vmatmul.mubr.msk.f32.gmra.mxu1 %vm50_vm0, %v36_v16 }
  0x15   :  { %7752 = vmatprep.mubr.msk.f32.mxu1 %vm50_vm0, %v37_v17 }
  0x16   :  { %7741 = vmatmul.mubr.msk.f32.gmra.mxu0 %vm50_vm0, %v30_v18 }
  0x18   :  { %7753 = vmatmul.mubr.msk.f32.gmra.mxu1 %vm50_vm0, %v38_v19 }
  0xca   :  { %v7733_v21 = vpop.f32.mrf.mxu0 }
  0xcb   :  { %v8632_v22 = vadd.f32 %v7733_v21, %v8629_v20 }
  0xcc   :  { %v165_v23 = vpop.f32.mrf.mxu0  ;;  %v7745_v24 = vpop.f32.mrf.mxu1 }
  0xcd   :  { %v166_v25 = vadd.f32 %v8629_v20, %v165_v23  ;;  %v8636_v26 = vadd.f32 %v7745_v24, %v8629_v20  ;;  %358 = vrot.lane.b32.xlu1 %v8632_v22, %s8507_s0  ;;  %262 = vrot.lane.b32.xlu0 %v8632_v22, %s8508_s13 }
  0xce   :  { %v205_v27 = vpop.f32.mrf.mxu1  ;;  %v7736_v31 = vpop.f32.mrf.mxu0 }
  0xcf   :  { %v206_v28 = vadd.f32 %v8629_v20, %v205_v27  ;;  %7759 = vmatprep.mubr.msk.f32.mxu1 %vm360_vm1, %v166_v25  ;;  %v8674_v32 = vadd.f32 %v7736_v31, %v8629_v20 }
  0xd0   :  { %v7748_v29 = vpop.f32.mrf.mxu1  ;;  %v175_v35 = vpop.f32.mrf.mxu0 }
  0xd1   :  { %7787 = vmatprep.mubr.msk.f32.mxu0 %vm360_vm1, %v206_v28  ;;  %278 = vrot.lane.b32.xlu1 %v8636_v26, %s8508_s13  ;;  %v8667_v30 = vadd.f32 %v7748_v29, %v8629_v20  ;;  %v8689_v36 = vadd.f32 %v8629_v20, %v175_v35 }
  0xd2   :  { %260 = vrot.lane.b32.xlu0 %v166_v25, %s8508_s13  ;;  %v215_v33 = vpop.f32.mrf.mxu1  ;;  %v7739_v37 = vpop.f32.mrf.mxu0 }
  0xd3   :  { %v8683_v34 = vadd.f32 %v8629_v20, %v215_v33  ;;  %v8716_v38 = vadd.f32 %v7739_v37, %v8629_v20 }
  0xd4   :  { %v185_v39 = vpop.f32.mrf.mxu0  ;;  %v7751_v41 = vpop.f32.mrf.mxu1 }
  0xd5   :  { %294 = vrot.lane.b32.xlu1 %v8632_v22, %s8509_s2  ;;  %v8723_v40 = vadd.f32 %v8629_v20, %v185_v39  ;;  %v8735_v44 = vadd.f32 %v7751_v41, %v8629_v20 }
  0xd6   :  { %356 = vrot.lane.b32.xlu0 %v166_v25, %s8507_s0  ;;  %v225_v42 = vpop.f32.mrf.mxu1  ;;  %v7742_v45 = vpop.f32.mrf.mxu0 }
  0xd7   :  { %v226_v43 = vadd.f32 %v8629_v20, %v225_v42  ;;  %v8758_v46 = vadd.f32 %v7742_v45, %v8629_v20 }
  0xd8   :  { %v7754_v47 = vpop.f32.mrf.mxu1  ;;  %v195_v49 = vpop.f32.mrf.mxu0 }
  0xd9   :  { %707 = vrot.lane.b32.xlu1 %v8636_v26, %s8507_s0  ;;  %v8765_v48 = vadd.f32 %v7754_v47, %v8629_v20  ;;  %v8772_v50 = vadd.f32 %v8629_v20, %v195_v49 }
  0xda   :  { %705 = vrot.lane.b32.xlu0 %v206_v28, %s8507_s0  ;;  %v235_v51 = vpop.f32.mrf.mxu1 }
  0xdb   :  { %v8783_v54 = vadd.f32 %v8629_v20, %v235_v51 }
  0xdd   :  { %310 = vrot.lane.b32.xlu1 %v8636_v26, %s8509_s2 }
  0xde   :  { %308 = vrot.lane.b32.xlu0 %v206_v28, %s8509_s2 }
  0xe1   :  { %326 = vrot.lane.b32.xlu1 %v8632_v22, %s8510_s14 }
  0xe2   :  { %324 = vrot.lane.b32.xlu0 %v166_v25, %s8510_s14 }
  0xe5   :  { %342 = vrot.lane.b32.xlu1 %v8636_v26, %s8510_s14 }
  0xe6   :  { %340 = vrot.lane.b32.xlu0 %v206_v28, %s8510_s14 }
  0xe9   :  { %3792 = vrot.lane.b32.xlu1 %v8632_v22, %s8511_s15 }
  0xea   :  { %4138 = vrot.lane.b32.xlu0 %v206_v28, %s8511_s15 }
  0xed   :  { %4140 = vrot.lane.b32.xlu1 %v8636_v26, %s8511_s15 }
  0xee   :  { %282 = vrot.lane.b32.xlu0 %v8667_v30, %s8508_s13 }
  0xf1   :  { %276 = vrot.lane.b32.xlu1 %v206_v28, %s8508_s13 }
  0xf2   :  { %298 = vrot.lane.b32.xlu0 %v8674_v32, %s8509_s2 }
  0xf5   :  { %292 = vrot.lane.b32.xlu1 %v166_v25, %s8509_s2 }
  0xf6   :  { %3879 = vrot.lane.b32.xlu0 %v8674_v32, %s8511_s15 }
  0xf9   :  { %3790 = vrot.lane.b32.xlu1 %v166_v25, %s8511_s15 }
  0xfa   :  { %280 = vrot.lane.b32.xlu0 %v8683_v34, %s8508_s13 }
  0xfd   :  { %266 = vrot.lane.b32.xlu1 %v8674_v32, %s8508_s13 }
  0xfe   :  { %444 = vrot.lane.b32.xlu0 %v8689_v36, %s8507_s0 }
 0x101   :  { %446 = vrot.lane.b32.xlu1 %v8674_v32, %s8507_s0 }
 0x102   :  { %296 = vrot.lane.b32.xlu0 %v8689_v36, %s8509_s2 }
 0x105   :  { %794 = vrot.lane.b32.xlu1 %v8667_v30, %s8507_s0 }
 0x106   :  { %792 = vrot.lane.b32.xlu0 %v8683_v34, %s8507_s0 }
 0x109   :  { %314 = vrot.lane.b32.xlu1 %v8667_v30, %s8509_s2 }
 0x10a   :  { %312 = vrot.lane.b32.xlu0 %v8683_v34, %s8509_s2 }
 0x10d   :  { %330 = vrot.lane.b32.xlu1 %v8674_v32, %s8510_s14 }
 0x10e   :  { %328 = vrot.lane.b32.xlu0 %v8689_v36, %s8510_s14 }
 0x111   :  { %346 = vrot.lane.b32.xlu1 %v8667_v30, %s8510_s14 }
 0x112   :  { %344 = vrot.lane.b32.xlu0 %v8683_v34, %s8510_s14 }
 0x115   :  { %4227 = vrot.lane.b32.xlu1 %v8667_v30, %s8511_s15 }
 0x116   :  { %270 = vrot.lane.b32.xlu0 %v8716_v38, %s8508_s13 }
 0x119   :  { %264 = vrot.lane.b32.xlu1 %v8689_v36, %s8508_s13 }
 0x11a   :  { %531 = vrot.lane.b32.xlu0 %v8723_v40, %s8507_s0 }
 0x11d   :  { %3877 = vrot.lane.b32.xlu1 %v8689_v36, %s8511_s15 }
 0x11e   :  { %300 = vrot.lane.b32.xlu0 %v8723_v40, %s8509_s2 }
 0x121   :  { %4225 = vrot.lane.b32.xlu1 %v8683_v34, %s8511_s15 }
 0x122   :  { %879 = vrot.lane.b32.xlu0 %v226_v43, %s8507_s0 }
 0x125   :  { %286 = vrot.lane.b32.xlu1 %v8735_v44, %s8508_s13 }
 0x126   :  { %316 = vrot.lane.b32.xlu0 %v226_v43, %s8509_s2 }
 0x129   :  { %533 = vrot.lane.b32.xlu1 %v8716_v38, %s8507_s0 }
 0x12a   :  { %332 = vrot.lane.b32.xlu0 %v8723_v40, %s8510_s14 }
 0x12d   :  { %302 = vrot.lane.b32.xlu1 %v8716_v38, %s8509_s2 }
 0x12e   :  { %348 = vrot.lane.b32.xlu0 %v226_v43, %s8510_s14 }
 0x131   :  { %881 = vrot.lane.b32.xlu1 %v8735_v44, %s8507_s0 }
 0x132   :  { %3964 = vrot.lane.b32.xlu0 %v8723_v40, %s8511_s15 }
 0x135   :  { %318 = vrot.lane.b32.xlu1 %v8735_v44, %s8509_s2 }
 0x136   :  { %4312 = vrot.lane.b32.xlu0 %v226_v43, %s8511_s15 }
 0x139   :  { %334 = vrot.lane.b32.xlu1 %v8716_v38, %s8510_s14 }
 0x13a   :  { %274 = vrot.lane.b32.xlu0 %v8758_v46, %s8508_s13 }
 0x13d   :  { %350 = vrot.lane.b32.xlu1 %v8735_v44, %s8510_s14 }
 0x13e   :  { %290 = vrot.lane.b32.xlu0 %v8765_v48, %s8508_s13 }
 0x13f   :  { %v359_v52 = vpop.permute.xlu1 %358  ;;  %v8774_v53 = vpop.permute.xlu0 %262 }
 0x140   :  { %7755 = vmatprep.subr.msk.mxu1 %vm360_vm1, %v359_v52 }
 0x141   :  { %7756 = vmatpush3.xpose.msk.msra.mxu1 %vm360_vm1, %v359_v52  ;;  %3966 = vrot.lane.b32.xlu1 %v8716_v38, %s8511_s15 }
 0x142   :  { %272 = vrot.lane.b32.xlu0 %v8772_v50, %s8508_s13 }
 0x143   :  { %v8785_v55 = vpop.permute.xlu1 %278 }
 0x144   :  { %v8787_v56 = vpop.permute.xlu0 %260 }
 0x145   :  { %4314 = vrot.lane.b32.xlu1 %v8735_v44, %s8511_s15 }
 0x146   :  { %288 = vrot.lane.b32.xlu0 %v8783_v54, %s8508_s13 }
 0x147   :  { %v8793_v57 = vpop.permute.xlu1 %294 }
 0x148   :  { %v357_v58 = vpop.permute.xlu0 %356 }
 0x149   :  { %7757 = vmatprep.subr.msk.mxu1 %vm360_vm1, %v357_v58  ;;  %268 = vrot.lane.b32.xlu1 %v8723_v40, %s8508_s13 }
 0x14a   :  { %618 = vrot.lane.b32.xlu0 %v8772_v50, %s8507_s0  ;;  %7758 = vmatpush3.xpose.msk.msra.mxu1 %vm360_vm1, %v357_v58 }
 0x14b   :  { %v708_v59 = vpop.permute.xlu1 %707 }
 0x14c   :  { %v706_v60 = vpop.permute.xlu0 %705  ;;  %7783 = vmatprep.subr.msk.mxu0 %vm360_vm1, %v708_v59 }
 0x14d   :  { %7760 = vmatmul.mubr.msk.f32.vlgmr.msra.gmra.mxu1 %vm360_vm1, %v8632_v22  ;;  %7784 = vmatpush3.xpose.msk.msra.mxu0 %vm360_vm1, %v708_v59 }
 0x14e   :  { %284 = vrot.lane.b32.xlu1 %v226_v43, %s8508_s13  ;;  %304 = vrot.lane.b32.xlu0 %v8772_v50, %s8509_s2 }
 0x14f   :  { %7766 = vmatprep.mubr.msk.f32.mxu1 %vm360_vm1, %v8689_v36  ;;  %7785 = vmatprep.subr.msk.mxu0 %vm360_vm1, %v706_v60  ;;  %v8811_v61 = vpop.permute.xlu1 %310 }
 0x150   :  { %v8813_v62 = vpop.permute.xlu0 %308 }
 0x151   :  { %11044 = vst [vmem:[#allocation3_spill] sm:$0xff] %v8813_v62  ;;  %7786 = vmatpush3.xpose.msk.msra.mxu0 %vm360_vm1, %v706_v60 }
 0x152   :  { %620 = vrot.lane.b32.xlu1 %v8758_v46, %s8507_s0  ;;  %966 = vrot.lane.b32.xlu0 %v8783_v54, %s8507_s0 }
 0x153   :  { %v8820_v63 = vpop.permute.xlu1 %326 }
 0x154   :  { %11045 = vst [vmem:[#allocation4_spill] sm:$0xff] %v8820_v63  ;;  %v8822_v0 = vpop.permute.xlu0 %324  ;;  %7788 = vmatmul.mubr.msk.f32.vlgmr.msra.gmra.mxu0 %vm360_vm1, %v8636_v26 }
 0x155   :  { %11046 = vst [vmem:[#allocation5_spill] sm:$0xff] %v8822_v0  ;;  %7801 = vmatprep.mubr.msk.f32.mxu0 %vm360_vm1, %v226_v43 }
 0x156   :  { %306 = vrot.lane.b32.xlu1 %v8758_v46, %s8509_s2  ;;  %320 = vrot.lane.b32.xlu0 %v8783_v54, %s8509_s2 }
 0x157   :  { %v8831_v1 = vpop.permute.xlu1 %342 }
 0x158   :  { %11047 = vst [vmem:[#allocation6_spill] sm:$0xff] %v8831_v1  ;;  %v8833_v2 = vpop.permute.xlu0 %340 }
 0x159   :  { %11048 = vst [vmem:[#allocation7_spill] sm:$0xff] %v8833_v2 }
 0x15a   :  { %968 = vrot.lane.b32.xlu1 %v8765_v48, %s8507_s0  ;;  %336 = vrot.lane.b32.xlu0 %v8772_v50, %s8510_s14 }
 0x15b   :  { %v8839_v3 = vpop.permute.xlu1 %3792 }
 0x15c   :  { %v8841_v4 = vpop.permute.xlu0 %4138 }
 0x15d   :  { %11049 = vst [vmem:[#allocation8_spill] sm:$0xff] %v8841_v4 }
 0x15e   :  { %322 = vrot.lane.b32.xlu1 %v8765_v48, %s8509_s2  ;;  %352 = vrot.lane.b32.xlu0 %v8783_v54, %s8510_s14 }
 0x15f   :  { %v8847_v5 = vpop.permute.xlu1 %4140 }
 0x160   :  { %11050 = vst [vmem:[#allocation9_spill] sm:$0xff] %v8847_v5  ;;  %v8849_v6 = vpop.permute.xlu0 %282 }
 0x162   :  { %338 = vrot.lane.b32.xlu1 %v8758_v46, %s8510_s14  ;;  %2099 = vrot.lane.b32.xlu0 %v8811_v61, %s8507_s0 }
 0x163   :  { %v8855_v7 = vpop.permute.xlu1 %276 }
 0x164   :  { %v8857_v8 = vpop.permute.xlu0 %298 }
 0x166   :  { %354 = vrot.lane.b32.xlu1 %v8765_v48, %s8510_s14  ;;  %2447 = vrot.lane.b32.xlu0 %v8820_v63, %s8507_s0 }
 0x167   :  { %v8863_v9 = vpop.permute.xlu1 %292 }
 0x168   :  { %v8865_v10 = vpop.permute.xlu0 %3879 }
 0x169   :  { %11051 = vst [vmem:[#allocation10_spill] sm:$0xff] %v8865_v10 }
 0x16a   :  { %4053 = vrot.lane.b32.xlu1 %v8758_v46, %s8511_s15  ;;  %2795 = vrot.lane.b32.xlu0 %v8831_v1, %s8507_s0 }
 0x16b   :  { %v8871_v11 = vpop.permute.xlu1 %3790 }
 0x16c   :  { %11052 = vst [vmem:[#allocation11_spill] sm:$0xff] %v8871_v11  ;;  %v8873_v12 = vpop.permute.xlu0 %280 }
 0x16e   :  { %4401 = vrot.lane.b32.xlu1 %v8765_v48, %s8511_s15  ;;  %1053 = vrot.lane.b32.xlu0 %v8787_v56, %s8507_s0 }
 0x16f   :  { %v8879_v13 = vpop.permute.xlu1 %266 }
 0x170   :  { %v445_v14 = vpop.permute.xlu0 %444 }
 0x172   :  { %4051 = vrot.lane.b32.xlu1 %v8772_v50, %s8511_s15  ;;  %1401 = vrot.lane.b32.xlu0 %v8855_v7, %s8507_s0 }
 0x173   :  { %v447_v15 = vpop.permute.xlu1 %446 }
 0x174   :  { %v8885_v16 = vpop.permute.xlu0 %296  ;;  %7762 = vmatprep.subr.msk.mxu1 %vm360_vm1, %v447_v15 }
 0x175   :  { %7763 = vmatpush3.xpose.msk.msra.mxu1 %vm360_vm1, %v447_v15 }
 0x176   :  { %1055 = vrot.lane.b32.xlu1 %v8774_v53, %s8507_s0  ;;  %1749 = vrot.lane.b32.xlu0 %v8863_v9, %s8507_s0 }
 0x177   :  { %7764 = vmatprep.subr.msk.mxu1 %vm360_vm1, %v445_v14  ;;  %v8894_v17 = vpop.permute.xlu1 %794 }
 0x178   :  { %v8896_v18 = vpop.permute.xlu0 %792 }
 0x179   :  { %7765 = vmatpush3.xpose.msk.msra.mxu1 %vm360_vm1, %v445_v14 }
 0x17a   :  { %1403 = vrot.lane.b32.xlu1 %v8785_v55, %s8507_s0 }
 0x17b   :  { %v8901_v19 = vpop.permute.xlu1 %314 }
 0x17c   :  { %11053 = vst [vmem:[#allocation12_spill] sm:$0xff] %v8901_v19  ;;  %v8903_v20 = vpop.permute.xlu0 %312  ;;  %2186 = vrot.lane.b32.xlu0 %v8901_v19, %s8507_s0  ;;  %7767 = vmatmul.mubr.msk.f32.vlgmr.msra.gmra.mxu1 %vm360_vm1, %v8674_v32 }
 0x17d   :  { %11054 = vst [vmem:[#allocation13_spill] sm:$0xff] %v8903_v20  ;;  %7773 = vmatprep.mubr.msk.f32.mxu1 %vm360_vm1, %v8723_v40 }
 0x17e   :  { %1751 = vrot.lane.b32.xlu1 %v8793_v57, %s8507_s0 }
 0x17f   :  { %v8913_v21 = vpop.permute.xlu1 %330 }
 0x180   :  { %11055 = vst [vmem:[#allocation14_spill] sm:$0xff] %v8913_v21  ;;  %v8915_v22 = vpop.permute.xlu0 %328  ;;  %2534 = vrot.lane.b32.xlu0 %v8913_v21, %s8507_s0 }
 0x181   :  { %11056 = vst [vmem:[#allocation15_spill] sm:$0xff] %v8915_v22 }
 0x182   :  { %4488 = vrot.lane.b32.xlu1 %v8774_v53, %s8511_s15 }
 0x183   :  { %v8921_v23 = vpop.permute.xlu1 %346 }
 0x184   :  { %11057 = vst [vmem:[#allocation16_spill] sm:$0xff] %v8921_v23  ;;  %v8923_v24 = vpop.permute.xlu0 %344  ;;  %2882 = vrot.lane.b32.xlu0 %v8921_v23, %s8507_s0 }
 0x185   :  { %11058 = vst [vmem:[#allocation17_spill] sm:$0xff] %v8923_v24 }
 0x186   :  { %2097 = vrot.lane.b32.xlu1 %v8813_v62, %s8507_s0 }
 0x187   :  { %v8929_v25 = vpop.permute.xlu1 %4227 }
 0x188   :  { %11059 = vst [vmem:[#allocation18_spill] sm:$0xff] %v8929_v25  ;;  %v8931_v26 = vpop.permute.xlu0 %270 }
 0x18a   :  { %2445 = vrot.lane.b32.xlu1 %v8822_v0, %s8507_s0 }
 0x18b   :  { %v8935_v27 = vpop.permute.xlu1 %264 }
 0x18c   :  { %v532_v28 = vpop.permute.xlu0 %531  ;;  %1140 = vrot.lane.b32.xlu0 %v8935_v27, %s8507_s0 }
 0x18e   :  { %2793 = vrot.lane.b32.xlu1 %v8833_v2, %s8507_s0 }
 0x18f   :  { %v8941_v29 = vpop.permute.xlu1 %3877 }
 0x190   :  { %11060 = vst [vmem:[#allocation19_spill] sm:$0xff] %v8941_v29  ;;  %v8943_v31 = vpop.permute.xlu0 %300  ;;  %1488 = vrot.lane.b32.xlu0 %v8873_v12, %s8507_s0 }
 0x192   :  { %1142 = vrot.lane.b32.xlu1 %v8879_v13, %s8507_s0 }
 0x193   :  { %v8949_v32 = vpop.permute.xlu1 %4225 }
 0x194   :  { %11061 = vst [vmem:[#allocation20_spill] sm:$0xff] %v8949_v32  ;;  %v880_v33 = vpop.permute.xlu0 %879 }
 0x196   :  { %1490 = vrot.lane.b32.xlu1 %v8849_v6, %s8507_s0 }
 0x197   :  { %v8953_v35 = vpop.permute.xlu1 %286 }
 0x198   :  { %v8955_v36 = vpop.permute.xlu0 %316 }
 0x199   :  { %11062 = vst [vmem:[#allocation21_spill] sm:$0xff] %v8955_v36 }
 0x19a   :  { %1838 = vrot.lane.b32.xlu1 %v8857_v8, %s8507_s0 }
 0x19b   :  { %v534_v37 = vpop.permute.xlu1 %533 }
 0x19c   :  { %v8959_v39 = vpop.permute.xlu0 %332  ;;  %7769 = vmatprep.subr.msk.mxu1 %vm360_vm1, %v534_v37 }
 0x19d   :  { %11063 = vst [vmem:[#allocation22_spill] sm:$0xff] %v8959_v39  ;;  %7770 = vmatpush3.xpose.msk.msra.mxu1 %vm360_vm1, %v534_v37 }
 0x19e   :  { %1836 = vrot.lane.b32.xlu1 %v8885_v16, %s8507_s0  ;;  %7771 = vmatprep.subr.msk.mxu1 %vm360_vm1, %v532_v28 }
 0x19f   :  { %v8966_v40 = vpop.permute.xlu1 %302 }
 0x1a0   :  { %v8968_v41 = vpop.permute.xlu0 %348  ;;  %1925 = vrot.lane.b32.xlu0 %v8966_v40, %s8507_s0 }
 0x1a1   :  { %11064 = vst [vmem:[#allocation23_spill] sm:$0xff] %v8968_v41  ;;  %7772 = vmatpush3.xpose.msk.msra.mxu1 %vm360_vm1, %v532_v28 }
 0x1a2   :  { %2184 = vrot.lane.b32.xlu1 %v8903_v20, %s8507_s0 }
 0x1a3   :  { %v882_v42 = vpop.permute.xlu1 %881 }
 0x1a4   :  { %v8975_v43 = vpop.permute.xlu0 %3964  ;;  %7774 = vmatmul.mubr.msk.f32.vlgmr.msra.gmra.mxu1 %vm360_vm1, %v8716_v38  ;;  %7797 = vmatprep.subr.msk.mxu0 %vm360_vm1, %v882_v42 }
 0x1a5   :  { %11065 = vst [vmem:[#allocation24_spill] sm:$0xff] %v8975_v43  ;;  %7798 = vmatpush3.xpose.msk.msra.mxu0 %vm360_vm1, %v882_v42  ;;  %7780 = vmatprep.mubr.msk.f32.mxu1 %vm360_vm1, %v8772_v50 }
 0x1a6   :  { %2532 = vrot.lane.b32.xlu1 %v8915_v22, %s8507_s0  ;;  %7799 = vmatprep.subr.msk.mxu0 %vm360_vm1, %v880_v33 }
 0x1a7   :  { %v8986_v45 = vpop.permute.xlu1 %318 }
 0x1a8   :  { %11066 = vst [vmem:[#allocation25_spill] sm:$0xff] %v8986_v45  ;;  %v8988_v47 = vpop.permute.xlu0 %4312  ;;  %2273 = vrot.lane.b32.xlu0 %v8986_v45, %s8507_s0 }
 0x1a9   :  { %11067 = vst [vmem:[#allocation26_spill] sm:$0xff] %v8988_v47  ;;  %7800 = vmatpush3.xpose.msk.msra.mxu0 %vm360_vm1, %v880_v33 }
 0x1aa   :  { %2880 = vrot.lane.b32.xlu1 %v8923_v24, %s8507_s0 }
 0x1ab   :  { %v8995_v38 = vpop.permute.xlu1 %334 }
 0x1ac   :  { %11068 = vst [vmem:[#allocation27_spill] sm:$0xff] %v8995_v38  ;;  %v8997_v49 = vpop.permute.xlu0 %274  ;;  %2621 = vrot.lane.b32.xlu0 %v8995_v38, %s8507_s0  ;;  %7802 = vmatmul.mubr.msk.f32.vlgmr.msra.gmra.mxu0 %vm360_vm1, %v8735_v44 }
 0x1ad   :  { %7815 = vmatprep.mubr.msk.f32.mxu0 %vm360_vm1, %v8787_v56 }
 0x1ae   :  { %1229 = vrot.lane.b32.xlu1 %v8931_v26, %s8507_s0 }
 0x1af   :  { %v9007_v50 = vpop.permute.xlu1 %350 }
 0x1b0   :  { %11069 = vst [vmem:[#allocation28_spill] sm:$0xff] %v9007_v50  ;;  %v9009_v51 = vpop.permute.xlu0 %290  ;;  %2969 = vrot.lane.b32.xlu0 %v9007_v50, %s8507_s0 }
 0x1b2   :  { %1577 = vrot.lane.b32.xlu1 %v8953_v35, %s8507_s0 }
 0x1b3   :  { %v9015_v52 = vpop.permute.xlu1 %3966 }
 0x1b4   :  { %11070 = vst [vmem:[#allocation29_spill] sm:$0xff] %v9015_v52  ;;  %v9017_v58 = vpop.permute.xlu0 %272 }
 0x1b6   :  { %1923 = vrot.lane.b32.xlu1 %v8943_v31, %s8507_s0 }
 0x1b7   :  { %v9021_v44 = vpop.permute.xlu1 %4314 }
 0x1b8   :  { %11071 = vst [vmem:[#allocation30_spill] sm:$0xff] %v9021_v44  ;;  %v9023_v59 = vpop.permute.xlu0 %288 }
 0x1ba   :  { %2271 = vrot.lane.b32.xlu1 %v8955_v36, %s8507_s0 }
 0x1bb   :  { %v9027_v60 = vpop.permute.xlu1 %268 }
 0x1bc   :  { %v619_v14 = vpop.permute.xlu0 %618  ;;  %1227 = vrot.lane.b32.xlu0 %v9027_v60, %s8507_s0 }
 0x1be   :  { %2619 = vrot.lane.b32.xlu1 %v8959_v39, %s8507_s0 }
 0x1c0   :  { %v9033_v15 = vpop.permute.xlu1 %284  ;;  %v9035_v28 = vpop.permute.xlu0 %304 }
 0x1c1   :  { %11072 = vst [vmem:[#allocation31_spill] sm:$0xff] %v9035_v28  ;;  %1575 = vrot.lane.b32.xlu0 %v9033_v15, %s8507_s0 }
 0x1c2   :  { %2967 = vrot.lane.b32.xlu1 %v8968_v41, %s8507_s0 }
 0x1c4   :  { %v621_v33 = vpop.permute.xlu1 %620  ;;  %v967_v37 = vpop.permute.xlu0 %966 }
 0x1c5   :  { %7776 = vmatprep.subr.msk.mxu1 %vm360_vm1, %v621_v33 }
 0x1c6   :  { %1316 = vrot.lane.b32.xlu1 %v8997_v49, %s8507_s0  ;;  %7777 = vmatpush3.xpose.msk.msra.mxu1 %vm360_vm1, %v621_v33 }
 0x1c7   :  { %7778 = vmatprep.subr.msk.mxu1 %vm360_vm1, %v619_v14 }
 0x1c8   :  { %v9046_v42 = vpop.permute.xlu1 %306  ;;  %v9048_v32 = vpop.permute.xlu0 %320 }
 0x1c9   :  { %11073 = vst [vmem:[#allocation32_spill] sm:$0xff] %v9046_v42  ;;  %11074 = vst [vmem:[#allocation33_spill] sm:$0xff] %v9048_v32  ;;  %2012 = vrot.lane.b32.xlu0 %v9046_v42, %s8507_s0 }
 0x1ca   :  { %1664 = vrot.lane.b32.xlu1 %v9009_v51, %s8507_s0  ;;  %7779 = vmatpush3.xpose.msk.msra.mxu1 %vm360_vm1, %v619_v14 }
 0x1cb   :  { %7790 = vmatprep.subr.msk.mxu1 %vm360_vm1, %v8894_v17 }
 0x1cc   :  { %v969_v47 = vpop.permute.xlu1 %968  ;;  %v9057_v44 = vpop.permute.xlu0 %336 }
 0x1cd   :  { %11075 = vst [vmem:[#allocation34_spill] sm:$0xff] %v9057_v44  ;;  %7781 = vmatmul.mubr.msk.f32.vlgmr.msra.gmra.mxu1 %vm360_vm1, %v8758_v46 }
 0x1ce   :  { %2010 = vrot.lane.b32.xlu1 %v9035_v28, %s8507_s0  ;;  %7791 = vmatpush3.xpose.msk.msra.mxu1 %vm360_vm1, %v8894_v17 }
 0x1cf   :  { %7794 = vmatprep.mubr.msk.f32.mxu1 %vm360_vm1, %v8683_v34  ;;  %7792 = vmatprep.subr.msk.mxu1 %vm360_vm1, %v8896_v18 }
 0x1d0   :  { %v9069_v14 = vpop.permute.xlu1 %322  ;;  %v9071_v33 = vpop.permute.xlu0 %352 }
 0x1d1   :  { %11076 = vst [vmem:[#allocation35_spill] sm:$0xff] %v9069_v14  ;;  %11077 = vst [vmem:[#allocation36_spill] sm:$0xff] %v9071_v33  ;;  %2360 = vrot.lane.b32.xlu0 %v9069_v14, %s8507_s0 }
 0x1d2   :  { %2358 = vrot.lane.b32.xlu1 %v9048_v32, %s8507_s0  ;;  %7793 = vmatpush3.xpose.msk.msra.mxu1 %vm360_vm1, %v8896_v18 }
 0x1d3   :  { %7804 = vmatprep.subr.msk.mxu1 %vm360_vm1, %v969_v47 }
 0x1d4   :  { %v9080_v46 = vpop.permute.xlu1 %338  ;;  %v9082_v34 = vpop.permute.xlu0 %2099 }
 0x1d5   :  { %11078 = vst [vmem:[#allocation37_spill] sm:$0xff] %v9080_v46  ;;  %2708 = vrot.lane.b32.xlu0 %v9080_v46, %s8507_s0  ;;  %7795 = vmatmul.mubr.msk.f32.vlgmr.msra.gmra.mxu1 %vm360_vm1, %v8667_v30 }
 0x1d6   :  { %2706 = vrot.lane.b32.xlu1 %v9057_v44, %s8507_s0  ;;  %7805 = vmatpush3.xpose.msk.msra.mxu1 %vm360_vm1, %v969_v47 }
 0x1d7   :  { %7808 = vmatprep.mubr.msk.f32.mxu1 %vm360_vm1, %v8783_v54  ;;  %7806 = vmatprep.subr.msk.mxu1 %vm360_vm1, %v967_v37 }
 0x1d8   :  { %v9094_v17 = vpop.permute.xlu1 %354  ;;  %v9098_v18 = vpop.permute.xlu0 %2447 }
 0x1d9   :  { %11079 = vst [vmem:[#allocation38_spill] sm:$0xff] %v9094_v17  ;;  %3056 = vrot.lane.b32.xlu0 %v9094_v17, %s8507_s0 }
 0x1da   :  { %3054 = vrot.lane.b32.xlu1 %v9071_v33, %s8507_s0  ;;  %7807 = vmatpush3.xpose.msk.msra.mxu1 %vm360_vm1, %v967_v37 }
 0x1dc   :  { %v9103_v30 = vpop.permute.xlu1 %4053  ;;  %v9113_v47 = vpop.permute.xlu0 %2795 }
 0x1dd   :  { %11080 = vst [vmem:[#allocation39_spill] sm:$0xff] %v9103_v30  ;;  %1314 = vrot.lane.b32.xlu0 %v9017_v58, %s8507_s0  ;;  %7809 = vmatmul.mubr.msk.f32.vlgmr.msra.gmra.mxu1 %vm360_vm1, %v8765_v48 }
 0x1de   :  { %4399 = vrot.lane.b32.xlu1 %v8783_v54, %s8511_s15  ;;  %7822 = vmatprep.mubr.msk.f32.mxu1 %vm360_vm1, %v8935_v27 }
 0x1e0   :  { %v9115_v4 = vpop.permute.xlu1 %4401  ;;  %v1054_v48 = vpop.permute.xlu0 %1053 }
 0x1e1   :  { %11081 = vst [vmem:[#allocation40_spill] sm:$0xff] %v9115_v4  ;;  %1662 = vrot.lane.b32.xlu0 %v9023_v59, %s8507_s0 }
 0x1e2   :  { %4575 = vrot.lane.b32.xlu1 %v8879_v13, %s8511_s15 }
 0x1e4   :  { %v9121_v37 = vpop.permute.xlu1 %4051  ;;  %v9134_v4 = vpop.permute.xlu0 %1401 }
 0x1e5   :  { %11082 = vst [vmem:[#allocation41_spill] sm:$0xff] %v9121_v37  ;;  %4486 = vrot.lane.b32.xlu0 %v8787_v56, %s8511_s15 }
 0x1e6   :  { %4662 = vrot.lane.b32.xlu1 %v8931_v26, %s8511_s15 }
 0x1e8   :  { %v1056_v54 = vpop.permute.xlu1 %1055 }
 0x1e9   :  { %7811 = vmatprep.subr.msk.mxu0 %vm360_vm1, %v1056_v54  ;;  %4660 = vrot.lane.b32.xlu0 %v9027_v60, %s8511_s15 }
 0x1ea   :  { %7812 = vmatpush3.xpose.msk.msra.mxu0 %vm360_vm1, %v1056_v54  ;;  %4573 = vrot.lane.b32.xlu1 %v8935_v27, %s8511_s15  ;;  %v9149_v27 = vpop.permute.xlu0 %1749 }
 0x1eb   :  { %7813 = vmatprep.subr.msk.mxu0 %vm360_vm1, %v1054_v48 }
 0x1ec   :  { %v9136_v56 = vpop.permute.xlu1 %1403 }
 0x1ed   :  { %4747 = vrot.lane.b32.xlu0 %v9017_v58, %s8511_s15 }
 0x1ee   :  { %4749 = vrot.lane.b32.xlu1 %v8997_v49, %s8511_s15  ;;  %7814 = vmatpush3.xpose.msk.msra.mxu0 %vm360_vm1, %v1054_v48  ;;  %v9157_v37 = vpop.permute.xlu0 %2186 }
 0x1f0   :  { %v9143_v25 = vpop.permute.xlu1 %1751 }
 0x1f1   :  { %4923 = vrot.lane.b32.xlu0 %v8849_v6, %s8511_s15  ;;  %7816 = vmatmul.mubr.msk.f32.vlgmr.msra.gmra.mxu0 %vm360_vm1, %v8774_v53 }
 0x1f2   :  { %4836 = vrot.lane.b32.xlu1 %v8785_v55, %s8511_s15  ;;  %7829 = vmatprep.mubr.msk.f32.mxu0 %vm360_vm1, %v9027_v60  ;;  %v9165_v53 = vpop.permute.xlu0 %2534 }
 0x1f4   :  { %v9155_v54 = vpop.permute.xlu1 %4488 }
 0x1f5   :  { %11083 = vst [vmem:[#allocation42_spill] sm:$0xff] %v9155_v54 }
 0x1f6   :  { %4834 = vrot.lane.b32.xlu1 %v8855_v7, %s8511_s15  ;;  %v9171_v30 = vpop.permute.xlu0 %2882 }
 0x1f7   :  { %11084 = vst [vmem:[#allocation43_spill] sm:$0xff] %v9171_v30 }
 0x1f8   :  { %v9161_v48 = vpop.permute.xlu1 %2097 }
 0x1fa   :  { %5010 = vrot.lane.b32.xlu1 %v8953_v35, %s8511_s15 }
 0x1fc   :  { %v9167_v5 = vpop.permute.xlu1 %2445 }
 0x1fe   :  { %v1141_v54 = vpop.permute.xlu0 %1140 }
 0x200   :  { %v9169_v43 = vpop.permute.xlu1 %2793 }
 0x204   :  { %v1143_v60 = vpop.permute.xlu1 %1142 }
 0x205   :  { %7818 = vmatprep.subr.msk.mxu1 %vm360_vm1, %v1143_v60 }
 0x206   :  { %7819 = vmatpush3.xpose.msk.msra.mxu1 %vm360_vm1, %v1143_v60  ;;  %v9190_v60 = vld [vmem:[%s10958_s5 + $0x8] sm:$0xff] }
 0x207   :  { %7820 = vmatprep.subr.msk.mxu1 %vm360_vm1, %v1141_v54 }
 0x208   :  { %v9176_v29 = vpop.permute.xlu1 %1490 }
 0x20a   :  { %7821 = vmatpush3.xpose.msk.msra.mxu1 %vm360_vm1, %v1141_v54  ;;  %v9195_v54 = vld [vmem:[%s10958_s5] sm:$0xff] }
 0x20c   :  { %v9179_v17 = vpop.permute.xlu1 %1838 }
 0x20d   :  { %7823 = vmatmul.mubr.msk.f32.vlgmr.msra.gmra.mxu1 %vm360_vm1, %v8879_v13  ;;  %v7761_v10 = vpop.f32.mrf.mxu1 }
 0x20e   :  { %7836 = vmatprep.mubr.msk.f32.mxu1 %vm360_vm1, %v9017_v58  ;;  %v9202_v58 = vpop.permute.xlu0 %1488  ;;  %v9212_v11 = vadd.f32 %v7761_v10, %v9190_v60 }
 0x20f   :  { %v435_v23 = vpop.f32.mrf.mxu1 }
 0x210   :  { %v9185_v33 = vpop.permute.xlu1 %1836  ;;  %v9205_v30 = vadd.f32 %v9195_v54, %v435_v23  ;;  %11088 = vst [vmem:[#allocation47_spill] sm:$0xff] %v9212_v11  ;;  %v3217_v23 = vsel %vm3213_vm2, %v9212_v11, -inf }
 0x212   :  { %11086 = vst [vmem:[#allocation45_spill] sm:$0xff] %v9205_v30  ;;  %v1926_v22 = vpop.permute.xlu0 %1925  ;;  %v3214_v14 = vsel %vm3213_vm2, %v9205_v30, -inf }
 0x214   :  { %v9197_v24 = vpop.permute.xlu1 %2184  ;;  %v7789_v13 = vpop.f32.mrf.mxu0 }
 0x215   :  { %v9200_v46 = vadd.f32 %v7789_v13, %v9190_v60 }
 0x216   :  { %v783_v21 = vpop.f32.mrf.mxu0 }
 0x217   :  { %11085 = vst [vmem:[#allocation44_spill] sm:$0xff] %v9200_v46  ;;  %v3241_v44 = vsel %vm3213_vm2, %v9200_v46, -inf  ;;  %v9215_v13 = vadd.f32 %v9195_v54, %v783_v21 }
 0x218   :  { %v9209_v52 = vpop.permute.xlu1 %2532  ;;  %3242 = vmax.xlane.f32.xlu0 %v3241_v44 }
 0x219   :  { %11087 = vst [vmem:[#allocation46_spill] sm:$0xff] %v9209_v52  ;;  %v3238_v10 = vsel %vm3213_vm2, %v9215_v13, -inf }
 0x21a   :  { %v9223_v46 = vpop.permute.xlu0 %2273 }
 0x21c   :  { %v9219_v50 = vpop.permute.xlu1 %2880  ;;  %3215 = vmax.xlane.f32.xlu0 %v3214_v14 }
 0x21d   :  { %11089 = vst [vmem:[#allocation48_spill] sm:$0xff] %v9219_v50 }
 0x21e   :  { %3218 = vmax.xlane.f32.xlu1 %v3217_v23  ;;  %v9229_v21 = vpop.permute.xlu0 %2621 }
 0x220   :  { %v1230_v44 = vpop.permute.xlu1 %1229  ;;  %3239 = vmax.xlane.f32.xlu0 %v3238_v10 }
 0x221   :  { %7825 = vmatprep.subr.msk.mxu0 %vm360_vm1, %v1230_v44 }
 0x222   :  { %7826 = vmatpush3.xpose.msk.msra.mxu0 %vm360_vm1, %v1230_v44  ;;  %v9231_v14 = vpop.permute.xlu0 %2969 }
 0x224   :  { %v1578_v30 = vpop.permute.xlu1 %1577 }
 0x228   :  { %v1924_v50 = vpop.permute.xlu1 %1923 }
 0x22c   :  { %v9233_v52 = vpop.permute.xlu1 %2271 }
 0x22e   :  { %v1228_v11 = vpop.permute.xlu0 %1227 }
 0x22f   :  { %7827 = vmatprep.subr.msk.mxu0 %vm360_vm1, %v1228_v11 }
 0x230   :  { %v9236_v23 = vpop.permute.xlu1 %2619  ;;  %7828 = vmatpush3.xpose.msk.msra.mxu0 %vm360_vm1, %v1228_v11 }
 0x231   :  { %7839 = vmatprep.subr.msk.mxu0 %vm360_vm1, %v9136_v56 }
 0x233   :  { %7830 = vmatmul.mubr.msk.f32.vlgmr.msra.gmra.mxu0 %vm360_vm1, %v8931_v26  ;;  %v1576_v11 = vpop.permute.xlu0 %1575 }
 0x234   :  { %v9243_v10 = vpop.permute.xlu1 %2967  ;;  %7840 = vmatpush3.xpose.msk.msra.mxu0 %vm360_vm1, %v9136_v56  ;;  %7843 = vmatprep.mubr.msk.f32.mxu0 %vm360_vm1, %v8855_v7 }
 0x235   :  { %7841 = vmatprep.subr.msk.mxu0 %vm360_vm1, %v9134_v4 }
 0x238   :  { %v1317_v44 = vpop.permute.xlu1 %1316  ;;  %7842 = vmatpush3.xpose.msk.msra.mxu0 %vm360_vm1, %v9134_v4 }
 0x239   :  { %7832 = vmatprep.subr.msk.mxu1 %vm360_vm1, %v1317_v44  ;;  %7853 = vmatprep.subr.msk.mxu0 %vm360_vm1, %v1578_v30 }
 0x23a   :  { %7833 = vmatpush3.xpose.msk.msra.mxu1 %vm360_vm1, %v1317_v44 }
 0x23b   :  { %7844 = vmatmul.mubr.msk.f32.vlgmr.msra.gmra.mxu0 %vm360_vm1, %v8785_v55  ;;  %v9265_v4 = vpop.permute.xlu0 %2012 }
 0x23c   :  { %v7768_v26 = vpop.f32.mrf.mxu1  ;;  %7854 = vmatpush3.xpose.msk.msra.mxu0 %vm360_vm1, %v1578_v30  ;;  %7857 = vmatprep.mubr.msk.f32.mxu0 %vm360_vm1, %v9033_v15 }
 0x23d   :  { %v9262_v7 = vadd.f32 %v7768_v26, %v9190_v60  ;;  %7855 = vmatprep.subr.msk.mxu0 %vm360_vm1, %v1576_v11  ;;  %v11091_v26 = vld [vmem:[#allocation35_spill] sm:$0xff] }
 0x23f   :  { %v3223_v56 = vsel %vm3213_vm2, %v9262_v7, -inf }
 0x240   :  { %7856 = vmatpush3.xpose.msk.msra.mxu0 %vm360_vm1, %v1576_v11  ;;  %3224 = vmax.xlane.f32.xlu1 %v3223_v56  ;;  %v11090_v11 = vld [vmem:[#allocation28_spill] sm:$0xff]  ;;  %v11093_v56 = vld [vmem:[#allocation46_spill] sm:$0xff] }
 0x241   :  { %7867 = vmatprep.subr.msk.mxu0 %vm360_vm1, %v9143_v25 }
 0x243   :  { %v9272_v55 = vpop.permute.xlu0 %2360  ;;  %7858 = vmatmul.mubr.msk.f32.vlgmr.msra.gmra.mxu0 %vm360_vm1, %v8953_v35 }
 0x244   :  { %7868 = vmatpush3.xpose.msk.msra.mxu0 %vm360_vm1, %v9143_v25  ;;  %7871 = vmatprep.mubr.msk.f32.mxu0 %vm360_vm1, %v8863_v9 }
 0x245   :  { %7869 = vmatprep.subr.msk.mxu0 %vm360_vm1, %v9149_v27 }
 0x247   :  { %v9282_v30 = vpop.permute.xlu0 %2708 }
 0x248   :  { %7870 = vmatpush3.xpose.msk.msra.mxu0 %vm360_vm1, %v9149_v27 }
 0x249   :  { %7881 = vmatprep.subr.msk.mxu0 %vm360_vm1, %v1926_v22 }
 0x24b   :  { %v9287_v44 = vpop.permute.xlu0 %3056  ;;  %7872 = vmatmul.mubr.msk.f32.vlgmr.msra.gmra.mxu0 %vm360_vm1, %v8793_v57 }
 0x24c   :  { %7882 = vmatpush3.xpose.msk.msra.mxu0 %vm360_vm1, %v1926_v22  ;;  %7885 = vmatprep.mubr.msk.f32.mxu0 %vm360_vm1, %v8943_v31  ;;  %v1665_v22 = vpop.permute.xlu1 %1664 }
 0x24d   :  { %7883 = vmatprep.subr.msk.mxu0 %vm360_vm1, %v1924_v50 }
 0x24f   :  { %v1315_v25 = vpop.permute.xlu0 %1314 }
 0x250   :  { %7834 = vmatprep.subr.msk.mxu1 %vm360_vm1, %v1315_v25  ;;  %7884 = vmatpush3.xpose.msk.msra.mxu0 %vm360_vm1, %v1924_v50 }
 0x251   :  { %7835 = vmatpush3.xpose.msk.msra.mxu1 %vm360_vm1, %v1315_v25  ;;  %7895 = vmatprep.subr.msk.mxu0 %vm360_vm1, %v9082_v34  ;;  %v11095_v25 = vld [vmem:[#allocation29_spill] sm:$0xff] }
 0x252   :  { %7846 = vmatprep.subr.msk.mxu1 %vm360_vm1, %v9176_v29 }
 0x253   :  { %7886 = vmatmul.mubr.msk.f32.vlgmr.msra.gmra.mxu0 %vm360_vm1, %v8966_v40 }
 0x254   :  { %7837 = vmatmul.mubr.msk.f32.vlgmr.msra.gmra.mxu1 %vm360_vm1, %v8997_v49  ;;  %7896 = vmatpush3.xpose.msk.msra.mxu0 %vm360_vm1, %v9082_v34 }
 0x255   :  { %7847 = vmatpush3.xpose.msk.msra.mxu1 %vm360_vm1, %v9176_v29  ;;  %7850 = vmatprep.mubr.msk.f32.mxu1 %vm360_vm1, %v8873_v12  ;;  %v1663_v29 = vpop.permute.xlu0 %1662 }
 0x256   :  { %7899 = vmatprep.mubr.msk.f32.mxu0 %vm360_vm1, %v8813_v62  ;;  %7848 = vmatprep.subr.msk.mxu1 %vm360_vm1, %v9202_v58 }
 0x257   :  { %7897 = vmatprep.subr.msk.mxu0 %vm360_vm1, %v9161_v48 }
 0x258   :  { %7898 = vmatpush3.xpose.msk.msra.mxu0 %vm360_vm1, %v9161_v48 }
 0x259   :  { %7849 = vmatpush3.xpose.msk.msra.mxu1 %vm360_vm1, %v9202_v58  ;;  %7909 = vmatprep.subr.msk.mxu0 %vm360_vm1, %v9223_v46 }
 0x25a   :  { %7860 = vmatprep.subr.msk.mxu1 %vm360_vm1, %v1665_v22 }
 0x25b   :  { %7900 = vmatmul.mubr.msk.f32.vlgmr.msra.gmra.mxu0 %vm360_vm1, %v8811_v61 }
 0x25c   :  { %7851 = vmatmul.mubr.msk.f32.vlgmr.msra.gmra.mxu1 %vm360_vm1, %v8849_v6  ;;  %7910 = vmatpush3.xpose.msk.msra.mxu0 %vm360_vm1, %v9223_v46  ;;  %v2011_v6 = vpop.permute.xlu1 %2010 }
 0x25d   :  { %7861 = vmatpush3.xpose.msk.msra.mxu1 %vm360_vm1, %v1665_v22  ;;  %7864 = vmatprep.mubr.msk.f32.mxu1 %vm360_vm1, %v9023_v59  ;;  %v11096_v22 = vld [vmem:[#allocation14_spill] sm:$0xff] }
 0x25e   :  { %7913 = vmatprep.mubr.msk.f32.mxu0 %vm360_vm1, %v8955_v36  ;;  %7862 = vmatprep.subr.msk.mxu1 %vm360_vm1, %v1663_v29 }
 0x25f   :  { %7911 = vmatprep.subr.msk.mxu0 %vm360_vm1, %v9233_v52 }
 0x260   :  { %7912 = vmatpush3.xpose.msk.msra.mxu0 %vm360_vm1, %v9233_v52  ;;  %v2359_v35 = vpop.permute.xlu1 %2358  ;;  %v522_v52 = vpop.f32.mrf.mxu1 }
 0x261   :  { %7863 = vmatpush3.xpose.msk.msra.mxu1 %vm360_vm1, %v1663_v29  ;;  %7923 = vmatprep.subr.msk.mxu0 %vm360_vm1, %v9098_v18  ;;  %v9395_v46 = vadd.f32 %v9195_v54, %v522_v52 }
 0x262   :  { %7874 = vmatprep.subr.msk.mxu1 %vm360_vm1, %v9179_v17 }
 0x263   :  { %7914 = vmatmul.mubr.msk.f32.vlgmr.msra.gmra.mxu0 %vm360_vm1, %v8986_v45  ;;  %v3220_v27 = vsel %vm3213_vm2, %v9395_v46, -inf }
 0x264   :  { %7865 = vmatmul.mubr.msk.f32.vlgmr.msra.gmra.mxu1 %vm360_vm1, %v9009_v51  ;;  %7924 = vmatpush3.xpose.msk.msra.mxu0 %vm360_vm1, %v9098_v18  ;;  %v7775_v48 = vpop.f32.mrf.mxu1 }
 0x265   :  { %7875 = vmatpush3.xpose.msk.msra.mxu1 %vm360_vm1, %v9179_v17  ;;  %7878 = vmatprep.mubr.msk.f32.mxu1 %vm360_vm1, %v8885_v16 }
 0x266   :  { %7927 = vmatprep.mubr.msk.f32.mxu0 %vm360_vm1, %v8822_v0  ;;  %7876 = vmatprep.subr.msk.mxu1 %vm360_vm1, %v9185_v33 }
 0x267   :  { %7925 = vmatprep.subr.msk.mxu0 %vm360_vm1, %v9167_v5 }
 0x268   :  { %7926 = vmatpush3.xpose.msk.msra.mxu0 %vm360_vm1, %v9167_v5  ;;  %v9376_v5 = vpop.permute.xlu1 %2706 }
 0x269   :  { %7877 = vmatpush3.xpose.msk.msra.mxu1 %vm360_vm1, %v9185_v33  ;;  %7937 = vmatprep.subr.msk.mxu0 %vm360_vm1, %v9229_v21 }
 0x26a   :  { %7888 = vmatprep.subr.msk.mxu1 %vm360_vm1, %v9265_v4 }
 0x26b   :  { %7928 = vmatmul.mubr.msk.f32.vlgmr.msra.gmra.mxu0 %vm360_vm1, %v8820_v63 }
 0x26c   :  { %7879 = vmatmul.mubr.msk.f32.vlgmr.msra.gmra.mxu1 %vm360_vm1, %v8857_v8  ;;  %v7803_v49 = vpop.f32.mrf.mxu0  ;;  %7938 = vmatpush3.xpose.msk.msra.mxu0 %vm360_vm1, %v9229_v21  ;;  %v9402_v17 = vpop.permute.xlu1 %3054 }
 0x26d   :  { %v9379_v50 = vadd.f32 %v7803_v49, %v9190_v60  ;;  %7889 = vmatpush3.xpose.msk.msra.mxu1 %vm360_vm1, %v9265_v4  ;;  %7892 = vmatprep.mubr.msk.f32.mxu1 %vm360_vm1, %v9035_v28  ;;  %v609_v21 = vpop.f32.mrf.mxu1  ;;  %v11092_v4 = vld [vmem:[#allocation15_spill] sm:$0xff] }
 0x26e   :  { %7941 = vmatprep.mubr.msk.f32.mxu0 %vm360_vm1, %v8959_v39  ;;  %7890 = vmatprep.subr.msk.mxu1 %vm360_vm1, %v2011_v6  ;;  %v957_v34 = vpop.f32.mrf.mxu0 }
 0x26f   :  { %7939 = vmatprep.subr.msk.mxu0 %vm360_vm1, %v9236_v23  ;;  %v3253_v33 = vsel %vm3213_vm2, %v9379_v50, -inf  ;;  %v9411_v18 = vadd.f32 %v9195_v54, %v957_v34 }
 0x270   :  { %7940 = vmatpush3.xpose.msk.msra.mxu0 %vm360_vm1, %v9236_v23  ;;  %3254 = vmax.xlane.f32.xlu0 %v3253_v33 }
 0x271   :  { %7891 = vmatpush3.xpose.msk.msra.mxu1 %vm360_vm1, %v2011_v6  ;;  %7951 = vmatprep.subr.msk.mxu0 %vm360_vm1, %v9113_v47  ;;  %v3250_v58 = vsel %vm3213_vm2, %v9411_v18, -inf  ;;  %v11097_v6 = vld [vmem:[#allocation34_spill] sm:$0xff] }
 0x272   :  { %7902 = vmatprep.subr.msk.mxu1 %vm360_vm1, %v9157_v37 }
 0x273   :  { %7942 = vmatmul.mubr.msk.f32.vlgmr.msra.gmra.mxu0 %vm360_vm1, %v8995_v38 }
 0x274   :  { %7893 = vmatmul.mubr.msk.f32.vlgmr.msra.gmra.mxu1 %vm360_vm1, %v9046_v42  ;;  %7952 = vmatpush3.xpose.msk.msra.mxu0 %vm360_vm1, %v9113_v47  ;;  %v9427_v47 = vpop.permute.xlu1 %4399 }
 0x275   :  { %7903 = vmatpush3.xpose.msk.msra.mxu1 %vm360_vm1, %v9157_v37  ;;  %7906 = vmatprep.mubr.msk.f32.mxu1 %vm360_vm1, %v8903_v20  ;;  %v9430_v37 = vadd.f32 %v7775_v48, %v9190_v60  ;;  %v11099_v48 = vld [vmem:[#allocation37_spill] sm:$0xff] }
 0x276   :  { %7955 = vmatprep.mubr.msk.f32.mxu0 %vm360_vm1, %v8833_v2  ;;  %3221 = vmax.xlane.f32.xlu0 %v3220_v27 }
 0x277   :  { %7904 = vmatprep.subr.msk.mxu1 %vm360_vm1, %v9197_v24  ;;  %7953 = vmatprep.subr.msk.mxu0 %vm360_vm1, %v9169_v43 }
 0x278   :  { %7954 = vmatpush3.xpose.msk.msra.mxu0 %vm360_vm1, %v9169_v43  ;;  %v3229_v43 = vsel %vm3213_vm2, %v9430_v37, -inf  ;;  %v9457_v23 = vpop.permute.xlu1 %4575 }
 0x279   :  { %7905 = vmatpush3.xpose.msk.msra.mxu1 %vm360_vm1, %v9197_v24  ;;  %7965 = vmatprep.subr.msk.mxu0 %vm360_vm1, %v9231_v14  ;;  %v9447_v24 = vadd.f32 %v9195_v54, %v609_v21 }
 0x27a   :  { %3251 = vmax.xlane.f32.xlu0 %v3250_v58  ;;  %7916 = vmatprep.subr.msk.mxu1 %vm360_vm1, %v9272_v55  ;;  %v11100_v58 = vld [vmem:[#allocation17_spill] sm:$0xff] }
 0x27b   :  { %7956 = vmatmul.mubr.msk.f32.vlgmr.msra.gmra.mxu0 %vm360_vm1, %v8831_v1 }
 0x27c   :  { %7907 = vmatmul.mubr.msk.f32.vlgmr.msra.gmra.mxu1 %vm360_vm1, %v8901_v19  ;;  %7966 = vmatpush3.xpose.msk.msra.mxu0 %vm360_vm1, %v9231_v14  ;;  %v3226_v14 = vsel %vm3213_vm2, %v9447_v24, -inf }
 0x27d   :  { %7917 = vmatpush3.xpose.msk.msra.mxu1 %vm360_vm1, %v9272_v55  ;;  %7920 = vmatprep.mubr.msk.f32.mxu1 %vm360_vm1, %v9048_v32  ;;  %v11094_v55 = vld [vmem:[#allocation11_spill] sm:$0xff] }
 0x27e   :  { %7969 = vmatprep.mubr.msk.f32.mxu0 %vm360_vm1, %v8968_v41  ;;  %3230 = vmax.xlane.f32.xlu0 %v3229_v43  ;;  %v11108_v32 = vld [vmem:[#allocation47_spill] sm:$0xff] }
 0x27f   :  { %7918 = vmatprep.subr.msk.mxu1 %vm360_vm1, %v2359_v35  ;;  %7967 = vmatprep.subr.msk.mxu0 %vm360_vm1, %v9243_v10 }
 0x280   :  { %7968 = vmatpush3.xpose.msk.msra.mxu0 %vm360_vm1, %v9243_v10  ;;  %v9475_v10 = vpop.permute.xlu1 %4662 }
 0x281   :  { %7919 = vmatpush3.xpose.msk.msra.mxu1 %vm360_vm1, %v2359_v35  ;;  %7979 = vmatprep.subr.mxu0 %v8839_v3 }
 0x282   :  { %3227 = vmax.xlane.f32.xlu0 %v3226_v14  ;;  %7930 = vmatprep.subr.msk.mxu1 %vm360_vm1, %v9165_v53 }
 0x283   :  { %7970 = vmatmul.mubr.msk.f32.vlgmr.msra.gmra.mxu0 %vm360_vm1, %v11090_v11  ;;  %v11103_v11 = vld [vmem:[#allocation36_spill] sm:$0xff] }
 0x284   :  { %7921 = vmatmul.mubr.msk.f32.vlgmr.msra.gmra.mxu1 %vm360_vm1, %v11091_v26  ;;  %7980 = vmatpush3.msra.mxu0 %v8839_v3  ;;  %v9488_v3 = vpop.permute.xlu0 %4486 }
 0x285   :  { %7931 = vmatpush3.xpose.msk.msra.mxu1 %vm360_vm1, %v9165_v53  ;;  %7934 = vmatprep.mubr.msk.f32.mxu1 %vm360_vm1, %v11092_v4  ;;  %v9492_v53 = vpop.permute.xlu1 %4573 }
 0x286   :  { %7932 = vmatprep.subr.msk.mxu1 %vm360_vm1, %v11093_v56  ;;  %7981 = vmatprep.subr.mxu0 %v11094_v55 }
 0x287   :  { %7982 = vmatpush3.msra.mxu0 %v11094_v55 }
 0x288   :  { %7993 = vmatprep.subr.mxu0 %v11095_v25  ;;  %v9505_v52 = vpop.permute.xlu0 %4660 }
 0x289   :  { %7933 = vmatpush3.xpose.msk.msra.mxu1 %vm360_vm1, %v11093_v56  ;;  %v9509_v34 = vpop.permute.xlu1 %4749  ;;  %v11101_v56 = vld [vmem:[#allocation48_spill] sm:$0xff] }
 0x28a   :  { %7944 = vmatprep.subr.msk.mxu1 %vm360_vm1, %v9282_v30 }
 0x28c   :  { %7935 = vmatmul.mubr.msk.f32.vlgmr.msra.gmra.mxu1 %vm360_vm1, %v11096_v22  ;;  %v9526_v14 = vpop.permute.xlu0 %4747 }
 0x28d   :  { %v7782_v29 = vpop.f32.mrf.mxu1  ;;  %7945 = vmatpush3.xpose.msk.msra.mxu1 %vm360_vm1, %v9282_v30  ;;  %7948 = vmatprep.mubr.msk.f32.mxu1 %vm360_vm1, %v11097_v6  ;;  %v11098_v30 = vld [vmem:[#allocation43_spill] sm:$0xff]  ;;  %v9533_v55 = vpop.permute.xlu1 %4836 }
 0x28e   :  { %v9501_v35 = vadd.f32 %v7782_v29, %v9190_v60  ;;  %7946 = vmatprep.subr.msk.mxu1 %vm360_vm1, %v9376_v5 }
 0x28f   :  { %v696_v49 = vpop.f32.mrf.mxu1 }
 0x290   :  { %v3235_v33 = vsel %vm3213_vm2, %v9501_v35, -inf  ;;  %v9512_v27 = vadd.f32 %v9195_v54, %v696_v49 }
 0x291   :  { %7947 = vmatpush3.xpose.msk.msra.mxu1 %vm360_vm1, %v9376_v5  ;;  %3236 = vmax.xlane.f32.xlu1 %v3235_v33 }
 0x292   :  { %7958 = vmatprep.subr.msk.mxu1 %vm360_vm1, %v11098_v30  ;;  %v3232_v21 = vsel %vm3213_vm2, %v9512_v27, -inf }
 0x294   :  { %7949 = vmatmul.mubr.msk.f32.vlgmr.msra.gmra.mxu1 %vm360_vm1, %v11099_v48 }
 0x295   :  { %7959 = vmatpush3.xpose.msk.msra.mxu1 %vm360_vm1, %v11098_v30  ;;  %7962 = vmatprep.mubr.msk.f32.mxu1 %vm360_vm1, %v11100_v58  ;;  %v7796_v43 = vpop.f32.mrf.mxu1  ;;  %v9544_v30 = vpop.permute.xlu0 %4923  ;;  %v11109_v58 = vld [vmem:[#allocation39_spill] sm:$0xff] }
 0x296   :  { %3233 = vmax.xlane.f32.xlu1 %v3232_v21  ;;  %v9529_v5 = vadd.f32 %v7796_v43, %v9190_v60  ;;  %7960 = vmatprep.subr.msk.mxu1 %vm360_vm1, %v11101_v56  ;;  %v11102_v21 = vld [vmem:[#allocation16_spill] sm:$0xff]  ;;  %v9548_v43 = vpop.permute.xlu1 %4834 }
 0x297   :  { %v870_v29 = vpop.f32.mrf.mxu1 }
 0x298   :  { %v3247_v49 = vsel %vm3213_vm2, %v9529_v5, -inf  ;;  %v9538_v33 = vadd.f32 %v9195_v54, %v870_v29 }
 0x299   :  { %7961 = vmatpush3.xpose.msk.msra.mxu1 %vm360_vm1, %v11101_v56 }
 0x29a   :  { %3248 = vmax.xlane.f32.xlu1 %v3247_v49  ;;  %7972 = vmatprep.subr.msk.mxu1 %vm360_vm1, %v9287_v44  ;;  %v3244_v56 = vsel %vm3213_vm2, %v9538_v33, -inf }
 0x29c   :  { %7963 = vmatmul.mubr.msk.f32.vlgmr.msra.gmra.mxu1 %vm360_vm1, %v11102_v21 }
 0x29d   :  { %7973 = vmatpush3.xpose.msk.msra.mxu1 %vm360_vm1, %v9287_v44  ;;  %7976 = vmatprep.mubr.msk.f32.mxu1 %vm360_vm1, %v11103_v11  ;;  %v7810_v29 = vpop.f32.mrf.mxu1 }
 0x29e   :  { %3245 = vmax.xlane.f32.xlu1 %v3244_v56  ;;  %v9557_v49 = vadd.f32 %v7810_v29, %v9190_v60  ;;  %7974 = vmatprep.subr.msk.mxu1 %vm360_vm1, %v9402_v17  ;;  %v11104_v56 = vld [vmem:[#allocation10_spill] sm:$0xff]  ;;  %v9571_v60 = vpop.permute.xlu1 %5010 }
 0x29f   :  { %v1044_v21 = vpop.f32.mrf.mxu1  ;;  %v11105_v29 = vld [vmem:[#allocation38_spill] sm:$0xff] }
 0x2a0   :  { %v3259_v1 = vsel %vm3213_vm2, %v9557_v49, -inf  ;;  %v9564_v44 = vadd.f32 %v9195_v54, %v1044_v21  ;;  %v11106_v21 = vld [vmem:[#allocation19_spill] sm:$0xff] }
 0x2a1   :  { %7975 = vmatpush3.xpose.msk.msra.mxu1 %vm360_vm1, %v9402_v17  ;;  %v9568_v48 = vpop.xlane.xlu0 %3242  ;;  %v11107_v17 = vld [vmem:[#allocation45_spill] sm:$0xff] }
 0x2a2   :  { %3260 = vmax.xlane.f32.xlu1 %v3259_v1  ;;  %7986 = vmatprep.subr.mxu1 %v11104_v56  ;;  %v3256_v38 = vsel %vm3213_vm2, %v9564_v44, -inf }
 0x2a4   :  { %7977 = vmatmul.mubr.msk.f32.vlgmr.msra.gmra.mxu1 %vm360_vm1, %v11105_v29 }
 0x2a5   :  { %7987 = vmatpush3.msra.mxu1 %v11104_v56  ;;  %v3216_v54 = vpop.xlane.xlu0 %3215  ;;  %v9586_v56 = vld [vmem:[%s10958_s5 + $0x18] sm:$0xff] }
 0x2a6   :  { %3257 = vmax.xlane.f32.xlu1 %v3256_v38  ;;  %7988 = vmatprep.subr.mxu1 %v11106_v21  ;;  %v3406_v22 = vsub.f32 %v11107_v17, %v3216_v54  ;;  %v9591_v54 = vld [vmem:[%s10958_s5 + $0x10] sm:$0xff] }
 0x2a7   :  { %7989 = vmatpush3.msra.mxu1 %v11106_v21  ;;  %v3219_v1 = vpop.xlane.xlu1 %3218 }
 0x2a8   :  { %v3470_v11 = vmul.f32 1.442695, %v3406_v22  ;;  %v3407_v41 = vsub.f32 %v11108_v32, %v3219_v1  ;;  %8000 = vmatprep.subr.mxu1 %v11109_v58  ;;  %v11112_v1 = vld [vmem:[#allocation24_spill] sm:$0xff] }
 0x2a9   :  { %v3240_v6 = vpop.xlane.xlu0 %3239 }
 0x2aa   :  { %8251 = vpow2.f32 %v3470_v11  ;;  %v3472_v29 = vmul.f32 1.442695, %v3407_v41 }
 0x2ac   :  { %8253 = vpow2.f32 %v3472_v29 }
 0x2b1   :  { %v7817_v38 = vpop.f32.mrf.mxu0 }
 0x2b2   :  { %v9594_v22 = vadd.f32 %v7817_v38, %v9586_v56  ;;  %v11113_v38 = vld [vmem:[#allocation9_spill] sm:$0xff] }
 0x2b3   :  { %v1131_v32 = vpop.f32.mrf.mxu0 }
 0x2b4   :  { %v9597_v21 = vadd.f32 %v9591_v54, %v1131_v32  ;;  %v3265_v41 = vsel %vm3213_vm2, %v9594_v22, -inf }
 0x2b5   :  { %3266 = vmax.xlane.f32.xlu0 %v3265_v41 }
 0x2b6   :  { %v3262_v29 = vsel %vm3213_vm2, %v9597_v21, -inf }
 0x2b7   :  { %v9601_v11 = vpop.eup %8251 }
 0x2b8   :  { %11110 = vst [vmem:[#allocation46_spill] sm:$0xff] %v9601_v11  ;;  %7983 = vmatprep.mubr.msk.f32.mxu0 %vm3213_vm2, %v9601_v11 }
 0x2b9   :  { %v9607_v17 = vpop.eup %8253  ;;  %3263 = vmax.xlane.f32.xlu0 %v3262_v29 }
 0x2ba   :  { %11111 = vst [vmem:[#allocation11_spill] sm:$0xff] %v9607_v17  ;;  %7984 = vmatmul.mubr.msk.f32.vlgmr.msra.gmra.mxu0 %vm3213_vm2, %v9607_v17 }
 0x2bb   :  { %7994 = vmatpush3.msra.mxu0 %v11095_v25 }
 0x2bc   :  { %7995 = vmatprep.subr.mxu0 %v11112_v1 }
 0x2bd   :  { %7996 = vmatpush3.msra.mxu0 %v11112_v1 }
 0x2be   :  { %8007 = vmatprep.subr.mxu0 %v11113_v38 }
 0x2c9   :  { %v3225_v0 = vpop.xlane.xlu1 %3224 }
 0x2cd   :  { %v7824_v32 = vpop.f32.mrf.mxu1 }
 0x2ce   :  { %v9616_v41 = vadd.f32 %v7824_v32, %v9586_v56 }
 0x2cf   :  { %v1218_v11 = vpop.f32.mrf.mxu1 }
 0x2d0   :  { %v9619_v2 = vadd.f32 %v9591_v54, %v1218_v11  ;;  %v3271_v29 = vsel %vm3213_vm2, %v9616_v41, -inf }
 0x2d1   :  { %3272 = vmax.xlane.f32.xlu1 %v3271_v29 }
 0x2d2   :  { %v3268_v25 = vsel %vm3213_vm2, %v9619_v2, -inf }
 0x2d5   :  { %3269 = vmax.xlane.f32.xlu1 %v3268_v25 }
 0x2f3   :  { %v7831_v17 = vpop.f32.mrf.mxu0 }
 0x2f4   :  { %v9626_v1 = vadd.f32 %v7831_v17, %v9586_v56  ;;  %v3409_v17 = vsub.f32 %v9262_v7, %v3225_v0  ;;  %v3414_v7 = vsub.f32 %v9215_v13, %v3240_v6 }
 0x2f5   :  { %v1305_v39 = vpop.f32.mrf.mxu0 }
 0x2f6   :  { %v9629_v32 = vadd.f32 %v9591_v54, %v1305_v39  ;;  %v3277_v11 = vsel %vm3213_vm2, %v9626_v1, -inf  ;;  %v3476_v19 = vmul.f32 1.442695, %v3409_v17 }
 0x2f7   :  { %3278 = vmax.xlane.f32.xlu0 %v3277_v11 }
 0x2f8   :  { %v3274_v29 = vsel %vm3213_vm2, %v9629_v32, -inf }
 0x2f9   :  { %v3255_v4 = vpop.xlane.xlu0 %3254 }
 0x2fb   :  { %v7845_v26 = vpop.f32.mrf.mxu0  ;;  %3275 = vmax.xlane.f32.xlu0 %v3274_v29 }
 0x2fc   :  { %v9636_v25 = vadd.f32 %v7845_v26, %v9586_v56 }
 0x2fd   :  { %v1479_v20 = vpop.f32.mrf.mxu0 }
 0x2fe   :  { %v9640_v39 = vadd.f32 %v9591_v54, %v1479_v20  ;;  %v3289_v63 = vsel %vm3213_vm2, %v9636_v25, -inf }
 0x2ff   :  { %v3222_v11 = vpop.xlane.xlu0 %3221  ;;  %3290 = vmax.xlane.f32.xlu0 %v3289_v63  ;;  %v11114_v63 = vld [vmem:[#allocation44_spill] sm:$0xff] }
 0x300   :  { %v3408_v36 = vsub.f32 %v9395_v46, %v3222_v11  ;;  %v3286_v29 = vsel %vm3213_vm2, %v9640_v39, -inf  ;;  %v3415_v46 = vsub.f32 %v11114_v63, %v9568_v48 }
 0x302   :  { %v3474_v28 = vmul.f32 1.442695, %v3408_v36  ;;  %v3486_v36 = vmul.f32 1.442695, %v3414_v7 }
 0x303   :  { %v3252_v26 = vpop.xlane.xlu0 %3251  ;;  %3287 = vmax.xlane.f32.xlu0 %v3286_v29 }
 0x304   :  { %8255 = vpow2.f32 %v3474_v28  ;;  %v3418_v11 = vsub.f32 %v9411_v18, %v3252_v26  ;;  %v3419_v28 = vsub.f32 %v9379_v50, %v3255_v4  ;;  %v7859_v18 = vpop.f32.mrf.mxu0  ;;  %v11118_v4 = vld [vmem:[#allocation18_spill] sm:$0xff] }
 0x305   :  { %8257 = vpow2.f32 %v3476_v19  ;;  %v3488_v19 = vmul.f32 1.442695, %v3415_v46 }
 0x306   :  { %v3494_v13 = vmul.f32 1.442695, %v3418_v11 }
 0x307   :  { %v3231_v0 = vpop.xlane.xlu0 %3230 }
 0x308   :  { %v3411_v20 = vsub.f32 %v9430_v37, %v3231_v0 }
 0x30a   :  { %v3480_v17 = vmul.f32 1.442695, %v3411_v20 }
 0x30b   :  { %v3228_v45 = vpop.xlane.xlu0 %3227 }
 0x30c   :  { %v3410_v62 = vsub.f32 %v9447_v24, %v3228_v45  ;;  %v3496_v45 = vmul.f32 1.442695, %v3419_v28 }
 0x30e   :  { %v3478_v42 = vmul.f32 1.442695, %v3410_v62 }
 0x310   :  { %8259 = vpow2.f32 %v3478_v42  ;;  %v11117_v42 = vld [vmem:[#allocation41_spill] sm:$0xff] }
 0x311   :  { %v9653_v29 = vpop.eup %8255  ;;  %8261 = vpow2.f32 %v3480_v17 }
 0x312   :  { %11115 = vst [vmem:[#allocation29_spill] sm:$0xff] %v9653_v29  ;;  %v9656_v37 = vpop.eup %8257  ;;  %8263 = vpow2.f32 %v3486_v36  ;;  %7990 = vmatprep.mubr.msk.f32.mxu1 %vm3213_vm2, %v9653_v29 }
 0x313   :  { %11116 = vst [vmem:[#allocation43_spill] sm:$0xff] %v9656_v37  ;;  %7991 = vmatmul.mubr.msk.f32.vlgmr.msra.gmra.mxu1 %vm3213_vm2, %v9656_v37  ;;  %8265 = vpow2.f32 %v3488_v19 }
 0x314   :  { %8001 = vmatpush3.msra.mxu1 %v11109_v58  ;;  %v7838_v62 = vpop.f32.mrf.mxu1  ;;  %8267 = vpow2.f32 %v3494_v13  ;;  %v1653_v58 = vpop.f32.mrf.mxu0 }
 0x315   :  { %8002 = vmatprep.subr.mxu1 %v11117_v42  ;;  %v9665_v50 = vadd.f32 %v7838_v62, %v9586_v56  ;;  %8269 = vpow2.f32 %v3496_v45 }
 0x316   :  { %8003 = vmatpush3.msra.mxu1 %v11117_v42  ;;  %v1392_v24 = vpop.f32.mrf.mxu1  ;;  %v7873_v20 = vpop.f32.mrf.mxu0 }
 0x317   :  { %8014 = vmatprep.subr.mxu1 %v11118_v4  ;;  %v9670_v6 = vadd.f32 %v9591_v54, %v1392_v24  ;;  %v3283_v48 = vsel %vm3213_vm2, %v9665_v50, -inf  ;;  %v11122_v24 = vld [vmem:[#allocation8_spill] sm:$0xff] }
 0x318   :  { %3284 = vmax.xlane.f32.xlu1 %v3283_v48  ;;  %v1827_v62 = vpop.f32.mrf.mxu0 }
 0x319   :  { %v3280_v0 = vsel %vm3213_vm2, %v9670_v6, -inf }
 0x31a   :  { %v3237_v26 = vpop.xlane.xlu1 %3236 }
 0x31b   :  { %v3413_v46 = vsub.f32 %v9501_v35, %v3237_v26  ;;  %v9702_v26 = vpop.f32.mrf.mxu0 }
 0x31c   :  { %3281 = vmax.xlane.f32.xlu1 %v3280_v0  ;;  %v7852_v7 = vpop.f32.mrf.mxu1 }
 0x31d   :  { %v9676_v63 = vpop.eup %8259  ;;  %v9680_v17 = vadd.f32 %v7852_v7, %v9586_v56  ;;  %v3484_v42 = vmul.f32 1.442695, %v3413_v46  ;;  %v9711_v46 = vadd.f32 %v7859_v18, %v9586_v56 }
 0x31e   :  { %11119 = vst [vmem:[#allocation48_spill] sm:$0xff] %v9676_v63  ;;  %v9682_v36 = vpop.eup %8261  ;;  %7997 = vmatprep.mubr.msk.f32.mxu0 %vm3213_vm2, %v9676_v63  ;;  %v1566_v11 = vpop.f32.mrf.mxu1 }
 0x31f   :  { %11120 = vst [vmem:[#allocation10_spill] sm:$0xff] %v9682_v36  ;;  %v9686_v19 = vpop.eup %8263  ;;  %7998 = vmatmul.mubr.msk.f32.vlgmr.msra.gmra.mxu0 %vm3213_vm2, %v9682_v36  ;;  %v3234_v28 = vpop.xlane.xlu1 %3233  ;;  %v3295_v13 = vsel %vm3213_vm2, %v9680_v17, -inf  ;;  %v9695_v45 = vadd.f32 %v9591_v54, %v1566_v11 }
 0x320   :  { %11121 = vst [vmem:[#allocation19_spill] sm:$0xff] %v9686_v19  ;;  %8008 = vmatpush3.msra.mxu0 %v11113_v38  ;;  %v3412_v35 = vsub.f32 %v9512_v27, %v3234_v28  ;;  %8011 = vmatprep.mubr.msk.f32.mxu0 %vm3213_vm2, %v9686_v19  ;;  %v9700_v48 = vpop.eup %8265  ;;  %v11125_v27 = vld [vmem:[#allocation30_spill] sm:$0xff] }
 0x321   :  { %8009 = vmatprep.subr.mxu0 %v11122_v24  ;;  %3296 = vmax.xlane.f32.xlu0 %v3295_v13  ;;  %11123 = vst [vmem:[#allocation45_spill] sm:$0xff] %v9700_v48  ;;  %v9705_v38 = vpop.eup %8267  ;;  %v3292_v11 = vsel %vm3213_vm2, %v9695_v45, -inf }
 0x322   :  { %v3482_v0 = vmul.f32 1.442695, %v3412_v35  ;;  %8010 = vmatpush3.msra.mxu0 %v11122_v24  ;;  %11124 = vst [vmem:[#allocation47_spill] sm:$0xff] %v9705_v38  ;;  %v11126_v35 = vld [vmem:[#allocation26_spill] sm:$0xff]  ;;  %v9723_v18 = vpop.eup %8269 }
 0x323   :  { %8021 = vmatprep.subr.mxu0 %v11125_v27  ;;  %8012 = vmatmul.mubr.msk.f32.vlgmr.msra.gmra.mxu0 %vm3213_vm2, %v9700_v48  ;;  %v3249_v7 = vpop.xlane.xlu1 %3248  ;;  %11127 = vst [vmem:[#allocation39_spill] sm:$0xff] %v9723_v18  ;;  %v11128_v48 = vld [vmem:[#allocation42_spill] sm:$0xff] }
 0x324   :  { %8271 = vpow2.f32 %v3482_v0  ;;  %8022 = vmatpush3.msra.mxu0 %v11125_v27  ;;  %8025 = vmatprep.mubr.msk.f32.mxu0 %vm3213_vm2, %v9705_v38  ;;  %v7866_v28 = vpop.f32.mrf.mxu1  ;;  %v3417_v13 = vsub.f32 %v9529_v5, %v3249_v7  ;;  %v2001_v0 = vpop.f32.mrf.mxu0 }
 0x325   :  { %8273 = vpow2.f32 %v3484_v42  ;;  %8023 = vmatprep.subr.mxu0 %v11126_v35  ;;  %3293 = vmax.xlane.f32.xlu0 %v3292_v11  ;;  %v9721_v24 = vadd.f32 %v7866_v28, %v9586_v56  ;;  %v9735_v56 = vadd.f32 %v9591_v54, %v1653_v58  ;;  %v9740_v11 = vld [vmem:[%s10958_s5 + $0x28] sm:$0xff] }
 0x326   :  { %8024 = vmatpush3.msra.mxu0 %v11126_v35  ;;  %v1740_v27 = vpop.f32.mrf.mxu1  ;;  %v9742_v28 = vpop.f32.mrf.mxu0  ;;  %v3492_v58 = vmul.f32 1.442695, %v3417_v13 }
 0x327   :  { %8035 = vmatprep.subr.mxu0 %v11128_v48  ;;  %8026 = vmatmul.mubr.msk.f32.vlgmr.msra.gmra.mxu0 %vm3213_vm2, %v9723_v18  ;;  %v3246_v42 = vpop.xlane.xlu1 %3245  ;;  %v9730_v5 = vadd.f32 %v9591_v54, %v1740_v27  ;;  %v3307_v7 = vsel %vm3213_vm2, %v9721_v24, -inf  ;;  %v3301_v27 = vsel %vm3213_vm2, %v9711_v46, -inf  ;;  %v9751_v54 = vld [vmem:[%s10958_s5 + $0x20] sm:$0xff]  ;;  %v3298_v13 = vsel %vm3213_vm2, %v9735_v56, -inf }
 0x328   :  { %8036 = vmatpush3.msra.mxu0 %v11128_v48  ;;  %v3416_v35 = vsub.f32 %v9538_v33, %v3246_v42  ;;  %3308 = vmax.xlane.f32.xlu1 %v3307_v7  ;;  %v9756_v48 = vadd.f32 %v7873_v20, %v9740_v11  ;;  %v9762_v7 = vadd.f32 %v9751_v54, %v1827_v62  ;;  %v2175_v36 = vpop.f32.mrf.mxu0 }
 0x329   :  { %8037 = vmatprep.subr.mxu0 %v9488_v3  ;;  %3302 = vmax.xlane.f32.xlu0 %v3301_v27  ;;  %v3304_v42 = vsel %vm3213_vm2, %v9730_v5, -inf  ;;  %v9770_v27 = vadd.f32 %v9751_v54, %v2001_v0 }
 0x32a   :  { %v3490_v18 = vmul.f32 1.442695, %v3416_v35  ;;  %8038 = vmatpush3.msra.mxu0 %v9488_v3  ;;  %v9767_v35 = vpop.f32.mrf.mxu0  ;;  %v3313_v62 = vsel %vm3213_vm2, %v9756_v48, -inf }
 0x32b   :  { %8049 = vmatprep.subr.mxu0 %v9475_v10  ;;  %v3261_v33 = vpop.xlane.xlu1 %3260 }
 0x32c   :  { %8275 = vpow2.f32 %v3490_v18  ;;  %3305 = vmax.xlane.f32.xlu1 %v3304_v42  ;;  %v3421_v3 = vsub.f32 %v9557_v49, %v3261_v33  ;;  %v7880_v20 = vpop.f32.mrf.mxu1 }
 0x32d   :  { %8277 = vpow2.f32 %v3492_v58  ;;  %3299 = vmax.xlane.f32.xlu0 %v3298_v13  ;;  %v9775_v18 = vadd.f32 %v7880_v20, %v9740_v11  ;;  %v3310_v58 = vsel %vm3213_vm2, %v9762_v7, -inf  ;;  %v2349_v13 = vpop.f32.mrf.mxu0  ;;  %v9787_v20 = vadd.f32 %v9751_v54, %v2175_v36  ;;  %v11131_v36 = vld [vmem:[#allocation20_spill] sm:$0xff] }
 0x32e   :  { %v3500_v33 = vmul.f32 1.442695, %v3421_v3  ;;  %v1914_v42 = vpop.f32.mrf.mxu1 }
 0x32f   :  { %v3258_v38 = vpop.xlane.xlu1 %3257  ;;  %v9796_v3 = vadd.f32 %v9751_v54, %v1914_v42 }
 0x330   :  { %v3420_v37 = vsub.f32 %v9564_v44, %v3258_v38  ;;  %3314 = vmax.xlane.f32.xlu1 %v3313_v62  ;;  %v3322_v44 = vsel %vm3213_vm2, %v9770_v27, -inf  ;;  %v9793_v38 = vpop.f32.mrf.mxu0  ;;  %v9804_v62 = vadd.f32 %v9751_v54, %v2349_v13 }
 0x331   :  { %v9780_v49 = vpop.eup %8271  ;;  %3311 = vmax.xlane.f32.xlu0 %v3310_v58  ;;  %v11132_v58 = vld [vmem:[#allocation40_spill] sm:$0xff]  ;;  %v3316_v13 = vsel %vm3213_vm2, %v9796_v3, -inf }
 0x332   :  { %11129 = vst [vmem:[#allocation24_spill] sm:$0xff] %v9780_v49  ;;  %v9782_v0 = vpop.eup %8273  ;;  %v3498_v19 = vmul.f32 1.442695, %v3420_v37  ;;  %8004 = vmatprep.mubr.msk.f32.mxu1 %vm3213_vm2, %v9780_v49  ;;  %v3319_v37 = vsel %vm3213_vm2, %v9775_v18, -inf  ;;  %v2523_v42 = vpop.f32.mrf.mxu0 }
 0x333   :  { %11130 = vst [vmem:[#allocation9_spill] sm:$0xff] %v9782_v0  ;;  %8005 = vmatmul.mubr.msk.f32.vlgmr.msra.gmra.mxu1 %vm3213_vm2, %v9782_v0 }
 0x334   :  { %8279 = vpow2.f32 %v3498_v19  ;;  %8015 = vmatpush3.msra.mxu1 %v11118_v4  ;;  %3323 = vmax.xlane.f32.xlu1 %v3322_v44  ;;  %v3334_v19 = vsel %vm3213_vm2, %v9787_v20, -inf  ;;  %v9811_v4 = vadd.f32 %v9702_v26, %v9740_v11 }
 0x335   :  { %8281 = vpow2.f32 %v3500_v33  ;;  %8016 = vmatprep.subr.mxu1 %v11131_v36  ;;  %3320 = vmax.xlane.f32.xlu0 %v3319_v37  ;;  %v9816_v33 = vld [vmem:[%s10958_s5 + $0x30] sm:$0xff]  ;;  %v7894_v37 = vpop.f32.mrf.mxu1 }
 0x336   :  { %8017 = vmatpush3.msra.mxu1 %v11131_v36  ;;  %v9827_v26 = vadd.f32 %v9816_v33, %v2523_v42  ;;  %v9834_v0 = vadd.f32 %v7894_v37, %v9740_v11 }
 0x337   :  { %8028 = vmatprep.subr.mxu1 %v11132_v58  ;;  %v2088_v49 = vpop.f32.mrf.mxu1 }
 0x338   :  { %3335 = vmax.xlane.f32.xlu1 %v3334_v19  ;;  %v3346_v19 = vsel %vm3213_vm2, %v9804_v62, -inf  ;;  %v9845_v37 = vadd.f32 %v9751_v54, %v2088_v49 }
 0x339   :  { %v9820_v44 = vpop.eup %8275  ;;  %3317 = vmax.xlane.f32.xlu0 %v3316_v13  ;;  %v3325_v13 = vsel %vm3213_vm2, %v9811_v4, -inf }
 0x33a   :  { %11133 = vst [vmem:[#allocation44_spill] sm:$0xff] %v9820_v44  ;;  %v9822_v36 = vpop.eup %8277  ;;  %8018 = vmatprep.mubr.msk.f32.mxu1 %vm3213_vm2, %v9820_v44  ;;  %v3331_v44 = vsel %vm3213_vm2, %v9834_v0, -inf }
 0x33b   :  { %11134 = vst [vmem:[#allocation41_spill] sm:$0xff] %v9822_v36  ;;  %8019 = vmatmul.mubr.msk.f32.vlgmr.msra.gmra.mxu1 %vm3213_vm2, %v9822_v36  ;;  %v3358_v36 = vsel %vm3213_vm2, %v9827_v26, -inf }
 0x33c   :  { %8029 = vmatpush3.msra.mxu1 %v11132_v58  ;;  %3347 = vmax.xlane.f32.xlu1 %v3346_v19  ;;  %v7908_v58 = vpop.f32.mrf.mxu1 }
 0x33d   :  { %8030 = vmatprep.subr.mxu1 %v9427_v47  ;;  %3326 = vmax.xlane.f32.xlu0 %v3325_v13 }
 0x33e   :  { %8031 = vmatpush3.msra.mxu1 %v9427_v47  ;;  %v3267_v42 = vpop.xlane.xlu0 %3266 }
 0x33f   :  { %8042 = vmatprep.subr.mxu1 %v9457_v23  ;;  %v3423_v19 = vsub.f32 %v9594_v22, %v3267_v42  ;;  %v9861_v22 = vadd.f32 %v9742_v28, %v9740_v11  ;;  %v9870_v28 = vadd.f32 %v7908_v58, %v9740_v11 }
 0x340   :  { %3359 = vmax.xlane.f32.xlu1 %v3358_v36  ;;  %v2262_v36 = vpop.f32.mrf.mxu1 }
 0x341   :  { %v9850_v63 = vpop.eup %8279  ;;  %3332 = vmax.xlane.f32.xlu0 %v3331_v44  ;;  %v3504_v49 = vmul.f32 1.442695, %v3423_v19  ;;  %v3328_v44 = vsel %vm3213_vm2, %v9845_v37, -inf }
 0x342   :  { %11135 = vst [vmem:[#allocation18_spill] sm:$0xff] %v9850_v63  ;;  %v9852_v47 = vpop.eup %8281  ;;  %8032 = vmatprep.mubr.msk.f32.mxu1 %vm3213_vm2, %v9850_v63  ;;  %v3264_v13 = vpop.xlane.xlu0 %3263 }
 0x343   :  { %11136 = vst [vmem:[#allocation8_spill] sm:$0xff] %v9852_v47  ;;  %v3422_v29 = vsub.f32 %v9597_v21, %v3264_v13  ;;  %8033 = vmatmul.mubr.msk.f32.vlgmr.msra.gmra.mxu1 %vm3213_vm2, %v9852_v47  ;;  %v7943_v13 = vpop.f32.mrf.mxu0  ;;  %v9894_v47 = vadd.f32 %v9767_v35, %v9740_v11 }
 0x344   :  { %8043 = vmatpush3.msra.mxu1 %v9457_v23  ;;  %v7922_v21 = vpop.f32.mrf.mxu1  ;;  %v3337_v23 = vsel %vm3213_vm2, %v9861_v22, -inf }
 0x345   :  { %v3502_v42 = vmul.f32 1.442695, %v3422_v29  ;;  %8044 = vmatprep.subr.mxu1 %v9492_v53  ;;  %3329 = vmax.xlane.f32.xlu0 %v3328_v44  ;;  %v9877_v29 = vld [vmem:[%s10958_s5 + $0x38] sm:$0xff]  ;;  %v3343_v44 = vsel %vm3213_vm2, %v9870_v28, -inf  ;;  %v3349_v63 = vsel %vm3213_vm2, %v9894_v47, -inf  ;;  %s8512_s5 = smov 8  }
 0x346   :  { %8045 = vmatpush3.msra.mxu1 %v9492_v53  ;;  %v2436_v19 = vpop.f32.mrf.mxu1  ;;  %v9880_v53 = vadd.f32 %v9751_v54, %v2262_v36 }
 0x347   :  { %8283 = vpow2.f32 %v3502_v42  ;;  %8056 = vmatprep.subr.mxu1 %v9509_v34  ;;  %v9888_v42 = vadd.f32 %v7943_v13, %v9877_v29  ;;  %v9903_v13 = vadd.f32 %v7922_v21, %v9740_v11  ;;  %v9915_v35 = vadd.f32 %v9751_v54, %v2436_v19 }
 0x348   :  { %8285 = vpow2.f32 %v3504_v49  ;;  %v3340_v36 = vsel %vm3213_vm2, %v9880_v53, -inf  ;;  %v9924_v21 = vadd.f32 %v9793_v38, %v9877_v29 }
 0x349   :  { %3338 = vmax.xlane.f32.xlu0 %v3337_v23  ;;  %11138 = vst [vmem:[#allocation26_spill] sm:$0xff] %v9903_v13  ;;  %v3355_v11 = vsel %vm3213_vm2, %v9903_v13, -inf  ;;  %v3352_v54 = vsel %vm3213_vm2, %v9915_v35, -inf  ;;  %v2697_v13 = vpop.f32.mrf.mxu0 }
 0x34c   :  { %v7936_v58 = vpop.f32.mrf.mxu1 }
 0x34d   :  { %3344 = vmax.xlane.f32.xlu0 %v3343_v44  ;;  %v9885_v49 = vadd.f32 %v7936_v58, %v9877_v29  ;;  %v3373_v44 = vsel %vm3213_vm2, %v9888_v42, -inf }
 0x34e   :  { %v2610_v19 = vpop.f32.mrf.mxu1 }
 0x34f   :  { %11137 = vst [vmem:[#allocation30_spill] sm:$0xff] %v9885_v49  ;;  %v3367_v23 = vsel %vm3213_vm2, %v9885_v49, -inf }
 0x350   :  { %3368 = vmax.xlane.f32.xlu1 %v3367_v23 }
 0x351   :  { %3341 = vmax.xlane.f32.xlu0 %v3340_v36 }
 0x354   :  { %v9900_v58 = vpop.eup %8283  ;;  %3374 = vmax.xlane.f32.xlu1 %v3373_v44 }
 0x355   :  { %v9907_v49 = vpop.eup %8285  ;;  %3350 = vmax.xlane.f32.xlu0 %v3349_v63  ;;  %8039 = vmatprep.mubr.msk.f32.mxu0 %vm3213_vm2, %v9900_v58 }
 0x356   :  { %8040 = vmatmul.mubr.msk.f32.vlgmr.msra.gmra.mxu0 %vm3213_vm2, %v9907_v49 }
 0x357   :  { %8050 = vmatpush3.msra.mxu0 %v9475_v10 }
 0x358   :  { %8051 = vmatprep.subr.mxu0 %v9505_v52 }
 0x359   :  { %8052 = vmatpush3.msra.mxu0 %v9505_v52  ;;  %3356 = vmax.xlane.f32.xlu0 %v3355_v11  ;;  %v9931_v52 = vadd.f32 %v9816_v33, %v2610_v19  ;;  %v3361_v11 = vsel %vm3213_vm2, %v9924_v21, -inf  ;;  %v7950_v19 = vpop.f32.mrf.mxu1 }
 0x35a   :  { %8063 = vmatprep.subr.mxu0 %v9533_v55  ;;  %v3273_v63 = vpop.xlane.xlu1 %3272 }
 0x35b   :  { %v3425_v10 = vsub.f32 %v9616_v41, %v3273_v63  ;;  %v9936_v41 = vadd.f32 %v9816_v33, %v2697_v13  ;;  %v3364_v63 = vsel %vm3213_vm2, %v9931_v52, -inf }
 0x35d   :  { %3353 = vmax.xlane.f32.xlu0 %v3352_v54  ;;  %v3508_v44 = vmul.f32 1.442695, %v3425_v10 }
 0x35e   :  { %v3270_v23 = vpop.xlane.xlu1 %3269 }
 0x35f   :  { %v3424_v36 = vsub.f32 %v9619_v2, %v3270_v23  ;;  %v3370_v2 = vsel %vm3213_vm2, %v9936_v41, -inf }
 0x361   :  { %v3506_v38 = vmul.f32 1.442695, %v3424_v36  ;;  %3362 = vmax.xlane.f32.xlu0 %v3361_v11 }
 0x363   :  { %8287 = vpow2.f32 %v3506_v38 }
 0x364   :  { %8289 = vpow2.f32 %v3508_v44  ;;  %v9965_v44 = vadd.f32 %v7950_v19, %v9877_v29 }
 0x365   :  { %3365 = vmax.xlane.f32.xlu0 %v3364_v63  ;;  %5008 = vrot.lane.b32.xlu1 %v9033_v15, %s8511_s15 }
 0x369   :  { %3371 = vmax.xlane.f32.xlu0 %v3370_v2  ;;  %5184 = vrot.lane.b32.xlu1 %v8793_v57, %s8511_s15 }
 0x370   :  { %v9946_v10 = vpop.eup %8287 }
 0x371   :  { %v9948_v54 = vpop.eup %8289  ;;  %8046 = vmatprep.mubr.msk.f32.mxu1 %vm3213_vm2, %v9946_v10 }
 0x372   :  { %8047 = vmatmul.mubr.msk.f32.vlgmr.msra.gmra.mxu1 %vm3213_vm2, %v9948_v54 }
 0x373   :  { %8057 = vmatpush3.msra.mxu1 %v9509_v34 }
 0x374   :  { %8058 = vmatprep.subr.mxu1 %v9526_v14 }
 0x375   :  { %8059 = vmatpush3.msra.mxu1 %v9526_v14 }
 0x376   :  { %8070 = vmatprep.subr.mxu1 %v9544_v30 }
 0x37f   :  { %4921 = vrot.lane.b32.xlu0 %v8873_v12, %s8511_s15 }
 0x380   :  { %v3279_v57 = vpop.xlane.xlu0 %3278 }
 0x381   :  { %v3427_v15 = vsub.f32 %v9626_v1, %v3279_v57  ;;  %v3379_v1 = vsel %vm3213_vm2, %v9965_v44, -inf }
 0x383   :  { %5097 = vrot.lane.b32.xlu0 %v9009_v51, %s8511_s15  ;;  %v3512_v34 = vmul.f32 1.442695, %v3427_v15 }
 0x384   :  { %v3276_v13 = vpop.xlane.xlu0 %3275 }
 0x385   :  { %v3426_v23 = vsub.f32 %v9629_v32, %v3276_v13 }
 0x387   :  { %v3510_v36 = vmul.f32 1.442695, %v3426_v23 }
 0x388   :  { %v3291_v14 = vpop.xlane.xlu0 %3290 }
 0x389   :  { %8291 = vpow2.f32 %v3510_v36  ;;  %v3431_v12 = vsub.f32 %v9636_v25, %v3291_v14  ;;  %v2784_v25 = vpop.f32.mrf.mxu1 }
 0x38a   :  { %8293 = vpow2.f32 %v3512_v34 }
 0x38b   :  { %v3520_v38 = vmul.f32 1.442695, %v3431_v12 }
 0x38c   :  { %v3288_v11 = vpop.xlane.xlu0 %3287 }
 0x38d   :  { %v3430_v51 = vsub.f32 %v9640_v39, %v3288_v11  ;;  %3380 = vmax.xlane.f32.xlu1 %v3379_v1  ;;  %v9984_v39 = vadd.f32 %v9816_v33, %v2784_v25  ;;  %v7957_v25 = vpop.f32.mrf.mxu0 }
 0x38f   :  { %v3518_v63 = vmul.f32 1.442695, %v3430_v51 }
 0x391   :  { %8295 = vpow2.f32 %v3518_v63 }
 0x392   :  { %8297 = vpow2.f32 %v3520_v38 }
 0x396   :  { %v9971_v32 = vpop.eup %8291 }
 0x397   :  { %v9973_v2 = vpop.eup %8293  ;;  %8053 = vmatprep.mubr.msk.f32.mxu0 %vm3213_vm2, %v9971_v32 }
 0x398   :  { %11139 = vst [vmem:[#allocation42_spill] sm:$0xff] %v9973_v2  ;;  %8054 = vmatmul.mubr.msk.f32.vlgmr.msra.gmra.mxu0 %vm3213_vm2, %v9973_v2 }
 0x399   :  { %8064 = vmatpush3.msra.mxu0 %v9533_v55 }
 0x39a   :  { %8065 = vmatprep.subr.mxu0 %v9548_v43 }
 0x39b   :  { %8066 = vmatpush3.msra.mxu0 %v9548_v43  ;;  %v3376_v43 = vsel %vm3213_vm2, %v9984_v39, -inf }
 0x39c   :  { %8077 = vmatprep.subr.mxu0 %v9571_v60 }
 0x39e   :  { %v9986_v57 = vpop.eup %8295  ;;  %5182 = vrot.lane.b32.xlu1 %v8863_v9, %s8511_s15 }
 0x39f   :  { %v9990_v15 = vpop.eup %8297  ;;  %8067 = vmatprep.mubr.msk.f32.mxu0 %vm3213_vm2, %v9986_v57 }
 0x3a0   :  { %11140 = vst [vmem:[#allocation20_spill] sm:$0xff] %v9990_v15  ;;  %8068 = vmatmul.mubr.msk.f32.vlgmr.msra.gmra.mxu0 %vm3213_vm2, %v9990_v15 }
 0x3a1   :  { %8078 = vmatpush3.msra.mxu0 %v9571_v60  ;;  %v3285_v55 = vpop.xlane.xlu1 %3284 }
 0x3a2   :  { %3377 = vmax.xlane.f32.xlu0 %v3376_v43  ;;  %5358 = vrot.lane.b32.xlu1 %v8966_v40, %s8511_s15  ;;  %v3429_v9 = vsub.f32 %v9665_v50, %v3285_v55  ;;  %v10029_v43 = vadd.f32 %v7957_v25, %v9877_v29  ;;  %v2871_v25 = vpop.f32.mrf.mxu0 }
 0x3a4   :  { %v3516_v23 = vmul.f32 1.442695, %v3429_v9  ;;  %11143 = vst [vmem:[#allocation50_spill] sm:$0xff] %v10029_v43 }
 0x3a5   :  { %v3282_v13 = vpop.xlane.xlu1 %3281 }
 0x3a6   :  { %v3428_v19 = vsub.f32 %v9670_v6, %v3282_v13 }
 0x3a8   :  { %v3514_v34 = vmul.f32 1.442695, %v3428_v19 }
 0x3aa   :  { %8299 = vpow2.f32 %v3514_v34  ;;  %v10003_v36 = vpop.xlane.xlu0 %3296 }
 0x3ab   :  { %8301 = vpow2.f32 %v3516_v23 }
 0x3ae   :  { %v3294_v60 = vpop.xlane.xlu0 %3293 }
 0x3af   :  { %v3432_v14 = vsub.f32 %v9695_v45, %v3294_v60 }
 0x3b1   :  { %v3522_v12 = vmul.f32 1.442695, %v3432_v14  ;;  %v10006_v11 = vpop.xlane.xlu1 %3308 }
 0x3b2   :  { %v3303_v1 = vpop.xlane.xlu0 %3302 }
 0x3b3   :  { %8303 = vpow2.f32 %v3522_v12  ;;  %v3435_v60 = vsub.f32 %v9711_v46, %v3303_v1 }
 0x3b5   :  { %v3306_v6 = vpop.xlane.xlu1 %3305 }
 0x3b6   :  { %v3300_v40 = vpop.xlane.xlu0 %3299 }
 0x3b7   :  { %v10008_v51 = vpop.eup %8299  ;;  %v3434_v50 = vsub.f32 %v9735_v56, %v3300_v40 }
 0x3b8   :  { %v10011_v38 = vpop.eup %8301  ;;  %5095 = vrot.lane.b32.xlu0 %v9023_v59, %s8511_s15  ;;  %8060 = vmatprep.mubr.msk.f32.mxu1 %vm3213_vm2, %v10008_v51 }
 0x3b9   :  { %11141 = vst [vmem:[#allocation40_spill] sm:$0xff] %v10011_v38  ;;  %v3526_v45 = vmul.f32 1.442695, %v3434_v50  ;;  %8061 = vmatmul.mubr.msk.f32.vlgmr.msra.gmra.mxu1 %vm3213_vm2, %v10011_v38  ;;  %v10022_v56 = vpop.xlane.xlu1 %3314  ;;  %v3528_v50 = vmul.f32 1.442695, %v3435_v60  ;;  %v10060_v38 = vadd.f32 %v9816_v33, %v2871_v25  ;;  %v3433_v25 = vsub.f32 %v9680_v17, %v10003_v36  ;;  %v11147_v36 = vld [vmem:[#allocation32_spill] sm:$0xff] }
 0x3ba   :  { %8071 = vmatpush3.msra.mxu1 %v9544_v30  ;;  %v3312_v63 = vpop.xlane.xlu0 %3311 }
 0x3bb   :  { %8305 = vpow2.f32 %v3526_v45  ;;  %v3438_v12 = vsub.f32 %v9762_v7, %v3312_v63  ;;  %v3382_v1 = vsel %vm3213_vm2, %v10060_v38, -inf }
 0x3bc   :  { %5271 = vrot.lane.b32.xlu0 %v8857_v8, %s8511_s15  ;;  %v3385_v8 = vsel %vm3213_vm2, %v10029_v43, -inf  ;;  %8307 = vpow2.f32 %v3528_v50 }
 0x3bd   :  { %v10035_v30 = vpop.xlane.xlu1 %3323 }
 0x3be   :  { %v10024_v55 = vpop.xlane.xlu0 %3320 }
 0x3c0   :  { %v10026_v59 = vpop.eup %8303 }
 0x3c1   :  { %11142 = vst [vmem:[#allocation49_spill] sm:$0xff] %v10026_v59  ;;  %8074 = vmatprep.mubr.msk.f32.mxu1 %vm3213_vm2, %v10026_v59  ;;  %v10043_v23 = vpop.xlane.xlu1 %3335 }
 0x3c2   :  { %v10033_v9 = vpop.xlane.xlu0 %3317 }
 0x3c5   :  { %v10053_v40 = vpop.xlane.xlu1 %3347 }
 0x3c6   :  { %v10039_v13 = vpop.xlane.xlu0 %3326  ;;  %3386 = vmax.xlane.f32.xlu1 %v3385_v8  ;;  %v3534_v8 = vmul.f32 1.442695, %v3438_v12 }
 0x3c8   :  { %v10041_v19 = vpop.eup %8305  ;;  %8309 = vpow2.f32 %v3534_v8 }
 0x3c9   :  { %11144 = vst [vmem:[#allocation51_spill] sm:$0xff] %v10041_v19  ;;  %8081 = vmatprep.mubr.msk.f32.mxu0 %vm3213_vm2, %v10041_v19  ;;  %v10057_v15 = vpop.xlane.xlu1 %3359 }
 0x3ca   :  { %v10047_v34 = vpop.xlane.xlu0 %3332 }
 0x3ce   :  { %v10050_v14 = vpop.xlane.xlu0 %3329 }
 0x3d2   :  { %v10055_v45 = vpop.xlane.xlu0 %3338 }
 0x3d6   :  { %v10062_v19 = vpop.xlane.xlu0 %3344 }
 0x3d7   :  { %5356 = vrot.lane.b32.xlu1 %v8943_v31, %s8511_s15  ;;  %v10080_v31 = vpop.eup %8307 }
 0x3d8   :  { %11146 = vst [vmem:[#allocation53_spill] sm:$0xff] %v10080_v31  ;;  %v10084_v8 = vpop.eup %8309 }
 0x3d9   :  { %v10066_v46 = vpop.xlane.xlu1 %3368 }
 0x3da   :  { %v10068_v7 = vpop.xlane.xlu0 %3341 }
 0x3db   :  { %3383 = vmax.xlane.f32.xlu0 %v3382_v1  ;;  %5532 = vrot.lane.b32.xlu1 %v8811_v61, %s8511_s15  ;;  %v3436_v1 = vsub.f32 %v9730_v5, %v3306_v6 }
 0x3dd   :  { %v10074_v63 = vpop.xlane.xlu1 %3374  ;;  %v3530_v59 = vmul.f32 1.442695, %v3436_v1 }
 0x3de   :  { %v10076_v60 = vpop.xlane.xlu0 %3350 }
 0x3e1   :  { %v5009_v12 = vpop.permute.xlu1 %5008 }
 0x3e2   :  { %v10078_v50 = vpop.xlane.xlu0 %3356  ;;  %8079 = vmatprep.subr.mxu0 %v5009_v12 }
 0x3e3   :  { %11145 = vst [vmem:[#allocation52_spill] sm:$0xff] %v10078_v50  ;;  %8080 = vmatpush3.msra.mxu0 %v5009_v12  ;;  %v3524_v50 = vmul.f32 1.442695, %v3433_v25  ;;  %v7964_v12 = vpop.f32.mrf.mxu1 }
 0x3e4   :  { %8082 = vmatmul.mubr.msk.f32.vlgmr.msra.gmra.mxu0 %vm3213_vm2, %v10080_v31 }
 0x3e5   :  { %8095 = vmatprep.mubr.msk.f32.mxu0 %vm3213_vm2, %v10084_v8  ;;  %v5185_v61 = vpop.permute.xlu1 %5184  ;;  %8311 = vpow2.f32 %v3524_v50  ;;  %v2958_v31 = vpop.f32.mrf.mxu1 }
 0x3e6   :  { %v10091_v43 = vpop.xlane.xlu0 %3353  ;;  %8091 = vmatprep.subr.mxu0 %v5185_v61  ;;  %8313 = vpow2.f32 %v3530_v59  ;;  %v10110_v59 = vadd.f32 %v7964_v12, %v9877_v29 }
 0x3e7   :  { %8092 = vmatpush3.msra.mxu0 %v5185_v61  ;;  %v3439_v61 = vsub.f32 %v9756_v48, %v10022_v56  ;;  %v11150_v48 = vld [vmem:[#allocation25_spill] sm:$0xff] }
 0x3e8   :  { %v3391_v50 = vsel %vm3213_vm2, %v10110_v59, -inf }
 0x3ea   :  { %v10093_v2 = vpop.xlane.xlu0 %3362 }
 0x3ee   :  { %v10095_v17 = vpop.xlane.xlu0 %3365 }
 0x3f1   :  { %5269 = vrot.lane.b32.xlu0 %v8885_v16, %s8511_s15 }
 0x3f2   :  { %v10099_v5 = vpop.xlane.xlu0 %3371  ;;  %v10103_v25 = vpop.eup %8311 }
 0x3f3   :  { %11148 = vst [vmem:[#allocation32_spill] sm:$0xff] %v10103_v25  ;;  %v10105_v1 = vpop.eup %8313 }
 0x3f5   :  { %5445 = vrot.lane.b32.xlu0 %v11147_v36, %s8511_s15  ;;  %v3442_v36 = vsub.f32 %v9770_v27, %v10035_v30 }
 0x3f6   :  { %v4922_v6 = vpop.permute.xlu0 %4921 }
 0x3f7   :  { %8072 = vmatprep.subr.mxu1 %v4922_v6  ;;  %v3542_v12 = vmul.f32 1.442695, %v3442_v36  ;;  %v3440_v36 = vsub.f32 %v9796_v3, %v10033_v9  ;;  %v11152_v3 = vld [vmem:[#allocation12_spill] sm:$0xff] }
 0x3f8   :  { %8073 = vmatpush3.msra.mxu1 %v4922_v6  ;;  %v3536_v6 = vmul.f32 1.442695, %v3439_v61 }
 0x3f9   :  { %8075 = vmatmul.mubr.msk.f32.vlgmr.msra.gmra.mxu1 %vm3213_vm2, %v10103_v25  ;;  %v10121_v25 = vadd.f32 %v9816_v33, %v2958_v31  ;;  %v3437_v31 = vsub.f32 %v9721_v24, %v10006_v11  ;;  %v11151_v24 = vld [vmem:[#allocation31_spill] sm:$0xff] }
 0x3fa   :  { %8088 = vmatprep.mubr.msk.f32.mxu1 %vm3213_vm2, %v10105_v1  ;;  %v5098_v16 = vpop.permute.xlu0 %5097  ;;  %8315 = vpow2.f32 %v3536_v6 }
 0x3fb   :  { %8084 = vmatprep.subr.mxu1 %v5098_v16  ;;  %8317 = vpow2.f32 %v3542_v12  ;;  %v3532_v12 = vmul.f32 1.442695, %v3437_v31 }
 0x3fc   :  { %8085 = vmatpush3.msra.mxu1 %v5098_v16  ;;  %v11149_v16 = vld [vmem:[#allocation3_spill] sm:$0xff] }
 0x3fd   :  { %8319 = vpow2.f32 %v3532_v12  ;;  %v3443_v12 = vsub.f32 %v9811_v4, %v10039_v13  ;;  %v11154_v4 = vld [vmem:[#allocation4_spill] sm:$0xff] }
 0x3ff   :  { %3392 = vmax.xlane.f32.xlu1 %v3391_v50  ;;  %v3388_v50 = vsel %vm3213_vm2, %v10121_v25, -inf }
 0x407   :  { %v10131_v30 = vpop.eup %8315 }
 0x408   :  { %v10135_v61 = vpop.eup %8317 }
 0x410   :  { %5530 = vrot.lane.b32.xlu1 %v11149_v16, %s8511_s15  ;;  %v3538_v16 = vmul.f32 1.442695, %v3440_v36 }
 0x412   :  { %8321 = vpow2.f32 %v3538_v16  ;;  %v3446_v16 = vsub.f32 %v9787_v20, %v10043_v23 }
 0x414   :  { %3389 = vmax.xlane.f32.xlu0 %v3388_v50  ;;  %5706 = vrot.lane.b32.xlu1 %v11150_v48, %s8511_s15  ;;  %v7971_v50 = vpop.f32.mrf.mxu0  ;;  %v10149_v48 = vpop.eup %8319 }
 0x415   :  { %v10156_v31 = vadd.f32 %v7971_v50, %v9877_v29 }
 0x416   :  { %v10129_v56 = vpop.xlane.xlu1 %3380 }
 0x41a   :  { %v5183_v27 = vpop.permute.xlu1 %5182 }
 0x41b   :  { %8093 = vmatprep.subr.mxu0 %v5183_v27 }
 0x41c   :  { %8094 = vmatpush3.msra.mxu0 %v5183_v27 }
 0x41d   :  { %8096 = vmatmul.mubr.msk.f32.vlgmr.msra.gmra.mxu0 %vm3213_vm2, %v10131_v30 }
 0x41e   :  { %8109 = vmatprep.mubr.msk.f32.mxu0 %vm3213_vm2, %v10135_v61  ;;  %v5359_v6 = vpop.permute.xlu1 %5358 }
 0x41f   :  { %8105 = vmatprep.subr.mxu0 %v5359_v6  ;;  %v10151_v27 = vpop.eup %8321 }
 0x420   :  { %8106 = vmatpush3.msra.mxu0 %v5359_v6  ;;  %v3397_v6 = vsel %vm3213_vm2, %v10156_v31, -inf }
 0x42a   :  { %5443 = vrot.lane.b32.xlu0 %v11151_v24, %s8511_s15  ;;  %v3544_v24 = vmul.f32 1.442695, %v3443_v12  ;;  %v3441_v12 = vsub.f32 %v9775_v18, %v10024_v55  ;;  %v11155_v18 = vld [vmem:[#allocation13_spill] sm:$0xff] }
 0x42b   :  { %v10145_v11 = vpop.xlane.xlu0 %3377 }
 0x42c   :  { %8323 = vpow2.f32 %v3544_v24  ;;  %v3444_v24 = vsub.f32 %v9845_v37, %v10050_v14  ;;  %v11156_v37 = vld [vmem:[#allocation35_spill] sm:$0xff] }
 0x42e   :  { %5619 = vrot.lane.b32.xlu0 %v11152_v3, %s8511_s15  ;;  %v3045_v3 = vpop.f32.mrf.mxu0 }
 0x42f   :  { %v5096_v9 = vpop.permute.xlu0 %5095  ;;  %v10167_v50 = vadd.f32 %v9816_v33, %v3045_v3 }
 0x430   :  { %8086 = vmatprep.subr.mxu1 %v5096_v9 }
 0x431   :  { %8087 = vmatpush3.msra.mxu1 %v5096_v9  ;;  %v3550_v9 = vmul.f32 1.442695, %v3446_v16 }
 0x432   :  { %8089 = vmatmul.mubr.msk.f32.vlgmr.msra.gmra.mxu1 %vm3213_vm2, %v10149_v48 }
 0x433   :  { %8102 = vmatprep.mubr.msk.f32.mxu1 %vm3213_vm2, %v10151_v27  ;;  %v5272_v36 = vpop.permute.xlu0 %5271  ;;  %8325 = vpow2.f32 %v3550_v9  ;;  %v3540_v9 = vmul.f32 1.442695, %v3441_v12 }
 0x434   :  { %8098 = vmatprep.subr.mxu1 %v5272_v36 }
 0x435   :  { %8099 = vmatpush3.msra.mxu1 %v5272_v36  ;;  %v11153_v36 = vld [vmem:[#allocation21_spill] sm:$0xff]  ;;  %8327 = vpow2.f32 %v3540_v9  ;;  %v3447_v9 = vsub.f32 %v9861_v22, %v10055_v45  ;;  %v11158_v22 = vld [vmem:[#allocation15_spill] sm:$0xff] }
 0x438   :  { %3398 = vmax.xlane.f32.xlu1 %v3397_v6  ;;  %v3394_v6 = vsel %vm3213_vm2, %v10167_v50, -inf }
 0x439   :  { %v10177_v23 = vpop.eup %8323 }
 0x440   :  { %v10181_v16 = vpop.eup %8325 }
 0x449   :  { %5704 = vrot.lane.b32.xlu1 %v11153_v36, %s8511_s15  ;;  %v3546_v36 = vmul.f32 1.442695, %v3444_v24 }
 0x44b   :  { %8329 = vpow2.f32 %v3546_v36  ;;  %v3450_v36 = vsub.f32 %v9804_v62, %v10053_v40  ;;  %v11159_v62 = vld [vmem:[#allocation22_spill] sm:$0xff] }
 0x44d   :  { %3395 = vmax.xlane.f32.xlu0 %v3394_v6  ;;  %5880 = vrot.lane.b32.xlu1 %v11154_v4, %s8511_s15  ;;  %v7978_v6 = vpop.f32.mrf.mxu1  ;;  %v10195_v4 = vpop.eup %8327 }
 0x44e   :  { %v10202_v12 = vadd.f32 %v7978_v6, %v9877_v29  ;;  %v3558_v29 = vmul.f32 1.442695, %v3450_v36  ;;  %v11157_v6 = vld [vmem:[#allocation5_spill] sm:$0xff] }
 0x44f   :  { %v10175_v13 = vpop.xlane.xlu1 %3386 }
 0x453   :  { %v5357_v20 = vpop.permute.xlu1 %5356 }
 0x454   :  { %8107 = vmatprep.subr.mxu0 %v5357_v20 }
 0x455   :  { %8108 = vmatpush3.msra.mxu0 %v5357_v20 }
 0x456   :  { %8110 = vmatmul.mubr.msk.f32.vlgmr.msra.gmra.mxu0 %vm3213_vm2, %v10177_v23 }
 0x457   :  { %8123 = vmatprep.mubr.msk.f32.mxu0 %vm3213_vm2, %v10181_v16  ;;  %v5533_v3 = vpop.permute.xlu1 %5532 }
 0x458   :  { %8119 = vmatprep.subr.mxu0 %v5533_v3  ;;  %v10197_v20 = vpop.eup %8329 }
 0x459   :  { %8120 = vmatpush3.msra.mxu0 %v5533_v3  ;;  %v3403_v3 = vsel %vm3213_vm2, %v10202_v12, -inf }
 0x463   :  { %5617 = vrot.lane.b32.xlu0 %v11155_v18, %s8511_s15  ;;  %v3552_v18 = vmul.f32 1.442695, %v3447_v9  ;;  %v11160_v9 = vld [vmem:[#allocation34_spill] sm:$0xff] }
 0x464   :  { %v10191_v55 = vpop.xlane.xlu0 %3383 }
 0x465   :  { %8331 = vpow2.f32 %v3552_v18  ;;  %v3448_v18 = vsub.f32 %v9880_v53, %v10068_v7  ;;  %v11163_v53 = vld [vmem:[#allocation23_spill] sm:$0xff]  ;;  %v11164_v7 = vld [vmem:[#allocation33_spill] sm:$0xff] }
 0x466   :  { %8333 = vpow2.f32 %v3558_v29 }
 0x467   :  { %5793 = vrot.lane.b32.xlu0 %v11156_v37, %s8511_s15  ;;  %v3132_v37 = vpop.f32.mrf.mxu1 }
 0x468   :  { %v5270_v14 = vpop.permute.xlu0 %5269 }
 0x469   :  { %8100 = vmatprep.subr.mxu1 %v5270_v14 }
 0x46a   :  { %8101 = vmatpush3.msra.mxu1 %v5270_v14  ;;  %v10213_v14 = vadd.f32 %v9816_v33, %v3132_v37 }
 0x46b   :  { %8103 = vmatmul.mubr.msk.f32.vlgmr.msra.gmra.mxu1 %vm3213_vm2, %v10195_v4 }
 0x46c   :  { %8116 = vmatprep.mubr.msk.f32.mxu1 %vm3213_vm2, %v10197_v20  ;;  %v5446_v24 = vpop.permute.xlu0 %5445 }
 0x46d   :  { %8112 = vmatprep.subr.mxu1 %v5446_v24 }
 0x46e   :  { %8113 = vmatpush3.msra.mxu1 %v5446_v24  ;;  %v3400_v24 = vsel %vm3213_vm2, %v10213_v14, -inf }
 0x471   :  { %3404 = vmax.xlane.f32.xlu1 %v3403_v3  ;;  %v3445_v3 = vsub.f32 %v9834_v0, %v10047_v34  ;;  %v11161_v0 = vld [vmem:[#allocation7_spill] sm:$0xff]  ;;  %v3554_v34 = vmul.f32 1.442695, %v3448_v18 }
 0x472   :  { %v10225_v33 = vpop.eup %8331  ;;  %v11167_v18 = vld [vmem:[#allocation27_spill] sm:$0xff] }
 0x473   :  { %v10231_v36 = vpop.eup %8333  ;;  %v3548_v29 = vmul.f32 1.442695, %v3445_v3 }
 0x475   :  { %8335 = vpow2.f32 %v3548_v29  ;;  %v11168_v29 = vld [vmem:[#allocation37_spill] sm:$0xff] }
 0x476   :  { %8337 = vpow2.f32 %v3554_v34  ;;  %v3454_v34 = vsub.f32 %v9827_v26, %v10057_v15 }
 0x482   :  { %5878 = vrot.lane.b32.xlu1 %v11157_v6, %s8511_s15  ;;  %v11162_v6 = vld [vmem:[#allocation17_spill] sm:$0xff]  ;;  %v10253_v3 = vpop.eup %8335 }
 0x486   :  { %3401 = vmax.xlane.f32.xlu0 %v3400_v24  ;;  %5965 = vrot.lane.b32.xlu1 %v11158_v22, %s8511_s15  ;;  %v11165_v22 = vld [vmem:[#allocation36_spill] sm:$0xff] }
 0x488   :  { %v10221_v45 = vpop.xlane.xlu1 %3392 }
 0x48a   :  { %6052 = vrot.lane.b32.xlu1 %v11159_v62, %s8511_s15  ;;  %v11166_v62 = vld [vmem:[#allocation14_spill] sm:$0xff] }
 0x48c   :  { %v5531_v40 = vpop.permute.xlu1 %5530 }
 0x48d   :  { %8121 = vmatprep.subr.mxu0 %v5531_v40 }
 0x48e   :  { %8122 = vmatpush3.msra.mxu0 %v5531_v40  ;;  %6139 = vrot.lane.b32.xlu1 %v11160_v9, %s8511_s15  ;;  %v10255_v9 = vpop.eup %8337 }
 0x48f   :  { %8124 = vmatmul.mubr.msk.f32.vlgmr.msra.gmra.mxu0 %vm3213_vm2, %v10225_v33 }
 0x490   :  { %8137 = vmatprep.mubr.msk.f32.mxu0 %vm3213_vm2, %v10231_v36  ;;  %v5707_v37 = vpop.permute.xlu1 %5706 }
 0x491   :  { %8133 = vmatprep.subr.mxu0 %v5707_v37 }
 0x492   :  { %8134 = vmatpush3.msra.mxu0 %v5707_v37  ;;  %6226 = vrot.lane.b32.xlu1 %v11161_v0, %s8511_s15  ;;  %v11169_v0 = vld [vmem:[#allocation6_spill] sm:$0xff] }
 0x496   :  { %6313 = vrot.lane.b32.xlu1 %v11162_v6, %s8511_s15  ;;  %v11170_v6 = vld [vmem:[#allocation16_spill] sm:$0xff] }
 0x49a   :  { %6400 = vrot.lane.b32.xlu1 %v11163_v53, %s8511_s15  ;;  %v3566_v53 = vmul.f32 1.442695, %v3454_v34 }
 0x49c   :  { %5791 = vrot.lane.b32.xlu0 %v11164_v7, %s8511_s15  ;;  %v3451_v7 = vsub.f32 %v9894_v47, %v10076_v60  ;;  %8339 = vpow2.f32 %v3566_v53  ;;  %v3458_v60 = vsub.f32 %v9936_v41, %v10099_v5  ;;  %v3652_v5 = vsel %vm3213_vm2, %v9946_v10, 0.0 }
 0x49d   :  { %v10247_v24 = vpop.xlane.xlu0 %3389  ;;  %v3460_v10 = vsub.f32 %v9984_v39, %v10145_v11  ;;  %v3706_v39 = vsel %vm3213_vm2, %v10135_v61, 0.0 }
 0x49e   :  { %6487 = vrot.lane.b32.xlu1 %v11165_v22, %s8511_s15  ;;  %v11171_v22 = vld [vmem:[#allocation28_spill] sm:$0xff] }
 0x4a0   :  { %5967 = vrot.lane.b32.xlu0 %v11166_v62, %s8511_s15  ;;  %v3560_v62 = vmul.f32 1.442695, %v3451_v7  ;;  %v3658_v7 = vsel %vm3213_vm2, %v9971_v32, 0.0  ;;  %v3694_v32 = vsel %vm3213_vm2, %v10084_v8, 0.0 }
 0x4a1   :  { %v5444_v40 = vpop.permute.xlu0 %5443 }
 0x4a2   :  { %8114 = vmatprep.subr.mxu1 %v5444_v40  ;;  %8341 = vpow2.f32 %v3560_v62 }
 0x4a3   :  { %8115 = vmatpush3.msra.mxu1 %v5444_v40  ;;  %v11172_v40 = vld [vmem:[#allocation38_spill] sm:$0xff] }
 0x4a4   :  { %8117 = vmatmul.mubr.msk.f32.vlgmr.msra.gmra.mxu1 %vm3213_vm2, %v10253_v3  ;;  %6054 = vrot.lane.b32.xlu0 %v11167_v18, %s8511_s15  ;;  %v3456_v18 = vsub.f32 %v9931_v52, %v10095_v17  ;;  %v3449_v52 = vsub.f32 %v9870_v28, %v10062_v19  ;;  %v3452_v17 = vsub.f32 %v9915_v35, %v10091_v43  ;;  %v3700_v35 = vsel %vm3213_vm2, %v10151_v27, 0.0  ;;  %v11173_v27 = vld [vmem:[#allocation30_spill] sm:$0xff] }
 0x4a5   :  { %8130 = vmatprep.mubr.msk.f32.mxu1 %vm3213_vm2, %v10255_v9  ;;  %v5620_v37 = vpop.permute.xlu0 %5619 }
 0x4a6   :  { %8126 = vmatprep.subr.mxu1 %v5620_v37  ;;  %v3570_v26 = vmul.f32 1.442695, %v3456_v18  ;;  %v3556_v28 = vmul.f32 1.442695, %v3449_v52  ;;  %v3562_v19 = vmul.f32 1.442695, %v3452_v17 }
 0x4a7   :  { %8127 = vmatpush3.msra.mxu1 %v5620_v37  ;;  %v3649_v37 = vsel %vm3213_vm2, %v9907_v49, 0.0  ;;  %v3574_v49 = vmul.f32 1.442695, %v3458_v60  ;;  %v3712_v52 = vsel %vm3213_vm2, %v10197_v20, 0.0 }
 0x4a8   :  { %6141 = vrot.lane.b32.xlu0 %v11168_v29, %s8511_s15  ;;  %8343 = vpow2.f32 %v3570_v26 }
 0x4a9   :  { %v8340_v47 = vpop.eup %8339  ;;  %8345 = vpow2.f32 %v3574_v49  ;;  %v3655_v49 = vsel %vm3213_vm2, %v9948_v54, 0.0  ;;  %v3461_v54 = vsub.f32 %v9965_v44, %v10129_v56  ;;  %v3709_v56 = vsel %vm3213_vm2, %v10177_v23, 0.0 }
 0x4aa   :  { %8347 = vpow2.f32 %v3556_v28  ;;  %v11174_v28 = vld [vmem:[#allocation42_spill] sm:$0xff]  ;;  %v3724_v23 = vsel %vm3213_vm2, %v10255_v9, 0.0  ;;  %v3715_v9 = vsel %vm3213_vm2, %v10253_v3, 0.0 }
 0x4ab   :  { %8349 = vpow2.f32 %v3562_v19  ;;  %v3661_v19 = vsel %vm3213_vm2, %v11174_v28, 0.0 }
 0x4ac   :  { %6228 = vrot.lane.b32.xlu0 %v11169_v0, %s8511_s15  ;;  %v3742_v0 = vsel %vm3213_vm2, %v8340_v47, 0.0 }
 0x4af   :  { %v10286_v34 = vpop.eup %8341 }
 0x4b0   :  { %6315 = vrot.lane.b32.xlu0 %v11170_v6, %s8511_s15  ;;  %v3455_v6 = vsub.f32 %v9924_v21, %v10093_v2  ;;  %v3578_v2 = vmul.f32 1.442695, %v3460_v10 }
 0x4b2   :  { %v3568_v53 = vmul.f32 1.442695, %v3455_v6  ;;  %v3580_v6 = vmul.f32 1.442695, %v3461_v54 }
 0x4b4   :  { %6402 = vrot.lane.b32.xlu0 %v11171_v22, %s8511_s15  ;;  %8351 = vpow2.f32 %v3568_v53  ;;  %v3457_v22 = vsub.f32 %v11173_v27, %v10066_v46  ;;  %v11175_v53 = vld [vmem:[#allocation49_spill] sm:$0xff] }
 0x4b5   :  { %v10301_v43 = vpop.eup %8343  ;;  %8353 = vpow2.f32 %v3578_v2  ;;  %v3676_v10 = vsel %vm3213_vm2, %v11175_v53, 0.0 }
 0x4b6   :  { %v3748_v21 = vsel %vm3213_vm2, %v10301_v43, 0.0  ;;  %v10317_v11 = vpop.eup %8345  ;;  %v3572_v18 = vmul.f32 1.442695, %v3457_v22 }
 0x4b7   :  { %v10321_v46 = vpop.eup %8347  ;;  %v3754_v61 = vsel %vm3213_vm2, %v10317_v11, 0.0 }
 0x4b8   :  { %6489 = vrot.lane.b32.xlu0 %v11172_v40, %s8511_s15  ;;  %v3646_v40 = vsel %vm3213_vm2, %v9900_v58, 0.0  ;;  %v3462_v58 = vsub.f32 %v10060_v38, %v10191_v55  ;;  %8355 = vpow2.f32 %v3572_v18  ;;  %v3664_v55 = vsel %vm3213_vm2, %v10008_v51, 0.0  ;;  %v11179_v18 = vld [vmem:[#allocation26_spill] sm:$0xff] }
 0x4b9   :  { %v3464_v51 = vsub.f32 %v10121_v25, %v10247_v24  ;;  %v3718_v24 = vsel %vm3213_vm2, %v10181_v16, 0.0 }
 0x4ba   :  { %v3582_v38 = vmul.f32 1.442695, %v3462_v58 }
 0x4bc   :  { %8357 = vpow2.f32 %v3582_v38 }
 0x4c1   :  { %v10279_v15 = vpop.xlane.xlu1 %3398 }
 0x4c2   :  { %3650 = vadd.xlane.f32.xlu1 %v3649_v37  ;;  %v10323_v37 = vpop.eup %8349 }
 0x4c3   :  { %v8352_v60 = vpop.eup %8351 }
 0x4c5   :  { %v5705_v29 = vpop.permute.xlu1 %5704 }
 0x4c6   :  { %8135 = vmatprep.subr.mxu0 %v5705_v29  ;;  %3743 = vadd.xlane.f32.xlu1 %v3742_v0  ;;  %v3745_v0 = vsel %vm3213_vm2, %v8352_v60, 0.0 }
 0x4c7   :  { %8136 = vmatpush3.msra.mxu0 %v5705_v29  ;;  %v3459_v29 = vsub.f32 %v9888_v42, %v10074_v63  ;;  %v3703_v63 = vsel %vm3213_vm2, %v10195_v4, 0.0 }
 0x4c8   :  { %8138 = vmatmul.mubr.msk.f32.vlgmr.msra.gmra.mxu0 %vm3213_vm2, %v10286_v34 }
 0x4c9   :  { %8151 = vmatprep.mubr.msk.f32.mxu0 %vm3213_vm2, %v8340_v47  ;;  %v5881_v41 = vpop.permute.xlu1 %5880  ;;  %v3697_v47 = vsel %vm3213_vm2, %v10131_v30, 0.0  ;;  %v10342_v30 = vpop.eup %8353  ;;  %v3576_v17 = vmul.f32 1.442695, %v3459_v29  ;;  %v11181_v29 = vld [vmem:[#allocation20_spill] sm:$0xff] }
 0x4ca   :  { %8147 = vmatprep.subr.mxu0 %v5881_v41  ;;  %3653 = vadd.xlane.f32.xlu1 %v3652_v5  ;;  %v3760_v42 = vsel %vm3213_vm2, %v10342_v30, 0.0  ;;  %v10352_v20 = vpop.eup %8355  ;;  %v3670_v5 = vsel %vm3213_vm2, %v9986_v57, 0.0 }
 0x4cb   :  { %8148 = vmatpush3.msra.mxu0 %v5881_v41  ;;  %8359 = vpow2.f32 %v3576_v17  ;;  %v3586_v41 = vmul.f32 1.442695, %v3464_v51  ;;  %v3751_v25 = vsel %vm3213_vm2, %v10352_v20, 0.0  ;;  %v10362_v4 = vpop.eup %8357  ;;  %v3688_v51 = vsel %vm3213_vm2, %v10105_v1, 0.0 }
 0x4cc   :  { %v3766_v57 = vsel %vm3213_vm2, %v10362_v4, 0.0 }
 0x4cd   :  { %8361 = vpow2.f32 %v3586_v41 }
 0x4ce   :  { %3701 = vadd.xlane.f32.xlu1 %v3700_v35  ;;  %8363 = vpow2.f32 %v3580_v6 }
 0x4d2   :  { %3749 = vadd.xlane.f32.xlu1 %v3748_v21  ;;  %v11176_v21 = vld [vmem:[#allocation50_spill] sm:$0xff] }
 0x4d3   :  { %v3463_v2 = vsub.f32 %v11176_v21, %v10175_v13  ;;  %v11178_v13 = vld [vmem:[#allocation52_spill] sm:$0xff] }
 0x4d5   :  { %v3584_v22 = vmul.f32 1.442695, %v3463_v2 }
 0x4d6   :  { %v10311_v62 = vpop.xlane.xlu0 %3395  ;;  %3659 = vadd.xlane.f32.xlu1 %v3658_v7 }
 0x4d7   :  { %3647 = vadd.xlane.f32.xlu0 %v3646_v40  ;;  %v3466_v44 = vsub.f32 %v10167_v50, %v10311_v62  ;;  %v11177_v40 = vld [vmem:[#allocation40_spill] sm:$0xff] }
 0x4d8   :  { %v10372_v16 = vpop.eup %8359 }
 0x4d9   :  { %v3590_v35 = vmul.f32 1.442695, %v3466_v44  ;;  %v3757_v7 = vsel %vm3213_vm2, %v10372_v16, 0.0 }
 0x4da   :  { %v5618_v26 = vpop.permute.xlu0 %5617  ;;  %3707 = vadd.xlane.f32.xlu1 %v3706_v39  ;;  %v10384_v27 = vpop.eup %8361  ;;  %v3667_v39 = vsel %vm3213_vm2, %v11177_v40, 0.0 }
 0x4db   :  { %8128 = vmatprep.subr.mxu1 %v5618_v26  ;;  %3695 = vadd.xlane.f32.xlu0 %v3694_v32  ;;  %8365 = vpow2.f32 %v3590_v35  ;;  %v3772_v32 = vsel %vm3213_vm2, %v10384_v27, 0.0  ;;  %v10397_v58 = vpop.eup %8363 }
 0x4dc   :  { %8129 = vmatpush3.msra.mxu1 %v5618_v26  ;;  %v3453_v26 = vsub.f32 %v11179_v18, %v11178_v13  ;;  %8367 = vpow2.f32 %v3584_v22  ;;  %v3763_v38 = vsel %vm3213_vm2, %v10397_v58, 0.0  ;;  %v3691_v22 = vsel %vm3213_vm2, %v10149_v48, 0.0 }
 0x4dd   :  { %8131 = vmatmul.mubr.msk.f32.vlgmr.msra.gmra.mxu1 %vm3213_vm2, %v10321_v46 }
 0x4de   :  { %8144 = vmatprep.mubr.msk.f32.mxu1 %vm3213_vm2, %v10323_v37  ;;  %v5794_v8 = vpop.permute.xlu0 %5793  ;;  %3755 = vadd.xlane.f32.xlu1 %v3754_v61  ;;  %v3564_v61 = vmul.f32 1.442695, %v3453_v26  ;;  %v11187_v26 = vld [vmem:[#allocation24_spill] sm:$0xff] }
 0x4df   :  { %8140 = vmatprep.subr.mxu1 %v5794_v8  ;;  %3698 = vadd.xlane.f32.xlu0 %v3697_v47 }
 0x4e0   :  { %8141 = vmatpush3.msra.mxu1 %v5794_v8  ;;  %v11180_v8 = vld [vmem:[#allocation51_spill] sm:$0xff]  ;;  %8369 = vpow2.f32 %v3564_v61 }
 0x4e1   :  { %v3682_v47 = vsel %vm3213_vm2, %v11180_v8, 0.0  ;;  %v10480_v8 = vpop.f32.mrf.mxu0 }
 0x4e2   :  { %3665 = vadd.xlane.f32.xlu1 %v3664_v55 }
 0x4e3   :  { %3746 = vadd.xlane.f32.xlu0 %v3745_v0  ;;  %v3673_v0 = vsel %vm3213_vm2, %v11181_v29, 0.0 }
 0x4e6   :  { %3713 = vadd.xlane.f32.xlu1 %v3712_v52 }
 0x4e7   :  { %3656 = vadd.xlane.f32.xlu0 %v3655_v49 }
 0x4e8   :  { %v10407_v3 = vpop.eup %8365 }
 0x4e9   :  { %v10415_v17 = vpop.eup %8367 }
 0x4ea   :  { %3761 = vadd.xlane.f32.xlu1 %v3760_v42  ;;  %v3467_v42 = vsub.f32 %v10156_v31, %v10279_v15  ;;  %v3769_v41 = vsel %vm3213_vm2, %v10415_v17, 0.0  ;;  %v11182_v31 = vld [vmem:[#allocation32_spill] sm:$0xff] }
 0x4eb   :  { %3704 = vadd.xlane.f32.xlu0 %v3703_v63  ;;  %v3679_v15 = vsel %vm3213_vm2, %v11182_v31, 0.0 }
 0x4ec   :  { %v3592_v1 = vmul.f32 1.442695, %v3467_v42  ;;  %v11195_v42 = vld [vmem:[#allocation9_spill] sm:$0xff] }
 0x4ed   :  { %v10424_v54 = vpop.eup %8369 }
 0x4ee   :  { %3671 = vadd.xlane.f32.xlu1 %v3670_v5  ;;  %v3739_v18 = vsel %vm3213_vm2, %v10424_v54, 0.0 }
 0x4ef   :  { %3752 = vadd.xlane.f32.xlu0 %v3751_v25 }
 0x4f2   :  { %3719 = vadd.xlane.f32.xlu1 %v3718_v24 }
 0x4f3   :  { %3662 = vadd.xlane.f32.xlu0 %v3661_v19 }
 0x4f6   :  { %3767 = vadd.xlane.f32.xlu1 %v3766_v57  ;;  %v11183_v57 = vld [vmem:[#allocation53_spill] sm:$0xff] }
 0x4f7   :  { %3710 = vadd.xlane.f32.xlu0 %v3709_v56 }
 0x4fa   :  { %3677 = vadd.xlane.f32.xlu1 %v3676_v10  ;;  %v10378_v50 = vpop.xlane.xlu1 %3404 }
 0x4fb   :  { %3758 = vadd.xlane.f32.xlu0 %v3757_v7 }
 0x4fe   :  { %3725 = vadd.xlane.f32.xlu1 %v3724_v23  ;;  %v5879_v62 = vpop.permute.xlu1 %5878 }
 0x4ff   :  { %3668 = vadd.xlane.f32.xlu0 %v3667_v39  ;;  %8149 = vmatprep.subr.mxu0 %v5879_v62 }
 0x500   :  { %8150 = vmatpush3.msra.mxu0 %v5879_v62  ;;  %v11186_v62 = vld [vmem:[#allocation48_spill] sm:$0xff] }
 0x501   :  { %8152 = vmatmul.mubr.msk.f32.vlgmr.msra.gmra.mxu0 %vm3213_vm2, %v8352_v60  ;;  %v3465_v60 = vsub.f32 %v10110_v59, %v10221_v45  ;;  %v3778_v59 = vsel %vm3213_vm2, %v10407_v3, 0.0  ;;  %v3721_v45 = vsel %vm3213_vm2, %v10225_v33, 0.0  ;;  %v3610_v40 = vsel %vm3213_vm2, %v11186_v62, 0.0 }
 0x502   :  { %3773 = vadd.xlane.f32.xlu1 %v3772_v32  ;;  %8165 = vmatprep.mubr.msk.f32.mxu0 %vm3213_vm2, %v10317_v11  ;;  %v3730_v11 = vsel %vm3213_vm2, %v10231_v36, 0.0  ;;  %v5966_v52 = vpop.permute.xlu1 %5965  ;;  %v3616_v32 = vsel %vm3213_vm2, %v11187_v26, 0.0 }
 0x503   :  { %3716 = vadd.xlane.f32.xlu0 %v3715_v9  ;;  %v3588_v55 = vmul.f32 1.442695, %v3465_v60 }
 0x505   :  { %8371 = vpow2.f32 %v3588_v55  ;;  %v11191_v55 = vld [vmem:[#allocation43_spill] sm:$0xff] }
 0x506   :  { %3683 = vadd.xlane.f32.xlu1 %v3682_v47  ;;  %v6053_v5 = vpop.permute.xlu1 %6052  ;;  %v11189_v47 = vld [vmem:[#allocation11_spill] sm:$0xff]  ;;  %v3607_v29 = vsel %vm3213_vm2, %v11191_v55, 0.0 }
 0x507   :  { %3764 = vadd.xlane.f32.xlu0 %v3763_v38  ;;  %v3601_v60 = vsel %vm3213_vm2, %v11189_v47, 0.0  ;;  %v11190_v38 = vld [vmem:[#allocation44_spill] sm:$0xff] }
 0x50a   :  { %3731 = vadd.xlane.f32.xlu1 %v3730_v11  ;;  %v6140_v24 = vpop.permute.xlu1 %6139  ;;  %v3628_v11 = vsel %vm3213_vm2, %v11190_v38, 0.0 }
 0x50b   :  { %3674 = vadd.xlane.f32.xlu0 %v3673_v0  ;;  %v11192_v0 = vld [vmem:[#allocation47_spill] sm:$0xff] }
 0x50e   :  { %3779 = vadd.xlane.f32.xlu1 %v3778_v59  ;;  %v6227_v44 = vpop.permute.xlu1 %6226 }
 0x50f   :  { %3722 = vadd.xlane.f32.xlu0 %v3721_v45  ;;  %v3402_v36 = vpop.xlane.xlu0 %3401  ;;  %v11193_v45 = vld [vmem:[#allocation10_spill] sm:$0xff] }
 0x510   :  { %v3468_v49 = vsub.f32 %v10213_v14, %v3402_v36  ;;  %v3736_v14 = vsel %vm3213_vm2, %v10323_v37, 0.0  ;;  %v3727_v37 = vsel %vm3213_vm2, %v10321_v46, 0.0  ;;  %v11194_v36 = vld [vmem:[#allocation18_spill] sm:$0xff] }
 0x512   :  { %v3594_v63 = vmul.f32 1.442695, %v3468_v49  ;;  %3689 = vadd.xlane.f32.xlu1 %v3688_v51  ;;  %v8372_v6 = vpop.eup %8371  ;;  %v6314_v53 = vpop.permute.xlu1 %6313  ;;  %v3640_v49 = vsel %vm3213_vm2, %v11194_v36, 0.0 }
 0x513   :  { %3770 = vadd.xlane.f32.xlu0 %v3769_v41  ;;  %v5792_v33 = vpop.permute.xlu0 %5791  ;;  %v3775_v19 = vsel %vm3213_vm2, %v8372_v6, 0.0 }
 0x514   :  { %8373 = vpow2.f32 %v3594_v63  ;;  %8142 = vmatprep.subr.mxu1 %v5792_v33  ;;  %v3619_v63 = vsel %vm3213_vm2, %v11195_v42, 0.0 }
 0x515   :  { %8143 = vmatpush3.msra.mxu1 %v5792_v33  ;;  %8375 = vpow2.f32 %v3592_v1  ;;  %v11197_v1 = vld [vmem:[#allocation41_spill] sm:$0xff] }
 0x516   :  { %8145 = vmatmul.mubr.msk.f32.vlgmr.msra.gmra.mxu1 %vm3213_vm2, %v10424_v54  ;;  %3737 = vadd.xlane.f32.xlu1 %v3736_v14  ;;  %v6401_v23 = vpop.permute.xlu1 %6400  ;;  %v3631_v31 = vsel %vm3213_vm2, %v11197_v1, 0.0 }
 0x517   :  { %3680 = vadd.xlane.f32.xlu0 %v3679_v15  ;;  %8158 = vmatprep.mubr.msk.f32.mxu1 %vm3213_vm2, %v10301_v43  ;;  %v5968_v25 = vpop.permute.xlu0 %5967  ;;  %v3469_v43 = vsub.f32 %v10202_v12, %v10378_v50  ;;  %v3685_v12 = vsel %vm3213_vm2, %v11183_v57, 0.0 }
 0x518   :  { %8154 = vmatprep.subr.mxu1 %v5968_v25 }
 0x519   :  { %8155 = vmatpush3.msra.mxu1 %v5968_v25 }
 0x51a   :  { %8156 = vmatprep.subr.mxu1 %v5966_v52  ;;  %v6488_v13 = vpop.permute.xlu1 %6487 }
 0x51b   :  { %3728 = vadd.xlane.f32.xlu0 %v3727_v37  ;;  %8157 = vmatpush3.msra.mxu1 %v5966_v52  ;;  %v6055_v28 = vpop.permute.xlu0 %6054  ;;  %v3634_v52 = vsel %vm3213_vm2, %v11192_v0, 0.0 }
 0x51c   :  { %8159 = vmatmul.mubr.msk.f32.vlgmr.msra.gmra.mxu1 %vm3213_vm2, %v10352_v20  ;;  %8161 = vmatprep.subr.mxu0 %v6055_v28 }
 0x51d   :  { %8162 = vmatpush3.msra.mxu0 %v6055_v28  ;;  %8172 = vmatprep.mubr.msk.f32.mxu1 %vm3213_vm2, %v10342_v30  ;;  %v3596_v30 = vmul.f32 1.442695, %v3469_v43 }
 0x51e   :  { %8163 = vmatprep.subr.mxu0 %v6053_v5 }
 0x51f   :  { %3776 = vadd.xlane.f32.xlu0 %v3775_v19  ;;  %8164 = vmatpush3.msra.mxu0 %v6053_v5  ;;  %v6142_v46 = vpop.permute.xlu0 %6141  ;;  %8377 = vpow2.f32 %v3596_v30  ;;  %v11196_v5 = vld [vmem:[#allocation45_spill] sm:$0xff]  ;;  %v11199_v19 = vld [vmem:[#allocation8_spill] sm:$0xff] }
 0x520   :  { %8166 = vmatmul.mubr.msk.f32.vlgmr.msra.gmra.mxu0 %vm3213_vm2, %v10372_v16  ;;  %8168 = vmatprep.subr.mxu1 %v6142_v46  ;;  %v11184_v16 = vld [vmem:[#allocation46_spill] sm:$0xff]  ;;  %v3625_v33 = vsel %vm3213_vm2, %v11196_v5, 0.0 }
 0x521   :  { %v8374_v20 = vpop.eup %8373  ;;  %8169 = vmatpush3.msra.mxu1 %v6142_v46  ;;  %8179 = vmatprep.mubr.msk.f32.mxu0 %vm3213_vm2, %v10362_v4  ;;  %v3733_v4 = vsel %vm3213_vm2, %v10286_v34, 0.0  ;;  %v3598_v10 = vsel %vm3213_vm2, %v11184_v16, 0.0  ;;  %v11185_v34 = vld [vmem:[#allocation29_spill] sm:$0xff] }
 0x522   :  { %8170 = vmatprep.subr.mxu1 %v6140_v24  ;;  %v3784_v56 = vsel %vm3213_vm2, %v8374_v20, 0.0  ;;  %v8376_v21 = vpop.eup %8375  ;;  %v3604_v7 = vsel %vm3213_vm2, %v11185_v34, 0.0 }
 0x523   :  { %3686 = vadd.xlane.f32.xlu0 %v3685_v12  ;;  %3785 = vadd.xlane.f32.xlu1 %v3784_v56  ;;  %v6229_v35 = vpop.permute.xlu0 %6228  ;;  %v3781_v50 = vsel %vm3213_vm2, %v8376_v21, 0.0 }
 0x524   :  { %8171 = vmatpush3.msra.mxu1 %v6140_v24  ;;  %8175 = vmatprep.subr.mxu0 %v6229_v35  ;;  %v11198_v24 = vld [vmem:[#allocation39_spill] sm:$0xff] }
 0x525   :  { %8173 = vmatmul.mubr.msk.f32.vlgmr.msra.gmra.mxu1 %vm3213_vm2, %v10397_v58  ;;  %8176 = vmatpush3.msra.mxu0 %v6229_v35  ;;  %v11188_v58 = vld [vmem:[#allocation19_spill] sm:$0xff]  ;;  %v3637_v37 = vsel %vm3213_vm2, %v11198_v24, 0.0 }
 0x526   :  { %8186 = vmatprep.mubr.msk.f32.mxu1 %vm3213_vm2, %v10384_v27  ;;  %8177 = vmatprep.subr.mxu0 %v6227_v44  ;;  %v3622_v61 = vsel %vm3213_vm2, %v11188_v58, 0.0 }
 0x527   :  { %3734 = vadd.xlane.f32.xlu0 %v3733_v4  ;;  %3599 = vadd.xlane.f32.xlu1 %v3598_v10  ;;  %v6316_v2 = vpop.permute.xlu0 %6315 }
 0x528   :  { %8178 = vmatpush3.msra.mxu0 %v6227_v44  ;;  %8182 = vmatprep.subr.mxu1 %v6316_v2  ;;  %v3643_v44 = vsel %vm3213_vm2, %v11199_v19, 0.0 }
 0x529   :  { %8180 = vmatmul.mubr.msk.f32.vlgmr.msra.gmra.mxu0 %vm3213_vm2, %v10415_v17  ;;  %8183 = vmatpush3.msra.mxu1 %v6316_v2  ;;  %v3613_v17 = vsel %vm3213_vm2, %v11193_v45, 0.0 }
 0x52a   :  { %8193 = vmatprep.mubr.msk.f32.mxu0 %vm3213_vm2, %v10407_v3  ;;  %8184 = vmatprep.subr.mxu1 %v6314_v53  ;;  %v10486_v3 = vpop.f32.mrf.mxu0 }
 0x52b   :  { %3782 = vadd.xlane.f32.xlu0 %v3781_v50  ;;  %3605 = vadd.xlane.f32.xlu1 %v3604_v7  ;;  %v6403_v27 = vpop.permute.xlu0 %6402 }
 0x52c   :  { %8185 = vmatpush3.msra.mxu1 %v6314_v53  ;;  %8189 = vmatprep.subr.mxu0 %v6403_v27  ;;  %v8378_v48 = vpop.eup %8377  ;;  %v10492_v59 = vpop.f32.mrf.mxu0 }
 0x52d   :  { %8187 = vmatmul.mubr.msk.f32.vlgmr.msra.gmra.mxu1 %vm3213_vm2, %v8372_v6  ;;  %8190 = vmatpush3.msra.mxu0 %v6403_v27  ;;  %v3787_v9 = vsel %vm3213_vm2, %v8378_v48, 0.0 }
 0x52e   :  { %8200 = vmatprep.mubr.msk.f32.mxu1 %vm3213_vm2, %v8374_v20  ;;  %8191 = vmatprep.subr.mxu0 %v6401_v23  ;;  %v10498_v51 = vpop.f32.mrf.mxu0 }
 0x52f   :  { %3692 = vadd.xlane.f32.xlu0 %v3691_v22  ;;  %3611 = vadd.xlane.f32.xlu1 %v3610_v40  ;;  %v6490_v39 = vpop.permute.xlu0 %6489 }
 0x530   :  { %8192 = vmatpush3.msra.mxu0 %v6401_v23  ;;  %8196 = vmatprep.subr.mxu1 %v6490_v39  ;;  %v10502_v41 = vpop.f32.mrf.mxu0 }
 0x531   :  { %8194 = vmatmul.mubr.msk.f32.vlgmr.msra.gmra.mxu0 %vm3213_vm2, %v8376_v21  ;;  %8197 = vmatpush3.msra.mxu1 %v6490_v39 }
 0x532   :  { %8198 = vmatprep.subr.mxu1 %v6488_v13  ;;  %v10506_v14 = vpop.f32.mrf.mxu0 }
 0x533   :  { %3740 = vadd.xlane.f32.xlu0 %v3739_v18  ;;  %3617 = vadd.xlane.f32.xlu1 %v3616_v32 }
 0x534   :  { %8199 = vmatpush3.msra.mxu1 %v6488_v13  ;;  %v10512_v25 = vpop.f32.mrf.mxu0 }
 0x535   :  { %8201 = vmatmul.mubr.msk.f32.vlgmr.msra.gmra.mxu1 %vm3213_vm2, %v8378_v48 }
 0x536   :  { %v10518_v28 = vpop.f32.mrf.mxu0 }
 0x537   :  { %3788 = vadd.xlane.f32.xlu0 %v3787_v9  ;;  %3623 = vadd.xlane.f32.xlu1 %v3622_v61 }
 0x538   :  { %v8041_v43 = vpop.f32.mrf.mxu0 }
 0x53a   :  { %v4564_v20 = vpop.f32.mrf.mxu0 }
 0x53b   :  { %3602 = vadd.xlane.f32.xlu0 %v3601_v60  ;;  %3629 = vadd.xlane.f32.xlu1 %v3628_v11 }
 0x53c   :  { %v10526_v57 = vpop.f32.mrf.mxu0 }
 0x53e   :  { %v10530_v56 = vpop.f32.mrf.mxu0 }
 0x53f   :  { %3608 = vadd.xlane.f32.xlu0 %v3607_v29  ;;  %3635 = vadd.xlane.f32.xlu1 %v3634_v52 }
 0x540   :  { %v10532_v53 = vpop.f32.mrf.mxu0 }
 0x541   :  { %11200 = vst [vmem:[#allocation3_spill] sm:$0xff] %v10532_v53 }
 0x542   :  { %v10536_v10 = vpop.f32.mrf.mxu0 }
 0x543   :  { %3614 = vadd.xlane.f32.xlu0 %v3613_v17  ;;  %3641 = vadd.xlane.f32.xlu1 %v3640_v49  ;;  %11201 = vst [vmem:[#allocation25_spill] sm:$0xff] %v10536_v10 }
 0x544   :  { %v10540_v50 = vpop.f32.mrf.mxu0 }
 0x545   :  { %11202 = vst [vmem:[#allocation31_spill] sm:$0xff] %v10540_v50 }
 0x546   :  { %v10544_v27 = vpop.f32.mrf.mxu0 }
 0x547   :  { %3620 = vadd.xlane.f32.xlu0 %v3619_v63  ;;  %11203 = vst [vmem:[#allocation12_spill] sm:$0xff] %v10544_v27 }
 0x548   :  { %v8097_v40 = vpop.f32.mrf.mxu0 }
 0x54a   :  { %v5260_v32 = vpop.f32.mrf.mxu0 }
 0x54b   :  { %3626 = vadd.xlane.f32.xlu0 %v3625_v33  ;;  %v3651_v54 = vpop.xlane.xlu1 %3650 }
 0x54c   :  { %8379 = vrcp.f32 %v3651_v54  ;;  %v10566_v29 = vpop.f32.mrf.mxu0 }
 0x54e   :  { %v10572_v45 = vpop.f32.mrf.mxu0 }
 0x54f   :  { %3632 = vadd.xlane.f32.xlu0 %v3631_v31  ;;  %v10510_v15 = vpop.xlane.xlu1 %3743 }
 0x550   :  { %v10578_v49 = vpop.f32.mrf.mxu0 }
 0x551   :  { %11204 = vst [vmem:[#allocation21_spill] sm:$0xff] %v10578_v49 }
 0x552   :  { %v5608_v33 = vpop.f32.mrf.mxu0 }
 0x553   :  { %3638 = vadd.xlane.f32.xlu0 %v3637_v37  ;;  %v10516_v6 = vpop.xlane.xlu1 %3653 }
 0x557   :  { %3644 = vadd.xlane.f32.xlu0 %v3643_v44  ;;  %v10522_v46 = vpop.xlane.xlu1 %3701 }
 0x559   :  { %v8380_v2 = vpop.eup %8379 }
 0x55a   :  { %v6655_v23 = vmul.f32 %v8380_v2, %v8041_v43  ;;  %v10594_v43 = vpop.f32.mrf.mxu1 }
 0x55b   :  { %v10524_v30 = vpop.xlane.xlu1 %3749 }
 0x55f   :  { %v10528_v12 = vpop.xlane.xlu1 %3659 }
 0x560   :  { %v3648_v35 = vpop.xlane.xlu0 %3647 }
 0x561   :  { %8381 = vrcp.f32 %v3648_v35 }
 0x563   :  { %v10534_v4 = vpop.xlane.xlu1 %3707 }
 0x564   :  { %v3696_v16 = vpop.xlane.xlu0 %3695 }
 0x565   :  { %8383 = vrcp.f32 %v3696_v16 }
 0x567   :  { %v10538_v21 = vpop.xlane.xlu1 %3755 }
 0x568   :  { %v3699_v34 = vpop.xlane.xlu0 %3698 }
 0x569   :  { %8385 = vrcp.f32 %v3699_v34 }
 0x56b   :  { %v10542_v7 = vpop.xlane.xlu1 %3665 }
 0x56c   :  { %v10546_v22 = vpop.xlane.xlu0 %3746 }
 0x56d   :  { %6736 = vrot.lane.b32.xlu0 %v6655_v23, %s8512_s5 }
 0x56e   :  { %v8382_v62 = vpop.eup %8381 }
 0x56f   :  { %v10549_v39 = vpop.xlane.xlu1 %3713  ;;  %v6654_v13 = vmul.f32 %v8382_v62, %v4564_v20  ;;  %v10598_v20 = vpop.f32.mrf.mxu1 }
 0x570   :  { %v10551_v18 = vpop.xlane.xlu0 %3656 }
 0x571   :  { %6734 = vrot.lane.b32.xlu1 %v6654_v13, %s8512_s5  ;;  %v10602_v16 = vpop.f32.mrf.mxu1 }
 0x572   :  { %v8384_v26 = vpop.eup %8383 }
 0x573   :  { %v10554_v48 = vpop.xlane.xlu1 %3761  ;;  %v6670_v9 = vmul.f32 %v8384_v26, %v5260_v32  ;;  %v10608_v23 = vpop.f32.mrf.mxu1 }
 0x574   :  { %v10556_v58 = vpop.xlane.xlu0 %3704 }
 0x575   :  { %6815 = vrot.lane.b32.xlu1 %v6670_v9, %s8513_s8 }
 0x576   :  { %v8386_v61 = vpop.eup %8385 }
 0x577   :  { %v10559_v47 = vpop.xlane.xlu1 %3671  ;;  %v6671_v60 = vmul.f32 %v8386_v61, %v8097_v40  ;;  %v10610_v40 = vpop.f32.mrf.mxu1 }
 0x578   :  { %v10561_v38 = vpop.xlane.xlu0 %3752 }
 0x579   :  { %6817 = vrot.lane.b32.xlu1 %v6671_v60, %s8513_s8  ;;  %v10618_v60 = vpop.f32.mrf.mxu1 }
 0x57b   :  { %v3720_v11 = vpop.xlane.xlu1 %3719 }
 0x57c   :  { %8387 = vrcp.f32 %v3720_v11  ;;  %v10564_v55 = vpop.xlane.xlu0 %3662 }
 0x57f   :  { %v10568_v0 = vpop.xlane.xlu1 %3767 }
 0x580   :  { %v10570_v52 = vpop.xlane.xlu0 %3710 }
 0x583   :  { %v10574_v17 = vpop.xlane.xlu1 %3677 }
 0x584   :  { %v10576_v36 = vpop.xlane.xlu0 %3758 }
 0x587   :  { %v10580_v42 = vpop.xlane.xlu1 %3725 }
 0x588   :  { %11205 = vst [vmem:[#allocation4_spill] sm:$0xff] %v10580_v42  ;;  %v10582_v63 = vpop.xlane.xlu0 %3668  ;;  %v8139_v62 = vpop.f32.mrf.mxu0 }
 0x589   :  { %v8388_v5 = vpop.eup %8387 }
 0x58a   :  { %v10584_v54 = vmul.f32 %v8388_v5, %v5608_v33  ;;  %v5782_v32 = vpop.f32.mrf.mxu0  ;;  %v10622_v5 = vpop.f32.mrf.mxu1 }
 0x58b   :  { %v10586_v1 = vpop.xlane.xlu1 %3773 }
 0x58c   :  { %11206 = vst [vmem:[#allocation13_spill] sm:$0xff] %v10584_v54  ;;  %11207 = vst [vmem:[#allocation35_spill] sm:$0xff] %v10586_v1  ;;  %v10588_v31 = vpop.xlane.xlu0 %3716  ;;  %v10628_v27 = vpop.f32.mrf.mxu1 }
 0x58e   :  { %v10630_v50 = vpop.f32.mrf.mxu1 }
 0x58f   :  { %v10590_v24 = vpop.xlane.xlu1 %3683 }
 0x590   :  { %11208 = vst [vmem:[#allocation5_spill] sm:$0xff] %v10590_v24  ;;  %v10592_v37 = vpop.xlane.xlu0 %3764 }
 0x593   :  { %v3732_v19 = vpop.xlane.xlu1 %3731 }
 0x594   :  { %8389 = vrcp.f32 %v3732_v19  ;;  %v10596_v44 = vpop.xlane.xlu0 %3674 }
 0x597   :  { %v10604_v2 = vpop.xlane.xlu1 %3779 }
 0x598   :  { %v10600_v35 = vpop.xlane.xlu0 %3722  ;;  %11209 = vst [vmem:[#allocation15_spill] sm:$0xff] %v10604_v2 }
 0x59b   :  { %v10614_v9 = vpop.xlane.xlu1 %3689 }
 0x59c   :  { %v10606_v34 = vpop.xlane.xlu0 %3770  ;;  %11210 = vst [vmem:[#allocation22_spill] sm:$0xff] %v10614_v9 }
 0x59f   :  { %v10624_v33 = vpop.xlane.xlu1 %3737 }
 0x5a0   :  { %v10612_v13 = vpop.xlane.xlu0 %3680 }
 0x5a1   :  { %v8390_v26 = vpop.eup %8389 }
 0x5a2   :  { %v10616_v61 = vmul.f32 %v8390_v26, %v5782_v32  ;;  %v10636_v26 = vpop.f32.mrf.mxu1 }
 0x5a4   :  { %11211 = vst [vmem:[#allocation34_spill] sm:$0xff] %v10616_v61  ;;  %v10620_v11 = vpop.xlane.xlu0 %3728  ;;  %v10638_v9 = vpop.f32.mrf.mxu1 }
 0x5a5   :  { %11212 = vst [vmem:[#allocation7_spill] sm:$0xff] %v10620_v11 }
 0x5a8   :  { %v10626_v19 = vpop.xlane.xlu0 %3776 }
 0x5a9   :  { %11213 = vst [vmem:[#allocation17_spill] sm:$0xff] %v10626_v19  ;;  %v10644_v19 = vpop.f32.mrf.mxu1 }
 0x5ac   :  { %v10632_v2 = vpop.xlane.xlu1 %3785  ;;  %v10634_v24 = vpop.xlane.xlu0 %3686 }
 0x5ad   :  { %11214 = vst [vmem:[#allocation23_spill] sm:$0xff] %v10632_v2  ;;  %11215 = vst [vmem:[#allocation33_spill] sm:$0xff] %v10634_v24  ;;  %v10647_v2 = vpop.f32.mrf.mxu1 }
 0x5ae   :  { %11217 = vst [vmem:[#allocation14_spill] sm:$0xff] %v10647_v2 }
 0x5b0   :  { %v3600_v32 = vpop.xlane.xlu1 %3599  ;;  %v3735_v61 = vpop.xlane.xlu0 %3734 }
 0x5b1   :  { %8391 = vrcp.f32 %v3600_v32 }
 0x5b2   :  { %8393 = vrcp.f32 %v3735_v61 }
 0x5b3   :  { %8395 = vrcp.f32 %v10510_v15  ;;  %v6980_v15 = vld [vmem:[%s10959_s3 + $0x18] sm:$0xff] }
 0x5b4   :  { %8397 = vrcp.f32 %v10546_v22  ;;  %v3606_v54 = vpop.xlane.xlu1 %3605  ;;  %v10642_v1 = vpop.xlane.xlu0 %3782  ;;  %8203 = vmatprep.subr.mxu0 %v6980_v15 }
 0x5b5   :  { %11216 = vst [vmem:[#allocation36_spill] sm:$0xff] %v10642_v1  ;;  %8399 = vrcp.f32 %v3606_v54  ;;  %v10656_v22 = vpop.f32.mrf.mxu1  ;;  %8204 = vmatpush3.msra.mxu0 %v6980_v15 }
 0x5b6   :  { %8401 = vrcp.f32 %v10551_v18  ;;  %11219 = vst [vmem:[#allocation37_spill] sm:$0xff] %v10656_v22  ;;  %v6979_v18 = vld [vmem:[%s10959_s3 + $0x10] sm:$0xff] }
 0x5b7   :  { %8403 = vrcp.f32 %v10516_v6  ;;  %v10662_v61 = vpop.f32.mrf.mxu1  ;;  %8205 = vmatprep.subr.mxu0 %v6979_v18 }
 0x5b8   :  { %v3612_v24 = vpop.xlane.xlu1 %3611  ;;  %v10650_v49 = vpop.xlane.xlu0 %3692  ;;  %11220 = vst [vmem:[#allocation6_spill] sm:$0xff] %v10662_v61  ;;  %8206 = vmatpush3.msra.mxu0 %v6979_v18 }
 0x5b9   :  { %11218 = vst [vmem:[#allocation27_spill] sm:$0xff] %v10650_v49  ;;  %8405 = vrcp.f32 %v3612_v24  ;;  %v10675_v2 = vpop.f32.mrf.mxu1 }
 0x5ba   :  { %8407 = vrcp.f32 %v10556_v58  ;;  %v6978_v58 = vld [vmem:[%s10959_s3 + $0x8] sm:$0xff] }
 0x5bb   :  { %8409 = vrcp.f32 %v10522_v46  ;;  %8207 = vmatprep.subr.mxu0 %v6978_v58  ;;  %v6977_v46 = vld [vmem:[%s10959_s3] sm:$0xff]  ;;  %v8104_v10 = vpop.f32.mrf.mxu1  ;;  %s8514_s3 = smov 24  }
 0x5bc   :  { %v3618_v6 = vpop.xlane.xlu1 %3617  ;;  %v3741_v54 = vpop.xlane.xlu0 %3740  ;;  %8208 = vmatpush3.msra.mxu0 %v6978_v58 }
 0x5bd   :  { %8411 = vrcp.f32 %v3618_v6  ;;  %8209 = vmatprep.subr.mxu0 %v6977_v46 }
 0x5be   :  { %v8392_v24 = vpop.eup %8391  ;;  %8210 = vmatpush3.msra.mxu0 %v6977_v46 }
 0x5bf   :  { %v8394_v32 = vpop.eup %8393  ;;  %v6638_v49 = vmul.f32 %v8392_v24, %v10486_v3 }
 0x5c0   :  { %v8396_v1 = vpop.eup %8395  ;;  %v3624_v15 = vpop.xlane.xlu1 %3623  ;;  %v10673_v6 = vmul.f32 %v8394_v32, %v8139_v62 }
 0x5c1   :  { %v10671_v22 = vpop.xlane.xlu0 %3788  ;;  %v8398_v61 = vpop.eup %8397  ;;  %8413 = vrcp.f32 %v3624_v15  ;;  %6702 = vst.msk [vmem:[#allocation2] sm:$0xff] %vm360_vm1, %v6638_v49 }
 0x5c2   :  { %11221 = vst [vmem:[#allocation16_spill] sm:$0xff] %v10671_v22  ;;  %v8153_v18 = vpop.f32.mrf.mxu0  ;;  %v8400_v3 = vpop.eup %8399 }
 0x5c3   :  { %v6687_v24 = vmul.f32 %v8398_v61, %v8153_v18  ;;  %v8402_v42 = vpop.eup %8401  ;;  %v6640_v11 = vmul.f32 %v8400_v3, %v10598_v20  ;;  %v5347_v15 = vpop.f32.mrf.mxu1 }
 0x5c4   :  { %v5956_v53 = vpop.f32.mrf.mxu0  ;;  %v3630_v62 = vpop.xlane.xlu1 %3629  ;;  %v6657_v61 = vmul.f32 %v8402_v42, %v10630_v50 }
 0x5c5   :  { %v6686_v22 = vmul.f32 %v8396_v1, %v5956_v53  ;;  %v3603_v32 = vpop.xlane.xlu0 %3602  ;;  %6898 = vrot.lane.b32.xlu1 %v6687_v24, %s8514_s3  ;;  %v8404_v58 = vpop.eup %8403  ;;  %8415 = vrcp.f32 %v3630_v62  ;;  %6704 = vst.msk [vmem:[#allocation2 + $0x10] sm:$0xff] %vm360_vm1, %v6640_v11 }
 0x5c6   :  { %v8406_v49 = vpop.eup %8405  ;;  %8417 = vrcp.f32 %v3603_v32  ;;  %v6656_v18 = vmul.f32 %v8404_v58, %v10636_v26  ;;  %v10687_v24 = vpop.f32.mrf.mxu1 }
 0x5c7   :  { %6896 = vrot.lane.b32.xlu0 %v6686_v22, %s8514_s3  ;;  %v8408_v46 = vpop.eup %8407  ;;  %v6642_v20 = vmul.f32 %v8406_v49, %v10498_v51  ;;  %8419 = vrcp.f32 %v3741_v54 }
 0x5c8   :  { %v3636_v53 = vpop.xlane.xlu1 %3635  ;;  %v8410_v3 = vpop.eup %8409  ;;  %v6673_v50 = vmul.f32 %v8408_v46, %v8104_v10 }
 0x5c9   :  { %v3609_v1 = vpop.xlane.xlu0 %3608  ;;  %6740 = vrot.lane.b32.xlu1 %v6657_v61, %s8512_s5  ;;  %8421 = vrcp.f32 %v3636_v53  ;;  %6706 = vst.msk [vmem:[#allocation2 + $0x20] sm:$0xff] %vm360_vm1, %v6642_v20  ;;  %v6672_v26 = vmul.f32 %v8410_v3, %v5347_v15  ;;  %v10695_v62 = vpop.f32.mrf.mxu1 }
 0x5ca   :  { %v8412_v11 = vpop.eup %8411  ;;  %8423 = vrcp.f32 %v3609_v1 }
 0x5cb   :  { %6738 = vrot.lane.b32.xlu0 %v6656_v18, %s8512_s5  ;;  %8425 = vrcp.f32 %v10624_v33  ;;  %v6644_v51 = vmul.f32 %v8412_v11, %v10608_v23 }
 0x5cc   :  { %8427 = vrcp.f32 %v10524_v30  ;;  %v3642_v42 = vpop.xlane.xlu1 %3641  ;;  %v10701_v30 = vpop.f32.mrf.mxu1 }
 0x5cd   :  { %v3615_v22 = vpop.xlane.xlu0 %3614  ;;  %6821 = vrot.lane.b32.xlu1 %v6673_v50, %s8513_s8  ;;  %8429 = vrcp.f32 %v3642_v42  ;;  %6708 = vst.msk [vmem:[#allocation2 + $0x30] sm:$0xff] %vm360_vm1, %v6644_v51 }
 0x5ce   :  { %v8414_v54 = vpop.eup %8413  ;;  %8431 = vrcp.f32 %v3615_v22  ;;  %v10707_v49 = vpop.f32.mrf.mxu1 }
 0x5cf   :  { %6819 = vrot.lane.b32.xlu0 %v6672_v26, %s8513_s8  ;;  %8433 = vrcp.f32 %v10561_v38  ;;  %v6646_v10 = vmul.f32 %v8414_v54, %v10506_v14 }
 0x5d0   :  { %8435 = vrcp.f32 %v10564_v55 }
 0x5d1   :  { %v3621_v23 = vpop.xlane.xlu0 %3620  ;;  %6710 = vst.msk [vmem:[#allocation2 + $0x40] sm:$0xff] %vm360_vm1, %v6646_v10 }
 0x5d2   :  { %8437 = vrcp.f32 %v3621_v23  ;;  %v8416_v33 = vpop.eup %8415 }
 0x5d3   :  { %v8418_v32 = vpop.eup %8417  ;;  %8439 = vrcp.f32 %v10528_v12  ;;  %v6648_v58 = vmul.f32 %v8416_v33, %v10618_v60 }
 0x5d4   :  { %8441 = vrcp.f32 %v10570_v52  ;;  %v6639_v14 = vmul.f32 %v8418_v32, %v10480_v8  ;;  %v8420_v55 = vpop.eup %8419 }
 0x5d5   :  { %v3627_v38 = vpop.xlane.xlu0 %3626  ;;  %6712 = vst.msk [vmem:[#allocation2 + $0x50] sm:$0xff] %vm360_vm1, %v6648_v58 }
 0x5d6   :  { %8443 = vrcp.f32 %v3627_v38  ;;  %v8422_v61 = vpop.eup %8421  ;;  %v8146_v46 = vpop.f32.mrf.mxu1  ;;  %6703 = vst.msk [vmem:[#allocation2 + $0x8] sm:$0xff] %vm360_vm1, %v6639_v14 }
 0x5d7   :  { %v8424_v15 = vpop.eup %8423  ;;  %8445 = vrcp.f32 %v10534_v4  ;;  %v10713_v12 = vmul.f32 %v8420_v55, %v8146_v46  ;;  %v6650_v52 = vmul.f32 %v8422_v61, %v10518_v28 }
 0x5d8   :  { %v8426_v60 = vpop.eup %8425  ;;  %v5869_v20 = vpop.f32.mrf.mxu1  ;;  %v6641_v8 = vmul.f32 %v8424_v15, %v10594_v43 }
 0x5d9   :  { %v3633_v53 = vpop.xlane.xlu0 %3632  ;;  %v8428_v1 = vpop.eup %8427  ;;  %v10717_v18 = vmul.f32 %v8426_v60, %v5869_v20  ;;  %6714 = vst.msk [vmem:[#allocation2 + $0x60] sm:$0xff] %vm360_vm1, %v6650_v52 }
 0x5da   :  { %8447 = vrcp.f32 %v3633_v53  ;;  %v8430_v3 = vpop.eup %8429  ;;  %6705 = vst.msk [vmem:[#allocation2 + $0x18] sm:$0xff] %vm360_vm1, %v6641_v8 }
 0x5db   :  { %8449 = vrcp.f32 %v10538_v21  ;;  %v8432_v4 = vpop.eup %8431  ;;  %v6652_v28 = vmul.f32 %v8430_v3, %v10628_v27 }
 0x5dc   :  { %8451 = vrcp.f32 %v10576_v36  ;;  %v8434_v11 = vpop.eup %8433  ;;  %v8160_v43 = vpop.f32.mrf.mxu1  ;;  %v6643_v51 = vmul.f32 %v8432_v4, %v10492_v59  ;;  %v11222_v4 = vld [vmem:[#allocation7_spill] sm:$0xff] }
 0x5dd   :  { %8453 = vrcp.f32 %v10582_v63  ;;  %v3639_v50 = vpop.xlane.xlu0 %3638  ;;  %v8436_v42 = vpop.eup %8435  ;;  %v6689_v22 = vmul.f32 %v8434_v11, %v8160_v43  ;;  %6716 = vst.msk [vmem:[#allocation2 + $0x70] sm:$0xff] %vm360_vm1, %v6652_v28 }
 0x5de   :  { %8455 = vrcp.f32 %v3639_v50  ;;  %v6043_v26 = vpop.f32.mrf.mxu1  ;;  %6707 = vst.msk [vmem:[#allocation2 + $0x28] sm:$0xff] %vm360_vm1, %v6643_v51  ;;  %v6659_v10 = vmul.f32 %v8436_v42, %v10526_v57  ;;  %v11225_v50 = vld [vmem:[#allocation4_spill] sm:$0xff]  ;;  %v11227_v42 = vld [vmem:[#allocation17_spill] sm:$0xff] }
 0x5df   :  { %v8438_v21 = vpop.eup %8437  ;;  %8457 = vrcp.f32 %v10542_v7  ;;  %v6688_v36 = vmul.f32 %v8428_v1, %v6043_v26  ;;  %6902 = vrot.lane.b32.xlu1 %v6689_v22, %s8514_s3 }
 0x5e0   :  { %v6645_v27 = vmul.f32 %v8438_v21, %v10602_v16  ;;  %v8440_v63 = vpop.eup %8439  ;;  %8459 = vrcp.f32 %v10588_v31  ;;  %v8167_v32 = vpop.f32.mrf.mxu0  ;;  %v11228_v21 = vld [vmem:[#allocation35_spill] sm:$0xff] }
 0x5e1   :  { %v3645_v59 = vpop.xlane.xlu0 %3644  ;;  %v8442_v54 = vpop.eup %8441  ;;  %6900 = vrot.lane.b32.xlu0 %v6688_v36, %s8514_s3  ;;  %v6658_v16 = vmul.f32 %v8440_v63, %v10530_v56 }
 0x5e2   :  { %8461 = vrcp.f32 %v3645_v59  ;;  %6709 = vst.msk [vmem:[#allocation2 + $0x38] sm:$0xff] %vm360_vm1, %v6645_v27  ;;  %v6675_v57 = vmul.f32 %v8442_v54, %v10566_v29  ;;  %v6130_v61 = vpop.f32.mrf.mxu0  ;;  %v11229_v27 = vld [vmem:[#allocation33_spill] sm:$0xff] }
 0x5e3   :  { %v8444_v23 = vpop.eup %8443  ;;  %8463 = vrcp.f32 %v10549_v39  ;;  %v6735_v7 = vpop.permute.xlu1 %6734  ;;  %6744 = vrot.lane.b32.xlu1 %v6659_v10, %s8512_s5  ;;  %v11230_v59 = vld [vmem:[#allocation13_spill] sm:$0xff] }
 0x5e4   :  { %v6647_v31 = vmul.f32 %v8444_v23, %v10502_v41  ;;  %v8446_v33 = vpop.eup %8445  ;;  %6783 = vst.msk [vmem:[#allocation2] sm:$0xff] %vm6782_vm3, %v6735_v7  ;;  %8465 = vrcp.f32 %v10592_v37  ;;  %v11231_v10 = vld [vmem:[#allocation5_spill] sm:$0xff] }
 0x5e5   :  { %v6737_v58 = vpop.permute.xlu0 %6736  ;;  %6742 = vrot.lane.b32.xlu0 %v6658_v16, %s8512_s5  ;;  %v6674_v41 = vmul.f32 %v8446_v33, %v10572_v45  ;;  %8467 = vrcp.f32 %v10554_v48  ;;  %v8174_v53 = vpop.f32.mrf.mxu1  ;;  %v11232_v16 = vld [vmem:[#allocation14_spill] sm:$0xff] }
 0x5e6   :  { %6784 = vst.msk [vmem:[#allocation2 + $0x8] sm:$0xff] %vm6782_vm3, %v6737_v58  ;;  %8469 = vrcp.f32 %v10596_v44 }
 0x5e7   :  { %6711 = vst.msk [vmem:[#allocation2 + $0x48] sm:$0xff] %vm360_vm1, %v6647_v31  ;;  %v8448_v39 = vpop.eup %8447  ;;  %v6816_v56 = vpop.permute.xlu1 %6815  ;;  %6825 = vrot.lane.b32.xlu1 %v6675_v57, %s8513_s8  ;;  %8471 = vrcp.f32 %v10559_v47 }
 0x5e8   :  { %v8450_v38 = vpop.eup %8449  ;;  %v6649_v14 = vmul.f32 %v8448_v39, %v10610_v40  ;;  %6864 = vst.msk [vmem:[#allocation2] sm:$0xff] %vm6863_vm4, %v6816_v56  ;;  %8473 = vrcp.f32 %v10600_v35 }
 0x5e9   :  { %v8452_v55 = vpop.eup %8451  ;;  %6823 = vrot.lane.b32.xlu0 %v6674_v41, %s8513_s8  ;;  %v6690_v45 = vmul.f32 %v8450_v38, %v6130_v61  ;;  %8475 = vrcp.f32 %v10606_v34  ;;  %v8181_v43 = vpop.f32.mrf.mxu0  ;;  %v11234_v41 = vld [vmem:[#allocation36_spill] sm:$0xff] }
 0x5ea   :  { %v8454_v29 = vpop.eup %8453  ;;  %v6691_v46 = vmul.f32 %v8452_v55, %v8167_v32  ;;  %6713 = vst.msk [vmem:[#allocation2 + $0x58] sm:$0xff] %vm360_vm1, %v6649_v14  ;;  %8477 = vrcp.f32 %v10568_v0  ;;  %v11233_v32 = vld [vmem:[#allocation37_spill] sm:$0xff]  ;;  %v11235_v55 = vld [vmem:[#allocation15_spill] sm:$0xff] }
 0x5eb   :  { %v8456_v37 = vpop.eup %8455  ;;  %v6818_v15 = vpop.permute.xlu1 %6817  ;;  %v6661_v44 = vmul.f32 %v8454_v29, %v10638_v9  ;;  %8479 = vrcp.f32 %v10612_v13  ;;  %v11224_v13 = vld [vmem:[#allocation25_spill] sm:$0xff] }
 0x5ec   :  { %6906 = vrot.lane.b32.xlu1 %v6691_v46, %s8514_s3  ;;  %v6651_v48 = vmul.f32 %v8456_v37, %v10512_v25  ;;  %v8458_v40 = vpop.eup %8457  ;;  %6865 = vst.msk [vmem:[#allocation2 + $0x8] sm:$0xff] %vm6863_vm4, %v6818_v15  ;;  %8481 = vrcp.f32 %v10574_v17  ;;  %v11226_v17 = vld [vmem:[#allocation21_spill] sm:$0xff]  ;;  %v6304_v26 = vpop.f32.mrf.mxu0  ;;  %v11236_v46 = vld [vmem:[#allocation27_spill] sm:$0xff]  ;;  %v11237_v15 = vld [vmem:[#allocation22_spill] sm:$0xff] }
 0x5ed   :  { %v8460_v52 = vpop.eup %8459  ;;  %6904 = vrot.lane.b32.xlu0 %v6690_v45, %s8514_s3  ;;  %v6660_v47 = vmul.f32 %v8458_v40, %v10644_v19  ;;  %v6217_v19 = vpop.f32.mrf.mxu1  ;;  %8483 = vrcp.f32 %v11222_v4 }
 0x5ee   :  { %6715 = vst.msk [vmem:[#allocation2 + $0x68] sm:$0xff] %vm360_vm1, %v6651_v48  ;;  %v6677_v8 = vmul.f32 %v8460_v52, %v10687_v24  ;;  %8485 = vrcp.f32 %v11225_v50  ;;  %v11238_v48 = vld [vmem:[#allocation31_spill] sm:$0xff]  ;;  %v11239_v52 = vld [vmem:[#allocation12_spill] sm:$0xff] }
 0x5ef   :  { %v8462_v60 = vpop.eup %8461  ;;  %8487 = vrcp.f32 %v11227_v42  ;;  %v8188_v57 = vpop.f32.mrf.mxu1 }
 0x5f0   :  { %6748 = vrot.lane.b32.xlu1 %v6661_v44, %s8512_s5  ;;  %v6653_v20 = vmul.f32 %v8462_v60, %v10622_v5  ;;  %v8464_v25 = vpop.eup %8463  ;;  %8489 = vrcp.f32 %v11228_v21 }
 0x5f1   :  { %6746 = vrot.lane.b32.xlu0 %v6660_v47, %s8512_s5  ;;  %v6676_v35 = vmul.f32 %v8464_v25, %v10695_v62  ;;  %v8466_v9 = vpop.eup %8465  ;;  %v11223_v62 = vld [vmem:[#allocation3_spill] sm:$0xff]  ;;  %8491 = vrcp.f32 %v11229_v27  ;;  %v6391_v61 = vpop.f32.mrf.mxu1  ;;  %v11240_v47 = vld [vmem:[#allocation16_spill] sm:$0xff] }
 0x5f2   :  { %6717 = vst.msk [vmem:[#allocation2 + $0x78] sm:$0xff] %vm360_vm1, %v6653_v20  ;;  %v8468_v1 = vpop.eup %8467  ;;  %v6693_v5 = vmul.f32 %v8466_v9, %v8174_v53  ;;  %8493 = vrcp.f32 %v11231_v10  ;;  %v8195_v60 = vpop.f32.mrf.mxu0  ;;  %v11242_v9 = vld [vmem:[#allocation34_spill] sm:$0xff] }
 0x5f3   :  { %v8470_v3 = vpop.eup %8469  ;;  %v6692_v24 = vmul.f32 %v8468_v1, %v6217_v19  ;;  %8495 = vrcp.f32 %v11234_v41 }
 0x5f4   :  { %6829 = vrot.lane.b32.xlu1 %v6677_v8, %s8513_s8  ;;  %v8472_v34 = vpop.eup %8471  ;;  %v6663_v0 = vmul.f32 %v8470_v3, %v11223_v62  ;;  %8497 = vrcp.f32 %v11235_v55  ;;  %v6478_v25 = vpop.f32.mrf.mxu0  ;;  %v11241_v8 = vld [vmem:[#allocation23_spill] sm:$0xff]  ;;  %v11243_v3 = vld [vmem:[#allocation6_spill] sm:$0xff] }
 0x5f5   :  { %6827 = vrot.lane.b32.xlu0 %v6676_v35, %s8513_s8  ;;  %v8474_v28 = vpop.eup %8473  ;;  %v6662_v11 = vmul.f32 %v8472_v34, %v11224_v13  ;;  %8499 = vrcp.f32 %v11236_v46  ;;  %v8202_v34 = vpop.f32.mrf.mxu1 }
 0x5f6   :  { %v6679_v51 = vmul.f32 %v8474_v28, %v11226_v17  ;;  %v8476_v22 = vpop.eup %8475  ;;  %8501 = vrcp.f32 %v11237_v15 }
 0x5f7   :  { %v8478_v36 = vpop.eup %8477  ;;  %v6695_v63 = vmul.f32 %v8476_v22, %v8181_v43  ;;  %8503 = vrcp.f32 %v11240_v47  ;;  %v6565_v62 = vpop.f32.mrf.mxu1 }
 0x5f8   :  { %6910 = vrot.lane.b32.xlu1 %v6693_v5, %s8514_s3  ;;  %v8480_v54 = vpop.eup %8479  ;;  %v6694_v23 = vmul.f32 %v8478_v36, %v6304_v26  ;;  %8505 = vrcp.f32 %v11241_v8 }
 0x5f9   :  { %6908 = vrot.lane.b32.xlu0 %v6692_v24, %s8514_s3  ;;  %v8482_v7 = vpop.eup %8481  ;;  %v6665_v31 = vmul.f32 %v8480_v54, %v11232_v16 }
 0x5fa   :  { %v8484_v33 = vpop.eup %8483  ;;  %v6664_v58 = vmul.f32 %v8482_v7, %v11233_v32 }
 0x5fb   :  { %v6681_v39 = vmul.f32 %v8484_v33, %v10701_v30  ;;  %v8486_v38 = vpop.eup %8485 }
 0x5fc   :  { %6752 = vrot.lane.b32.xlu1 %v6663_v0, %s8512_s5  ;;  %v6680_v56 = vmul.f32 %v8486_v38, %v10707_v49  ;;  %v8488_v14 = vpop.eup %8487 }
 0x5fd   :  { %6750 = vrot.lane.b32.xlu0 %v6662_v11, %s8512_s5  ;;  %v8490_v29 = vpop.eup %8489  ;;  %v6697_v37 = vmul.f32 %v8488_v14, %v8188_v57 }
 0x5fe   :  { %v8492_v45 = vpop.eup %8491  ;;  %v6696_v30 = vmul.f32 %v8490_v29, %v6391_v61 }
 0x5ff   :  { %v8494_v49 = vpop.eup %8493  ;;  %v6667_v40 = vmul.f32 %v8492_v45, %v11238_v48 }
 0x600   :  { %6833 = vrot.lane.b32.xlu1 %v6679_v51, %s8513_s8  ;;  %v6666_v44 = vmul.f32 %v8494_v49, %v11239_v52  ;;  %v8496_v20 = vpop.eup %8495 }
 0x601   :  { %6831 = vrot.lane.b32.xlu0 %v11230_v59, %s8513_s8  ;;  %v8498_v53 = vpop.eup %8497  ;;  %v6699_v35 = vmul.f32 %v8496_v20, %v8195_v60 }
 0x602   :  { %v8500_v19 = vpop.eup %8499  ;;  %v6698_v1 = vmul.f32 %v8498_v53, %v6478_v25 }
 0x603   :  { %v8502_v5 = vpop.eup %8501  ;;  %v6669_v24 = vmul.f32 %v8500_v19, %v11243_v3 }
 0x604   :  { %6914 = vrot.lane.b32.xlu1 %v6695_v63, %s8514_s3  ;;  %v8504_v4 = vpop.eup %8503 }
 0x605   :  { %6912 = vrot.lane.b32.xlu0 %v6694_v23, %s8514_s3  ;;  %v6701_v0 = vmul.f32 %v8504_v4, %v8202_v34  ;;  %v8506_v28 = vpop.eup %8505 }
 0x606   :  { %v6700_v13 = vmul.f32 %v8506_v28, %v6565_v62  ;;  %v7410_v62 = vld [vmem:[%s10960_s4] ss:$0 sm:$0xff] }
 0x608   :  { %6756 = vrot.lane.b32.xlu1 %v6665_v31, %s8512_s5 }
 0x609   :  { %6754 = vrot.lane.b32.xlu0 %v6664_v58, %s8512_s5 }
 0x60c   :  { %6837 = vrot.lane.b32.xlu1 %v6681_v39, %s8513_s8 }
 0x60d   :  { %6835 = vrot.lane.b32.xlu0 %v6680_v56, %s8513_s8 }
 0x610   :  { %6918 = vrot.lane.b32.xlu1 %v6697_v37, %s8514_s3 }
 0x611   :  { %6916 = vrot.lane.b32.xlu0 %v6696_v30, %s8514_s3 }
 0x614   :  { %6760 = vrot.lane.b32.xlu1 %v6667_v40, %s8512_s5 }
 0x615   :  { %6758 = vrot.lane.b32.xlu0 %v6666_v44, %s8512_s5 }
 0x618   :  { %6841 = vrot.lane.b32.xlu1 %v10673_v6, %s8513_s8  ;;  %v6668_v6 = vmul.f32 %v8502_v5, %v10675_v2 }
 0x619   :  { %6839 = vrot.lane.b32.xlu0 %v11242_v9, %s8513_s8 }
 0x61c   :  { %6922 = vrot.lane.b32.xlu1 %v6699_v35, %s8514_s3 }
 0x61d   :  { %6920 = vrot.lane.b32.xlu0 %v6698_v1, %s8514_s3 }
 0x620   :  { %6764 = vrot.lane.b32.xlu1 %v6669_v24, %s8512_s5 }
 0x621   :  { %6762 = vrot.lane.b32.xlu0 %v6668_v6, %s8512_s5 }
 0x624   :  { %6845 = vrot.lane.b32.xlu1 %v10713_v12, %s8513_s8 }
 0x625   :  { %6843 = vrot.lane.b32.xlu0 %v10717_v18, %s8513_s8 }
 0x628   :  { %6926 = vrot.lane.b32.xlu1 %v6701_v0, %s8514_s3 }
 0x629   :  { %6924 = vrot.lane.b32.xlu0 %v6700_v13, %s8514_s3 }
 0x637   :  { %v6899_v2 = vpop.permute.xlu1 %6898 }
 0x638   :  { %6946 = vst.msk [vmem:[#allocation2 + $0x8] sm:$0xff] %vm6944_vm5, %v6899_v2 }
 0x639   :  { %v6897_v11 = vpop.permute.xlu0 %6896 }
 0x63a   :  { %6945 = vst.msk [vmem:[#allocation2] sm:$0xff] %vm6944_vm5, %v6897_v11 }
 0x63b   :  { %v6741_v12 = vpop.permute.xlu1 %6740 }
 0x63c   :  { %6786 = vst.msk [vmem:[#allocation2 + $0x18] sm:$0xff] %vm6782_vm3, %v6741_v12 }
 0x63d   :  { %v6739_v43 = vpop.permute.xlu0 %6738 }
 0x63e   :  { %6785 = vst.msk [vmem:[#allocation2 + $0x10] sm:$0xff] %vm6782_vm3, %v6739_v43 }
 0x63f   :  { %v6822_v18 = vpop.permute.xlu1 %6821  ;;  %v6962_v51 = vld [vmem:[#allocation2 + $0x8] sm:$0xff] }
 0x640   :  { %6867 = vst.msk [vmem:[#allocation2 + $0x18] sm:$0xff] %vm6863_vm4, %v6822_v18 }
 0x641   :  { %v6820_v50 = vpop.permute.xlu0 %6819  ;;  %v6961_v17 = vld [vmem:[#allocation2] sm:$0xff] }
 0x642   :  { %6866 = vst.msk [vmem:[#allocation2 + $0x10] sm:$0xff] %vm6863_vm4, %v6820_v50  ;;  %8211 = vmatprep.mubr.msk.f32.mxu0 %vm50_vm0, %v6961_v17 }
 0x643   :  { %8212 = vmatmul.mubr.msk.f32.vlgmr.msra.gmra.mxu0 %vm50_vm0, %v6962_v51 }
 0x651   :  { %v6903_v42 = vpop.permute.xlu1 %6902 }
 0x652   :  { %6948 = vst.msk [vmem:[#allocation2 + $0x18] sm:$0xff] %vm6944_vm5, %v6903_v42 }
 0x653   :  { %v6901_v22 = vpop.permute.xlu0 %6900 }
 0x654   :  { %6947 = vst.msk [vmem:[#allocation2 + $0x10] sm:$0xff] %vm6944_vm5, %v6901_v22 }
 0x655   :  { %v6745_v21 = vpop.permute.xlu1 %6744 }
 0x656   :  { %6788 = vst.msk [vmem:[#allocation2 + $0x28] sm:$0xff] %vm6782_vm3, %v6745_v21 }
 0x657   :  { %v6743_v26 = vpop.permute.xlu0 %6742 }
 0x658   :  { %6787 = vst.msk [vmem:[#allocation2 + $0x20] sm:$0xff] %vm6782_vm3, %v6743_v26 }
 0x659   :  { %v6826_v36 = vpop.permute.xlu1 %6825  ;;  %v6964_v59 = vld [vmem:[#allocation2 + $0x18] sm:$0xff] }
 0x65a   :  { %6869 = vst.msk [vmem:[#allocation2 + $0x28] sm:$0xff] %vm6863_vm4, %v6826_v36 }
 0x65b   :  { %v6824_v27 = vpop.permute.xlu0 %6823  ;;  %v6963_v63 = vld [vmem:[#allocation2 + $0x10] sm:$0xff] }
 0x65c   :  { %6868 = vst.msk [vmem:[#allocation2 + $0x20] sm:$0xff] %vm6863_vm4, %v6824_v27  ;;  %8214 = vmatprep.mubr.msk.f32.mxu0 %vm50_vm0, %v6963_v63 }
 0x65d   :  { %8215 = vmatmul.mubr.msk.f32.gmra.mxu0 %vm50_vm0, %v6964_v59 }
 0x65e   :  { %v6907_v54 = vpop.permute.xlu1 %6906 }
 0x65f   :  { %6950 = vst.msk [vmem:[#allocation2 + $0x28] sm:$0xff] %vm6944_vm5, %v6907_v54  ;;  %v6905_v10 = vpop.permute.xlu0 %6904 }
 0x660   :  { %6949 = vst.msk [vmem:[#allocation2 + $0x20] sm:$0xff] %vm6944_vm5, %v6905_v10 }
 0x662   :  { %v6749_v23 = vpop.permute.xlu1 %6748 }
 0x663   :  { %6790 = vst.msk [vmem:[#allocation2 + $0x38] sm:$0xff] %vm6782_vm3, %v6749_v23  ;;  %v6747_v7 = vpop.permute.xlu0 %6746 }
 0x664   :  { %6789 = vst.msk [vmem:[#allocation2 + $0x30] sm:$0xff] %vm6782_vm3, %v6747_v7 }
 0x666   :  { %v6830_v16 = vpop.permute.xlu1 %6829  ;;  %v6966_v32 = vld [vmem:[#allocation2 + $0x28] sm:$0xff] }
 0x667   :  { %6871 = vst.msk [vmem:[#allocation2 + $0x38] sm:$0xff] %vm6863_vm4, %v6830_v16  ;;  %v6828_v31 = vpop.permute.xlu0 %6827  ;;  %v6965_v33 = vld [vmem:[#allocation2 + $0x20] sm:$0xff] }
 0x668   :  { %6870 = vst.msk [vmem:[#allocation2 + $0x30] sm:$0xff] %vm6863_vm4, %v6828_v31  ;;  %8217 = vmatprep.mubr.msk.f32.mxu0 %vm50_vm0, %v6965_v33 }
 0x669   :  { %8218 = vmatmul.mubr.msk.f32.gmra.mxu0 %vm50_vm0, %v6966_v32 }
 0x66a   :  { %v6911_v58 = vpop.permute.xlu1 %6910 }
 0x66b   :  { %6952 = vst.msk [vmem:[#allocation2 + $0x38] sm:$0xff] %vm6944_vm5, %v6911_v58  ;;  %v6909_v57 = vpop.permute.xlu0 %6908 }
 0x66c   :  { %6951 = vst.msk [vmem:[#allocation2 + $0x30] sm:$0xff] %vm6944_vm5, %v6909_v57 }
 0x66e   :  { %v6753_v39 = vpop.permute.xlu1 %6752 }
 0x66f   :  { %6792 = vst.msk [vmem:[#allocation2 + $0x48] sm:$0xff] %vm6782_vm3, %v6753_v39  ;;  %v6751_v38 = vpop.permute.xlu0 %6750 }
 0x670   :  { %6791 = vst.msk [vmem:[#allocation2 + $0x40] sm:$0xff] %vm6782_vm3, %v6751_v38 }
 0x672   :  { %v6834_v56 = vpop.permute.xlu1 %6833  ;;  %v6968_v55 = vld [vmem:[#allocation2 + $0x38] sm:$0xff] }
 0x673   :  { %6873 = vst.msk [vmem:[#allocation2 + $0x48] sm:$0xff] %vm6863_vm4, %v6834_v56  ;;  %v6832_v41 = vpop.permute.xlu0 %6831  ;;  %v6967_v14 = vld [vmem:[#allocation2 + $0x30] sm:$0xff] }
 0x674   :  { %6872 = vst.msk [vmem:[#allocation2 + $0x40] sm:$0xff] %vm6863_vm4, %v6832_v41  ;;  %8220 = vmatprep.mubr.msk.f32.mxu0 %vm50_vm0, %v6967_v14 }
 0x675   :  { %8221 = vmatmul.mubr.msk.f32.gmra.mxu0 %vm50_vm0, %v6968_v55 }
 0x676   :  { %v6915_v61 = vpop.permute.xlu1 %6914 }
 0x677   :  { %6954 = vst.msk [vmem:[#allocation2 + $0x48] sm:$0xff] %vm6944_vm5, %v6915_v61  ;;  %v6913_v29 = vpop.permute.xlu0 %6912 }
 0x678   :  { %6953 = vst.msk [vmem:[#allocation2 + $0x40] sm:$0xff] %vm6944_vm5, %v6913_v29 }
 0x67a   :  { %v6757_v46 = vpop.permute.xlu1 %6756 }
 0x67b   :  { %6794 = vst.msk [vmem:[#allocation2 + $0x58] sm:$0xff] %vm6782_vm3, %v6757_v46  ;;  %v6755_v37 = vpop.permute.xlu0 %6754 }
 0x67c   :  { %6793 = vst.msk [vmem:[#allocation2 + $0x50] sm:$0xff] %vm6782_vm3, %v6755_v37 }
 0x67e   :  { %v6838_v45 = vpop.permute.xlu1 %6837  ;;  %v6970_v49 = vld [vmem:[#allocation2 + $0x48] sm:$0xff] }
 0x67f   :  { %6875 = vst.msk [vmem:[#allocation2 + $0x58] sm:$0xff] %vm6863_vm4, %v6838_v45  ;;  %v6836_v15 = vpop.permute.xlu0 %6835  ;;  %v6969_v30 = vld [vmem:[#allocation2 + $0x40] sm:$0xff] }
 0x680   :  { %6874 = vst.msk [vmem:[#allocation2 + $0x50] sm:$0xff] %vm6863_vm4, %v6836_v15  ;;  %8223 = vmatprep.mubr.msk.f32.mxu0 %vm50_vm0, %v6969_v30 }
 0x681   :  { %8224 = vmatmul.mubr.msk.f32.gmra.mxu0 %vm50_vm0, %v6970_v49 }
 0x682   :  { %v6919_v48 = vpop.permute.xlu1 %6918 }
 0x683   :  { %6956 = vst.msk [vmem:[#allocation2 + $0x58] sm:$0xff] %vm6944_vm5, %v6919_v48  ;;  %v6917_v40 = vpop.permute.xlu0 %6916 }
 0x684   :  { %6955 = vst.msk [vmem:[#allocation2 + $0x50] sm:$0xff] %vm6944_vm5, %v6917_v40 }
 0x686   :  { %v6761_v52 = vpop.permute.xlu1 %6760 }
 0x687   :  { %6796 = vst.msk [vmem:[#allocation2 + $0x68] sm:$0xff] %vm6782_vm3, %v6761_v52  ;;  %v6759_v44 = vpop.permute.xlu0 %6758 }
 0x688   :  { %6795 = vst.msk [vmem:[#allocation2 + $0x60] sm:$0xff] %vm6782_vm3, %v6759_v44 }
 0x68a   :  { %v6842_v60 = vpop.permute.xlu1 %6841  ;;  %v6972_v25 = vld [vmem:[#allocation2 + $0x58] sm:$0xff] }
 0x68b   :  { %6877 = vst.msk [vmem:[#allocation2 + $0x68] sm:$0xff] %vm6863_vm4, %v6842_v60  ;;  %v6840_v47 = vpop.permute.xlu0 %6839  ;;  %v6971_v20 = vld [vmem:[#allocation2 + $0x50] sm:$0xff] }
 0x68c   :  { %6876 = vst.msk [vmem:[#allocation2 + $0x60] sm:$0xff] %vm6863_vm4, %v6840_v47  ;;  %8226 = vmatprep.mubr.msk.f32.mxu0 %vm50_vm0, %v6971_v20 }
 0x68d   :  { %8227 = vmatmul.mubr.msk.f32.gmra.mxu0 %vm50_vm0, %v6972_v25 }
 0x68e   :  { %v6923_v53 = vpop.permute.xlu1 %6922 }
 0x68f   :  { %6958 = vst.msk [vmem:[#allocation2 + $0x68] sm:$0xff] %vm6944_vm5, %v6923_v53  ;;  %v6921_v8 = vpop.permute.xlu0 %6920 }
 0x690   :  { %6957 = vst.msk [vmem:[#allocation2 + $0x60] sm:$0xff] %vm6944_vm5, %v6921_v8 }
 0x692   :  { %v6765_v35 = vpop.permute.xlu1 %6764 }
 0x693   :  { %6798 = vst.msk [vmem:[#allocation2 + $0x78] sm:$0xff] %vm6782_vm3, %v6765_v35  ;;  %v6763_v9 = vpop.permute.xlu0 %6762 }
 0x694   :  { %6797 = vst.msk [vmem:[#allocation2 + $0x70] sm:$0xff] %vm6782_vm3, %v6763_v9 }
 0x696   :  { %v6846_v19 = vpop.permute.xlu1 %6845  ;;  %v6974_v3 = vld [vmem:[#allocation2 + $0x68] sm:$0xff] }
 0x697   :  { %6879 = vst.msk [vmem:[#allocation2 + $0x78] sm:$0xff] %vm6863_vm4, %v6846_v19  ;;  %v6844_v1 = vpop.permute.xlu0 %6843  ;;  %v6973_v5 = vld [vmem:[#allocation2 + $0x60] sm:$0xff] }
 0x698   :  { %6878 = vst.msk [vmem:[#allocation2 + $0x70] sm:$0xff] %vm6863_vm4, %v6844_v1  ;;  %8229 = vmatprep.mubr.msk.f32.mxu0 %vm50_vm0, %v6973_v5 }
 0x699   :  { %8230 = vmatmul.mubr.msk.f32.gmra.mxu0 %vm50_vm0, %v6974_v3 }
 0x69a   :  { %v6927_v24 = vpop.permute.xlu1 %6926 }
 0x69b   :  { %6960 = vst.msk [vmem:[#allocation2 + $0x78] sm:$0xff] %vm6944_vm5, %v6927_v24  ;;  %v6925_v6 = vpop.permute.xlu0 %6924 }
 0x69c   :  { %6959 = vst.msk [vmem:[#allocation2 + $0x70] sm:$0xff] %vm6944_vm5, %v6925_v6 }
 0x6a2   :  { %v6976_v4 = vld [vmem:[#allocation2 + $0x78] sm:$0xff] }
 0x6a3   :  { %v6975_v34 = vld [vmem:[#allocation2 + $0x70] sm:$0xff] }
 0x6a4   :  { %8232 = vmatprep.mubr.msk.f32.mxu0 %vm50_vm0, %v6975_v34 }
 0x6a5   :  { %8233 = vmatmul.mubr.msk.f32.gmra.mxu0 %vm50_vm0, %v6976_v4 }
 0x703   :  { %v8213_v0 = vpop.f32.mrf.mxu0 }
 0x704   :  { %v7108_v28 = vadd.f32 %v8213_v0, %v7410_v62 }
 0x705   :  { %v7102_v13 = vpop.f32.mrf.mxu0 }
 0x706   :  { %7182 = vst.msk [vmem:[%s10961_s6 + $0x8] sm:$0xff] %vm50_vm0, %v7108_v28  ;;  %v7103_v2 = vadd.f32 %v7410_v62, %v7102_v13 }
 0x708   :  { %7181 = vst.msk [vmem:[%s10961_s6] sm:$0xff] %vm50_vm0, %v7103_v2 }
 0x71d   :  { %v8216_v11 = vpop.f32.mrf.mxu0 }
 0x71e   :  { %v7118_v12 = vadd.f32 %v8216_v11, %v7410_v62 }
 0x71f   :  { %v7112_v43 = vpop.f32.mrf.mxu0 }
 0x720   :  { %7184 = vst.msk [vmem:[%s10961_s6 + $0x18] sm:$0xff] %vm50_vm0, %v7118_v12  ;;  %v7113_v18 = vadd.f32 %v7410_v62, %v7112_v43 }
 0x722   :  { %7183 = vst.msk [vmem:[%s10961_s6 + $0x10] sm:$0xff] %vm50_vm0, %v7113_v18 }
 0x729   :  { %v8219_v50 = vpop.f32.mrf.mxu0 }
 0x72a   :  { %v7128_v17 = vadd.f32 %v8219_v50, %v7410_v62 }
 0x72b   :  { %v7122_v51 = vpop.f32.mrf.mxu0 }
 0x72c   :  { %7186 = vst.msk [vmem:[%s10961_s6 + $0x28] sm:$0xff] %vm50_vm0, %v7128_v17  ;;  %v7123_v42 = vadd.f32 %v7410_v62, %v7122_v51 }
 0x72e   :  { %7185 = vst.msk [vmem:[%s10961_s6 + $0x20] sm:$0xff] %vm50_vm0, %v7123_v42 }
 0x735   :  { %v8222_v22 = vpop.f32.mrf.mxu0 }
 0x736   :  { %v7138_v21 = vadd.f32 %v8222_v22, %v7410_v62 }
 0x737   :  { %v7132_v26 = vpop.f32.mrf.mxu0 }
 0x738   :  { %7188 = vst.msk [vmem:[%s10961_s6 + $0x38] sm:$0xff] %vm50_vm0, %v7138_v21  ;;  %v7133_v36 = vadd.f32 %v7410_v62, %v7132_v26 }
 0x73a   :  { %7187 = vst.msk [vmem:[%s10961_s6 + $0x30] sm:$0xff] %vm50_vm0, %v7133_v36 }
 0x741   :  { %v8225_v27 = vpop.f32.mrf.mxu0 }
 0x742   :  { %v7148_v63 = vadd.f32 %v8225_v27, %v7410_v62 }
 0x743   :  { %v7142_v59 = vpop.f32.mrf.mxu0 }
 0x744   :  { %7190 = vst.msk [vmem:[%s10961_s6 + $0x48] sm:$0xff] %vm50_vm0, %v7148_v63  ;;  %v7143_v54 = vadd.f32 %v7410_v62, %v7142_v59 }
 0x746   :  { %7189 = vst.msk [vmem:[%s10961_s6 + $0x40] sm:$0xff] %vm50_vm0, %v7143_v54 }
 0x74d   :  { %v8228_v10 = vpop.f32.mrf.mxu0 }
 0x74e   :  { %v7158_v23 = vadd.f32 %v8228_v10, %v7410_v62 }
 0x74f   :  { %v7152_v7 = vpop.f32.mrf.mxu0 }
 0x750   :  { %7192 = vst.msk [vmem:[%s10961_s6 + $0x58] sm:$0xff] %vm50_vm0, %v7158_v23  ;;  %v7153_v16 = vadd.f32 %v7410_v62, %v7152_v7 }
 0x752   :  { %7191 = vst.msk [vmem:[%s10961_s6 + $0x50] sm:$0xff] %vm50_vm0, %v7153_v16 }
 0x759   :  { %v8231_v31 = vpop.f32.mrf.mxu0 }
 0x75a   :  { %v7168_v33 = vadd.f32 %v8231_v31, %v7410_v62 }
 0x75b   :  { %v7162_v32 = vpop.f32.mrf.mxu0 }
 0x75c   :  { %7194 = vst.msk [vmem:[%s10961_s6 + $0x68] sm:$0xff] %vm50_vm0, %v7168_v33  ;;  %v7163_v58 = vadd.f32 %v7410_v62, %v7162_v32 }
 0x75e   :  { %7193 = vst.msk [vmem:[%s10961_s6 + $0x60] sm:$0xff] %vm50_vm0, %v7163_v58 }
 0x765   :  { %v8234_v57 = vpop.f32.mrf.mxu0 }
 0x766   :  { %v7178_v39 = vadd.f32 %v8234_v57, %v7410_v62 }
 0x767   :  { %v7172_v38 = vpop.f32.mrf.mxu0 }
 0x768   :  { %7196 = vst.msk [vmem:[%s10961_s6 + $0x78] sm:$0xff] %vm50_vm0, %v7178_v39  ;;  %v7173_v56 = vadd.f32 %v7410_v62, %v7172_v38 }
 0x76a   :  { %7195 = vst.msk [vmem:[%s10961_s6 + $0x70] sm:$0xff] %vm50_vm0, %v7173_v56 }

// kernel: tpu_custom_call.1
= control target key start
LH: loop header
LB: loop body
LE: loop exit
PB: predicated region body
PF: predicated region fallthrough
CT: control target
= control target key end

     0   :  { %vm50_vm0 = vcmask 261120   ;;  %vm360_vm1 = vcmask 64512   ;;  %s8508_s13 = smov 120   ;;  %s8510_s14 = smov 104   ;;  %vm3213_vm2 = vcmask 130048   ;;  %vm6782_vm3 = vcmask 130112   ;;  %s10955_s1 = inlined_call_operand.vmem [shape: f32[32,96], index: 1, kind: input, shape index: {}]   ;;  %s10956_s0 = inlined_call_operand.vmem [shape: f32[128,32], index: 0, kind: input, shape index: {}]   ;;  %s10957_s2 = inlined_call_operand.vmem [shape: f32[1,96], index: 2, kind: input, shape index: {}]   ;;  %s10958_s5 = inlined_call_operand.vmem [shape: f32[4,16,16], index: 5, kind: input, shape index: {}]   ;;  %s10959_s3 = inlined_call_operand.vmem [shape: f32[32,32], index: 3, kind: input, shape index: {}]   ;;  %s10960_s4 = inlined_call_operand.vmem [shape: f32[1,32], index: 4, kind: input, shape index: {}]   ;;  %s10961_s6 = inlined_call_operand.vmem [shape: f32[128,32], index: 6, kind: output, shape index: {}]  }
   0x1   :  { %v42_v0 = vld [vmem:[%s10955_s1 + $0x18] sm:$0xff]  ;;  %v41_v1 = vld [vmem:[%s10955_s1 + $0x10] sm:$0xff]  ;;  %v40_v2 = vld [vmem:[%s10955_s1 + $0x8] sm:$0xff]  ;;  %s8511_s15 = smov 64   ;;  %s8513_s8 = smov 16   ;;  %vm6863_vm4 = vcmask 195712  }
   0x2   :  { %7723 = vmatprep.subr.mxu0 %v42_v0  ;;  %8235 = vmatprep.subr.mxu1 %v42_v0  ;;  %v39_v3 = vld [vmem:[%s10955_s1] sm:$0xff]  ;;  %v24_v5 = vld [vmem:[%s10956_s0 + $0x8] sm:$0xff]  ;;  %v25_v7 = vld [vmem:[%s10956_s0 + $0x10] sm:$0xff]  ;;  %vm6944_vm5 = vcmask 261312  }
   0x3   :  { %7724 = vmatpush3.msra.mxu0 %v42_v0  ;;  %8239 = vmatpush3.msra.mxu1 %v42_v0  ;;  %v23_v4 = vld [vmem:[%s10956_s0] sm:$0xff]  ;;  %v32_v8 = vld [vmem:[%s10956_s0 + $0x48] sm:$0xff]  ;;  %v33_v9 = vld [vmem:[%s10956_s0 + $0x50] sm:$0xff] }
   0x4   :  { %7725 = vmatprep.subr.mxu0 %v41_v1  ;;  %8236 = vmatprep.subr.mxu1 %v41_v1  ;;  %v31_v6 = vld [vmem:[%s10956_s0 + $0x40] sm:$0xff]  ;;  %v26_v10 = vld [vmem:[%s10956_s0 + $0x18] sm:$0xff]  ;;  %v28_v14 = vld [vmem:[%s10956_s0 + $0x28] sm:$0xff] }
   0x5   :  { %7726 = vmatpush3.msra.mxu0 %v41_v1  ;;  %8240 = vmatpush3.msra.mxu1 %v41_v1  ;;  %v27_v11 = vld [vmem:[%s10956_s0 + $0x20] sm:$0xff]  ;;  %v34_v12 = vld [vmem:[%s10956_s0 + $0x58] sm:$0xff]  ;;  %v29_v15 = vld [vmem:[%s10956_s0 + $0x30] sm:$0xff] }
   0x6   :  { %7727 = vmatprep.subr.mxu0 %v40_v2  ;;  %8237 = vmatprep.subr.mxu1 %v40_v2  ;;  %v35_v13 = vld [vmem:[%s10956_s0 + $0x60] sm:$0xff]  ;;  %v36_v16 = vld [vmem:[%s10956_s0 + $0x68] sm:$0xff]  ;;  %v37_v17 = vld [vmem:[%s10956_s0 + $0x70] sm:$0xff] }
   0x7   :  { %7728 = vmatpush3.msra.mxu0 %v40_v2  ;;  %8241 = vmatpush3.msra.mxu1 %v40_v2  ;;  %v30_v18 = vld [vmem:[%s10956_s0 + $0x38] sm:$0xff]  ;;  %v8629_v20 = vld [vmem:[%s10957_s2] ss:$0 sm:$0xff]  ;;  %s8509_s2 = smov 112  }
   0x8   :  { %7729 = vmatprep.subr.mxu0 %v39_v3  ;;  %7731 = vmatprep.mubr.msk.f32.mxu0 %vm50_vm0, %v23_v4  ;;  %v38_v19 = vld [vmem:[%s10956_s0 + $0x78] sm:$0xff]  ;;  %s8507_s0 = smov 96  }
   0x9   :  { %7730 = vmatpush3.msra.mxu0 %v39_v3  ;;  %8238 = vmatprep.subr.mxu1 %v39_v3 }
   0xa   :  { %7732 = vmatmul.mubr.msk.f32.vlgmr.msra.gmra.mxu0 %vm50_vm0, %v24_v5  ;;  %8242 = vmatpush3.msra.mxu1 %v39_v3 }
   0xb   :  { %7743 = vmatprep.mubr.msk.f32.mxu1 %vm50_vm0, %v31_v6  ;;  %7734 = vmatprep.mubr.msk.f32.mxu0 %vm50_vm0, %v25_v7 }
   0xc   :  { %7744 = vmatmul.mubr.msk.f32.vlgmr.msra.gmra.mxu1 %vm50_vm0, %v32_v8 }
   0xd   :  { %7746 = vmatprep.mubr.msk.f32.mxu1 %vm50_vm0, %v33_v9 }
   0xe   :  { %7735 = vmatmul.mubr.msk.f32.gmra.mxu0 %vm50_vm0, %v26_v10 }
   0xf   :  { %7737 = vmatprep.mubr.msk.f32.mxu0 %vm50_vm0, %v27_v11 }
  0x10   :  { %7747 = vmatmul.mubr.msk.f32.gmra.mxu1 %vm50_vm0, %v34_v12 }
  0x11   :  { %7749 = vmatprep.mubr.msk.f32.mxu1 %vm50_vm0, %v35_v13 }
  0x12   :  { %7738 = vmatmul.mubr.msk.f32.gmra.mxu0 %vm50_vm0, %v28_v14 }
  0x13   :  { %7740 = vmatprep.mubr.msk.f32.mxu0 %vm50_vm0, %v29_v15 }
  0x14   :  { %7750 = vmatmul.mubr.msk.f32.gmra.mxu1 %vm50_vm0, %v36_v16 }
  0x15   :  { %7752 = vmatprep.mubr.msk.f32.mxu1 %vm50_vm0, %v37_v17 }
  0x16   :  { %7741 = vmatmul.mubr.msk.f32.gmra.mxu0 %vm50_vm0, %v30_v18 }
  0x18   :  { %7753 = vmatmul.mubr.msk.f32.gmra.mxu1 %vm50_vm0, %v38_v19 }
  0xca   :  { %v7733_v21 = vpop.f32.mrf.mxu0 }
  0xcb   :  { %v8632_v22 = vadd.f32 %v7733_v21, %v8629_v20 }
  0xcc   :  { %v165_v23 = vpop.f32.mrf.mxu0  ;;  %v7745_v24 = vpop.f32.mrf.mxu1 }
  0xcd   :  { %v166_v25 = vadd.f32 %v8629_v20, %v165_v23  ;;  %v8636_v26 = vadd.f32 %v7745_v24, %v8629_v20  ;;  %358 = vrot.lane.b32.xlu1 %v8632_v22, %s8507_s0  ;;  %262 = vrot.lane.b32.xlu0 %v8632_v22, %s8508_s13 }
  0xce   :  { %v205_v27 = vpop.f32.mrf.mxu1  ;;  %v7736_v31 = vpop.f32.mrf.mxu0 }
  0xcf   :  { %v206_v28 = vadd.f32 %v8629_v20, %v205_v27  ;;  %7759 = vmatprep.mubr.msk.f32.mxu1 %vm360_vm1, %v166_v25  ;;  %v8674_v32 = vadd.f32 %v7736_v31, %v8629_v20 }
  0xd0   :  { %v7748_v29 = vpop.f32.mrf.mxu1  ;;  %v175_v35 = vpop.f32.mrf.mxu0 }
  0xd1   :  { %7787 = vmatprep.mubr.msk.f32.mxu0 %vm360_vm1, %v206_v28  ;;  %278 = vrot.lane.b32.xlu1 %v8636_v26, %s8508_s13  ;;  %v8667_v30 = vadd.f32 %v7748_v29, %v8629_v20  ;;  %v8689_v36 = vadd.f32 %v8629_v20, %v175_v35 }
  0xd2   :  { %260 = vrot.lane.b32.xlu0 %v166_v25, %s8508_s13  ;;  %v215_v33 = vpop.f32.mrf.mxu1  ;;  %v7739_v37 = vpop.f32.mrf.mxu0 }
  0xd3   :  { %v8683_v34 = vadd.f32 %v8629_v20, %v215_v33  ;;  %v8716_v38 = vadd.f32 %v7739_v37, %v8629_v20 }
  0xd4   :  { %v185_v39 = vpop.f32.mrf.mxu0  ;;  %v7751_v41 = vpop.f32.mrf.mxu1 }
  0xd5   :  { %294 = vrot.lane.b32.xlu1 %v8632_v22, %s8509_s2  ;;  %v8723_v40 = vadd.f32 %v8629_v20, %v185_v39  ;;  %v8735_v44 = vadd.f32 %v7751_v41, %v8629_v20 }
  0xd6   :  { %356 = vrot.lane.b32.xlu0 %v166_v25, %s8507_s0  ;;  %v225_v42 = vpop.f32.mrf.mxu1  ;;  %v7742_v45 = vpop.f32.mrf.mxu0 }
  0xd7   :  { %v226_v43 = vadd.f32 %v8629_v20, %v225_v42  ;;  %v8758_v46 = vadd.f32 %v7742_v45, %v8629_v20 }
  0xd8   :  { %v7754_v47 = vpop.f32.mrf.mxu1  ;;  %v195_v49 = vpop.f32.mrf.mxu0 }
  0xd9   :  { %707 = vrot.lane.b32.xlu1 %v8636_v26, %s8507_s0  ;;  %v8765_v48 = vadd.f32 %v7754_v47, %v8629_v20  ;;  %v8772_v50 = vadd.f32 %v8629_v20, %v195_v49 }
  0xda   :  { %705 = vrot.lane.b32.xlu0 %v206_v28, %s8507_s0  ;;  %v235_v51 = vpop.f32.mrf.mxu1 }
  0xdb   :  { %v8783_v54 = vadd.f32 %v8629_v20, %v235_v51 }
  0xdd   :  { %310 = vrot.lane.b32.xlu1 %v8636_v26, %s8509_s2 }
  0xde   :  { %308 = vrot.lane.b32.xlu0 %v206_v28, %s8509_s2 }
  0xe1   :  { %326 = vrot.lane.b32.xlu1 %v8632_v22, %s8510_s14 }
  0xe2   :  { %324 = vrot.lane.b32.xlu0 %v166_v25, %s8510_s14 }
  0xe5   :  { %342 = vrot.lane.b32.xlu1 %v8636_v26, %s8510_s14 }
  0xe6   :  { %340 = vrot.lane.b32.xlu0 %v206_v28, %s8510_s14 }
  0xe9   :  { %3792 = vrot.lane.b32.xlu1 %v8632_v22, %s8511_s15 }
  0xea   :  { %4138 = vrot.lane.b32.xlu0 %v206_v28, %s8511_s15 }
  0xed   :  { %4140 = vrot.lane.b32.xlu1 %v8636_v26, %s8511_s15 }
  0xee   :  { %282 = vrot.lane.b32.xlu0 %v8667_v30, %s8508_s13 }
  0xf1   :  { %276 = vrot.lane.b32.xlu1 %v206_v28, %s8508_s13 }
  0xf2   :  { %298 = vrot.lane.b32.xlu0 %v8674_v32, %s8509_s2 }
  0xf5   :  { %292 = vrot.lane.b32.xlu1 %v166_v25, %s8509_s2 }
  0xf6   :  { %3879 = vrot.lane.b32.xlu0 %v8674_v32, %s8511_s15 }
  0xf9   :  { %3790 = vrot.lane.b32.xlu1 %v166_v25, %s8511_s15 }
  0xfa   :  { %280 = vrot.lane.b32.xlu0 %v8683_v34, %s8508_s13 }
  0xfd   :  { %266 = vrot.lane.b32.xlu1 %v8674_v32, %s8508_s13 }
  0xfe   :  { %444 = vrot.lane.b32.xlu0 %v8689_v36, %s8507_s0 }
 0x101   :  { %446 = vrot.lane.b32.xlu1 %v8674_v32, %s8507_s0 }
 0x102   :  { %296 = vrot.lane.b32.xlu0 %v8689_v36, %s8509_s2 }
 0x105   :  { %794 = vrot.lane.b32.xlu1 %v8667_v30, %s8507_s0 }
 0x106   :  { %792 = vrot.lane.b32.xlu0 %v8683_v34, %s8507_s0 }
 0x109   :  { %314 = vrot.lane.b32.xlu1 %v8667_v30, %s8509_s2 }
 0x10a   :  { %312 = vrot.lane.b32.xlu0 %v8683_v34, %s8509_s2 }
 0x10d   :  { %330 = vrot.lane.b32.xlu1 %v8674_v32, %s8510_s14 }
 0x10e   :  { %328 = vrot.lane.b32.xlu0 %v8689_v36, %s8510_s14 }
 0x111   :  { %346 = vrot.lane.b32.xlu1 %v8667_v30, %s8510_s14 }
 0x112   :  { %344 = vrot.lane.b32.xlu0 %v8683_v34, %s8510_s14 }
 0x115   :  { %4227 = vrot.lane.b32.xlu1 %v8667_v30, %s8511_s15 }
 0x116   :  { %270 = vrot.lane.b32.xlu0 %v8716_v38, %s8508_s13 }
 0x119   :  { %264 = vrot.lane.b32.xlu1 %v8689_v36, %s8508_s13 }
 0x11a   :  { %531 = vrot.lane.b32.xlu0 %v8723_v40, %s8507_s0 }
 0x11d   :  { %3877 = vrot.lane.b32.xlu1 %v8689_v36, %s8511_s15 }
 0x11e   :  { %300 = vrot.lane.b32.xlu0 %v8723_v40, %s8509_s2 }
 0x121   :  { %4225 = vrot.lane.b32.xlu1 %v8683_v34, %s8511_s15 }
 0x122   :  { %879 = vrot.lane.b32.xlu0 %v226_v43, %s8507_s0 }
 0x125   :  { %286 = vrot.lane.b32.xlu1 %v8735_v44, %s8508_s13 }
 0x126   :  { %316 = vrot.lane.b32.xlu0 %v226_v43, %s8509_s2 }
 0x129   :  { %533 = vrot.lane.b32.xlu1 %v8716_v38, %s8507_s0 }
 0x12a   :  { %332 = vrot.lane.b32.xlu0 %v8723_v40, %s8510_s14 }
 0x12d   :  { %302 = vrot.lane.b32.xlu1 %v8716_v38, %s8509_s2 }
 0x12e   :  { %348 = vrot.lane.b32.xlu0 %v226_v43, %s8510_s14 }
 0x131   :  { %881 = vrot.lane.b32.xlu1 %v8735_v44, %s8507_s0 }
 0x132   :  { %3964 = vrot.lane.b32.xlu0 %v8723_v40, %s8511_s15 }
 0x135   :  { %318 = vrot.lane.b32.xlu1 %v8735_v44, %s8509_s2 }
 0x136   :  { %4312 = vrot.lane.b32.xlu0 %v226_v43, %s8511_s15 }
 0x139   :  { %334 = vrot.lane.b32.xlu1 %v8716_v38, %s8510_s14 }
 0x13a   :  { %274 = vrot.lane.b32.xlu0 %v8758_v46, %s8508_s13 }
 0x13d   :  { %350 = vrot.lane.b32.xlu1 %v8735_v44, %s8510_s14 }
 0x13e   :  { %290 = vrot.lane.b32.xlu0 %v8765_v48, %s8508_s13 }
 0x13f   :  { %v359_v52 = vpop.permute.xlu1 %358  ;;  %v8774_v53 = vpop.permute.xlu0 %262 }
 0x140   :  { %7755 = vmatprep.subr.msk.mxu1 %vm360_vm1, %v359_v52 }
 0x141   :  { %7756 = vmatpush3.xpose.msk.msra.mxu1 %vm360_vm1, %v359_v52  ;;  %3966 = vrot.lane.b32.xlu1 %v8716_v38, %s8511_s15 }
 0x142   :  { %272 = vrot.lane.b32.xlu0 %v8772_v50, %s8508_s13 }
 0x143   :  { %v8785_v55 = vpop.permute.xlu1 %278 }
 0x144   :  { %v8787_v56 = vpop.permute.xlu0 %260 }
 0x145   :  { %4314 = vrot.lane.b32.xlu1 %v8735_v44, %s8511_s15 }
 0x146   :  { %288 = vrot.lane.b32.xlu0 %v8783_v54, %s8508_s13 }
 0x147   :  { %v8793_v57 = vpop.permute.xlu1 %294 }
 0x148   :  { %v357_v58 = vpop.permute.xlu0 %356 }
 0x149   :  { %7757 = vmatprep.subr.msk.mxu1 %vm360_vm1, %v357_v58  ;;  %268 = vrot.lane.b32.xlu1 %v8723_v40, %s8508_s13 }
 0x14a   :  { %618 = vrot.lane.b32.xlu0 %v8772_v50, %s8507_s0  ;;  %7758 = vmatpush3.xpose.msk.msra.mxu1 %vm360_vm1, %v357_v58 }
 0x14b   :  { %v708_v59 = vpop.permute.xlu1 %707 }
 0x14c   :  { %v706_v60 = vpop.permute.xlu0 %705  ;;  %7783 = vmatprep.subr.msk.mxu0 %vm360_vm1, %v708_v59 }
 0x14d   :  { %7760 = vmatmul.mubr.msk.f32.vlgmr.msra.gmra.mxu1 %vm360_vm1, %v8632_v22  ;;  %7784 = vmatpush3.xpose.msk.msra.mxu0 %vm360_vm1, %v708_v59 }
 0x14e   :  { %284 = vrot.lane.b32.xlu1 %v226_v43, %s8508_s13  ;;  %304 = vrot.lane.b32.xlu0 %v8772_v50, %s8509_s2 }
 0x14f   :  { %7766 = vmatprep.mubr.msk.f32.mxu1 %vm360_vm1, %v8689_v36  ;;  %7785 = vmatprep.subr.msk.mxu0 %vm360_vm1, %v706_v60  ;;  %v8811_v61 = vpop.permute.xlu1 %310 }
 0x150   :  { %v8813_v62 = vpop.permute.xlu0 %308 }
 0x151   :  { %11044 = vst [vmem:[#allocation3_spill] sm:$0xff] %v8813_v62  ;;  %7786 = vmatpush3.xpose.msk.msra.mxu0 %vm360_vm1, %v706_v60 }
 0x152   :  { %620 = vrot.lane.b32.xlu1 %v8758_v46, %s8507_s0  ;;  %966 = vrot.lane.b32.xlu0 %v8783_v54, %s8507_s0 }
 0x153   :  { %v8820_v63 = vpop.permute.xlu1 %326 }
 0x154   :  { %11045 = vst [vmem:[#allocation4_spill] sm:$0xff] %v8820_v63  ;;  %v8822_v0 = vpop.permute.xlu0 %324  ;;  %7788 = vmatmul.mubr.msk.f32.vlgmr.msra.gmra.mxu0 %vm360_vm1, %v8636_v26 }
 0x155   :  { %11046 = vst [vmem:[#allocation5_spill] sm:$0xff] %v8822_v0  ;;  %7801 = vmatprep.mubr.msk.f32.mxu0 %vm360_vm1, %v226_v43 }
 0x156   :  { %306 = vrot.lane.b32.xlu1 %v8758_v46, %s8509_s2  ;;  %320 = vrot.lane.b32.xlu0 %v8783_v54, %s8509_s2 }
 0x157   :  { %v8831_v1 = vpop.permute.xlu1 %342 }
 0x158   :  { %11047 = vst [vmem:[#allocation6_spill] sm:$0xff] %v8831_v1  ;;  %v8833_v2 = vpop.permute.xlu0 %340 }
 0x159   :  { %11048 = vst [vmem:[#allocation7_spill] sm:$0xff] %v8833_v2 }
 0x15a   :  { %968 = vrot.lane.b32.xlu1 %v8765_v48, %s8507_s0  ;;  %336 = vrot.lane.b32.xlu0 %v8772_v50, %s8510_s14 }
 0x15b   :  { %v8839_v3 = vpop.permute.xlu1 %3792 }
 0x15c   :  { %v8841_v4 = vpop.permute.xlu0 %4138 }
 0x15d   :  { %11049 = vst [vmem:[#allocation8_spill] sm:$0xff] %v8841_v4 }
 0x15e   :  { %322 = vrot.lane.b32.xlu1 %v8765_v48, %s8509_s2  ;;  %352 = vrot.lane.b32.xlu0 %v8783_v54, %s8510_s14 }
 0x15f   :  { %v8847_v5 = vpop.permute.xlu1 %4140 }
 0x160   :  { %11050 = vst [vmem:[#allocation9_spill] sm:$0xff] %v8847_v5  ;;  %v8849_v6 = vpop.permute.xlu0 %282 }
 0x162   :  { %338 = vrot.lane.b32.xlu1 %v8758_v46, %s8510_s14  ;;  %2099 = vrot.lane.b32.xlu0 %v8811_v61, %s8507_s0 }
 0x163   :  { %v8855_v7 = vpop.permute.xlu1 %276 }
 0x164   :  { %v8857_v8 = vpop.permute.xlu0 %298 }
 0x166   :  { %354 = vrot.lane.b32.xlu1 %v8765_v48, %s8510_s14  ;;  %2447 = vrot.lane.b32.xlu0 %v8820_v63, %s8507_s0 }
 0x167   :  { %v8863_v9 = vpop.permute.xlu1 %292 }
 0x168   :  { %v8865_v10 = vpop.permute.xlu0 %3879 }
 0x169   :  { %11051 = vst [vmem:[#allocation10_spill] sm:$0xff] %v8865_v10 }
 0x16a   :  { %4053 = vrot.lane.b32.xlu1 %v8758_v46, %s8511_s15  ;;  %2795 = vrot.lane.b32.xlu0 %v8831_v1, %s8507_s0 }
 0x16b   :  { %v8871_v11 = vpop.permute.xlu1 %3790 }
 0x16c   :  { %11052 = vst [vmem:[#allocation11_spill] sm:$0xff] %v8871_v11  ;;  %v8873_v12 = vpop.permute.xlu0 %280 }
 0x16e   :  { %4401 = vrot.lane.b32.xlu1 %v8765_v48, %s8511_s15  ;;  %1053 = vrot.lane.b32.xlu0 %v8787_v56, %s8507_s0 }
 0x16f   :  { %v8879_v13 = vpop.permute.xlu1 %266 }
 0x170   :  { %v445_v14 = vpop.permute.xlu0 %444 }
 0x172   :  { %4051 = vrot.lane.b32.xlu1 %v8772_v50, %s8511_s15  ;;  %1401 = vrot.lane.b32.xlu0 %v8855_v7, %s8507_s0 }
 0x173   :  { %v447_v15 = vpop.permute.xlu1 %446 }
 0x174   :  { %v8885_v16 = vpop.permute.xlu0 %296  ;;  %7762 = vmatprep.subr.msk.mxu1 %vm360_vm1, %v447_v15 }
 0x175   :  { %7763 = vmatpush3.xpose.msk.msra.mxu1 %vm360_vm1, %v447_v15 }
 0x176   :  { %1055 = vrot.lane.b32.xlu1 %v8774_v53, %s8507_s0  ;;  %1749 = vrot.lane.b32.xlu0 %v8863_v9, %s8507_s0 }
 0x177   :  { %7764 = vmatprep.subr.msk.mxu1 %vm360_vm1, %v445_v14  ;;  %v8894_v17 = vpop.permute.xlu1 %794 }
 0x178   :  { %v8896_v18 = vpop.permute.xlu0 %792 }
 0x179   :  { %7765 = vmatpush3.xpose.msk.msra.mxu1 %vm360_vm1, %v445_v14 }
 0x17a   :  { %1403 = vrot.lane.b32.xlu1 %v8785_v55, %s8507_s0 }
 0x17b   :  { %v8901_v19 = vpop.permute.xlu1 %314 }
 0x17c   :  { %11053 = vst [vmem:[#allocation12_spill] sm:$0xff] %v8901_v19  ;;  %v8903_v20 = vpop.permute.xlu0 %312  ;;  %2186 = vrot.lane.b32.xlu0 %v8901_v19, %s8507_s0  ;;  %7767 = vmatmul.mubr.msk.f32.vlgmr.msra.gmra.mxu1 %vm360_vm1, %v8674_v32 }
 0x17d   :  { %11054 = vst [vmem:[#allocation13_spill] sm:$0xff] %v8903_v20  ;;  %7773 = vmatprep.mubr.msk.f32.mxu1 %vm360_vm1, %v8723_v40 }
 0x17e   :  { %1751 = vrot.lane.b32.xlu1 %v8793_v57, %s8507_s0 }
 0x17f   :  { %v8913_v21 = vpop.permute.xlu1 %330 }
 0x180   :  { %11055 = vst [vmem:[#allocation14_spill] sm:$0xff] %v8913_v21  ;;  %v8915_v22 = vpop.permute.xlu0 %328  ;;  %2534 = vrot.lane.b32.xlu0 %v8913_v21, %s8507_s0 }
 0x181   :  { %11056 = vst [vmem:[#allocation15_spill] sm:$0xff] %v8915_v22 }
 0x182   :  { %4488 = vrot.lane.b32.xlu1 %v8774_v53, %s8511_s15 }
 0x183   :  { %v8921_v23 = vpop.permute.xlu1 %346 }
 0x184   :  { %11057 = vst [vmem:[#allocation16_spill] sm:$0xff] %v8921_v23  ;;  %v8923_v24 = vpop.permute.xlu0 %344  ;;  %2882 = vrot.lane.b32.xlu0 %v8921_v23, %s8507_s0 }
 0x185   :  { %11058 = vst [vmem:[#allocation17_spill] sm:$0xff] %v8923_v24 }
 0x186   :  { %2097 = vrot.lane.b32.xlu1 %v8813_v62, %s8507_s0 }
 0x187   :  { %v8929_v25 = vpop.permute.xlu1 %4227 }
 0x188   :  { %11059 = vst [vmem:[#allocation18_spill] sm:$0xff] %v8929_v25  ;;  %v8931_v26 = vpop.permute.xlu0 %270 }
 0x18a   :  { %2445 = vrot.lane.b32.xlu1 %v8822_v0, %s8507_s0 }
 0x18b   :  { %v8935_v27 = vpop.permute.xlu1 %264 }
 0x18c   :  { %v532_v28 = vpop.permute.xlu0 %531  ;;  %1140 = vrot.lane.b32.xlu0 %v8935_v27, %s8507_s0 }
 0x18e   :  { %2793 = vrot.lane.b32.xlu1 %v8833_v2, %s8507_s0 }
 0x18f   :  { %v8941_v29 = vpop.permute.xlu1 %3877 }
 0x190   :  { %11060 = vst [vmem:[#allocation19_spill] sm:$0xff] %v8941_v29  ;;  %v8943_v31 = vpop.permute.xlu0 %300  ;;  %1488 = vrot.lane.b32.xlu0 %v8873_v12, %s8507_s0 }
 0x192   :  { %1142 = vrot.lane.b32.xlu1 %v8879_v13, %s8507_s0 }
 0x193   :  { %v8949_v32 = vpop.permute.xlu1 %4225 }
 0x194   :  { %11061 = vst [vmem:[#allocation20_spill] sm:$0xff] %v8949_v32  ;;  %v880_v33 = vpop.permute.xlu0 %879 }
 0x196   :  { %1490 = vrot.lane.b32.xlu1 %v8849_v6, %s8507_s0 }
 0x197   :  { %v8953_v35 = vpop.permute.xlu1 %286 }
 0x198   :  { %v8955_v36 = vpop.permute.xlu0 %316 }
 0x199   :  { %11062 = vst [vmem:[#allocation21_spill] sm:$0xff] %v8955_v36 }
 0x19a   :  { %1838 = vrot.lane.b32.xlu1 %v8857_v8, %s8507_s0 }
 0x19b   :  { %v534_v37 = vpop.permute.xlu1 %533 }
 0x19c   :  { %v8959_v39 = vpop.permute.xlu0 %332  ;;  %7769 = vmatprep.subr.msk.mxu1 %vm360_vm1, %v534_v37 }
 0x19d   :  { %11063 = vst [vmem:[#allocation22_spill] sm:$0xff] %v8959_v39  ;;  %7770 = vmatpush3.xpose.msk.msra.mxu1 %vm360_vm1, %v534_v37 }
 0x19e   :  { %1836 = vrot.lane.b32.xlu1 %v8885_v16, %s8507_s0  ;;  %7771 = vmatprep.subr.msk.mxu1 %vm360_vm1, %v532_v28 }
 0x19f   :  { %v8966_v40 = vpop.permute.xlu1 %302 }
 0x1a0   :  { %v8968_v41 = vpop.permute.xlu0 %348  ;;  %1925 = vrot.lane.b32.xlu0 %v8966_v40, %s8507_s0 }
 0x1a1   :  { %11064 = vst [vmem:[#allocation23_spill] sm:$0xff] %v8968_v41  ;;  %7772 = vmatpush3.xpose.msk.msra.mxu1 %vm360_vm1, %v532_v28 }
 0x1a2   :  { %2184 = vrot.lane.b32.xlu1 %v8903_v20, %s8507_s0 }
 0x1a3   :  { %v882_v42 = vpop.permute.xlu1 %881 }
 0x1a4   :  { %v8975_v43 = vpop.permute.xlu0 %3964  ;;  %7774 = vmatmul.mubr.msk.f32.vlgmr.msra.gmra.mxu1 %vm360_vm1, %v8716_v38  ;;  %7797 = vmatprep.subr.msk.mxu0 %vm360_vm1, %v882_v42 }
 0x1a5   :  { %11065 = vst [vmem:[#allocation24_spill] sm:$0xff] %v8975_v43  ;;  %7798 = vmatpush3.xpose.msk.msra.mxu0 %vm360_vm1, %v882_v42  ;;  %7780 = vmatprep.mubr.msk.f32.mxu1 %vm360_vm1, %v8772_v50 }
 0x1a6   :  { %2532 = vrot.lane.b32.xlu1 %v8915_v22, %s8507_s0  ;;  %7799 = vmatprep.subr.msk.mxu0 %vm360_vm1, %v880_v33 }
 0x1a7   :  { %v8986_v45 = vpop.permute.xlu1 %318 }
 0x1a8   :  { %11066 = vst [vmem:[#allocation25_spill] sm:$0xff] %v8986_v45  ;;  %v8988_v47 = vpop.permute.xlu0 %4312  ;;  %2273 = vrot.lane.b32.xlu0 %v8986_v45, %s8507_s0 }
 0x1a9   :  { %11067 = vst [vmem:[#allocation26_spill] sm:$0xff] %v8988_v47  ;;  %7800 = vmatpush3.xpose.msk.msra.mxu0 %vm360_vm1, %v880_v33 }
 0x1aa   :  { %2880 = vrot.lane.b32.xlu1 %v8923_v24, %s8507_s0 }
 0x1ab   :  { %v8995_v38 = vpop.permute.xlu1 %334 }
 0x1ac   :  { %11068 = vst [vmem:[#allocation27_spill] sm:$0xff] %v8995_v38  ;;  %v8997_v49 = vpop.permute.xlu0 %274  ;;  %2621 = vrot.lane.b32.xlu0 %v8995_v38, %s8507_s0  ;;  %7802 = vmatmul.mubr.msk.f32.vlgmr.msra.gmra.mxu0 %vm360_vm1, %v8735_v44 }
 0x1ad   :  { %7815 = vmatprep.mubr.msk.f32.mxu0 %vm360_vm1, %v8787_v56 }
 0x1ae   :  { %1229 = vrot.lane.b32.xlu1 %v8931_v26, %s8507_s0 }
 0x1af   :  { %v9007_v50 = vpop.permute.xlu1 %350 }
 0x1b0   :  { %11069 = vst [vmem:[#allocation28_spill] sm:$0xff] %v9007_v50  ;;  %v9009_v51 = vpop.permute.xlu0 %290  ;;  %2969 = vrot.lane.b32.xlu0 %v9007_v50, %s8507_s0 }
 0x1b2   :  { %1577 = vrot.lane.b32.xlu1 %v8953_v35, %s8507_s0 }
 0x1b3   :  { %v9015_v52 = vpop.permute.xlu1 %3966 }
 0x1b4   :  { %11070 = vst [vmem:[#allocation29_spill] sm:$0xff] %v9015_v52  ;;  %v9017_v58 = vpop.permute.xlu0 %272 }
 0x1b6   :  { %1923 = vrot.lane.b32.xlu1 %v8943_v31, %s8507_s0 }
 0x1b7   :  { %v9021_v44 = vpop.permute.xlu1 %4314 }
 0x1b8   :  { %11071 = vst [vmem:[#allocation30_spill] sm:$0xff] %v9021_v44  ;;  %v9023_v59 = vpop.permute.xlu0 %288 }
 0x1ba   :  { %2271 = vrot.lane.b32.xlu1 %v8955_v36, %s8507_s0 }
 0x1bb   :  { %v9027_v60 = vpop.permute.xlu1 %268 }
 0x1bc   :  { %v619_v14 = vpop.permute.xlu0 %618  ;;  %1227 = vrot.lane.b32.xlu0 %v9027_v60, %s8507_s0 }
 0x1be   :  { %2619 = vrot.lane.b32.xlu1 %v8959_v39, %s8507_s0 }
 0x1c0   :  { %v9033_v15 = vpop.permute.xlu1 %284  ;;  %v9035_v28 = vpop.permute.xlu0 %304 }
 0x1c1   :  { %11072 = vst [vmem:[#allocation31_spill] sm:$0xff] %v9035_v28  ;;  %1575 = vrot.lane.b32.xlu0 %v9033_v15, %s8507_s0 }
 0x1c2   :  { %2967 = vrot.lane.b32.xlu1 %v8968_v41, %s8507_s0 }
 0x1c4   :  { %v621_v33 = vpop.permute.xlu1 %620  ;;  %v967_v37 = vpop.permute.xlu0 %966 }
 0x1c5   :  { %7776 = vmatprep.subr.msk.mxu1 %vm360_vm1, %v621_v33 }
 0x1c6   :  { %1316 = vrot.lane.b32.xlu1 %v8997_v49, %s8507_s0  ;;  %7777 = vmatpush3.xpose.msk.msra.mxu1 %vm360_vm1, %v621_v33 }
 0x1c7   :  { %7778 = vmatprep.subr.msk.mxu1 %vm360_vm1, %v619_v14 }
 0x1c8   :  { %v9046_v42 = vpop.permute.xlu1 %306  ;;  %v9048_v32 = vpop.permute.xlu0 %320 }
 0x1c9   :  { %11073 = vst [vmem:[#allocation32_spill] sm:$0xff] %v9046_v42  ;;  %11074 = vst [vmem:[#allocation33_spill] sm:$0xff] %v9048_v32  ;;  %2012 = vrot.lane.b32.xlu0 %v9046_v42, %s8507_s0 }
 0x1ca   :  { %1664 = vrot.lane.b32.xlu1 %v9009_v51, %s8507_s0  ;;  %7779 = vmatpush3.xpose.msk.msra.mxu1 %vm360_vm1, %v619_v14 }
 0x1cb   :  { %7790 = vmatprep.subr.msk.mxu1 %vm360_vm1, %v8894_v17 }
 0x1cc   :  { %v969_v47 = vpop.permute.xlu1 %968  ;;  %v9057_v44 = vpop.permute.xlu0 %336 }
 0x1cd   :  { %11075 = vst [vmem:[#allocation34_spill] sm:$0xff] %v9057_v44  ;;  %7781 = vmatmul.mubr.msk.f32.vlgmr.msra.gmra.mxu1 %vm360_vm1, %v8758_v46 }
 0x1ce   :  { %2010 = vrot.lane.b32.xlu1 %v9035_v28, %s8507_s0  ;;  %7791 = vmatpush3.xpose.msk.msra.mxu1 %vm360_vm1, %v8894_v17 }
 0x1cf   :  { %7794 = vmatprep.mubr.msk.f32.mxu1 %vm360_vm1, %v8683_v34  ;;  %7792 = vmatprep.subr.msk.mxu1 %vm360_vm1, %v8896_v18 }
 0x1d0   :  { %v9069_v14 = vpop.permute.xlu1 %322  ;;  %v9071_v33 = vpop.permute.xlu0 %352 }
 0x1d1   :  { %11076 = vst [vmem:[#allocation35_spill] sm:$0xff] %v9069_v14  ;;  %11077 = vst [vmem:[#allocation36_spill] sm:$0xff] %v9071_v33  ;;  %2360 = vrot.lane.b32.xlu0 %v9069_v14, %s8507_s0 }
 0x1d2   :  { %2358 = vrot.lane.b32.xlu1 %v9048_v32, %s8507_s0  ;;  %7793 = vmatpush3.xpose.msk.msra.mxu1 %vm360_vm1, %v8896_v18 }
 0x1d3   :  { %7804 = vmatprep.subr.msk.mxu1 %vm360_vm1, %v969_v47 }
 0x1d4   :  { %v9080_v46 = vpop.permute.xlu1 %338  ;;  %v9082_v34 = vpop.permute.xlu0 %2099 }
 0x1d5   :  { %11078 = vst [vmem:[#allocation37_spill] sm:$0xff] %v9080_v46  ;;  %2708 = vrot.lane.b32.xlu0 %v9080_v46, %s8507_s0  ;;  %7795 = vmatmul.mubr.msk.f32.vlgmr.msra.gmra.mxu1 %vm360_vm1, %v8667_v30 }
 0x1d6   :  { %2706 = vrot.lane.b32.xlu1 %v9057_v44, %s8507_s0  ;;  %7805 = vmatpush3.xpose.msk.msra.mxu1 %vm360_vm1, %v969_v47 }
 0x1d7   :  { %7808 = vmatprep.mubr.msk.f32.mxu1 %vm360_vm1, %v8783_v54  ;;  %7806 = vmatprep.subr.msk.mxu1 %vm360_vm1, %v967_v37 }
 0x1d8   :  { %v9094_v17 = vpop.permute.xlu1 %354  ;;  %v9098_v18 = vpop.permute.xlu0 %2447 }
 0x1d9   :  { %11079 = vst [vmem:[#allocation38_spill] sm:$0xff] %v9094_v17  ;;  %3056 = vrot.lane.b32.xlu0 %v9094_v17, %s8507_s0 }
 0x1da   :  { %3054 = vrot.lane.b32.xlu1 %v9071_v33, %s8507_s0  ;;  %7807 = vmatpush3.xpose.msk.msra.mxu1 %vm360_vm1, %v967_v37 }
 0x1dc   :  { %v9103_v30 = vpop.permute.xlu1 %4053  ;;  %v9113_v47 = vpop.permute.xlu0 %2795 }
 0x1dd   :  { %11080 = vst [vmem:[#allocation39_spill] sm:$0xff] %v9103_v30  ;;  %1314 = vrot.lane.b32.xlu0 %v9017_v58, %s8507_s0  ;;  %7809 = vmatmul.mubr.msk.f32.vlgmr.msra.gmra.mxu1 %vm360_vm1, %v8765_v48 }
 0x1de   :  { %4399 = vrot.lane.b32.xlu1 %v8783_v54, %s8511_s15  ;;  %7822 = vmatprep.mubr.msk.f32.mxu1 %vm360_vm1, %v8935_v27 }
 0x1e0   :  { %v9115_v4 = vpop.permute.xlu1 %4401  ;;  %v1054_v48 = vpop.permute.xlu0 %1053 }
 0x1e1   :  { %11081 = vst [vmem:[#allocation40_spill] sm:$0xff] %v9115_v4  ;;  %1662 = vrot.lane.b32.xlu0 %v9023_v59, %s8507_s0 }
 0x1e2   :  { %4575 = vrot.lane.b32.xlu1 %v8879_v13, %s8511_s15 }
 0x1e4   :  { %v9121_v37 = vpop.permute.xlu1 %4051  ;;  %v9134_v4 = vpop.permute.xlu0 %1401 }
 0x1e5   :  { %11082 = vst [vmem:[#allocation41_spill] sm:$0xff] %v9121_v37  ;;  %4486 = vrot.lane.b32.xlu0 %v8787_v56, %s8511_s15 }
 0x1e6   :  { %4662 = vrot.lane.b32.xlu1 %v8931_v26, %s8511_s15 }
 0x1e8   :  { %v1056_v54 = vpop.permute.xlu1 %1055 }
 0x1e9   :  { %7811 = vmatprep.subr.msk.mxu0 %vm360_vm1, %v1056_v54  ;;  %4660 = vrot.lane.b32.xlu0 %v9027_v60, %s8511_s15 }
 0x1ea   :  { %7812 = vmatpush3.xpose.msk.msra.mxu0 %vm360_vm1, %v1056_v54  ;;  %4573 = vrot.lane.b32.xlu1 %v8935_v27, %s8511_s15  ;;  %v9149_v27 = vpop.permute.xlu0 %1749 }
 0x1eb   :  { %7813 = vmatprep.subr.msk.mxu0 %vm360_vm1, %v1054_v48 }
 0x1ec   :  { %v9136_v56 = vpop.permute.xlu1 %1403 }
 0x1ed   :  { %4747 = vrot.lane.b32.xlu0 %v9017_v58, %s8511_s15 }
 0x1ee   :  { %4749 = vrot.lane.b32.xlu1 %v8997_v49, %s8511_s15  ;;  %7814 = vmatpush3.xpose.msk.msra.mxu0 %vm360_vm1, %v1054_v48  ;;  %v9157_v37 = vpop.permute.xlu0 %2186 }
 0x1f0   :  { %v9143_v25 = vpop.permute.xlu1 %1751 }
 0x1f1   :  { %4923 = vrot.lane.b32.xlu0 %v8849_v6, %s8511_s15  ;;  %7816 = vmatmul.mubr.msk.f32.vlgmr.msra.gmra.mxu0 %vm360_vm1, %v8774_v53 }
 0x1f2   :  { %4836 = vrot.lane.b32.xlu1 %v8785_v55, %s8511_s15  ;;  %7829 = vmatprep.mubr.msk.f32.mxu0 %vm360_vm1, %v9027_v60  ;;  %v9165_v53 = vpop.permute.xlu0 %2534 }
 0x1f4   :  { %v9155_v54 = vpop.permute.xlu1 %4488 }
 0x1f5   :  { %11083 = vst [vmem:[#allocation42_spill] sm:$0xff] %v9155_v54 }
 0x1f6   :  { %4834 = vrot.lane.b32.xlu1 %v8855_v7, %s8511_s15  ;;  %v9171_v30 = vpop.permute.xlu0 %2882 }
 0x1f7   :  { %11084 = vst [vmem:[#allocation43_spill] sm:$0xff] %v9171_v30 }
 0x1f8   :  { %v9161_v48 = vpop.permute.xlu1 %2097 }
 0x1fa   :  { %5010 = vrot.lane.b32.xlu1 %v8953_v35, %s8511_s15 }
 0x1fc   :  { %v9167_v5 = vpop.permute.xlu1 %2445 }
 0x1fe   :  { %v1141_v54 = vpop.permute.xlu0 %1140 }
 0x200   :  { %v9169_v43 = vpop.permute.xlu1 %2793 }
 0x204   :  { %v1143_v60 = vpop.permute.xlu1 %1142 }
 0x205   :  { %7818 = vmatprep.subr.msk.mxu1 %vm360_vm1, %v1143_v60 }
 0x206   :  { %7819 = vmatpush3.xpose.msk.msra.mxu1 %vm360_vm1, %v1143_v60  ;;  %v9190_v60 = vld [vmem:[%s10958_s5 + $0x8] sm:$0xff] }
 0x207   :  { %7820 = vmatprep.subr.msk.mxu1 %vm360_vm1, %v1141_v54 }
 0x208   :  { %v9176_v29 = vpop.permute.xlu1 %1490 }
 0x20a   :  { %7821 = vmatpush3.xpose.msk.msra.mxu1 %vm360_vm1, %v1141_v54  ;;  %v9195_v54 = vld [vmem:[%s10958_s5] sm:$0xff] }
 0x20c   :  { %v9179_v17 = vpop.permute.xlu1 %1838 }
 0x20d   :  { %7823 = vmatmul.mubr.msk.f32.vlgmr.msra.gmra.mxu1 %vm360_vm1, %v8879_v13  ;;  %v7761_v10 = vpop.f32.mrf.mxu1 }
 0x20e   :  { %7836 = vmatprep.mubr.msk.f32.mxu1 %vm360_vm1, %v9017_v58  ;;  %v9202_v58 = vpop.permute.xlu0 %1488  ;;  %v9212_v11 = vadd.f32 %v7761_v10, %v9190_v60 }
 0x20f   :  { %v435_v23 = vpop.f32.mrf.mxu1 }
 0x210   :  { %v9185_v33 = vpop.permute.xlu1 %1836  ;;  %v9205_v30 = vadd.f32 %v9195_v54, %v435_v23  ;;  %11088 = vst [vmem:[#allocation47_spill] sm:$0xff] %v9212_v11  ;;  %v3217_v23 = vsel %vm3213_vm2, %v9212_v11, -inf }
 0x212   :  { %11086 = vst [vmem:[#allocation45_spill] sm:$0xff] %v9205_v30  ;;  %v1926_v22 = vpop.permute.xlu0 %1925  ;;  %v3214_v14 = vsel %vm3213_vm2, %v9205_v30, -inf }
 0x214   :  { %v9197_v24 = vpop.permute.xlu1 %2184  ;;  %v7789_v13 = vpop.f32.mrf.mxu0 }
 0x215   :  { %v9200_v46 = vadd.f32 %v7789_v13, %v9190_v60 }
 0x216   :  { %v783_v21 = vpop.f32.mrf.mxu0 }
 0x217   :  { %11085 = vst [vmem:[#allocation44_spill] sm:$0xff] %v9200_v46  ;;  %v3241_v44 = vsel %vm3213_vm2, %v9200_v46, -inf  ;;  %v9215_v13 = vadd.f32 %v9195_v54, %v783_v21 }
 0x218   :  { %v9209_v52 = vpop.permute.xlu1 %2532  ;;  %3242 = vmax.xlane.f32.xlu0 %v3241_v44 }
 0x219   :  { %11087 = vst [vmem:[#allocation46_spill] sm:$0xff] %v9209_v52  ;;  %v3238_v10 = vsel %vm3213_vm2, %v9215_v13, -inf }
 0x21a   :  { %v9223_v46 = vpop.permute.xlu0 %2273 }
 0x21c   :  { %v9219_v50 = vpop.permute.xlu1 %2880  ;;  %3215 = vmax.xlane.f32.xlu0 %v3214_v14 }
 0x21d   :  { %11089 = vst [vmem:[#allocation48_spill] sm:$0xff] %v9219_v50 }
 0x21e   :  { %3218 = vmax.xlane.f32.xlu1 %v3217_v23  ;;  %v9229_v21 = vpop.permute.xlu0 %2621 }
 0x220   :  { %v1230_v44 = vpop.permute.xlu1 %1229  ;;  %3239 = vmax.xlane.f32.xlu0 %v3238_v10 }
 0x221   :  { %7825 = vmatprep.subr.msk.mxu0 %vm360_vm1, %v1230_v44 }
 0x222   :  { %7826 = vmatpush3.xpose.msk.msra.mxu0 %vm360_vm1, %v1230_v44  ;;  %v9231_v14 = vpop.permute.xlu0 %2969 }
 0x224   :  { %v1578_v30 = vpop.permute.xlu1 %1577 }
 0x228   :  { %v1924_v50 = vpop.permute.xlu1 %1923 }
 0x22c   :  { %v9233_v52 = vpop.permute.xlu1 %2271 }
 0x22e   :  { %v1228_v11 = vpop.permute.xlu0 %1227 }
 0x22f   :  { %7827 = vmatprep.subr.msk.mxu0 %vm360_vm1, %v1228_v11 }
 0x230   :  { %v9236_v23 = vpop.permute.xlu1 %2619  ;;  %7828 = vmatpush3.xpose.msk.msra.mxu0 %vm360_vm1, %v1228_v11 }
 0x231   :  { %7839 = vmatprep.subr.msk.mxu0 %vm360_vm1, %v9136_v56 }
 0x233   :  { %7830 = vmatmul.mubr.msk.f32.vlgmr.msra.gmra.mxu0 %vm360_vm1, %v8931_v26  ;;  %v1576_v11 = vpop.permute.xlu0 %1575 }
 0x234   :  { %v9243_v10 = vpop.permute.xlu1 %2967  ;;  %7840 = vmatpush3.xpose.msk.msra.mxu0 %vm360_vm1, %v9136_v56  ;;  %7843 = vmatprep.mubr.msk.f32.mxu0 %vm360_vm1, %v8855_v7 }
 0x235   :  { %7841 = vmatprep.subr.msk.mxu0 %vm360_vm1, %v9134_v4 }
 0x238   :  { %v1317_v44 = vpop.permute.xlu1 %1316  ;;  %7842 = vmatpush3.xpose.msk.msra.mxu0 %vm360_vm1, %v9134_v4 }
 0x239   :  { %7832 = vmatprep.subr.msk.mxu1 %vm360_vm1, %v1317_v44  ;;  %7853 = vmatprep.subr.msk.mxu0 %vm360_vm1, %v1578_v30 }
 0x23a   :  { %7833 = vmatpush3.xpose.msk.msra.mxu1 %vm360_vm1, %v1317_v44 }
 0x23b   :  { %7844 = vmatmul.mubr.msk.f32.vlgmr.msra.gmra.mxu0 %vm360_vm1, %v8785_v55  ;;  %v9265_v4 = vpop.permute.xlu0 %2012 }
 0x23c   :  { %v7768_v26 = vpop.f32.mrf.mxu1  ;;  %7854 = vmatpush3.xpose.msk.msra.mxu0 %vm360_vm1, %v1578_v30  ;;  %7857 = vmatprep.mubr.msk.f32.mxu0 %vm360_vm1, %v9033_v15 }
 0x23d   :  { %v9262_v7 = vadd.f32 %v7768_v26, %v9190_v60  ;;  %7855 = vmatprep.subr.msk.mxu0 %vm360_vm1, %v1576_v11  ;;  %v11091_v26 = vld [vmem:[#allocation35_spill] sm:$0xff] }
 0x23f   :  { %v3223_v56 = vsel %vm3213_vm2, %v9262_v7, -inf }
 0x240   :  { %7856 = vmatpush3.xpose.msk.msra.mxu0 %vm360_vm1, %v1576_v11  ;;  %3224 = vmax.xlane.f32.xlu1 %v3223_v56  ;;  %v11090_v11 = vld [vmem:[#allocation28_spill] sm:$0xff]  ;;  %v11093_v56 = vld [vmem:[#allocation46_spill] sm:$0xff] }
 0x241   :  { %7867 = vmatprep.subr.msk.mxu0 %vm360_vm1, %v9143_v25 }
 0x243   :  { %v9272_v55 = vpop.permute.xlu0 %2360  ;;  %7858 = vmatmul.mubr.msk.f32.vlgmr.msra.gmra.mxu0 %vm360_vm1, %v8953_v35 }
 0x244   :  { %7868 = vmatpush3.xpose.msk.msra.mxu0 %vm360_vm1, %v9143_v25  ;;  %7871 = vmatprep.mubr.msk.f32.mxu0 %vm360_vm1, %v8863_v9 }
 0x245   :  { %7869 = vmatprep.subr.msk.mxu0 %vm360_vm1, %v9149_v27 }
 0x247   :  { %v9282_v30 = vpop.permute.xlu0 %2708 }
 0x248   :  { %7870 = vmatpush3.xpose.msk.msra.mxu0 %vm360_vm1, %v9149_v27 }
 0x249   :  { %7881 = vmatprep.subr.msk.mxu0 %vm360_vm1, %v1926_v22 }
 0x24b   :  { %v9287_v44 = vpop.permute.xlu0 %3056  ;;  %7872 = vmatmul.mubr.msk.f32.vlgmr.msra.gmra.mxu0 %vm360_vm1, %v8793_v57 }
 0x24c   :  { %7882 = vmatpush3.xpose.msk.msra.mxu0 %vm360_vm1, %v1926_v22  ;;  %7885 = vmatprep.mubr.msk.f32.mxu0 %vm360_vm1, %v8943_v31  ;;  %v1665_v22 = vpop.permute.xlu1 %1664 }
 0x24d   :  { %7883 = vmatprep.subr.msk.mxu0 %vm360_vm1, %v1924_v50 }
 0x24f   :  { %v1315_v25 = vpop.permute.xlu0 %1314 }
 0x250   :  { %7834 = vmatprep.subr.msk.mxu1 %vm360_vm1, %v1315_v25  ;;  %7884 = vmatpush3.xpose.msk.msra.mxu0 %vm360_vm1, %v1924_v50 }
 0x251   :  { %7835 = vmatpush3.xpose.msk.msra.mxu1 %vm360_vm1, %v1315_v25  ;;  %7895 = vmatprep.subr.msk.mxu0 %vm360_vm1, %v9082_v34  ;;  %v11095_v25 = vld [vmem:[#allocation29_spill] sm:$0xff] }
 0x252   :  { %7846 = vmatprep.subr.msk.mxu1 %vm360_vm1, %v9176_v29 }
 0x253   :  { %7886 = vmatmul.mubr.msk.f32.vlgmr.msra.gmra.mxu0 %vm360_vm1, %v8966_v40 }
 0x254   :  { %7837 = vmatmul.mubr.msk.f32.vlgmr.msra.gmra.mxu1 %vm360_vm1, %v8997_v49  ;;  %7896 = vmatpush3.xpose.msk.msra.mxu0 %vm360_vm1, %v9082_v34 }
 0x255   :  { %7847 = vmatpush3.xpose.msk.msra.mxu1 %vm360_vm1, %v9176_v29  ;;  %7850 = vmatprep.mubr.msk.f32.mxu1 %vm360_vm1, %v8873_v12  ;;  %v1663_v29 = vpop.permute.xlu0 %1662 }
 0x256   :  { %7899 = vmatprep.mubr.msk.f32.mxu0 %vm360_vm1, %v8813_v62  ;;  %7848 = vmatprep.subr.msk.mxu1 %vm360_vm1, %v9202_v58 }
 0x257   :  { %7897 = vmatprep.subr.msk.mxu0 %vm360_vm1, %v9161_v48 }
 0x258   :  { %7898 = vmatpush3.xpose.msk.msra.mxu0 %vm360_vm1, %v9161_v48 }
 0x259   :  { %7849 = vmatpush3.xpose.msk.msra.mxu1 %vm360_vm1, %v9202_v58  ;;  %7909 = vmatprep.subr.msk.mxu0 %vm360_vm1, %v9223_v46 }
 0x25a   :  { %7860 = vmatprep.subr.msk.mxu1 %vm360_vm1, %v1665_v22 }
 0x25b   :  { %7900 = vmatmul.mubr.msk.f32.vlgmr.msra.gmra.mxu0 %vm360_vm1, %v8811_v61 }
 0x25c   :  { %7851 = vmatmul.mubr.msk.f32.vlgmr.msra.gmra.mxu1 %vm360_vm1, %v8849_v6  ;;  %7910 = vmatpush3.xpose.msk.msra.mxu0 %vm360_vm1, %v9223_v46  ;;  %v2011_v6 = vpop.permute.xlu1 %2010 }
 0x25d   :  { %7861 = vmatpush3.xpose.msk.msra.mxu1 %vm360_vm1, %v1665_v22  ;;  %7864 = vmatprep.mubr.msk.f32.mxu1 %vm360_vm1, %v9023_v59  ;;  %v11096_v22 = vld [vmem:[#allocation14_spill] sm:$0xff] }
 0x25e   :  { %7913 = vmatprep.mubr.msk.f32.mxu0 %vm360_vm1, %v8955_v36  ;;  %7862 = vmatprep.subr.msk.mxu1 %vm360_vm1, %v1663_v29 }
 0x25f   :  { %7911 = vmatprep.subr.msk.mxu0 %vm360_vm1, %v9233_v52 }
 0x260   :  { %7912 = vmatpush3.xpose.msk.msra.mxu0 %vm360_vm1, %v9233_v52  ;;  %v2359_v35 = vpop.permute.xlu1 %2358  ;;  %v522_v52 = vpop.f32.mrf.mxu1 }
 0x261   :  { %7863 = vmatpush3.xpose.msk.msra.mxu1 %vm360_vm1, %v1663_v29  ;;  %7923 = vmatprep.subr.msk.mxu0 %vm360_vm1, %v9098_v18  ;;  %v9395_v46 = vadd.f32 %v9195_v54, %v522_v52 }
 0x262   :  { %7874 = vmatprep.subr.msk.mxu1 %vm360_vm1, %v9179_v17 }
 0x263   :  { %7914 = vmatmul.mubr.msk.f32.vlgmr.msra.gmra.mxu0 %vm360_vm1, %v8986_v45  ;;  %v3220_v27 = vsel %vm3213_vm2, %v9395_v46, -inf }
 0x264   :  { %7865 = vmatmul.mubr.msk.f32.vlgmr.msra.gmra.mxu1 %vm360_vm1, %v9009_v51  ;;  %7924 = vmatpush3.xpose.msk.msra.mxu0 %vm360_vm1, %v9098_v18  ;;  %v7775_v48 = vpop.f32.mrf.mxu1 }
 0x265   :  { %7875 = vmatpush3.xpose.msk.msra.mxu1 %vm360_vm1, %v9179_v17  ;;  %7878 = vmatprep.mubr.msk.f32.mxu1 %vm360_vm1, %v8885_v16 }
 0x266   :  { %7927 = vmatprep.mubr.msk.f32.mxu0 %vm360_vm1, %v8822_v0  ;;  %7876 = vmatprep.subr.msk.mxu1 %vm360_vm1, %v9185_v33 }
 0x267   :  { %7925 = vmatprep.subr.msk.mxu0 %vm360_vm1, %v9167_v5 }
 0x268   :  { %7926 = vmatpush3.xpose.msk.msra.mxu0 %vm360_vm1, %v9167_v5  ;;  %v9376_v5 = vpop.permute.xlu1 %2706 }
 0x269   :  { %7877 = vmatpush3.xpose.msk.msra.mxu1 %vm360_vm1, %v9185_v33  ;;  %7937 = vmatprep.subr.msk.mxu0 %vm360_vm1, %v9229_v21 }
 0x26a   :  { %7888 = vmatprep.subr.msk.mxu1 %vm360_vm1, %v9265_v4 }
 0x26b   :  { %7928 = vmatmul.mubr.msk.f32.vlgmr.msra.gmra.mxu0 %vm360_vm1, %v8820_v63 }
 0x26c   :  { %7879 = vmatmul.mubr.msk.f32.vlgmr.msra.gmra.mxu1 %vm360_vm1, %v8857_v8  ;;  %v7803_v49 = vpop.f32.mrf.mxu0  ;;  %7938 = vmatpush3.xpose.msk.msra.mxu0 %vm360_vm1, %v9229_v21  ;;  %v9402_v17 = vpop.permute.xlu1 %3054 }
 0x26d   :  { %v9379_v50 = vadd.f32 %v7803_v49, %v9190_v60  ;;  %7889 = vmatpush3.xpose.msk.msra.mxu1 %vm360_vm1, %v9265_v4  ;;  %7892 = vmatprep.mubr.msk.f32.mxu1 %vm360_vm1, %v9035_v28  ;;  %v609_v21 = vpop.f32.mrf.mxu1  ;;  %v11092_v4 = vld [vmem:[#allocation15_spill] sm:$0xff] }
 0x26e   :  { %7941 = vmatprep.mubr.msk.f32.mxu0 %vm360_vm1, %v8959_v39  ;;  %7890 = vmatprep.subr.msk.mxu1 %vm360_vm1, %v2011_v6  ;;  %v957_v34 = vpop.f32.mrf.mxu0 }
 0x26f   :  { %7939 = vmatprep.subr.msk.mxu0 %vm360_vm1, %v9236_v23  ;;  %v3253_v33 = vsel %vm3213_vm2, %v9379_v50, -inf  ;;  %v9411_v18 = vadd.f32 %v9195_v54, %v957_v34 }
 0x270   :  { %7940 = vmatpush3.xpose.msk.msra.mxu0 %vm360_vm1, %v9236_v23  ;;  %3254 = vmax.xlane.f32.xlu0 %v3253_v33 }
 0x271   :  { %7891 = vmatpush3.xpose.msk.msra.mxu1 %vm360_vm1, %v2011_v6  ;;  %7951 = vmatprep.subr.msk.mxu0 %vm360_vm1, %v9113_v47  ;;  %v3250_v58 = vsel %vm3213_vm2, %v9411_v18, -inf  ;;  %v11097_v6 = vld [vmem:[#allocation34_spill] sm:$0xff] }
 0x272   :  { %7902 = vmatprep.subr.msk.mxu1 %vm360_vm1, %v9157_v37 }
 0x273   :  { %7942 = vmatmul.mubr.msk.f32.vlgmr.msra.gmra.mxu0 %vm360_vm1, %v8995_v38 }
 0x274   :  { %7893 = vmatmul.mubr.msk.f32.vlgmr.msra.gmra.mxu1 %vm360_vm1, %v9046_v42  ;;  %7952 = vmatpush3.xpose.msk.msra.mxu0 %vm360_vm1, %v9113_v47  ;;  %v9427_v47 = vpop.permute.xlu1 %4399 }
 0x275   :  { %7903 = vmatpush3.xpose.msk.msra.mxu1 %vm360_vm1, %v9157_v37  ;;  %7906 = vmatprep.mubr.msk.f32.mxu1 %vm360_vm1, %v8903_v20  ;;  %v9430_v37 = vadd.f32 %v7775_v48, %v9190_v60  ;;  %v11099_v48 = vld [vmem:[#allocation37_spill] sm:$0xff] }
 0x276   :  { %7955 = vmatprep.mubr.msk.f32.mxu0 %vm360_vm1, %v8833_v2  ;;  %3221 = vmax.xlane.f32.xlu0 %v3220_v27 }
 0x277   :  { %7904 = vmatprep.subr.msk.mxu1 %vm360_vm1, %v9197_v24  ;;  %7953 = vmatprep.subr.msk.mxu0 %vm360_vm1, %v9169_v43 }
 0x278   :  { %7954 = vmatpush3.xpose.msk.msra.mxu0 %vm360_vm1, %v9169_v43  ;;  %v3229_v43 = vsel %vm3213_vm2, %v9430_v37, -inf  ;;  %v9457_v23 = vpop.permute.xlu1 %4575 }
 0x279   :  { %7905 = vmatpush3.xpose.msk.msra.mxu1 %vm360_vm1, %v9197_v24  ;;  %7965 = vmatprep.subr.msk.mxu0 %vm360_vm1, %v9231_v14  ;;  %v9447_v24 = vadd.f32 %v9195_v54, %v609_v21 }
 0x27a   :  { %3251 = vmax.xlane.f32.xlu0 %v3250_v58  ;;  %7916 = vmatprep.subr.msk.mxu1 %vm360_vm1, %v9272_v55  ;;  %v11100_v58 = vld [vmem:[#allocation17_spill] sm:$0xff] }
 0x27b   :  { %7956 = vmatmul.mubr.msk.f32.vlgmr.msra.gmra.mxu0 %vm360_vm1, %v8831_v1 }
 0x27c   :  { %7907 = vmatmul.mubr.msk.f32.vlgmr.msra.gmra.mxu1 %vm360_vm1, %v8901_v19  ;;  %7966 = vmatpush3.xpose.msk.msra.mxu0 %vm360_vm1, %v9231_v14  ;;  %v3226_v14 = vsel %vm3213_vm2, %v9447_v24, -inf }
 0x27d   :  { %7917 = vmatpush3.xpose.msk.msra.mxu1 %vm360_vm1, %v9272_v55  ;;  %7920 = vmatprep.mubr.msk.f32.mxu1 %vm360_vm1, %v9048_v32  ;;  %v11094_v55 = vld [vmem:[#allocation11_spill] sm:$0xff] }
 0x27e   :  { %7969 = vmatprep.mubr.msk.f32.mxu0 %vm360_vm1, %v8968_v41  ;;  %3230 = vmax.xlane.f32.xlu0 %v3229_v43  ;;  %v11108_v32 = vld [vmem:[#allocation47_spill] sm:$0xff] }
 0x27f   :  { %7918 = vmatprep.subr.msk.mxu1 %vm360_vm1, %v2359_v35  ;;  %7967 = vmatprep.subr.msk.mxu0 %vm360_vm1, %v9243_v10 }
 0x280   :  { %7968 = vmatpush3.xpose.msk.msra.mxu0 %vm360_vm1, %v9243_v10  ;;  %v9475_v10 = vpop.permute.xlu1 %4662 }
 0x281   :  { %7919 = vmatpush3.xpose.msk.msra.mxu1 %vm360_vm1, %v2359_v35  ;;  %7979 = vmatprep.subr.mxu0 %v8839_v3 }
 0x282   :  { %3227 = vmax.xlane.f32.xlu0 %v3226_v14  ;;  %7930 = vmatprep.subr.msk.mxu1 %vm360_vm1, %v9165_v53 }
 0x283   :  { %7970 = vmatmul.mubr.msk.f32.vlgmr.msra.gmra.mxu0 %vm360_vm1, %v11090_v11  ;;  %v11103_v11 = vld [vmem:[#allocation36_spill] sm:$0xff] }
 0x284   :  { %7921 = vmatmul.mubr.msk.f32.vlgmr.msra.gmra.mxu1 %vm360_vm1, %v11091_v26  ;;  %7980 = vmatpush3.msra.mxu0 %v8839_v3  ;;  %v9488_v3 = vpop.permute.xlu0 %4486 }
 0x285   :  { %7931 = vmatpush3.xpose.msk.msra.mxu1 %vm360_vm1, %v9165_v53  ;;  %7934 = vmatprep.mubr.msk.f32.mxu1 %vm360_vm1, %v11092_v4  ;;  %v9492_v53 = vpop.permute.xlu1 %4573 }
 0x286   :  { %7932 = vmatprep.subr.msk.mxu1 %vm360_vm1, %v11093_v56  ;;  %7981 = vmatprep.subr.mxu0 %v11094_v55 }
 0x287   :  { %7982 = vmatpush3.msra.mxu0 %v11094_v55 }
 0x288   :  { %7993 = vmatprep.subr.mxu0 %v11095_v25  ;;  %v9505_v52 = vpop.permute.xlu0 %4660 }
 0x289   :  { %7933 = vmatpush3.xpose.msk.msra.mxu1 %vm360_vm1, %v11093_v56  ;;  %v9509_v34 = vpop.permute.xlu1 %4749  ;;  %v11101_v56 = vld [vmem:[#allocation48_spill] sm:$0xff] }
 0x28a   :  { %7944 = vmatprep.subr.msk.mxu1 %vm360_vm1, %v9282_v30 }
 0x28c   :  { %7935 = vmatmul.mubr.msk.f32.vlgmr.msra.gmra.mxu1 %vm360_vm1, %v11096_v22  ;;  %v9526_v14 = vpop.permute.xlu0 %4747 }
 0x28d   :  { %v7782_v29 = vpop.f32.mrf.mxu1  ;;  %7945 = vmatpush3.xpose.msk.msra.mxu1 %vm360_vm1, %v9282_v30  ;;  %7948 = vmatprep.mubr.msk.f32.mxu1 %vm360_vm1, %v11097_v6  ;;  %v11098_v30 = vld [vmem:[#allocation43_spill] sm:$0xff]  ;;  %v9533_v55 = vpop.permute.xlu1 %4836 }
 0x28e   :  { %v9501_v35 = vadd.f32 %v7782_v29, %v9190_v60  ;;  %7946 = vmatprep.subr.msk.mxu1 %vm360_vm1, %v9376_v5 }
 0x28f   :  { %v696_v49 = vpop.f32.mrf.mxu1 }
 0x290   :  { %v3235_v33 = vsel %vm3213_vm2, %v9501_v35, -inf  ;;  %v9512_v27 = vadd.f32 %v9195_v54, %v696_v49 }
 0x291   :  { %7947 = vmatpush3.xpose.msk.msra.mxu1 %vm360_vm1, %v9376_v5  ;;  %3236 = vmax.xlane.f32.xlu1 %v3235_v33 }
 0x292   :  { %7958 = vmatprep.subr.msk.mxu1 %vm360_vm1, %v11098_v30  ;;  %v3232_v21 = vsel %vm3213_vm2, %v9512_v27, -inf }
 0x294   :  { %7949 = vmatmul.mubr.msk.f32.vlgmr.msra.gmra.mxu1 %vm360_vm1, %v11099_v48 }
 0x295   :  { %7959 = vmatpush3.xpose.msk.msra.mxu1 %vm360_vm1, %v11098_v30  ;;  %7962 = vmatprep.mubr.msk.f32.mxu1 %vm360_vm1, %v11100_v58  ;;  %v7796_v43 = vpop.f32.mrf.mxu1  ;;  %v9544_v30 = vpop.permute.xlu0 %4923  ;;  %v11109_v58 = vld [vmem:[#allocation39_spill] sm:$0xff] }
 0x296   :  { %3233 = vmax.xlane.f32.xlu1 %v3232_v21  ;;  %v9529_v5 = vadd.f32 %v7796_v43, %v9190_v60  ;;  %7960 = vmatprep.subr.msk.mxu1 %vm360_vm1, %v11101_v56  ;;  %v11102_v21 = vld [vmem:[#allocation16_spill] sm:$0xff]  ;;  %v9548_v43 = vpop.permute.xlu1 %4834 }
 0x297   :  { %v870_v29 = vpop.f32.mrf.mxu1 }
 0x298   :  { %v3247_v49 = vsel %vm3213_vm2, %v9529_v5, -inf  ;;  %v9538_v33 = vadd.f32 %v9195_v54, %v870_v29 }
 0x299   :  { %7961 = vmatpush3.xpose.msk.msra.mxu1 %vm360_vm1, %v11101_v56 }
 0x29a   :  { %3248 = vmax.xlane.f32.xlu1 %v3247_v49  ;;  %7972 = vmatprep.subr.msk.mxu1 %vm360_vm1, %v9287_v44  ;;  %v3244_v56 = vsel %vm3213_vm2, %v9538_v33, -inf }
 0x29c   :  { %7963 = vmatmul.mubr.msk.f32.vlgmr.msra.gmra.mxu1 %vm360_vm1, %v11102_v21 }
 0x29d   :  { %7973 = vmatpush3.xpose.msk.msra.mxu1 %vm360_vm1, %v9287_v44  ;;  %7976 = vmatprep.mubr.msk.f32.mxu1 %vm360_vm1, %v11103_v11  ;;  %v7810_v29 = vpop.f32.mrf.mxu1 }
 0x29e   :  { %3245 = vmax.xlane.f32.xlu1 %v3244_v56  ;;  %v9557_v49 = vadd.f32 %v7810_v29, %v9190_v60  ;;  %7974 = vmatprep.subr.msk.mxu1 %vm360_vm1, %v9402_v17  ;;  %v11104_v56 = vld [vmem:[#allocation10_spill] sm:$0xff]  ;;  %v9571_v60 = vpop.permute.xlu1 %5010 }
 0x29f   :  { %v1044_v21 = vpop.f32.mrf.mxu1  ;;  %v11105_v29 = vld [vmem:[#allocation38_spill] sm:$0xff] }
 0x2a0   :  { %v3259_v1 = vsel %vm3213_vm2, %v9557_v49, -inf  ;;  %v9564_v44 = vadd.f32 %v9195_v54, %v1044_v21  ;;  %v11106_v21 = vld [vmem:[#allocation19_spill] sm:$0xff] }
 0x2a1   :  { %7975 = vmatpush3.xpose.msk.msra.mxu1 %vm360_vm1, %v9402_v17  ;;  %v9568_v48 = vpop.xlane.xlu0 %3242  ;;  %v11107_v17 = vld [vmem:[#allocation45_spill] sm:$0xff] }
 0x2a2   :  { %3260 = vmax.xlane.f32.xlu1 %v3259_v1  ;;  %7986 = vmatprep.subr.mxu1 %v11104_v56  ;;  %v3256_v38 = vsel %vm3213_vm2, %v9564_v44, -inf }
 0x2a4   :  { %7977 = vmatmul.mubr.msk.f32.vlgmr.msra.gmra.mxu1 %vm360_vm1, %v11105_v29 }
 0x2a5   :  { %7987 = vmatpush3.msra.mxu1 %v11104_v56  ;;  %v3216_v54 = vpop.xlane.xlu0 %3215  ;;  %v9586_v56 = vld [vmem:[%s10958_s5 + $0x18] sm:$0xff] }
 0x2a6   :  { %3257 = vmax.xlane.f32.xlu1 %v3256_v38  ;;  %7988 = vmatprep.subr.mxu1 %v11106_v21  ;;  %v3406_v22 = vsub.f32 %v11107_v17, %v3216_v54  ;;  %v9591_v54 = vld [vmem:[%s10958_s5 + $0x10] sm:$0xff] }
 0x2a7   :  { %7989 = vmatpush3.msra.mxu1 %v11106_v21  ;;  %v3219_v1 = vpop.xlane.xlu1 %3218 }
 0x2a8   :  { %v3470_v11 = vmul.f32 1.442695, %v3406_v22  ;;  %v3407_v41 = vsub.f32 %v11108_v32, %v3219_v1  ;;  %8000 = vmatprep.subr.mxu1 %v11109_v58  ;;  %v11112_v1 = vld [vmem:[#allocation24_spill] sm:$0xff] }
 0x2a9   :  { %v3240_v6 = vpop.xlane.xlu0 %3239 }
 0x2aa   :  { %8251 = vpow2.f32 %v3470_v11  ;;  %v3472_v29 = vmul.f32 1.442695, %v3407_v41 }
 0x2ac   :  { %8253 = vpow2.f32 %v3472_v29 }
 0x2b1   :  { %v7817_v38 = vpop.f32.mrf.mxu0 }
 0x2b2   :  { %v9594_v22 = vadd.f32 %v7817_v38, %v9586_v56  ;;  %v11113_v38 = vld [vmem:[#allocation9_spill] sm:$0xff] }
 0x2b3   :  { %v1131_v32 = vpop.f32.mrf.mxu0 }
 0x2b4   :  { %v9597_v21 = vadd.f32 %v9591_v54, %v1131_v32  ;;  %v3265_v41 = vsel %vm3213_vm2, %v9594_v22, -inf }
 0x2b5   :  { %3266 = vmax.xlane.f32.xlu0 %v3265_v41 }
 0x2b6   :  { %v3262_v29 = vsel %vm3213_vm2, %v9597_v21, -inf }
 0x2b7   :  { %v9601_v11 = vpop.eup %8251 }
 0x2b8   :  { %11110 = vst [vmem:[#allocation46_spill] sm:$0xff] %v9601_v11  ;;  %7983 = vmatprep.mubr.msk.f32.mxu0 %vm3213_vm2, %v9601_v11 }
 0x2b9   :  { %v9607_v17 = vpop.eup %8253  ;;  %3263 = vmax.xlane.f32.xlu0 %v3262_v29 }
 0x2ba   :  { %11111 = vst [vmem:[#allocation11_spill] sm:$0xff] %v9607_v17  ;;  %7984 = vmatmul.mubr.msk.f32.vlgmr.msra.gmra.mxu0 %vm3213_vm2, %v9607_v17 }
 0x2bb   :  { %7994 = vmatpush3.msra.mxu0 %v11095_v25 }
 0x2bc   :  { %7995 = vmatprep.subr.mxu0 %v11112_v1 }
 0x2bd   :  { %7996 = vmatpush3.msra.mxu0 %v11112_v1 }
 0x2be   :  { %8007 = vmatprep.subr.mxu0 %v11113_v38 }
 0x2c9   :  { %v3225_v0 = vpop.xlane.xlu1 %3224 }
 0x2cd   :  { %v7824_v32 = vpop.f32.mrf.mxu1 }
 0x2ce   :  { %v9616_v41 = vadd.f32 %v7824_v32, %v9586_v56 }
 0x2cf   :  { %v1218_v11 = vpop.f32.mrf.mxu1 }
 0x2d0   :  { %v9619_v2 = vadd.f32 %v9591_v54, %v1218_v11  ;;  %v3271_v29 = vsel %vm3213_vm2, %v9616_v41, -inf }
 0x2d1   :  { %3272 = vmax.xlane.f32.xlu1 %v3271_v29 }
 0x2d2   :  { %v3268_v25 = vsel %vm3213_vm2, %v9619_v2, -inf }
 0x2d5   :  { %3269 = vmax.xlane.f32.xlu1 %v3268_v25 }
 0x2f3   :  { %v7831_v17 = vpop.f32.mrf.mxu0 }
 0x2f4   :  { %v9626_v1 = vadd.f32 %v7831_v17, %v9586_v56  ;;  %v3409_v17 = vsub.f32 %v9262_v7, %v3225_v0  ;;  %v3414_v7 = vsub.f32 %v9215_v13, %v3240_v6 }
 0x2f5   :  { %v1305_v39 = vpop.f32.mrf.mxu0 }
 0x2f6   :  { %v9629_v32 = vadd.f32 %v9591_v54, %v1305_v39  ;;  %v3277_v11 = vsel %vm3213_vm2, %v9626_v1, -inf  ;;  %v3476_v19 = vmul.f32 1.442695, %v3409_v17 }
 0x2f7   :  { %3278 = vmax.xlane.f32.xlu0 %v3277_v11 }
 0x2f8   :  { %v3274_v29 = vsel %vm3213_vm2, %v9629_v32, -inf }
 0x2f9   :  { %v3255_v4 = vpop.xlane.xlu0 %3254 }
 0x2fb   :  { %v7845_v26 = vpop.f32.mrf.mxu0  ;;  %3275 = vmax.xlane.f32.xlu0 %v3274_v29 }
 0x2fc   :  { %v9636_v25 = vadd.f32 %v7845_v26, %v9586_v56 }
 0x2fd   :  { %v1479_v20 = vpop.f32.mrf.mxu0 }
 0x2fe   :  { %v9640_v39 = vadd.f32 %v9591_v54, %v1479_v20  ;;  %v3289_v63 = vsel %vm3213_vm2, %v9636_v25, -inf }
 0x2ff   :  { %v3222_v11 = vpop.xlane.xlu0 %3221  ;;  %3290 = vmax.xlane.f32.xlu0 %v3289_v63  ;;  %v11114_v63 = vld [vmem:[#allocation44_spill] sm:$0xff] }
 0x300   :  { %v3408_v36 = vsub.f32 %v9395_v46, %v3222_v11  ;;  %v3286_v29 = vsel %vm3213_vm2, %v9640_v39, -inf  ;;  %v3415_v46 = vsub.f32 %v11114_v63, %v9568_v48 }
 0x302   :  { %v3474_v28 = vmul.f32 1.442695, %v3408_v36  ;;  %v3486_v36 = vmul.f32 1.442695, %v3414_v7 }
 0x303   :  { %v3252_v26 = vpop.xlane.xlu0 %3251  ;;  %3287 = vmax.xlane.f32.xlu0 %v3286_v29 }
 0x304   :  { %8255 = vpow2.f32 %v3474_v28  ;;  %v3418_v11 = vsub.f32 %v9411_v18, %v3252_v26  ;;  %v3419_v28 = vsub.f32 %v9379_v50, %v3255_v4  ;;  %v7859_v18 = vpop.f32.mrf.mxu0  ;;  %v11118_v4 = vld [vmem:[#allocation18_spill] sm:$0xff] }
 0x305   :  { %8257 = vpow2.f32 %v3476_v19  ;;  %v3488_v19 = vmul.f32 1.442695, %v3415_v46 }
 0x306   :  { %v3494_v13 = vmul.f32 1.442695, %v3418_v11 }
 0x307   :  { %v3231_v0 = vpop.xlane.xlu0 %3230 }
 0x308   :  { %v3411_v20 = vsub.f32 %v9430_v37, %v3231_v0 }
 0x30a   :  { %v3480_v17 = vmul.f32 1.442695, %v3411_v20 }
 0x30b   :  { %v3228_v45 = vpop.xlane.xlu0 %3227 }
 0x30c   :  { %v3410_v62 = vsub.f32 %v9447_v24, %v3228_v45  ;;  %v3496_v45 = vmul.f32 1.442695, %v3419_v28 }
 0x30e   :  { %v3478_v42 = vmul.f32 1.442695, %v3410_v62 }
 0x310   :  { %8259 = vpow2.f32 %v3478_v42  ;;  %v11117_v42 = vld [vmem:[#allocation41_spill] sm:$0xff] }
 0x311   :  { %v9653_v29 = vpop.eup %8255  ;;  %8261 = vpow2.f32 %v3480_v17 }
 0x312   :  { %11115 = vst [vmem:[#allocation29_spill] sm:$0xff] %v9653_v29  ;;  %v9656_v37 = vpop.eup %8257  ;;  %8263 = vpow2.f32 %v3486_v36  ;;  %7990 = vmatprep.mubr.msk.f32.mxu1 %vm3213_vm2, %v9653_v29 }
 0x313   :  { %11116 = vst [vmem:[#allocation43_spill] sm:$0xff] %v9656_v37  ;;  %7991 = vmatmul.mubr.msk.f32.vlgmr.msra.gmra.mxu1 %vm3213_vm2, %v9656_v37  ;;  %8265 = vpow2.f32 %v3488_v19 }
 0x314   :  { %8001 = vmatpush3.msra.mxu1 %v11109_v58  ;;  %v7838_v62 = vpop.f32.mrf.mxu1  ;;  %8267 = vpow2.f32 %v3494_v13  ;;  %v1653_v58 = vpop.f32.mrf.mxu0 }
 0x315   :  { %8002 = vmatprep.subr.mxu1 %v11117_v42  ;;  %v9665_v50 = vadd.f32 %v7838_v62, %v9586_v56  ;;  %8269 = vpow2.f32 %v3496_v45 }
 0x316   :  { %8003 = vmatpush3.msra.mxu1 %v11117_v42  ;;  %v1392_v24 = vpop.f32.mrf.mxu1  ;;  %v7873_v20 = vpop.f32.mrf.mxu0 }
 0x317   :  { %8014 = vmatprep.subr.mxu1 %v11118_v4  ;;  %v9670_v6 = vadd.f32 %v9591_v54, %v1392_v24  ;;  %v3283_v48 = vsel %vm3213_vm2, %v9665_v50, -inf  ;;  %v11122_v24 = vld [vmem:[#allocation8_spill] sm:$0xff] }
 0x318   :  { %3284 = vmax.xlane.f32.xlu1 %v3283_v48  ;;  %v1827_v62 = vpop.f32.mrf.mxu0 }
 0x319   :  { %v3280_v0 = vsel %vm3213_vm2, %v9670_v6, -inf }
 0x31a   :  { %v3237_v26 = vpop.xlane.xlu1 %3236 }
 0x31b   :  { %v3413_v46 = vsub.f32 %v9501_v35, %v3237_v26  ;;  %v9702_v26 = vpop.f32.mrf.mxu0 }
 0x31c   :  { %3281 = vmax.xlane.f32.xlu1 %v3280_v0  ;;  %v7852_v7 = vpop.f32.mrf.mxu1 }
 0x31d   :  { %v9676_v63 = vpop.eup %8259  ;;  %v9680_v17 = vadd.f32 %v7852_v7, %v9586_v56  ;;  %v3484_v42 = vmul.f32 1.442695, %v3413_v46  ;;  %v9711_v46 = vadd.f32 %v7859_v18, %v9586_v56 }
 0x31e   :  { %11119 = vst [vmem:[#allocation48_spill] sm:$0xff] %v9676_v63  ;;  %v9682_v36 = vpop.eup %8261  ;;  %7997 = vmatprep.mubr.msk.f32.mxu0 %vm3213_vm2, %v9676_v63  ;;  %v1566_v11 = vpop.f32.mrf.mxu1 }
 0x31f   :  { %11120 = vst [vmem:[#allocation10_spill] sm:$0xff] %v9682_v36  ;;  %v9686_v19 = vpop.eup %8263  ;;  %7998 = vmatmul.mubr.msk.f32.vlgmr.msra.gmra.mxu0 %vm3213_vm2, %v9682_v36  ;;  %v3234_v28 = vpop.xlane.xlu1 %3233  ;;  %v3295_v13 = vsel %vm3213_vm2, %v9680_v17, -inf  ;;  %v9695_v45 = vadd.f32 %v9591_v54, %v1566_v11 }
 0x320   :  { %11121 = vst [vmem:[#allocation19_spill] sm:$0xff] %v9686_v19  ;;  %8008 = vmatpush3.msra.mxu0 %v11113_v38  ;;  %v3412_v35 = vsub.f32 %v9512_v27, %v3234_v28  ;;  %8011 = vmatprep.mubr.msk.f32.mxu0 %vm3213_vm2, %v9686_v19  ;;  %v9700_v48 = vpop.eup %8265  ;;  %v11125_v27 = vld [vmem:[#allocation30_spill] sm:$0xff] }
 0x321   :  { %8009 = vmatprep.subr.mxu0 %v11122_v24  ;;  %3296 = vmax.xlane.f32.xlu0 %v3295_v13  ;;  %11123 = vst [vmem:[#allocation45_spill] sm:$0xff] %v9700_v48  ;;  %v9705_v38 = vpop.eup %8267  ;;  %v3292_v11 = vsel %vm3213_vm2, %v9695_v45, -inf }
 0x322   :  { %v3482_v0 = vmul.f32 1.442695, %v3412_v35  ;;  %8010 = vmatpush3.msra.mxu0 %v11122_v24  ;;  %11124 = vst [vmem:[#allocation47_spill] sm:$0xff] %v9705_v38  ;;  %v11126_v35 = vld [vmem:[#allocation26_spill] sm:$0xff]  ;;  %v9723_v18 = vpop.eup %8269 }
 0x323   :  { %8021 = vmatprep.subr.mxu0 %v11125_v27  ;;  %8012 = vmatmul.mubr.msk.f32.vlgmr.msra.gmra.mxu0 %vm3213_vm2, %v9700_v48  ;;  %v3249_v7 = vpop.xlane.xlu1 %3248  ;;  %11127 = vst [vmem:[#allocation39_spill] sm:$0xff] %v9723_v18  ;;  %v11128_v48 = vld [vmem:[#allocation42_spill] sm:$0xff] }
 0x324   :  { %8271 = vpow2.f32 %v3482_v0  ;;  %8022 = vmatpush3.msra.mxu0 %v11125_v27  ;;  %8025 = vmatprep.mubr.msk.f32.mxu0 %vm3213_vm2, %v9705_v38  ;;  %v7866_v28 = vpop.f32.mrf.mxu1  ;;  %v3417_v13 = vsub.f32 %v9529_v5, %v3249_v7  ;;  %v2001_v0 = vpop.f32.mrf.mxu0 }
 0x325   :  { %8273 = vpow2.f32 %v3484_v42  ;;  %8023 = vmatprep.subr.mxu0 %v11126_v35  ;;  %3293 = vmax.xlane.f32.xlu0 %v3292_v11  ;;  %v9721_v24 = vadd.f32 %v7866_v28, %v9586_v56  ;;  %v9735_v56 = vadd.f32 %v9591_v54, %v1653_v58  ;;  %v9740_v11 = vld [vmem:[%s10958_s5 + $0x28] sm:$0xff] }
 0x326   :  { %8024 = vmatpush3.msra.mxu0 %v11126_v35  ;;  %v1740_v27 = vpop.f32.mrf.mxu1  ;;  %v9742_v28 = vpop.f32.mrf.mxu0  ;;  %v3492_v58 = vmul.f32 1.442695, %v3417_v13 }
 0x327   :  { %8035 = vmatprep.subr.mxu0 %v11128_v48  ;;  %8026 = vmatmul.mubr.msk.f32.vlgmr.msra.gmra.mxu0 %vm3213_vm2, %v9723_v18  ;;  %v3246_v42 = vpop.xlane.xlu1 %3245  ;;  %v9730_v5 = vadd.f32 %v9591_v54, %v1740_v27  ;;  %v3307_v7 = vsel %vm3213_vm2, %v9721_v24, -inf  ;;  %v3301_v27 = vsel %vm3213_vm2, %v9711_v46, -inf  ;;  %v9751_v54 = vld [vmem:[%s10958_s5 + $0x20] sm:$0xff]  ;;  %v3298_v13 = vsel %vm3213_vm2, %v9735_v56, -inf }
 0x328   :  { %8036 = vmatpush3.msra.mxu0 %v11128_v48  ;;  %v3416_v35 = vsub.f32 %v9538_v33, %v3246_v42  ;;  %3308 = vmax.xlane.f32.xlu1 %v3307_v7  ;;  %v9756_v48 = vadd.f32 %v7873_v20, %v9740_v11  ;;  %v9762_v7 = vadd.f32 %v9751_v54, %v1827_v62  ;;  %v2175_v36 = vpop.f32.mrf.mxu0 }
 0x329   :  { %8037 = vmatprep.subr.mxu0 %v9488_v3  ;;  %3302 = vmax.xlane.f32.xlu0 %v3301_v27  ;;  %v3304_v42 = vsel %vm3213_vm2, %v9730_v5, -inf  ;;  %v9770_v27 = vadd.f32 %v9751_v54, %v2001_v0 }
 0x32a   :  { %v3490_v18 = vmul.f32 1.442695, %v3416_v35  ;;  %8038 = vmatpush3.msra.mxu0 %v9488_v3  ;;  %v9767_v35 = vpop.f32.mrf.mxu0  ;;  %v3313_v62 = vsel %vm3213_vm2, %v9756_v48, -inf }
 0x32b   :  { %8049 = vmatprep.subr.mxu0 %v9475_v10  ;;  %v3261_v33 = vpop.xlane.xlu1 %3260 }
 0x32c   :  { %8275 = vpow2.f32 %v3490_v18  ;;  %3305 = vmax.xlane.f32.xlu1 %v3304_v42  ;;  %v3421_v3 = vsub.f32 %v9557_v49, %v3261_v33  ;;  %v7880_v20 = vpop.f32.mrf.mxu1 }
 0x32d   :  { %8277 = vpow2.f32 %v3492_v58  ;;  %3299 = vmax.xlane.f32.xlu0 %v3298_v13  ;;  %v9775_v18 = vadd.f32 %v7880_v20, %v9740_v11  ;;  %v3310_v58 = vsel %vm3213_vm2, %v9762_v7, -inf  ;;  %v2349_v13 = vpop.f32.mrf.mxu0  ;;  %v9787_v20 = vadd.f32 %v9751_v54, %v2175_v36  ;;  %v11131_v36 = vld [vmem:[#allocation20_spill] sm:$0xff] }
 0x32e   :  { %v3500_v33 = vmul.f32 1.442695, %v3421_v3  ;;  %v1914_v42 = vpop.f32.mrf.mxu1 }
 0x32f   :  { %v3258_v38 = vpop.xlane.xlu1 %3257  ;;  %v9796_v3 = vadd.f32 %v9751_v54, %v1914_v42 }
 0x330   :  { %v3420_v37 = vsub.f32 %v9564_v44, %v3258_v38  ;;  %3314 = vmax.xlane.f32.xlu1 %v3313_v62  ;;  %v3322_v44 = vsel %vm3213_vm2, %v9770_v27, -inf  ;;  %v9793_v38 = vpop.f32.mrf.mxu0  ;;  %v9804_v62 = vadd.f32 %v9751_v54, %v2349_v13 }
 0x331   :  { %v9780_v49 = vpop.eup %8271  ;;  %3311 = vmax.xlane.f32.xlu0 %v3310_v58  ;;  %v11132_v58 = vld [vmem:[#allocation40_spill] sm:$0xff]  ;;  %v3316_v13 = vsel %vm3213_vm2, %v9796_v3, -inf }
 0x332   :  { %11129 = vst [vmem:[#allocation24_spill] sm:$0xff] %v9780_v49  ;;  %v9782_v0 = vpop.eup %8273  ;;  %v3498_v19 = vmul.f32 1.442695, %v3420_v37  ;;  %8004 = vmatprep.mubr.msk.f32.mxu1 %vm3213_vm2, %v9780_v49  ;;  %v3319_v37 = vsel %vm3213_vm2, %v9775_v18, -inf  ;;  %v2523_v42 = vpop.f32.mrf.mxu0 }
 0x333   :  { %11130 = vst [vmem:[#allocation9_spill] sm:$0xff] %v9782_v0  ;;  %8005 = vmatmul.mubr.msk.f32.vlgmr.msra.gmra.mxu1 %vm3213_vm2, %v9782_v0 }
 0x334   :  { %8279 = vpow2.f32 %v3498_v19  ;;  %8015 = vmatpush3.msra.mxu1 %v11118_v4  ;;  %3323 = vmax.xlane.f32.xlu1 %v3322_v44  ;;  %v3334_v19 = vsel %vm3213_vm2, %v9787_v20, -inf  ;;  %v9811_v4 = vadd.f32 %v9702_v26, %v9740_v11 }
 0x335   :  { %8281 = vpow2.f32 %v3500_v33  ;;  %8016 = vmatprep.subr.mxu1 %v11131_v36  ;;  %3320 = vmax.xlane.f32.xlu0 %v3319_v37  ;;  %v9816_v33 = vld [vmem:[%s10958_s5 + $0x30] sm:$0xff]  ;;  %v7894_v37 = vpop.f32.mrf.mxu1 }
 0x336   :  { %8017 = vmatpush3.msra.mxu1 %v11131_v36  ;;  %v9827_v26 = vadd.f32 %v9816_v33, %v2523_v42  ;;  %v9834_v0 = vadd.f32 %v7894_v37, %v9740_v11 }
 0x337   :  { %8028 = vmatprep.subr.mxu1 %v11132_v58  ;;  %v2088_v49 = vpop.f32.mrf.mxu1 }
 0x338   :  { %3335 = vmax.xlane.f32.xlu1 %v3334_v19  ;;  %v3346_v19 = vsel %vm3213_vm2, %v9804_v62, -inf  ;;  %v9845_v37 = vadd.f32 %v9751_v54, %v2088_v49 }
 0x339   :  { %v9820_v44 = vpop.eup %8275  ;;  %3317 = vmax.xlane.f32.xlu0 %v3316_v13  ;;  %v3325_v13 = vsel %vm3213_vm2, %v9811_v4, -inf }
 0x33a   :  { %11133 = vst [vmem:[#allocation44_spill] sm:$0xff] %v9820_v44  ;;  %v9822_v36 = vpop.eup %8277  ;;  %8018 = vmatprep.mubr.msk.f32.mxu1 %vm3213_vm2, %v9820_v44  ;;  %v3331_v44 = vsel %vm3213_vm2, %v9834_v0, -inf }
 0x33b   :  { %11134 = vst [vmem:[#allocation41_spill] sm:$0xff] %v9822_v36  ;;  %8019 = vmatmul.mubr.msk.f32.vlgmr.msra.gmra.mxu1 %vm3213_vm2, %v9822_v36  ;;  %v3358_v36 = vsel %vm3213_vm2, %v9827_v26, -inf }
 0x33c   :  { %8029 = vmatpush3.msra.mxu1 %v11132_v58  ;;  %3347 = vmax.xlane.f32.xlu1 %v3346_v19  ;;  %v7908_v58 = vpop.f32.mrf.mxu1 }
 0x33d   :  { %8030 = vmatprep.subr.mxu1 %v9427_v47  ;;  %3326 = vmax.xlane.f32.xlu0 %v3325_v13 }
 0x33e   :  { %8031 = vmatpush3.msra.mxu1 %v9427_v47  ;;  %v3267_v42 = vpop.xlane.xlu0 %3266 }
 0x33f   :  { %8042 = vmatprep.subr.mxu1 %v9457_v23  ;;  %v3423_v19 = vsub.f32 %v9594_v22, %v3267_v42  ;;  %v9861_v22 = vadd.f32 %v9742_v28, %v9740_v11  ;;  %v9870_v28 = vadd.f32 %v7908_v58, %v9740_v11 }
 0x340   :  { %3359 = vmax.xlane.f32.xlu1 %v3358_v36  ;;  %v2262_v36 = vpop.f32.mrf.mxu1 }
 0x341   :  { %v9850_v63 = vpop.eup %8279  ;;  %3332 = vmax.xlane.f32.xlu0 %v3331_v44  ;;  %v3504_v49 = vmul.f32 1.442695, %v3423_v19  ;;  %v3328_v44 = vsel %vm3213_vm2, %v9845_v37, -inf }
 0x342   :  { %11135 = vst [vmem:[#allocation18_spill] sm:$0xff] %v9850_v63  ;;  %v9852_v47 = vpop.eup %8281  ;;  %8032 = vmatprep.mubr.msk.f32.mxu1 %vm3213_vm2, %v9850_v63  ;;  %v3264_v13 = vpop.xlane.xlu0 %3263 }
 0x343   :  { %11136 = vst [vmem:[#allocation8_spill] sm:$0xff] %v9852_v47  ;;  %v3422_v29 = vsub.f32 %v9597_v21, %v3264_v13  ;;  %8033 = vmatmul.mubr.msk.f32.vlgmr.msra.gmra.mxu1 %vm3213_vm2, %v9852_v47  ;;  %v7943_v13 = vpop.f32.mrf.mxu0  ;;  %v9894_v47 = vadd.f32 %v9767_v35, %v9740_v11 }
 0x344   :  { %8043 = vmatpush3.msra.mxu1 %v9457_v23  ;;  %v7922_v21 = vpop.f32.mrf.mxu1  ;;  %v3337_v23 = vsel %vm3213_vm2, %v9861_v22, -inf }
 0x345   :  { %v3502_v42 = vmul.f32 1.442695, %v3422_v29  ;;  %8044 = vmatprep.subr.mxu1 %v9492_v53  ;;  %3329 = vmax.xlane.f32.xlu0 %v3328_v44  ;;  %v9877_v29 = vld [vmem:[%s10958_s5 + $0x38] sm:$0xff]  ;;  %v3343_v44 = vsel %vm3213_vm2, %v9870_v28, -inf  ;;  %v3349_v63 = vsel %vm3213_vm2, %v9894_v47, -inf  ;;  %s8512_s5 = smov 8  }
 0x346   :  { %8045 = vmatpush3.msra.mxu1 %v9492_v53  ;;  %v2436_v19 = vpop.f32.mrf.mxu1  ;;  %v9880_v53 = vadd.f32 %v9751_v54, %v2262_v36 }
 0x347   :  { %8283 = vpow2.f32 %v3502_v42  ;;  %8056 = vmatprep.subr.mxu1 %v9509_v34  ;;  %v9888_v42 = vadd.f32 %v7943_v13, %v9877_v29  ;;  %v9903_v13 = vadd.f32 %v7922_v21, %v9740_v11  ;;  %v9915_v35 = vadd.f32 %v9751_v54, %v2436_v19 }
 0x348   :  { %8285 = vpow2.f32 %v3504_v49  ;;  %v3340_v36 = vsel %vm3213_vm2, %v9880_v53, -inf  ;;  %v9924_v21 = vadd.f32 %v9793_v38, %v9877_v29 }
 0x349   :  { %3338 = vmax.xlane.f32.xlu0 %v3337_v23  ;;  %11138 = vst [vmem:[#allocation26_spill] sm:$0xff] %v9903_v13  ;;  %v3355_v11 = vsel %vm3213_vm2, %v9903_v13, -inf  ;;  %v3352_v54 = vsel %vm3213_vm2, %v9915_v35, -inf  ;;  %v2697_v13 = vpop.f32.mrf.mxu0 }
 0x34c   :  { %v7936_v58 = vpop.f32.mrf.mxu1 }
 0x34d   :  { %3344 = vmax.xlane.f32.xlu0 %v3343_v44  ;;  %v9885_v49 = vadd.f32 %v7936_v58, %v9877_v29  ;;  %v3373_v44 = vsel %vm3213_vm2, %v9888_v42, -inf }
 0x34e   :  { %v2610_v19 = vpop.f32.mrf.mxu1 }
 0x34f   :  { %11137 = vst [vmem:[#allocation30_spill] sm:$0xff] %v9885_v49  ;;  %v3367_v23 = vsel %vm3213_vm2, %v9885_v49, -inf }
 0x350   :  { %3368 = vmax.xlane.f32.xlu1 %v3367_v23 }
 0x351   :  { %3341 = vmax.xlane.f32.xlu0 %v3340_v36 }
 0x354   :  { %v9900_v58 = vpop.eup %8283  ;;  %3374 = vmax.xlane.f32.xlu1 %v3373_v44 }
 0x355   :  { %v9907_v49 = vpop.eup %8285  ;;  %3350 = vmax.xlane.f32.xlu0 %v3349_v63  ;;  %8039 = vmatprep.mubr.msk.f32.mxu0 %vm3213_vm2, %v9900_v58 }
 0x356   :  { %8040 = vmatmul.mubr.msk.f32.vlgmr.msra.gmra.mxu0 %vm3213_vm2, %v9907_v49 }
 0x357   :  { %8050 = vmatpush3.msra.mxu0 %v9475_v10 }
 0x358   :  { %8051 = vmatprep.subr.mxu0 %v9505_v52 }
 0x359   :  { %8052 = vmatpush3.msra.mxu0 %v9505_v52  ;;  %3356 = vmax.xlane.f32.xlu0 %v3355_v11  ;;  %v9931_v52 = vadd.f32 %v9816_v33, %v2610_v19  ;;  %v3361_v11 = vsel %vm3213_vm2, %v9924_v21, -inf  ;;  %v7950_v19 = vpop.f32.mrf.mxu1 }
 0x35a   :  { %8063 = vmatprep.subr.mxu0 %v9533_v55  ;;  %v3273_v63 = vpop.xlane.xlu1 %3272 }
 0x35b   :  { %v3425_v10 = vsub.f32 %v9616_v41, %v3273_v63  ;;  %v9936_v41 = vadd.f32 %v9816_v33, %v2697_v13  ;;  %v3364_v63 = vsel %vm3213_vm2, %v9931_v52, -inf }
 0x35d   :  { %3353 = vmax.xlane.f32.xlu0 %v3352_v54  ;;  %v3508_v44 = vmul.f32 1.442695, %v3425_v10 }
 0x35e   :  { %v3270_v23 = vpop.xlane.xlu1 %3269 }
 0x35f   :  { %v3424_v36 = vsub.f32 %v9619_v2, %v3270_v23  ;;  %v3370_v2 = vsel %vm3213_vm2, %v9936_v41, -inf }
 0x361   :  { %v3506_v38 = vmul.f32 1.442695, %v3424_v36  ;;  %3362 = vmax.xlane.f32.xlu0 %v3361_v11 }
 0x363   :  { %8287 = vpow2.f32 %v3506_v38 }
 0x364   :  { %8289 = vpow2.f32 %v3508_v44  ;;  %v9965_v44 = vadd.f32 %v7950_v19, %v9877_v29 }
 0x365   :  { %3365 = vmax.xlane.f32.xlu0 %v3364_v63  ;;  %5008 = vrot.lane.b32.xlu1 %v9033_v15, %s8511_s15 }
 0x369   :  { %3371 = vmax.xlane.f32.xlu0 %v3370_v2  ;;  %5184 = vrot.lane.b32.xlu1 %v8793_v57, %s8511_s15 }
 0x370   :  { %v9946_v10 = vpop.eup %8287 }
 0x371   :  { %v9948_v54 = vpop.eup %8289  ;;  %8046 = vmatprep.mubr.msk.f32.mxu1 %vm3213_vm2, %v9946_v10 }
 0x372   :  { %8047 = vmatmul.mubr.msk.f32.vlgmr.msra.gmra.mxu1 %vm3213_vm2, %v9948_v54 }
 0x373   :  { %8057 = vmatpush3.msra.mxu1 %v9509_v34 }
 0x374   :  { %8058 = vmatprep.subr.mxu1 %v9526_v14 }
 0x375   :  { %8059 = vmatpush3.msra.mxu1 %v9526_v14 }
 0x376   :  { %8070 = vmatprep.subr.mxu1 %v9544_v30 }
 0x37f   :  { %4921 = vrot.lane.b32.xlu0 %v8873_v12, %s8511_s15 }
 0x380   :  { %v3279_v57 = vpop.xlane.xlu0 %3278 }
 0x381   :  { %v3427_v15 = vsub.f32 %v9626_v1, %v3279_v57  ;;  %v3379_v1 = vsel %vm3213_vm2, %v9965_v44, -inf }
 0x383   :  { %5097 = vrot.lane.b32.xlu0 %v9009_v51, %s8511_s15  ;;  %v3512_v34 = vmul.f32 1.442695, %v3427_v15 }
 0x384   :  { %v3276_v13 = vpop.xlane.xlu0 %3275 }
 0x385   :  { %v3426_v23 = vsub.f32 %v9629_v32, %v3276_v13 }
 0x387   :  { %v3510_v36 = vmul.f32 1.442695, %v3426_v23 }
 0x388   :  { %v3291_v14 = vpop.xlane.xlu0 %3290 }
 0x389   :  { %8291 = vpow2.f32 %v3510_v36  ;;  %v3431_v12 = vsub.f32 %v9636_v25, %v3291_v14  ;;  %v2784_v25 = vpop.f32.mrf.mxu1 }
 0x38a   :  { %8293 = vpow2.f32 %v3512_v34 }
 0x38b   :  { %v3520_v38 = vmul.f32 1.442695, %v3431_v12 }
 0x38c   :  { %v3288_v11 = vpop.xlane.xlu0 %3287 }
 0x38d   :  { %v3430_v51 = vsub.f32 %v9640_v39, %v3288_v11  ;;  %3380 = vmax.xlane.f32.xlu1 %v3379_v1  ;;  %v9984_v39 = vadd.f32 %v9816_v33, %v2784_v25  ;;  %v7957_v25 = vpop.f32.mrf.mxu0 }
 0x38f   :  { %v3518_v63 = vmul.f32 1.442695, %v3430_v51 }
 0x391   :  { %8295 = vpow2.f32 %v3518_v63 }
 0x392   :  { %8297 = vpow2.f32 %v3520_v38 }
 0x396   :  { %v9971_v32 = vpop.eup %8291 }
 0x397   :  { %v9973_v2 = vpop.eup %8293  ;;  %8053 = vmatprep.mubr.msk.f32.mxu0 %vm3213_vm2, %v9971_v32 }
 0x398   :  { %11139 = vst [vmem:[#allocation42_spill] sm:$0xff] %v9973_v2  ;;  %8054 = vmatmul.mubr.msk.f32.vlgmr.msra.gmra.mxu0 %vm3213_vm2, %v9973_v2 }
 0x399   :  { %8064 = vmatpush3.msra.mxu0 %v9533_v55 }
 0x39a   :  { %8065 = vmatprep.subr.mxu0 %v9548_v43 }
 0x39b   :  { %8066 = vmatpush3.msra.mxu0 %v9548_v43  ;;  %v3376_v43 = vsel %vm3213_vm2, %v9984_v39, -inf }
 0x39c   :  { %8077 = vmatprep.subr.mxu0 %v9571_v60 }
 0x39e   :  { %v9986_v57 = vpop.eup %8295  ;;  %5182 = vrot.lane.b32.xlu1 %v8863_v9, %s8511_s15 }
 0x39f   :  { %v9990_v15 = vpop.eup %8297  ;;  %8067 = vmatprep.mubr.msk.f32.mxu0 %vm3213_vm2, %v9986_v57 }
 0x3a0   :  { %11140 = vst [vmem:[#allocation20_spill] sm:$0xff] %v9990_v15  ;;  %8068 = vmatmul.mubr.msk.f32.vlgmr.msra.gmra.mxu0 %vm3213_vm2, %v9990_v15 }
 0x3a1   :  { %8078 = vmatpush3.msra.mxu0 %v9571_v60  ;;  %v3285_v55 = vpop.xlane.xlu1 %3284 }
 0x3a2   :  { %3377 = vmax.xlane.f32.xlu0 %v3376_v43  ;;  %5358 = vrot.lane.b32.xlu1 %v8966_v40, %s8511_s15  ;;  %v3429_v9 = vsub.f32 %v9665_v50, %v3285_v55  ;;  %v10029_v43 = vadd.f32 %v7957_v25, %v9877_v29  ;;  %v2871_v25 = vpop.f32.mrf.mxu0 }
 0x3a4   :  { %v3516_v23 = vmul.f32 1.442695, %v3429_v9  ;;  %11143 = vst [vmem:[#allocation50_spill] sm:$0xff] %v10029_v43 }
 0x3a5   :  { %v3282_v13 = vpop.xlane.xlu1 %3281 }
 0x3a6   :  { %v3428_v19 = vsub.f32 %v9670_v6, %v3282_v13 }
 0x3a8   :  { %v3514_v34 = vmul.f32 1.442695, %v3428_v19 }
 0x3aa   :  { %8299 = vpow2.f32 %v3514_v34  ;;  %v10003_v36 = vpop.xlane.xlu0 %3296 }
 0x3ab   :  { %8301 = vpow2.f32 %v3516_v23 }
 0x3ae   :  { %v3294_v60 = vpop.xlane.xlu0 %3293 }
 0x3af   :  { %v3432_v14 = vsub.f32 %v9695_v45, %v3294_v60 }
 0x3b1   :  { %v3522_v12 = vmul.f32 1.442695, %v3432_v14  ;;  %v10006_v11 = vpop.xlane.xlu1 %3308 }
 0x3b2   :  { %v3303_v1 = vpop.xlane.xlu0 %3302 }
 0x3b3   :  { %8303 = vpow2.f32 %v3522_v12  ;;  %v3435_v60 = vsub.f32 %v9711_v46, %v3303_v1 }
 0x3b5   :  { %v3306_v6 = vpop.xlane.xlu1 %3305 }
 0x3b6   :  { %v3300_v40 = vpop.xlane.xlu0 %3299 }
 0x3b7   :  { %v10008_v51 = vpop.eup %8299  ;;  %v3434_v50 = vsub.f32 %v9735_v56, %v3300_v40 }
 0x3b8   :  { %v10011_v38 = vpop.eup %8301  ;;  %5095 = vrot.lane.b32.xlu0 %v9023_v59, %s8511_s15  ;;  %8060 = vmatprep.mubr.msk.f32.mxu1 %vm3213_vm2, %v10008_v51 }
 0x3b9   :  { %11141 = vst [vmem:[#allocation40_spill] sm:$0xff] %v10011_v38  ;;  %v3526_v45 = vmul.f32 1.442695, %v3434_v50  ;;  %8061 = vmatmul.mubr.msk.f32.vlgmr.msra.gmra.mxu1 %vm3213_vm2, %v10011_v38  ;;  %v10022_v56 = vpop.xlane.xlu1 %3314  ;;  %v3528_v50 = vmul.f32 1.442695, %v3435_v60  ;;  %v10060_v38 = vadd.f32 %v9816_v33, %v2871_v25  ;;  %v3433_v25 = vsub.f32 %v9680_v17, %v10003_v36  ;;  %v11147_v36 = vld [vmem:[#allocation32_spill] sm:$0xff] }
 0x3ba   :  { %8071 = vmatpush3.msra.mxu1 %v9544_v30  ;;  %v3312_v63 = vpop.xlane.xlu0 %3311 }
 0x3bb   :  { %8305 = vpow2.f32 %v3526_v45  ;;  %v3438_v12 = vsub.f32 %v9762_v7, %v3312_v63  ;;  %v3382_v1 = vsel %vm3213_vm2, %v10060_v38, -inf }
 0x3bc   :  { %5271 = vrot.lane.b32.xlu0 %v8857_v8, %s8511_s15  ;;  %v3385_v8 = vsel %vm3213_vm2, %v10029_v43, -inf  ;;  %8307 = vpow2.f32 %v3528_v50 }
 0x3bd   :  { %v10035_v30 = vpop.xlane.xlu1 %3323 }
 0x3be   :  { %v10024_v55 = vpop.xlane.xlu0 %3320 }
 0x3c0   :  { %v10026_v59 = vpop.eup %8303 }
 0x3c1   :  { %11142 = vst [vmem:[#allocation49_spill] sm:$0xff] %v10026_v59  ;;  %8074 = vmatprep.mubr.msk.f32.mxu1 %vm3213_vm2, %v10026_v59  ;;  %v10043_v23 = vpop.xlane.xlu1 %3335 }
 0x3c2   :  { %v10033_v9 = vpop.xlane.xlu0 %3317 }
 0x3c5   :  { %v10053_v40 = vpop.xlane.xlu1 %3347 }
 0x3c6   :  { %v10039_v13 = vpop.xlane.xlu0 %3326  ;;  %3386 = vmax.xlane.f32.xlu1 %v3385_v8  ;;  %v3534_v8 = vmul.f32 1.442695, %v3438_v12 }
 0x3c8   :  { %v10041_v19 = vpop.eup %8305  ;;  %8309 = vpow2.f32 %v3534_v8 }
 0x3c9   :  { %11144 = vst [vmem:[#allocation51_spill] sm:$0xff] %v10041_v19  ;;  %8081 = vmatprep.mubr.msk.f32.mxu0 %vm3213_vm2, %v10041_v19  ;;  %v10057_v15 = vpop.xlane.xlu1 %3359 }
 0x3ca   :  { %v10047_v34 = vpop.xlane.xlu0 %3332 }
 0x3ce   :  { %v10050_v14 = vpop.xlane.xlu0 %3329 }
 0x3d2   :  { %v10055_v45 = vpop.xlane.xlu0 %3338 }
 0x3d6   :  { %v10062_v19 = vpop.xlane.xlu0 %3344 }
 0x3d7   :  { %5356 = vrot.lane.b32.xlu1 %v8943_v31, %s8511_s15  ;;  %v10080_v31 = vpop.eup %8307 }
 0x3d8   :  { %11146 = vst [vmem:[#allocation53_spill] sm:$0xff] %v10080_v31  ;;  %v10084_v8 = vpop.eup %8309 }
 0x3d9   :  { %v10066_v46 = vpop.xlane.xlu1 %3368 }
 0x3da   :  { %v10068_v7 = vpop.xlane.xlu0 %3341 }
 0x3db   :  { %3383 = vmax.xlane.f32.xlu0 %v3382_v1  ;;  %5532 = vrot.lane.b32.xlu1 %v8811_v61, %s8511_s15  ;;  %v3436_v1 = vsub.f32 %v9730_v5, %v3306_v6 }
 0x3dd   :  { %v10074_v63 = vpop.xlane.xlu1 %3374  ;;  %v3530_v59 = vmul.f32 1.442695, %v3436_v1 }
 0x3de   :  { %v10076_v60 = vpop.xlane.xlu0 %3350 }
 0x3e1   :  { %v5009_v12 = vpop.permute.xlu1 %5008 }
 0x3e2   :  { %v10078_v50 = vpop.xlane.xlu0 %3356  ;;  %8079 = vmatprep.subr.mxu0 %v5009_v12 }
 0x3e3   :  { %11145 = vst [vmem:[#allocation52_spill] sm:$0xff] %v10078_v50  ;;  %8080 = vmatpush3.msra.mxu0 %v5009_v12  ;;  %v3524_v50 = vmul.f32 1.442695, %v3433_v25  ;;  %v7964_v12 = vpop.f32.mrf.mxu1 }
 0x3e4   :  { %8082 = vmatmul.mubr.msk.f32.vlgmr.msra.gmra.mxu0 %vm3213_vm2, %v10080_v31 }
 0x3e5   :  { %8095 = vmatprep.mubr.msk.f32.mxu0 %vm3213_vm2, %v10084_v8  ;;  %v5185_v61 = vpop.permute.xlu1 %5184  ;;  %8311 = vpow2.f32 %v3524_v50  ;;  %v2958_v31 = vpop.f32.mrf.mxu1 }
 0x3e6   :  { %v10091_v43 = vpop.xlane.xlu0 %3353  ;;  %8091 = vmatprep.subr.mxu0 %v5185_v61  ;;  %8313 = vpow2.f32 %v3530_v59  ;;  %v10110_v59 = vadd.f32 %v7964_v12, %v9877_v29 }
 0x3e7   :  { %8092 = vmatpush3.msra.mxu0 %v5185_v61  ;;  %v3439_v61 = vsub.f32 %v9756_v48, %v10022_v56  ;;  %v11150_v48 = vld [vmem:[#allocation25_spill] sm:$0xff] }
 0x3e8   :  { %v3391_v50 = vsel %vm3213_vm2, %v10110_v59, -inf }
 0x3ea   :  { %v10093_v2 = vpop.xlane.xlu0 %3362 }
 0x3ee   :  { %v10095_v17 = vpop.xlane.xlu0 %3365 }
 0x3f1   :  { %5269 = vrot.lane.b32.xlu0 %v8885_v16, %s8511_s15 }
 0x3f2   :  { %v10099_v5 = vpop.xlane.xlu0 %3371  ;;  %v10103_v25 = vpop.eup %8311 }
 0x3f3   :  { %11148 = vst [vmem:[#allocation32_spill] sm:$0xff] %v10103_v25  ;;  %v10105_v1 = vpop.eup %8313 }
 0x3f5   :  { %5445 = vrot.lane.b32.xlu0 %v11147_v36, %s8511_s15  ;;  %v3442_v36 = vsub.f32 %v9770_v27, %v10035_v30 }
 0x3f6   :  { %v4922_v6 = vpop.permute.xlu0 %4921 }
 0x3f7   :  { %8072 = vmatprep.subr.mxu1 %v4922_v6  ;;  %v3542_v12 = vmul.f32 1.442695, %v3442_v36  ;;  %v3440_v36 = vsub.f32 %v9796_v3, %v10033_v9  ;;  %v11152_v3 = vld [vmem:[#allocation12_spill] sm:$0xff] }
 0x3f8   :  { %8073 = vmatpush3.msra.mxu1 %v4922_v6  ;;  %v3536_v6 = vmul.f32 1.442695, %v3439_v61 }
 0x3f9   :  { %8075 = vmatmul.mubr.msk.f32.vlgmr.msra.gmra.mxu1 %vm3213_vm2, %v10103_v25  ;;  %v10121_v25 = vadd.f32 %v9816_v33, %v2958_v31  ;;  %v3437_v31 = vsub.f32 %v9721_v24, %v10006_v11  ;;  %v11151_v24 = vld [vmem:[#allocation31_spill] sm:$0xff] }
 0x3fa   :  { %8088 = vmatprep.mubr.msk.f32.mxu1 %vm3213_vm2, %v10105_v1  ;;  %v5098_v16 = vpop.permute.xlu0 %5097  ;;  %8315 = vpow2.f32 %v3536_v6 }
 0x3fb   :  { %8084 = vmatprep.subr.mxu1 %v5098_v16  ;;  %8317 = vpow2.f32 %v3542_v12  ;;  %v3532_v12 = vmul.f32 1.442695, %v3437_v31 }
 0x3fc   :  { %8085 = vmatpush3.msra.mxu1 %v5098_v16  ;;  %v11149_v16 = vld [vmem:[#allocation3_spill] sm:$0xff] }
 0x3fd   :  { %8319 = vpow2.f32 %v3532_v12  ;;  %v3443_v12 = vsub.f32 %v9811_v4, %v10039_v13  ;;  %v11154_v4 = vld [vmem:[#allocation4_spill] sm:$0xff] }
 0x3ff   :  { %3392 = vmax.xlane.f32.xlu1 %v3391_v50  ;;  %v3388_v50 = vsel %vm3213_vm2, %v10121_v25, -inf }
 0x407   :  { %v10131_v30 = vpop.eup %8315 }
 0x408   :  { %v10135_v61 = vpop.eup %8317 }
 0x410   :  { %5530 = vrot.lane.b32.xlu1 %v11149_v16, %s8511_s15  ;;  %v3538_v16 = vmul.f32 1.442695, %v3440_v36 }
 0x412   :  { %8321 = vpow2.f32 %v3538_v16  ;;  %v3446_v16 = vsub.f32 %v9787_v20, %v10043_v23 }
 0x414   :  { %3389 = vmax.xlane.f32.xlu0 %v3388_v50  ;;  %5706 = vrot.lane.b32.xlu1 %v11150_v48, %s8511_s15  ;;  %v7971_v50 = vpop.f32.mrf.mxu0  ;;  %v10149_v48 = vpop.eup %8319 }
 0x415   :  { %v10156_v31 = vadd.f32 %v7971_v50, %v9877_v29 }
 0x416   :  { %v10129_v56 = vpop.xlane.xlu1 %3380 }
 0x41a   :  { %v5183_v27 = vpop.permute.xlu1 %5182 }
 0x41b   :  { %8093 = vmatprep.subr.mxu0 %v5183_v27 }
 0x41c   :  { %8094 = vmatpush3.msra.mxu0 %v5183_v27 }
 0x41d   :  { %8096 = vmatmul.mubr.msk.f32.vlgmr.msra.gmra.mxu0 %vm3213_vm2, %v10131_v30 }
 0x41e   :  { %8109 = vmatprep.mubr.msk.f32.mxu0 %vm3213_vm2, %v10135_v61  ;;  %v5359_v6 = vpop.permute.xlu1 %5358 }
 0x41f   :  { %8105 = vmatprep.subr.mxu0 %v5359_v6  ;;  %v10151_v27 = vpop.eup %8321 }
 0x420   :  { %8106 = vmatpush3.msra.mxu0 %v5359_v6  ;;  %v3397_v6 = vsel %vm3213_vm2, %v10156_v31, -inf }
 0x42a   :  { %5443 = vrot.lane.b32.xlu0 %v11151_v24, %s8511_s15  ;;  %v3544_v24 = vmul.f32 1.442695, %v3443_v12  ;;  %v3441_v12 = vsub.f32 %v9775_v18, %v10024_v55  ;;  %v11155_v18 = vld [vmem:[#allocation13_spill] sm:$0xff] }
 0x42b   :  { %v10145_v11 = vpop.xlane.xlu0 %3377 }
 0x42c   :  { %8323 = vpow2.f32 %v3544_v24  ;;  %v3444_v24 = vsub.f32 %v9845_v37, %v10050_v14  ;;  %v11156_v37 = vld [vmem:[#allocation35_spill] sm:$0xff] }
 0x42e   :  { %5619 = vrot.lane.b32.xlu0 %v11152_v3, %s8511_s15  ;;  %v3045_v3 = vpop.f32.mrf.mxu0 }
 0x42f   :  { %v5096_v9 = vpop.permute.xlu0 %5095  ;;  %v10167_v50 = vadd.f32 %v9816_v33, %v3045_v3 }
 0x430   :  { %8086 = vmatprep.subr.mxu1 %v5096_v9 }
 0x431   :  { %8087 = vmatpush3.msra.mxu1 %v5096_v9  ;;  %v3550_v9 = vmul.f32 1.442695, %v3446_v16 }
 0x432   :  { %8089 = vmatmul.mubr.msk.f32.vlgmr.msra.gmra.mxu1 %vm3213_vm2, %v10149_v48 }
 0x433   :  { %8102 = vmatprep.mubr.msk.f32.mxu1 %vm3213_vm2, %v10151_v27  ;;  %v5272_v36 = vpop.permute.xlu0 %5271  ;;  %8325 = vpow2.f32 %v3550_v9  ;;  %v3540_v9 = vmul.f32 1.442695, %v3441_v12 }
 0x434   :  { %8098 = vmatprep.subr.mxu1 %v5272_v36 }
 0x435   :  { %8099 = vmatpush3.msra.mxu1 %v5272_v36  ;;  %v11153_v36 = vld [vmem:[#allocation21_spill] sm:$0xff]  ;;  %8327 = vpow2.f32 %v3540_v9  ;;  %v3447_v9 = vsub.f32 %v9861_v22, %v10055_v45  ;;  %v11158_v22 = vld [vmem:[#allocation15_spill] sm:$0xff] }
 0x438   :  { %3398 = vmax.xlane.f32.xlu1 %v3397_v6  ;;  %v3394_v6 = vsel %vm3213_vm2, %v10167_v50, -inf }
 0x439   :  { %v10177_v23 = vpop.eup %8323 }
 0x440   :  { %v10181_v16 = vpop.eup %8325 }
 0x449   :  { %5704 = vrot.lane.b32.xlu1 %v11153_v36, %s8511_s15  ;;  %v3546_v36 = vmul.f32 1.442695, %v3444_v24 }
 0x44b   :  { %8329 = vpow2.f32 %v3546_v36  ;;  %v3450_v36 = vsub.f32 %v9804_v62, %v10053_v40  ;;  %v11159_v62 = vld [vmem:[#allocation22_spill] sm:$0xff] }
 0x44d   :  { %3395 = vmax.xlane.f32.xlu0 %v3394_v6  ;;  %5880 = vrot.lane.b32.xlu1 %v11154_v4, %s8511_s15  ;;  %v7978_v6 = vpop.f32.mrf.mxu1  ;;  %v10195_v4 = vpop.eup %8327 }
 0x44e   :  { %v10202_v12 = vadd.f32 %v7978_v6, %v9877_v29  ;;  %v3558_v29 = vmul.f32 1.442695, %v3450_v36  ;;  %v11157_v6 = vld [vmem:[#allocation5_spill] sm:$0xff] }
 0x44f   :  { %v10175_v13 = vpop.xlane.xlu1 %3386 }
 0x453   :  { %v5357_v20 = vpop.permute.xlu1 %5356 }
 0x454   :  { %8107 = vmatprep.subr.mxu0 %v5357_v20 }
 0x455   :  { %8108 = vmatpush3.msra.mxu0 %v5357_v20 }
 0x456   :  { %8110 = vmatmul.mubr.msk.f32.vlgmr.msra.gmra.mxu0 %vm3213_vm2, %v10177_v23 }
 0x457   :  { %8123 = vmatprep.mubr.msk.f32.mxu0 %vm3213_vm2, %v10181_v16  ;;  %v5533_v3 = vpop.permute.xlu1 %5532 }
 0x458   :  { %8119 = vmatprep.subr.mxu0 %v5533_v3  ;;  %v10197_v20 = vpop.eup %8329 }
 0x459   :  { %8120 = vmatpush3.msra.mxu0 %v5533_v3  ;;  %v3403_v3 = vsel %vm3213_vm2, %v10202_v12, -inf }
 0x463   :  { %5617 = vrot.lane.b32.xlu0 %v11155_v18, %s8511_s15  ;;  %v3552_v18 = vmul.f32 1.442695, %v3447_v9  ;;  %v11160_v9 = vld [vmem:[#allocation34_spill] sm:$0xff] }
 0x464   :  { %v10191_v55 = vpop.xlane.xlu0 %3383 }
 0x465   :  { %8331 = vpow2.f32 %v3552_v18  ;;  %v3448_v18 = vsub.f32 %v9880_v53, %v10068_v7  ;;  %v11163_v53 = vld [vmem:[#allocation23_spill] sm:$0xff]  ;;  %v11164_v7 = vld [vmem:[#allocation33_spill] sm:$0xff] }
 0x466   :  { %8333 = vpow2.f32 %v3558_v29 }
 0x467   :  { %5793 = vrot.lane.b32.xlu0 %v11156_v37, %s8511_s15  ;;  %v3132_v37 = vpop.f32.mrf.mxu1 }
 0x468   :  { %v5270_v14 = vpop.permute.xlu0 %5269 }
 0x469   :  { %8100 = vmatprep.subr.mxu1 %v5270_v14 }
 0x46a   :  { %8101 = vmatpush3.msra.mxu1 %v5270_v14  ;;  %v10213_v14 = vadd.f32 %v9816_v33, %v3132_v37 }
 0x46b   :  { %8103 = vmatmul.mubr.msk.f32.vlgmr.msra.gmra.mxu1 %vm3213_vm2, %v10195_v4 }
 0x46c   :  { %8116 = vmatprep.mubr.msk.f32.mxu1 %vm3213_vm2, %v10197_v20  ;;  %v5446_v24 = vpop.permute.xlu0 %5445 }
 0x46d   :  { %8112 = vmatprep.subr.mxu1 %v5446_v24 }
 0x46e   :  { %8113 = vmatpush3.msra.mxu1 %v5446_v24  ;;  %v3400_v24 = vsel %vm3213_vm2, %v10213_v14, -inf }
 0x471   :  { %3404 = vmax.xlane.f32.xlu1 %v3403_v3  ;;  %v3445_v3 = vsub.f32 %v9834_v0, %v10047_v34  ;;  %v11161_v0 = vld [vmem:[#allocation7_spill] sm:$0xff]  ;;  %v3554_v34 = vmul.f32 1.442695, %v3448_v18 }
 0x472   :  { %v10225_v33 = vpop.eup %8331  ;;  %v11167_v18 = vld [vmem:[#allocation27_spill] sm:$0xff] }
 0x473   :  { %v10231_v36 = vpop.eup %8333  ;;  %v3548_v29 = vmul.f32 1.442695, %v3445_v3 }
 0x475   :  { %8335 = vpow2.f32 %v3548_v29  ;;  %v11168_v29 = vld [vmem:[#allocation37_spill] sm:$0xff] }
 0x476   :  { %8337 = vpow2.f32 %v3554_v34  ;;  %v3454_v34 = vsub.f32 %v9827_v26, %v10057_v15 }
 0x482   :  { %5878 = vrot.lane.b32.xlu1 %v11157_v6, %s8511_s15  ;;  %v11162_v6 = vld [vmem:[#allocation17_spill] sm:$0xff]  ;;  %v10253_v3 = vpop.eup %8335 }
 0x486   :  { %3401 = vmax.xlane.f32.xlu0 %v3400_v24  ;;  %5965 = vrot.lane.b32.xlu1 %v11158_v22, %s8511_s15  ;;  %v11165_v22 = vld [vmem:[#allocation36_spill] sm:$0xff] }
 0x488   :  { %v10221_v45 = vpop.xlane.xlu1 %3392 }
 0x48a   :  { %6052 = vrot.lane.b32.xlu1 %v11159_v62, %s8511_s15  ;;  %v11166_v62 = vld [vmem:[#allocation14_spill] sm:$0xff] }
 0x48c   :  { %v5531_v40 = vpop.permute.xlu1 %5530 }
 0x48d   :  { %8121 = vmatprep.subr.mxu0 %v5531_v40 }
 0x48e   :  { %8122 = vmatpush3.msra.mxu0 %v5531_v40  ;;  %6139 = vrot.lane.b32.xlu1 %v11160_v9, %s8511_s15  ;;  %v10255_v9 = vpop.eup %8337 }
 0x48f   :  { %8124 = vmatmul.mubr.msk.f32.vlgmr.msra.gmra.mxu0 %vm3213_vm2, %v10225_v33 }
 0x490   :  { %8137 = vmatprep.mubr.msk.f32.mxu0 %vm3213_vm2, %v10231_v36  ;;  %v5707_v37 = vpop.permute.xlu1 %5706 }
 0x491   :  { %8133 = vmatprep.subr.mxu0 %v5707_v37 }
 0x492   :  { %8134 = vmatpush3.msra.mxu0 %v5707_v37  ;;  %6226 = vrot.lane.b32.xlu1 %v11161_v0, %s8511_s15  ;;  %v11169_v0 = vld [vmem:[#allocation6_spill] sm:$0xff] }
 0x496   :  { %6313 = vrot.lane.b32.xlu1 %v11162_v6, %s8511_s15  ;;  %v11170_v6 = vld [vmem:[#allocation16_spill] sm:$0xff] }
 0x49a   :  { %6400 = vrot.lane.b32.xlu1 %v11163_v53, %s8511_s15  ;;  %v3566_v53 = vmul.f32 1.442695, %v3454_v34 }
 0x49c   :  { %5791 = vrot.lane.b32.xlu0 %v11164_v7, %s8511_s15  ;;  %v3451_v7 = vsub.f32 %v9894_v47, %v10076_v60  ;;  %8339 = vpow2.f32 %v3566_v53  ;;  %v3458_v60 = vsub.f32 %v9936_v41, %v10099_v5  ;;  %v3652_v5 = vsel %vm3213_vm2, %v9946_v10, 0.0 }
 0x49d   :  { %v10247_v24 = vpop.xlane.xlu0 %3389  ;;  %v3460_v10 = vsub.f32 %v9984_v39, %v10145_v11  ;;  %v3706_v39 = vsel %vm3213_vm2, %v10135_v61, 0.0 }
 0x49e   :  { %6487 = vrot.lane.b32.xlu1 %v11165_v22, %s8511_s15  ;;  %v11171_v22 = vld [vmem:[#allocation28_spill] sm:$0xff] }
 0x4a0   :  { %5967 = vrot.lane.b32.xlu0 %v11166_v62, %s8511_s15  ;;  %v3560_v62 = vmul.f32 1.442695, %v3451_v7  ;;  %v3658_v7 = vsel %vm3213_vm2, %v9971_v32, 0.0  ;;  %v3694_v32 = vsel %vm3213_vm2, %v10084_v8, 0.0 }
 0x4a1   :  { %v5444_v40 = vpop.permute.xlu0 %5443 }
 0x4a2   :  { %8114 = vmatprep.subr.mxu1 %v5444_v40  ;;  %8341 = vpow2.f32 %v3560_v62 }
 0x4a3   :  { %8115 = vmatpush3.msra.mxu1 %v5444_v40  ;;  %v11172_v40 = vld [vmem:[#allocation38_spill] sm:$0xff] }
 0x4a4   :  { %8117 = vmatmul.mubr.msk.f32.vlgmr.msra.gmra.mxu1 %vm3213_vm2, %v10253_v3  ;;  %6054 = vrot.lane.b32.xlu0 %v11167_v18, %s8511_s15  ;;  %v3456_v18 = vsub.f32 %v9931_v52, %v10095_v17  ;;  %v3449_v52 = vsub.f32 %v9870_v28, %v10062_v19  ;;  %v3452_v17 = vsub.f32 %v9915_v35, %v10091_v43  ;;  %v3700_v35 = vsel %vm3213_vm2, %v10151_v27, 0.0  ;;  %v11173_v27 = vld [vmem:[#allocation30_spill] sm:$0xff] }
 0x4a5   :  { %8130 = vmatprep.mubr.msk.f32.mxu1 %vm3213_vm2, %v10255_v9  ;;  %v5620_v37 = vpop.permute.xlu0 %5619 }
 0x4a6   :  { %8126 = vmatprep.subr.mxu1 %v5620_v37  ;;  %v3570_v26 = vmul.f32 1.442695, %v3456_v18  ;;  %v3556_v28 = vmul.f32 1.442695, %v3449_v52  ;;  %v3562_v19 = vmul.f32 1.442695, %v3452_v17 }
 0x4a7   :  { %8127 = vmatpush3.msra.mxu1 %v5620_v37  ;;  %v3649_v37 = vsel %vm3213_vm2, %v9907_v49, 0.0  ;;  %v3574_v49 = vmul.f32 1.442695, %v3458_v60  ;;  %v3712_v52 = vsel %vm3213_vm2, %v10197_v20, 0.0 }
 0x4a8   :  { %6141 = vrot.lane.b32.xlu0 %v11168_v29, %s8511_s15  ;;  %8343 = vpow2.f32 %v3570_v26 }
 0x4a9   :  { %v8340_v47 = vpop.eup %8339  ;;  %8345 = vpow2.f32 %v3574_v49  ;;  %v3655_v49 = vsel %vm3213_vm2, %v9948_v54, 0.0  ;;  %v3461_v54 = vsub.f32 %v9965_v44, %v10129_v56  ;;  %v3709_v56 = vsel %vm3213_vm2, %v10177_v23, 0.0 }
 0x4aa   :  { %8347 = vpow2.f32 %v3556_v28  ;;  %v11174_v28 = vld [vmem:[#allocation42_spill] sm:$0xff]  ;;  %v3724_v23 = vsel %vm3213_vm2, %v10255_v9, 0.0  ;;  %v3715_v9 = vsel %vm3213_vm2, %v10253_v3, 0.0 }
 0x4ab   :  { %8349 = vpow2.f32 %v3562_v19  ;;  %v3661_v19 = vsel %vm3213_vm2, %v11174_v28, 0.0 }
 0x4ac   :  { %6228 = vrot.lane.b32.xlu0 %v11169_v0, %s8511_s15  ;;  %v3742_v0 = vsel %vm3213_vm2, %v8340_v47, 0.0 }
 0x4af   :  { %v10286_v34 = vpop.eup %8341 }
 0x4b0   :  { %6315 = vrot.lane.b32.xlu0 %v11170_v6, %s8511_s15  ;;  %v3455_v6 = vsub.f32 %v9924_v21, %v10093_v2  ;;  %v3578_v2 = vmul.f32 1.442695, %v3460_v10 }
 0x4b2   :  { %v3568_v53 = vmul.f32 1.442695, %v3455_v6  ;;  %v3580_v6 = vmul.f32 1.442695, %v3461_v54 }
 0x4b4   :  { %6402 = vrot.lane.b32.xlu0 %v11171_v22, %s8511_s15  ;;  %8351 = vpow2.f32 %v3568_v53  ;;  %v3457_v22 = vsub.f32 %v11173_v27, %v10066_v46  ;;  %v11175_v53 = vld [vmem:[#allocation49_spill] sm:$0xff] }
 0x4b5   :  { %v10301_v43 = vpop.eup %8343  ;;  %8353 = vpow2.f32 %v3578_v2  ;;  %v3676_v10 = vsel %vm3213_vm2, %v11175_v53, 0.0 }
 0x4b6   :  { %v3748_v21 = vsel %vm3213_vm2, %v10301_v43, 0.0  ;;  %v10317_v11 = vpop.eup %8345  ;;  %v3572_v18 = vmul.f32 1.442695, %v3457_v22 }
 0x4b7   :  { %v10321_v46 = vpop.eup %8347  ;;  %v3754_v61 = vsel %vm3213_vm2, %v10317_v11, 0.0 }
 0x4b8   :  { %6489 = vrot.lane.b32.xlu0 %v11172_v40, %s8511_s15  ;;  %v3646_v40 = vsel %vm3213_vm2, %v9900_v58, 0.0  ;;  %v3462_v58 = vsub.f32 %v10060_v38, %v10191_v55  ;;  %8355 = vpow2.f32 %v3572_v18  ;;  %v3664_v55 = vsel %vm3213_vm2, %v10008_v51, 0.0  ;;  %v11179_v18 = vld [vmem:[#allocation26_spill] sm:$0xff] }
 0x4b9   :  { %v3464_v51 = vsub.f32 %v10121_v25, %v10247_v24  ;;  %v3718_v24 = vsel %vm3213_vm2, %v10181_v16, 0.0 }
 0x4ba   :  { %v3582_v38 = vmul.f32 1.442695, %v3462_v58 }
 0x4bc   :  { %8357 = vpow2.f32 %v3582_v38 }
 0x4c1   :  { %v10279_v15 = vpop.xlane.xlu1 %3398 }
 0x4c2   :  { %3650 = vadd.xlane.f32.xlu1 %v3649_v37  ;;  %v10323_v37 = vpop.eup %8349 }
 0x4c3   :  { %v8352_v60 = vpop.eup %8351 }
 0x4c5   :  { %v5705_v29 = vpop.permute.xlu1 %5704 }
 0x4c6   :  { %8135 = vmatprep.subr.mxu0 %v5705_v29  ;;  %3743 = vadd.xlane.f32.xlu1 %v3742_v0  ;;  %v3745_v0 = vsel %vm3213_vm2, %v8352_v60, 0.0 }
 0x4c7   :  { %8136 = vmatpush3.msra.mxu0 %v5705_v29  ;;  %v3459_v29 = vsub.f32 %v9888_v42, %v10074_v63  ;;  %v3703_v63 = vsel %vm3213_vm2, %v10195_v4, 0.0 }
 0x4c8   :  { %8138 = vmatmul.mubr.msk.f32.vlgmr.msra.gmra.mxu0 %vm3213_vm2, %v10286_v34 }
 0x4c9   :  { %8151 = vmatprep.mubr.msk.f32.mxu0 %vm3213_vm2, %v8340_v47  ;;  %v5881_v41 = vpop.permute.xlu1 %5880  ;;  %v3697_v47 = vsel %vm3213_vm2, %v10131_v30, 0.0  ;;  %v10342_v30 = vpop.eup %8353  ;;  %v3576_v17 = vmul.f32 1.442695, %v3459_v29  ;;  %v11181_v29 = vld [vmem:[#allocation20_spill] sm:$0xff] }
 0x4ca   :  { %8147 = vmatprep.subr.mxu0 %v5881_v41  ;;  %3653 = vadd.xlane.f32.xlu1 %v3652_v5  ;;  %v3760_v42 = vsel %vm3213_vm2, %v10342_v30, 0.0  ;;  %v10352_v20 = vpop.eup %8355  ;;  %v3670_v5 = vsel %vm3213_vm2, %v9986_v57, 0.0 }
 0x4cb   :  { %8148 = vmatpush3.msra.mxu0 %v5881_v41  ;;  %8359 = vpow2.f32 %v3576_v17  ;;  %v3586_v41 = vmul.f32 1.442695, %v3464_v51  ;;  %v3751_v25 = vsel %vm3213_vm2, %v10352_v20, 0.0  ;;  %v10362_v4 = vpop.eup %8357  ;;  %v3688_v51 = vsel %vm3213_vm2, %v10105_v1, 0.0 }
 0x4cc   :  { %v3766_v57 = vsel %vm3213_vm2, %v10362_v4, 0.0 }
 0x4cd   :  { %8361 = vpow2.f32 %v3586_v41 }
 0x4ce   :  { %3701 = vadd.xlane.f32.xlu1 %v3700_v35  ;;  %8363 = vpow2.f32 %v3580_v6 }
 0x4d2   :  { %3749 = vadd.xlane.f32.xlu1 %v3748_v21  ;;  %v11176_v21 = vld [vmem:[#allocation50_spill] sm:$0xff] }
 0x4d3   :  { %v3463_v2 = vsub.f32 %v11176_v21, %v10175_v13  ;;  %v11178_v13 = vld [vmem:[#allocation52_spill] sm:$0xff] }
 0x4d5   :  { %v3584_v22 = vmul.f32 1.442695, %v3463_v2 }
 0x4d6   :  { %v10311_v62 = vpop.xlane.xlu0 %3395  ;;  %3659 = vadd.xlane.f32.xlu1 %v3658_v7 }
 0x4d7   :  { %3647 = vadd.xlane.f32.xlu0 %v3646_v40  ;;  %v3466_v44 = vsub.f32 %v10167_v50, %v10311_v62  ;;  %v11177_v40 = vld [vmem:[#allocation40_spill] sm:$0xff] }
 0x4d8   :  { %v10372_v16 = vpop.eup %8359 }
 0x4d9   :  { %v3590_v35 = vmul.f32 1.442695, %v3466_v44  ;;  %v3757_v7 = vsel %vm3213_vm2, %v10372_v16, 0.0 }
 0x4da   :  { %v5618_v26 = vpop.permute.xlu0 %5617  ;;  %3707 = vadd.xlane.f32.xlu1 %v3706_v39  ;;  %v10384_v27 = vpop.eup %8361  ;;  %v3667_v39 = vsel %vm3213_vm2, %v11177_v40, 0.0 }
 0x4db   :  { %8128 = vmatprep.subr.mxu1 %v5618_v26  ;;  %3695 = vadd.xlane.f32.xlu0 %v3694_v32  ;;  %8365 = vpow2.f32 %v3590_v35  ;;  %v3772_v32 = vsel %vm3213_vm2, %v10384_v27, 0.0  ;;  %v10397_v58 = vpop.eup %8363 }
 0x4dc   :  { %8129 = vmatpush3.msra.mxu1 %v5618_v26  ;;  %v3453_v26 = vsub.f32 %v11179_v18, %v11178_v13  ;;  %8367 = vpow2.f32 %v3584_v22  ;;  %v3763_v38 = vsel %vm3213_vm2, %v10397_v58, 0.0  ;;  %v3691_v22 = vsel %vm3213_vm2, %v10149_v48, 0.0 }
 0x4dd   :  { %8131 = vmatmul.mubr.msk.f32.vlgmr.msra.gmra.mxu1 %vm3213_vm2, %v10321_v46 }
 0x4de   :  { %8144 = vmatprep.mubr.msk.f32.mxu1 %vm3213_vm2, %v10323_v37  ;;  %v5794_v8 = vpop.permute.xlu0 %5793  ;;  %3755 = vadd.xlane.f32.xlu1 %v3754_v61  ;;  %v3564_v61 = vmul.f32 1.442695, %v3453_v26  ;;  %v11187_v26 = vld [vmem:[#allocation24_spill] sm:$0xff] }
 0x4df   :  { %8140 = vmatprep.subr.mxu1 %v5794_v8  ;;  %3698 = vadd.xlane.f32.xlu0 %v3697_v47 }
 0x4e0   :  { %8141 = vmatpush3.msra.mxu1 %v5794_v8  ;;  %v11180_v8 = vld [vmem:[#allocation51_spill] sm:$0xff]  ;;  %8369 = vpow2.f32 %v3564_v61 }
 0x4e1   :  { %v3682_v47 = vsel %vm3213_vm2, %v11180_v8, 0.0  ;;  %v10480_v8 = vpop.f32.mrf.mxu0 }
 0x4e2   :  { %3665 = vadd.xlane.f32.xlu1 %v3664_v55 }
 0x4e3   :  { %3746 = vadd.xlane.f32.xlu0 %v3745_v0  ;;  %v3673_v0 = vsel %vm3213_vm2, %v11181_v29, 0.0 }
 0x4e6   :  { %3713 = vadd.xlane.f32.xlu1 %v3712_v52 }
 0x4e7   :  { %3656 = vadd.xlane.f32.xlu0 %v3655_v49 }
 0x4e8   :  { %v10407_v3 = vpop.eup %8365 }
 0x4e9   :  { %v10415_v17 = vpop.eup %8367 }
 0x4ea   :  { %3761 = vadd.xlane.f32.xlu1 %v3760_v42  ;;  %v3467_v42 = vsub.f32 %v10156_v31, %v10279_v15  ;;  %v3769_v41 = vsel %vm3213_vm2, %v10415_v17, 0.0  ;;  %v11182_v31 = vld [vmem:[#allocation32_spill] sm:$0xff] }
 0x4eb   :  { %3704 = vadd.xlane.f32.xlu0 %v3703_v63  ;;  %v3679_v15 = vsel %vm3213_vm2, %v11182_v31, 0.0 }
 0x4ec   :  { %v3592_v1 = vmul.f32 1.442695, %v3467_v42  ;;  %v11195_v42 = vld [vmem:[#allocation9_spill] sm:$0xff] }
 0x4ed   :  { %v10424_v54 = vpop.eup %8369 }
 0x4ee   :  { %3671 = vadd.xlane.f32.xlu1 %v3670_v5  ;;  %v3739_v18 = vsel %vm3213_vm2, %v10424_v54, 0.0 }
 0x4ef   :  { %3752 = vadd.xlane.f32.xlu0 %v3751_v25 }
 0x4f2   :  { %3719 = vadd.xlane.f32.xlu1 %v3718_v24 }
 0x4f3   :  { %3662 = vadd.xlane.f32.xlu0 %v3661_v19 }
 0x4f6   :  { %3767 = vadd.xlane.f32.xlu1 %v3766_v57  ;;  %v11183_v57 = vld [vmem:[#allocation53_spill] sm:$0xff] }
 0x4f7   :  { %3710 = vadd.xlane.f32.xlu0 %v3709_v56 }
 0x4fa   :  { %3677 = vadd.xlane.f32.xlu1 %v3676_v10  ;;  %v10378_v50 = vpop.xlane.xlu1 %3404 }
 0x4fb   :  { %3758 = vadd.xlane.f32.xlu0 %v3757_v7 }
 0x4fe   :  { %3725 = vadd.xlane.f32.xlu1 %v3724_v23  ;;  %v5879_v62 = vpop.permute.xlu1 %5878 }
 0x4ff   :  { %3668 = vadd.xlane.f32.xlu0 %v3667_v39  ;;  %8149 = vmatprep.subr.mxu0 %v5879_v62 }
 0x500   :  { %8150 = vmatpush3.msra.mxu0 %v5879_v62  ;;  %v11186_v62 = vld [vmem:[#allocation48_spill] sm:$0xff] }
 0x501   :  { %8152 = vmatmul.mubr.msk.f32.vlgmr.msra.gmra.mxu0 %vm3213_vm2, %v8352_v60  ;;  %v3465_v60 = vsub.f32 %v10110_v59, %v10221_v45  ;;  %v3778_v59 = vsel %vm3213_vm2, %v10407_v3, 0.0  ;;  %v3721_v45 = vsel %vm3213_vm2, %v10225_v33, 0.0  ;;  %v3610_v40 = vsel %vm3213_vm2, %v11186_v62, 0.0 }
 0x502   :  { %3773 = vadd.xlane.f32.xlu1 %v3772_v32  ;;  %8165 = vmatprep.mubr.msk.f32.mxu0 %vm3213_vm2, %v10317_v11  ;;  %v3730_v11 = vsel %vm3213_vm2, %v10231_v36, 0.0  ;;  %v5966_v52 = vpop.permute.xlu1 %5965  ;;  %v3616_v32 = vsel %vm3213_vm2, %v11187_v26, 0.0 }
 0x503   :  { %3716 = vadd.xlane.f32.xlu0 %v3715_v9  ;;  %v3588_v55 = vmul.f32 1.442695, %v3465_v60 }
 0x505   :  { %8371 = vpow2.f32 %v3588_v55  ;;  %v11191_v55 = vld [vmem:[#allocation43_spill] sm:$0xff] }
 0x506   :  { %3683 = vadd.xlane.f32.xlu1 %v3682_v47  ;;  %v6053_v5 = vpop.permute.xlu1 %6052  ;;  %v11189_v47 = vld [vmem:[#allocation11_spill] sm:$0xff]  ;;  %v3607_v29 = vsel %vm3213_vm2, %v11191_v55, 0.0 }
 0x507   :  { %3764 = vadd.xlane.f32.xlu0 %v3763_v38  ;;  %v3601_v60 = vsel %vm3213_vm2, %v11189_v47, 0.0  ;;  %v11190_v38 = vld [vmem:[#allocation44_spill] sm:$0xff] }
 0x50a   :  { %3731 = vadd.xlane.f32.xlu1 %v3730_v11  ;;  %v6140_v24 = vpop.permute.xlu1 %6139  ;;  %v3628_v11 = vsel %vm3213_vm2, %v11190_v38, 0.0 }
 0x50b   :  { %3674 = vadd.xlane.f32.xlu0 %v3673_v0  ;;  %v11192_v0 = vld [vmem:[#allocation47_spill] sm:$0xff] }
 0x50e   :  { %3779 = vadd.xlane.f32.xlu1 %v3778_v59  ;;  %v6227_v44 = vpop.permute.xlu1 %6226 }
 0x50f   :  { %3722 = vadd.xlane.f32.xlu0 %v3721_v45  ;;  %v3402_v36 = vpop.xlane.xlu0 %3401  ;;  %v11193_v45 = vld [vmem:[#allocation10_spill] sm:$0xff] }
 0x510   :  { %v3468_v49 = vsub.f32 %v10213_v14, %v3402_v36  ;;  %v3736_v14 = vsel %vm3213_vm2, %v10323_v37, 0.0  ;;  %v3727_v37 = vsel %vm3213_vm2, %v10321_v46, 0.0  ;;  %v11194_v36 = vld [vmem:[#allocation18_spill] sm:$0xff] }
 0x512   :  { %v3594_v63 = vmul.f32 1.442695, %v3468_v49  ;;  %3689 = vadd.xlane.f32.xlu1 %v3688_v51  ;;  %v8372_v6 = vpop.eup %8371  ;;  %v6314_v53 = vpop.permute.xlu1 %6313  ;;  %v3640_v49 = vsel %vm3213_vm2, %v11194_v36, 0.0 }
 0x513   :  { %3770 = vadd.xlane.f32.xlu0 %v3769_v41  ;;  %v5792_v33 = vpop.permute.xlu0 %5791  ;;  %v3775_v19 = vsel %vm3213_vm2, %v8372_v6, 0.0 }
 0x514   :  { %8373 = vpow2.f32 %v3594_v63  ;;  %8142 = vmatprep.subr.mxu1 %v5792_v33  ;;  %v3619_v63 = vsel %vm3213_vm2, %v11195_v42, 0.0 }
 0x515   :  { %8143 = vmatpush3.msra.mxu1 %v5792_v33  ;;  %8375 = vpow2.f32 %v3592_v1  ;;  %v11197_v1 = vld [vmem:[#allocation41_spill] sm:$0xff] }
 0x516   :  { %8145 = vmatmul.mubr.msk.f32.vlgmr.msra.gmra.mxu1 %vm3213_vm2, %v10424_v54  ;;  %3737 = vadd.xlane.f32.xlu1 %v3736_v14  ;;  %v6401_v23 = vpop.permute.xlu1 %6400  ;;  %v3631_v31 = vsel %vm3213_vm2, %v11197_v1, 0.0 }
 0x517   :  { %3680 = vadd.xlane.f32.xlu0 %v3679_v15  ;;  %8158 = vmatprep.mubr.msk.f32.mxu1 %vm3213_vm2, %v10301_v43  ;;  %v5968_v25 = vpop.permute.xlu0 %5967  ;;  %v3469_v43 = vsub.f32 %v10202_v12, %v10378_v50  ;;  %v3685_v12 = vsel %vm3213_vm2, %v11183_v57, 0.0 }
 0x518   :  { %8154 = vmatprep.subr.mxu1 %v5968_v25 }
 0x519   :  { %8155 = vmatpush3.msra.mxu1 %v5968_v25 }
 0x51a   :  { %8156 = vmatprep.subr.mxu1 %v5966_v52  ;;  %v6488_v13 = vpop.permute.xlu1 %6487 }
 0x51b   :  { %3728 = vadd.xlane.f32.xlu0 %v3727_v37  ;;  %8157 = vmatpush3.msra.mxu1 %v5966_v52  ;;  %v6055_v28 = vpop.permute.xlu0 %6054  ;;  %v3634_v52 = vsel %vm3213_vm2, %v11192_v0, 0.0 }
 0x51c   :  { %8159 = vmatmul.mubr.msk.f32.vlgmr.msra.gmra.mxu1 %vm3213_vm2, %v10352_v20  ;;  %8161 = vmatprep.subr.mxu0 %v6055_v28 }
 0x51d   :  { %8162 = vmatpush3.msra.mxu0 %v6055_v28  ;;  %8172 = vmatprep.mubr.msk.f32.mxu1 %vm3213_vm2, %v10342_v30  ;;  %v3596_v30 = vmul.f32 1.442695, %v3469_v43 }
 0x51e   :  { %8163 = vmatprep.subr.mxu0 %v6053_v5 }
 0x51f   :  { %3776 = vadd.xlane.f32.xlu0 %v3775_v19  ;;  %8164 = vmatpush3.msra.mxu0 %v6053_v5  ;;  %v6142_v46 = vpop.permute.xlu0 %6141  ;;  %8377 = vpow2.f32 %v3596_v30  ;;  %v11196_v5 = vld [vmem:[#allocation45_spill] sm:$0xff]  ;;  %v11199_v19 = vld [vmem:[#allocation8_spill] sm:$0xff] }
 0x520   :  { %8166 = vmatmul.mubr.msk.f32.vlgmr.msra.gmra.mxu0 %vm3213_vm2, %v10372_v16  ;;  %8168 = vmatprep.subr.mxu1 %v6142_v46  ;;  %v11184_v16 = vld [vmem:[#allocation46_spill] sm:$0xff]  ;;  %v3625_v33 = vsel %vm3213_vm2, %v11196_v5, 0.0 }
 0x521   :  { %v8374_v20 = vpop.eup %8373  ;;  %8169 = vmatpush3.msra.mxu1 %v6142_v46  ;;  %8179 = vmatprep.mubr.msk.f32.mxu0 %vm3213_vm2, %v10362_v4  ;;  %v3733_v4 = vsel %vm3213_vm2, %v10286_v34, 0.0  ;;  %v3598_v10 = vsel %vm3213_vm2, %v11184_v16, 0.0  ;;  %v11185_v34 = vld [vmem:[#allocation29_spill] sm:$0xff] }
 0x522   :  { %8170 = vmatprep.subr.mxu1 %v6140_v24  ;;  %v3784_v56 = vsel %vm3213_vm2, %v8374_v20, 0.0  ;;  %v8376_v21 = vpop.eup %8375  ;;  %v3604_v7 = vsel %vm3213_vm2, %v11185_v34, 0.0 }
 0x523   :  { %3686 = vadd.xlane.f32.xlu0 %v3685_v12  ;;  %3785 = vadd.xlane.f32.xlu1 %v3784_v56  ;;  %v6229_v35 = vpop.permute.xlu0 %6228  ;;  %v3781_v50 = vsel %vm3213_vm2, %v8376_v21, 0.0 }
 0x524   :  { %8171 = vmatpush3.msra.mxu1 %v6140_v24  ;;  %8175 = vmatprep.subr.mxu0 %v6229_v35  ;;  %v11198_v24 = vld [vmem:[#allocation39_spill] sm:$0xff] }
 0x525   :  { %8173 = vmatmul.mubr.msk.f32.vlgmr.msra.gmra.mxu1 %vm3213_vm2, %v10397_v58  ;;  %8176 = vmatpush3.msra.mxu0 %v6229_v35  ;;  %v11188_v58 = vld [vmem:[#allocation19_spill] sm:$0xff]  ;;  %v3637_v37 = vsel %vm3213_vm2, %v11198_v24, 0.0 }
 0x526   :  { %8186 = vmatprep.mubr.msk.f32.mxu1 %vm3213_vm2, %v10384_v27  ;;  %8177 = vmatprep.subr.mxu0 %v6227_v44  ;;  %v3622_v61 = vsel %vm3213_vm2, %v11188_v58, 0.0 }
 0x527   :  { %3734 = vadd.xlane.f32.xlu0 %v3733_v4  ;;  %3599 = vadd.xlane.f32.xlu1 %v3598_v10  ;;  %v6316_v2 = vpop.permute.xlu0 %6315 }
 0x528   :  { %8178 = vmatpush3.msra.mxu0 %v6227_v44  ;;  %8182 = vmatprep.subr.mxu1 %v6316_v2  ;;  %v3643_v44 = vsel %vm3213_vm2, %v11199_v19, 0.0 }
 0x529   :  { %8180 = vmatmul.mubr.msk.f32.vlgmr.msra.gmra.mxu0 %vm3213_vm2, %v10415_v17  ;;  %8183 = vmatpush3.msra.mxu1 %v6316_v2  ;;  %v3613_v17 = vsel %vm3213_vm2, %v11193_v45, 0.0 }
 0x52a   :  { %8193 = vmatprep.mubr.msk.f32.mxu0 %vm3213_vm2, %v10407_v3  ;;  %8184 = vmatprep.subr.mxu1 %v6314_v53  ;;  %v10486_v3 = vpop.f32.mrf.mxu0 }
 0x52b   :  { %3782 = vadd.xlane.f32.xlu0 %v3781_v50  ;;  %3605 = vadd.xlane.f32.xlu1 %v3604_v7  ;;  %v6403_v27 = vpop.permute.xlu0 %6402 }
 0x52c   :  { %8185 = vmatpush3.msra.mxu1 %v6314_v53  ;;  %8189 = vmatprep.subr.mxu0 %v6403_v27  ;;  %v8378_v48 = vpop.eup %8377  ;;  %v10492_v59 = vpop.f32.mrf.mxu0 }
 0x52d   :  { %8187 = vmatmul.mubr.msk.f32.vlgmr.msra.gmra.mxu1 %vm3213_vm2, %v8372_v6  ;;  %8190 = vmatpush3.msra.mxu0 %v6403_v27  ;;  %v3787_v9 = vsel %vm3213_vm2, %v8378_v48, 0.0 }
 0x52e   :  { %8200 = vmatprep.mubr.msk.f32.mxu1 %vm3213_vm2, %v8374_v20  ;;  %8191 = vmatprep.subr.mxu0 %v6401_v23  ;;  %v10498_v51 = vpop.f32.mrf.mxu0 }
 0x52f   :  { %3692 = vadd.xlane.f32.xlu0 %v3691_v22  ;;  %3611 = vadd.xlane.f32.xlu1 %v3610_v40  ;;  %v6490_v39 = vpop.permute.xlu0 %6489 }
 0x530   :  { %8192 = vmatpush3.msra.mxu0 %v6401_v23  ;;  %8196 = vmatprep.subr.mxu1 %v6490_v39  ;;  %v10502_v41 = vpop.f32.mrf.mxu0 }
 0x531   :  { %8194 = vmatmul.mubr.msk.f32.vlgmr.msra.gmra.mxu0 %vm3213_vm2, %v8376_v21  ;;  %8197 = vmatpush3.msra.mxu1 %v6490_v39 }
 0x532   :  { %8198 = vmatprep.subr.mxu1 %v6488_v13  ;;  %v10506_v14 = vpop.f32.mrf.mxu0 }
 0x533   :  { %3740 = vadd.xlane.f32.xlu0 %v3739_v18  ;;  %3617 = vadd.xlane.f32.xlu1 %v3616_v32 }
 0x534   :  { %8199 = vmatpush3.msra.mxu1 %v6488_v13  ;;  %v10512_v25 = vpop.f32.mrf.mxu0 }
 0x535   :  { %8201 = vmatmul.mubr.msk.f32.vlgmr.msra.gmra.mxu1 %vm3213_vm2, %v8378_v48 }
 0x536   :  { %v10518_v28 = vpop.f32.mrf.mxu0 }
 0x537   :  { %3788 = vadd.xlane.f32.xlu0 %v3787_v9  ;;  %3623 = vadd.xlane.f32.xlu1 %v3622_v61 }
 0x538   :  { %v8041_v43 = vpop.f32.mrf.mxu0 }
 0x53a   :  { %v4564_v20 = vpop.f32.mrf.mxu0 }
 0x53b   :  { %3602 = vadd.xlane.f32.xlu0 %v3601_v60  ;;  %3629 = vadd.xlane.f32.xlu1 %v3628_v11 }
 0x53c   :  { %v10526_v57 = vpop.f32.mrf.mxu0 }
 0x53e   :  { %v10530_v56 = vpop.f32.mrf.mxu0 }
 0x53f   :  { %3608 = vadd.xlane.f32.xlu0 %v3607_v29  ;;  %3635 = vadd.xlane.f32.xlu1 %v3634_v52 }
 0x540   :  { %v10532_v53 = vpop.f32.mrf.mxu0 }
 0x541   :  { %11200 = vst [vmem:[#allocation3_spill] sm:$0xff] %v10532_v53 }
 0x542   :  { %v10536_v10 = vpop.f32.mrf.mxu0 }
 0x543   :  { %3614 = vadd.xlane.f32.xlu0 %v3613_v17  ;;  %3641 = vadd.xlane.f32.xlu1 %v3640_v49  ;;  %11201 = vst [vmem:[#allocation25_spill] sm:$0xff] %v10536_v10 }
 0x544   :  { %v10540_v50 = vpop.f32.mrf.mxu0 }
 0x545   :  { %11202 = vst [vmem:[#allocation31_spill] sm:$0xff] %v10540_v50 }
 0x546   :  { %v10544_v27 = vpop.f32.mrf.mxu0 }
 0x547   :  { %3620 = vadd.xlane.f32.xlu0 %v3619_v63  ;;  %11203 = vst [vmem:[#allocation12_spill] sm:$0xff] %v10544_v27 }
 0x548   :  { %v8097_v40 = vpop.f32.mrf.mxu0 }
 0x54a   :  { %v5260_v32 = vpop.f32.mrf.mxu0 }
 0x54b   :  { %3626 = vadd.xlane.f32.xlu0 %v3625_v33  ;;  %v3651_v54 = vpop.xlane.xlu1 %3650 }
 0x54c   :  { %8379 = vrcp.f32 %v3651_v54  ;;  %v10566_v29 = vpop.f32.mrf.mxu0 }
 0x54e   :  { %v10572_v45 = vpop.f32.mrf.mxu0 }
 0x54f   :  { %3632 = vadd.xlane.f32.xlu0 %v3631_v31  ;;  %v10510_v15 = vpop.xlane.xlu1 %3743 }
 0x550   :  { %v10578_v49 = vpop.f32.mrf.mxu0 }
 0x551   :  { %11204 = vst [vmem:[#allocation21_spill] sm:$0xff] %v10578_v49 }
 0x552   :  { %v5608_v33 = vpop.f32.mrf.mxu0 }
 0x553   :  { %3638 = vadd.xlane.f32.xlu0 %v3637_v37  ;;  %v10516_v6 = vpop.xlane.xlu1 %3653 }
 0x557   :  { %3644 = vadd.xlane.f32.xlu0 %v3643_v44  ;;  %v10522_v46 = vpop.xlane.xlu1 %3701 }
 0x559   :  { %v8380_v2 = vpop.eup %8379 }
 0x55a   :  { %v6655_v23 = vmul.f32 %v8380_v2, %v8041_v43  ;;  %v10594_v43 = vpop.f32.mrf.mxu1 }
 0x55b   :  { %v10524_v30 = vpop.xlane.xlu1 %3749 }
 0x55f   :  { %v10528_v12 = vpop.xlane.xlu1 %3659 }
 0x560   :  { %v3648_v35 = vpop.xlane.xlu0 %3647 }
 0x561   :  { %8381 = vrcp.f32 %v3648_v35 }
 0x563   :  { %v10534_v4 = vpop.xlane.xlu1 %3707 }
 0x564   :  { %v3696_v16 = vpop.xlane.xlu0 %3695 }
 0x565   :  { %8383 = vrcp.f32 %v3696_v16 }
 0x567   :  { %v10538_v21 = vpop.xlane.xlu1 %3755 }
 0x568   :  { %v3699_v34 = vpop.xlane.xlu0 %3698 }
 0x569   :  { %8385 = vrcp.f32 %v3699_v34 }
 0x56b   :  { %v10542_v7 = vpop.xlane.xlu1 %3665 }
 0x56c   :  { %v10546_v22 = vpop.xlane.xlu0 %3746 }
 0x56d   :  { %6736 = vrot.lane.b32.xlu0 %v6655_v23, %s8512_s5 }
 0x56e   :  { %v8382_v62 = vpop.eup %8381 }
 0x56f   :  { %v10549_v39 = vpop.xlane.xlu1 %3713  ;;  %v6654_v13 = vmul.f32 %v8382_v62, %v4564_v20  ;;  %v10598_v20 = vpop.f32.mrf.mxu1 }
 0x570   :  { %v10551_v18 = vpop.xlane.xlu0 %3656 }
 0x571   :  { %6734 = vrot.lane.b32.xlu1 %v6654_v13, %s8512_s5  ;;  %v10602_v16 = vpop.f32.mrf.mxu1 }
 0x572   :  { %v8384_v26 = vpop.eup %8383 }
 0x573   :  { %v10554_v48 = vpop.xlane.xlu1 %3761  ;;  %v6670_v9 = vmul.f32 %v8384_v26, %v5260_v32  ;;  %v10608_v23 = vpop.f32.mrf.mxu1 }
 0x574   :  { %v10556_v58 = vpop.xlane.xlu0 %3704 }
 0x575   :  { %6815 = vrot.lane.b32.xlu1 %v6670_v9, %s8513_s8 }
 0x576   :  { %v8386_v61 = vpop.eup %8385 }
 0x577   :  { %v10559_v47 = vpop.xlane.xlu1 %3671  ;;  %v6671_v60 = vmul.f32 %v8386_v61, %v8097_v40  ;;  %v10610_v40 = vpop.f32.mrf.mxu1 }
 0x578   :  { %v10561_v38 = vpop.xlane.xlu0 %3752 }
 0x579   :  { %6817 = vrot.lane.b32.xlu1 %v6671_v60, %s8513_s8  ;;  %v10618_v60 = vpop.f32.mrf.mxu1 }
 0x57b   :  { %v3720_v11 = vpop.xlane.xlu1 %3719 }
 0x57c   :  { %8387 = vrcp.f32 %v3720_v11  ;;  %v10564_v55 = vpop.xlane.xlu0 %3662 }
 0x57f   :  { %v10568_v0 = vpop.xlane.xlu1 %3767 }
 0x580   :  { %v10570_v52 = vpop.xlane.xlu0 %3710 }
 0x583   :  { %v10574_v17 = vpop.xlane.xlu1 %3677 }
 0x584   :  { %v10576_v36 = vpop.xlane.xlu0 %3758 }
 0x587   :  { %v10580_v42 = vpop.xlane.xlu1 %3725 }
 0x588   :  { %11205 = vst [vmem:[#allocation4_spill] sm:$0xff] %v10580_v42  ;;  %v10582_v63 = vpop.xlane.xlu0 %3668  ;;  %v8139_v62 = vpop.f32.mrf.mxu0 }
 0x589   :  { %v8388_v5 = vpop.eup %8387 }
 0x58a   :  { %v10584_v54 = vmul.f32 %v8388_v5, %v5608_v33  ;;  %v5782_v32 = vpop.f32.mrf.mxu0  ;;  %v10622_v5 = vpop.f32.mrf.mxu1 }
 0x58b   :  { %v10586_v1 = vpop.xlane.xlu1 %3773 }
 0x58c   :  { %11206 = vst [vmem:[#allocation13_spill] sm:$0xff] %v10584_v54  ;;  %11207 = vst [vmem:[#allocation35_spill] sm:$0xff] %v10586_v1  ;;  %v10588_v31 = vpop.xlane.xlu0 %3716  ;;  %v10628_v27 = vpop.f32.mrf.mxu1 }
 0x58e   :  { %v10630_v50 = vpop.f32.mrf.mxu1 }
 0x58f   :  { %v10590_v24 = vpop.xlane.xlu1 %3683 }
 0x590   :  { %11208 = vst [vmem:[#allocation5_spill] sm:$0xff] %v10590_v24  ;;  %v10592_v37 = vpop.xlane.xlu0 %3764 }
 0x593   :  { %v3732_v19 = vpop.xlane.xlu1 %3731 }
 0x594   :  { %8389 = vrcp.f32 %v3732_v19  ;;  %v10596_v44 = vpop.xlane.xlu0 %3674 }
 0x597   :  { %v10604_v2 = vpop.xlane.xlu1 %3779 }
 0x598   :  { %v10600_v35 = vpop.xlane.xlu0 %3722  ;;  %11209 = vst [vmem:[#allocation15_spill] sm:$0xff] %v10604_v2 }
 0x59b   :  { %v10614_v9 = vpop.xlane.xlu1 %3689 }
 0x59c   :  { %v10606_v34 = vpop.xlane.xlu0 %3770  ;;  %11210 = vst [vmem:[#allocation22_spill] sm:$0xff] %v10614_v9 }
 0x59f   :  { %v10624_v33 = vpop.xlane.xlu1 %3737 }
 0x5a0   :  { %v10612_v13 = vpop.xlane.xlu0 %3680 }
 0x5a1   :  { %v8390_v26 = vpop.eup %8389 }
 0x5a2   :  { %v10616_v61 = vmul.f32 %v8390_v26, %v5782_v32  ;;  %v10636_v26 = vpop.f32.mrf.mxu1 }
 0x5a4   :  { %11211 = vst [vmem:[#allocation34_spill] sm:$0xff] %v10616_v61  ;;  %v10620_v11 = vpop.xlane.xlu0 %3728  ;;  %v10638_v9 = vpop.f32.mrf.mxu1 }
 0x5a5   :  { %11212 = vst [vmem:[#allocation7_spill] sm:$0xff] %v10620_v11 }
 0x5a8   :  { %v10626_v19 = vpop.xlane.xlu0 %3776 }
 0x5a9   :  { %11213 = vst [vmem:[#allocation17_spill] sm:$0xff] %v10626_v19  ;;  %v10644_v19 = vpop.f32.mrf.mxu1 }
 0x5ac   :  { %v10632_v2 = vpop.xlane.xlu1 %3785  ;;  %v10634_v24 = vpop.xlane.xlu0 %3686 }
 0x5ad   :  { %11214 = vst [vmem:[#allocation23_spill] sm:$0xff] %v10632_v2  ;;  %11215 = vst [vmem:[#allocation33_spill] sm:$0xff] %v10634_v24  ;;  %v10647_v2 = vpop.f32.mrf.mxu1 }
 0x5ae   :  { %11217 = vst [vmem:[#allocation14_spill] sm:$0xff] %v10647_v2 }
 0x5b0   :  { %v3600_v32 = vpop.xlane.xlu1 %3599  ;;  %v3735_v61 = vpop.xlane.xlu0 %3734 }
 0x5b1   :  { %8391 = vrcp.f32 %v3600_v32 }
 0x5b2   :  { %8393 = vrcp.f32 %v3735_v61 }
 0x5b3   :  { %8395 = vrcp.f32 %v10510_v15  ;;  %v6980_v15 = vld [vmem:[%s10959_s3 + $0x18] sm:$0xff] }
 0x5b4   :  { %8397 = vrcp.f32 %v10546_v22  ;;  %v3606_v54 = vpop.xlane.xlu1 %3605  ;;  %v10642_v1 = vpop.xlane.xlu0 %3782  ;;  %8203 = vmatprep.subr.mxu0 %v6980_v15 }
 0x5b5   :  { %11216 = vst [vmem:[#allocation36_spill] sm:$0xff] %v10642_v1  ;;  %8399 = vrcp.f32 %v3606_v54  ;;  %v10656_v22 = vpop.f32.mrf.mxu1  ;;  %8204 = vmatpush3.msra.mxu0 %v6980_v15 }
 0x5b6   :  { %8401 = vrcp.f32 %v10551_v18  ;;  %11219 = vst [vmem:[#allocation37_spill] sm:$0xff] %v10656_v22  ;;  %v6979_v18 = vld [vmem:[%s10959_s3 + $0x10] sm:$0xff] }
 0x5b7   :  { %8403 = vrcp.f32 %v10516_v6  ;;  %v10662_v61 = vpop.f32.mrf.mxu1  ;;  %8205 = vmatprep.subr.mxu0 %v6979_v18 }
 0x5b8   :  { %v3612_v24 = vpop.xlane.xlu1 %3611  ;;  %v10650_v49 = vpop.xlane.xlu0 %3692  ;;  %11220 = vst [vmem:[#allocation6_spill] sm:$0xff] %v10662_v61  ;;  %8206 = vmatpush3.msra.mxu0 %v6979_v18 }
 0x5b9   :  { %11218 = vst [vmem:[#allocation27_spill] sm:$0xff] %v10650_v49  ;;  %8405 = vrcp.f32 %v3612_v24  ;;  %v10675_v2 = vpop.f32.mrf.mxu1 }
 0x5ba   :  { %8407 = vrcp.f32 %v10556_v58  ;;  %v6978_v58 = vld [vmem:[%s10959_s3 + $0x8] sm:$0xff] }
 0x5bb   :  { %8409 = vrcp.f32 %v10522_v46  ;;  %8207 = vmatprep.subr.mxu0 %v6978_v58  ;;  %v6977_v46 = vld [vmem:[%s10959_s3] sm:$0xff]  ;;  %v8104_v10 = vpop.f32.mrf.mxu1  ;;  %s8514_s3 = smov 24  }
 0x5bc   :  { %v3618_v6 = vpop.xlane.xlu1 %3617  ;;  %v3741_v54 = vpop.xlane.xlu0 %3740  ;;  %8208 = vmatpush3.msra.mxu0 %v6978_v58 }
 0x5bd   :  { %8411 = vrcp.f32 %v3618_v6  ;;  %8209 = vmatprep.subr.mxu0 %v6977_v46 }
 0x5be   :  { %v8392_v24 = vpop.eup %8391  ;;  %8210 = vmatpush3.msra.mxu0 %v6977_v46 }
 0x5bf   :  { %v8394_v32 = vpop.eup %8393  ;;  %v6638_v49 = vmul.f32 %v8392_v24, %v10486_v3 }
 0x5c0   :  { %v8396_v1 = vpop.eup %8395  ;;  %v3624_v15 = vpop.xlane.xlu1 %3623  ;;  %v10673_v6 = vmul.f32 %v8394_v32, %v8139_v62 }
 0x5c1   :  { %v10671_v22 = vpop.xlane.xlu0 %3788  ;;  %v8398_v61 = vpop.eup %8397  ;;  %8413 = vrcp.f32 %v3624_v15  ;;  %6702 = vst.msk [vmem:[#allocation2] sm:$0xff] %vm360_vm1, %v6638_v49 }
 0x5c2   :  { %11221 = vst [vmem:[#allocation16_spill] sm:$0xff] %v10671_v22  ;;  %v8153_v18 = vpop.f32.mrf.mxu0  ;;  %v8400_v3 = vpop.eup %8399 }
 0x5c3   :  { %v6687_v24 = vmul.f32 %v8398_v61, %v8153_v18  ;;  %v8402_v42 = vpop.eup %8401  ;;  %v6640_v11 = vmul.f32 %v8400_v3, %v10598_v20  ;;  %v5347_v15 = vpop.f32.mrf.mxu1 }
 0x5c4   :  { %v5956_v53 = vpop.f32.mrf.mxu0  ;;  %v3630_v62 = vpop.xlane.xlu1 %3629  ;;  %v6657_v61 = vmul.f32 %v8402_v42, %v10630_v50 }
 0x5c5   :  { %v6686_v22 = vmul.f32 %v8396_v1, %v5956_v53  ;;  %v3603_v32 = vpop.xlane.xlu0 %3602  ;;  %6898 = vrot.lane.b32.xlu1 %v6687_v24, %s8514_s3  ;;  %v8404_v58 = vpop.eup %8403  ;;  %8415 = vrcp.f32 %v3630_v62  ;;  %6704 = vst.msk [vmem:[#allocation2 + $0x10] sm:$0xff] %vm360_vm1, %v6640_v11 }
 0x5c6   :  { %v8406_v49 = vpop.eup %8405  ;;  %8417 = vrcp.f32 %v3603_v32  ;;  %v6656_v18 = vmul.f32 %v8404_v58, %v10636_v26  ;;  %v10687_v24 = vpop.f32.mrf.mxu1 }
 0x5c7   :  { %6896 = vrot.lane.b32.xlu0 %v6686_v22, %s8514_s3  ;;  %v8408_v46 = vpop.eup %8407  ;;  %v6642_v20 = vmul.f32 %v8406_v49, %v10498_v51  ;;  %8419 = vrcp.f32 %v3741_v54 }
 0x5c8   :  { %v3636_v53 = vpop.xlane.xlu1 %3635  ;;  %v8410_v3 = vpop.eup %8409  ;;  %v6673_v50 = vmul.f32 %v8408_v46, %v8104_v10 }
 0x5c9   :  { %v3609_v1 = vpop.xlane.xlu0 %3608  ;;  %6740 = vrot.lane.b32.xlu1 %v6657_v61, %s8512_s5  ;;  %8421 = vrcp.f32 %v3636_v53  ;;  %6706 = vst.msk [vmem:[#allocation2 + $0x20] sm:$0xff] %vm360_vm1, %v6642_v20  ;;  %v6672_v26 = vmul.f32 %v8410_v3, %v5347_v15  ;;  %v10695_v62 = vpop.f32.mrf.mxu1 }
 0x5ca   :  { %v8412_v11 = vpop.eup %8411  ;;  %8423 = vrcp.f32 %v3609_v1 }
 0x5cb   :  { %6738 = vrot.lane.b32.xlu0 %v6656_v18, %s8512_s5  ;;  %8425 = vrcp.f32 %v10624_v33  ;;  %v6644_v51 = vmul.f32 %v8412_v11, %v10608_v23 }
 0x5cc   :  { %8427 = vrcp.f32 %v10524_v30  ;;  %v3642_v42 = vpop.xlane.xlu1 %3641  ;;  %v10701_v30 = vpop.f32.mrf.mxu1 }
 0x5cd   :  { %v3615_v22 = vpop.xlane.xlu0 %3614  ;;  %6821 = vrot.lane.b32.xlu1 %v6673_v50, %s8513_s8  ;;  %8429 = vrcp.f32 %v3642_v42  ;;  %6708 = vst.msk [vmem:[#allocation2 + $0x30] sm:$0xff] %vm360_vm1, %v6644_v51 }
 0x5ce   :  { %v8414_v54 = vpop.eup %8413  ;;  %8431 = vrcp.f32 %v3615_v22  ;;  %v10707_v49 = vpop.f32.mrf.mxu1 }
 0x5cf   :  { %6819 = vrot.lane.b32.xlu0 %v6672_v26, %s8513_s8  ;;  %8433 = vrcp.f32 %v10561_v38  ;;  %v6646_v10 = vmul.f32 %v8414_v54, %v10506_v14 }
 0x5d0   :  { %8435 = vrcp.f32 %v10564_v55 }
 0x5d1   :  { %v3621_v23 = vpop.xlane.xlu0 %3620  ;;  %6710 = vst.msk [vmem:[#allocation2 + $0x40] sm:$0xff] %vm360_vm1, %v6646_v10 }
 0x5d2   :  { %8437 = vrcp.f32 %v3621_v23  ;;  %v8416_v33 = vpop.eup %8415 }
 0x5d3   :  { %v8418_v32 = vpop.eup %8417  ;;  %8439 = vrcp.f32 %v10528_v12  ;;  %v6648_v58 = vmul.f32 %v8416_v33, %v10618_v60 }
 0x5d4   :  { %8441 = vrcp.f32 %v10570_v52  ;;  %v6639_v14 = vmul.f32 %v8418_v32, %v10480_v8  ;;  %v8420_v55 = vpop.eup %8419 }
 0x5d5   :  { %v3627_v38 = vpop.xlane.xlu0 %3626  ;;  %6712 = vst.msk [vmem:[#allocation2 + $0x50] sm:$0xff] %vm360_vm1, %v6648_v58 }
 0x5d6   :  { %8443 = vrcp.f32 %v3627_v38  ;;  %v8422_v61 = vpop.eup %8421  ;;  %v8146_v46 = vpop.f32.mrf.mxu1  ;;  %6703 = vst.msk [vmem:[#allocation2 + $0x8] sm:$0xff] %vm360_vm1, %v6639_v14 }
 0x5d7   :  { %v8424_v15 = vpop.eup %8423  ;;  %8445 = vrcp.f32 %v10534_v4  ;;  %v10713_v12 = vmul.f32 %v8420_v55, %v8146_v46  ;;  %v6650_v52 = vmul.f32 %v8422_v61, %v10518_v28 }
 0x5d8   :  { %v8426_v60 = vpop.eup %8425  ;;  %v5869_v20 = vpop.f32.mrf.mxu1  ;;  %v6641_v8 = vmul.f32 %v8424_v15, %v10594_v43 }
 0x5d9   :  { %v3633_v53 = vpop.xlane.xlu0 %3632  ;;  %v8428_v1 = vpop.eup %8427  ;;  %v10717_v18 = vmul.f32 %v8426_v60, %v5869_v20  ;;  %6714 = vst.msk [vmem:[#allocation2 + $0x60] sm:$0xff] %vm360_vm1, %v6650_v52 }
 0x5da   :  { %8447 = vrcp.f32 %v3633_v53  ;;  %v8430_v3 = vpop.eup %8429  ;;  %6705 = vst.msk [vmem:[#allocation2 + $0x18] sm:$0xff] %vm360_vm1, %v6641_v8 }
 0x5db   :  { %8449 = vrcp.f32 %v10538_v21  ;;  %v8432_v4 = vpop.eup %8431  ;;  %v6652_v28 = vmul.f32 %v8430_v3, %v10628_v27 }
 0x5dc   :  { %8451 = vrcp.f32 %v10576_v36  ;;  %v8434_v11 = vpop.eup %8433  ;;  %v8160_v43 = vpop.f32.mrf.mxu1  ;;  %v6643_v51 = vmul.f32 %v8432_v4, %v10492_v59  ;;  %v11222_v4 = vld [vmem:[#allocation7_spill] sm:$0xff] }
 0x5dd   :  { %8453 = vrcp.f32 %v10582_v63  ;;  %v3639_v50 = vpop.xlane.xlu0 %3638  ;;  %v8436_v42 = vpop.eup %8435  ;;  %v6689_v22 = vmul.f32 %v8434_v11, %v8160_v43  ;;  %6716 = vst.msk [vmem:[#allocation2 + $0x70] sm:$0xff] %vm360_vm1, %v6652_v28 }
 0x5de   :  { %8455 = vrcp.f32 %v3639_v50  ;;  %v6043_v26 = vpop.f32.mrf.mxu1  ;;  %6707 = vst.msk [vmem:[#allocation2 + $0x28] sm:$0xff] %vm360_vm1, %v6643_v51  ;;  %v6659_v10 = vmul.f32 %v8436_v42, %v10526_v57  ;;  %v11225_v50 = vld [vmem:[#allocation4_spill] sm:$0xff]  ;;  %v11227_v42 = vld [vmem:[#allocation17_spill] sm:$0xff] }
 0x5df   :  { %v8438_v21 = vpop.eup %8437  ;;  %8457 = vrcp.f32 %v10542_v7  ;;  %v6688_v36 = vmul.f32 %v8428_v1, %v6043_v26  ;;  %6902 = vrot.lane.b32.xlu1 %v6689_v22, %s8514_s3 }
 0x5e0   :  { %v6645_v27 = vmul.f32 %v8438_v21, %v10602_v16  ;;  %v8440_v63 = vpop.eup %8439  ;;  %8459 = vrcp.f32 %v10588_v31  ;;  %v8167_v32 = vpop.f32.mrf.mxu0  ;;  %v11228_v21 = vld [vmem:[#allocation35_spill] sm:$0xff] }
 0x5e1   :  { %v3645_v59 = vpop.xlane.xlu0 %3644  ;;  %v8442_v54 = vpop.eup %8441  ;;  %6900 = vrot.lane.b32.xlu0 %v6688_v36, %s8514_s3  ;;  %v6658_v16 = vmul.f32 %v8440_v63, %v10530_v56 }
 0x5e2   :  { %8461 = vrcp.f32 %v3645_v59  ;;  %6709 = vst.msk [vmem:[#allocation2 + $0x38] sm:$0xff] %vm360_vm1, %v6645_v27  ;;  %v6675_v57 = vmul.f32 %v8442_v54, %v10566_v29  ;;  %v6130_v61 = vpop.f32.mrf.mxu0  ;;  %v11229_v27 = vld [vmem:[#allocation33_spill] sm:$0xff] }
 0x5e3   :  { %v8444_v23 = vpop.eup %8443  ;;  %8463 = vrcp.f32 %v10549_v39  ;;  %v6735_v7 = vpop.permute.xlu1 %6734  ;;  %6744 = vrot.lane.b32.xlu1 %v6659_v10, %s8512_s5  ;;  %v11230_v59 = vld [vmem:[#allocation13_spill] sm:$0xff] }
 0x5e4   :  { %v6647_v31 = vmul.f32 %v8444_v23, %v10502_v41  ;;  %v8446_v33 = vpop.eup %8445  ;;  %6783 = vst.msk [vmem:[#allocation2] sm:$0xff] %vm6782_vm3, %v6735_v7  ;;  %8465 = vrcp.f32 %v10592_v37  ;;  %v11231_v10 = vld [vmem:[#allocation5_spill] sm:$0xff] }
 0x5e5   :  { %v6737_v58 = vpop.permute.xlu0 %6736  ;;  %6742 = vrot.lane.b32.xlu0 %v6658_v16, %s8512_s5  ;;  %v6674_v41 = vmul.f32 %v8446_v33, %v10572_v45  ;;  %8467 = vrcp.f32 %v10554_v48  ;;  %v8174_v53 = vpop.f32.mrf.mxu1  ;;  %v11232_v16 = vld [vmem:[#allocation14_spill] sm:$0xff] }
 0x5e6   :  { %6784 = vst.msk [vmem:[#allocation2 + $0x8] sm:$0xff] %vm6782_vm3, %v6737_v58  ;;  %8469 = vrcp.f32 %v10596_v44 }
 0x5e7   :  { %6711 = vst.msk [vmem:[#allocation2 + $0x48] sm:$0xff] %vm360_vm1, %v6647_v31  ;;  %v8448_v39 = vpop.eup %8447  ;;  %v6816_v56 = vpop.permute.xlu1 %6815  ;;  %6825 = vrot.lane.b32.xlu1 %v6675_v57, %s8513_s8  ;;  %8471 = vrcp.f32 %v10559_v47 }
 0x5e8   :  { %v8450_v38 = vpop.eup %8449  ;;  %v6649_v14 = vmul.f32 %v8448_v39, %v10610_v40  ;;  %6864 = vst.msk [vmem:[#allocation2] sm:$0xff] %vm6863_vm4, %v6816_v56  ;;  %8473 = vrcp.f32 %v10600_v35 }
 0x5e9   :  { %v8452_v55 = vpop.eup %8451  ;;  %6823 = vrot.lane.b32.xlu0 %v6674_v41, %s8513_s8  ;;  %v6690_v45 = vmul.f32 %v8450_v38, %v6130_v61  ;;  %8475 = vrcp.f32 %v10606_v34  ;;  %v8181_v43 = vpop.f32.mrf.mxu0  ;;  %v11234_v41 = vld [vmem:[#allocation36_spill] sm:$0xff] }
 0x5ea   :  { %v8454_v29 = vpop.eup %8453  ;;  %v6691_v46 = vmul.f32 %v8452_v55, %v8167_v32  ;;  %6713 = vst.msk [vmem:[#allocation2 + $0x58] sm:$0xff] %vm360_vm1, %v6649_v14  ;;  %8477 = vrcp.f32 %v10568_v0  ;;  %v11233_v32 = vld [vmem:[#allocation37_spill] sm:$0xff]  ;;  %v11235_v55 = vld [vmem:[#allocation15_spill] sm:$0xff] }
 0x5eb   :  { %v8456_v37 = vpop.eup %8455  ;;  %v6818_v15 = vpop.permute.xlu1 %6817  ;;  %v6661_v44 = vmul.f32 %v8454_v29, %v10638_v9  ;;  %8479 = vrcp.f32 %v10612_v13  ;;  %v11224_v13 = vld [vmem:[#allocation25_spill] sm:$0xff] }
 0x5ec   :  { %6906 = vrot.lane.b32.xlu1 %v6691_v46, %s8514_s3  ;;  %v6651_v48 = vmul.f32 %v8456_v37, %v10512_v25  ;;  %v8458_v40 = vpop.eup %8457  ;;  %6865 = vst.msk [vmem:[#allocation2 + $0x8] sm:$0xff] %vm6863_vm4, %v6818_v15  ;;  %8481 = vrcp.f32 %v10574_v17  ;;  %v11226_v17 = vld [vmem:[#allocation21_spill] sm:$0xff]  ;;  %v6304_v26 = vpop.f32.mrf.mxu0  ;;  %v11236_v46 = vld [vmem:[#allocation27_spill] sm:$0xff]  ;;  %v11237_v15 = vld [vmem:[#allocation22_spill] sm:$0xff] }
 0x5ed   :  { %v8460_v52 = vpop.eup %8459  ;;  %6904 = vrot.lane.b32.xlu0 %v6690_v45, %s8514_s3  ;;  %v6660_v47 = vmul.f32 %v8458_v40, %v10644_v19  ;;  %v6217_v19 = vpop.f32.mrf.mxu1  ;;  %8483 = vrcp.f32 %v11222_v4 }
 0x5ee   :  { %6715 = vst.msk [vmem:[#allocation2 + $0x68] sm:$0xff] %vm360_vm1, %v6651_v48  ;;  %v6677_v8 = vmul.f32 %v8460_v52, %v10687_v24  ;;  %8485 = vrcp.f32 %v11225_v50  ;;  %v11238_v48 = vld [vmem:[#allocation31_spill] sm:$0xff]  ;;  %v11239_v52 = vld [vmem:[#allocation12_spill] sm:$0xff] }
 0x5ef   :  { %v8462_v60 = vpop.eup %8461  ;;  %8487 = vrcp.f32 %v11227_v42  ;;  %v8188_v57 = vpop.f32.mrf.mxu1 }
 0x5f0   :  { %6748 = vrot.lane.b32.xlu1 %v6661_v44, %s8512_s5  ;;  %v6653_v20 = vmul.f32 %v8462_v60, %v10622_v5  ;;  %v8464_v25 = vpop.eup %8463  ;;  %8489 = vrcp.f32 %v11228_v21 }
 0x5f1   :  { %6746 = vrot.lane.b32.xlu0 %v6660_v47, %s8512_s5  ;;  %v6676_v35 = vmul.f32 %v8464_v25, %v10695_v62  ;;  %v8466_v9 = vpop.eup %8465  ;;  %v11223_v62 = vld [vmem:[#allocation3_spill] sm:$0xff]  ;;  %8491 = vrcp.f32 %v11229_v27  ;;  %v6391_v61 = vpop.f32.mrf.mxu1  ;;  %v11240_v47 = vld [vmem:[#allocation16_spill] sm:$0xff] }
 0x5f2   :  { %6717 = vst.msk [vmem:[#allocation2 + $0x78] sm:$0xff] %vm360_vm1, %v6653_v20  ;;  %v8468_v1 = vpop.eup %8467  ;;  %v6693_v5 = vmul.f32 %v8466_v9, %v8174_v53  ;;  %8493 = vrcp.f32 %v11231_v10  ;;  %v8195_v60 = vpop.f32.mrf.mxu0  ;;  %v11242_v9 = vld [vmem:[#allocation34_spill] sm:$0xff] }
 0x5f3   :  { %v8470_v3 = vpop.eup %8469  ;;  %v6692_v24 = vmul.f32 %v8468_v1, %v6217_v19  ;;  %8495 = vrcp.f32 %v11234_v41 }
 0x5f4   :  { %6829 = vrot.lane.b32.xlu1 %v6677_v8, %s8513_s8  ;;  %v8472_v34 = vpop.eup %8471  ;;  %v6663_v0 = vmul.f32 %v8470_v3, %v11223_v62  ;;  %8497 = vrcp.f32 %v11235_v55  ;;  %v6478_v25 = vpop.f32.mrf.mxu0  ;;  %v11241_v8 = vld [vmem:[#allocation23_spill] sm:$0xff]  ;;  %v11243_v3 = vld [vmem:[#allocation6_spill] sm:$0xff] }
 0x5f5   :  { %6827 = vrot.lane.b32.xlu0 %v6676_v35, %s8513_s8  ;;  %v8474_v28 = vpop.eup %8473  ;;  %v6662_v11 = vmul.f32 %v8472_v34, %v11224_v13  ;;  %8499 = vrcp.f32 %v11236_v46  ;;  %v8202_v34 = vpop.f32.mrf.mxu1 }
 0x5f6   :  { %v6679_v51 = vmul.f32 %v8474_v28, %v11226_v17  ;;  %v8476_v22 = vpop.eup %8475  ;;  %8501 = vrcp.f32 %v11237_v15 }
 0x5f7   :  { %v8478_v36 = vpop.eup %8477  ;;  %v6695_v63 = vmul.f32 %v8476_v22, %v8181_v43  ;;  %8503 = vrcp.f32 %v11240_v47  ;;  %v6565_v62 = vpop.f32.mrf.mxu1 }
 0x5f8   :  { %6910 = vrot.lane.b32.xlu1 %v6693_v5, %s8514_s3  ;;  %v8480_v54 = vpop.eup %8479  ;;  %v6694_v23 = vmul.f32 %v8478_v36, %v6304_v26  ;;  %8505 = vrcp.f32 %v11241_v8 }
 0x5f9   :  { %6908 = vrot.lane.b32.xlu0 %v6692_v24, %s8514_s3  ;;  %v8482_v7 = vpop.eup %8481  ;;  %v6665_v31 = vmul.f32 %v8480_v54, %v11232_v16 }
 0x5fa   :  { %v8484_v33 = vpop.eup %8483  ;;  %v6664_v58 = vmul.f32 %v8482_v7, %v11233_v32 }
 0x5fb   :  { %v6681_v39 = vmul.f32 %v8484_v33, %v10701_v30  ;;  %v8486_v38 = vpop.eup %8485 }
 0x5fc   :  { %6752 = vrot.lane.b32.xlu1 %v6663_v0, %s8512_s5  ;;  %v6680_v56 = vmul.f32 %v8486_v38, %v10707_v49  ;;  %v8488_v14 = vpop.eup %8487 }
 0x5fd   :  { %6750 = vrot.lane.b32.xlu0 %v6662_v11, %s8512_s5  ;;  %v8490_v29 = vpop.eup %8489  ;;  %v6697_v37 = vmul.f32 %v8488_v14, %v8188_v57 }
 0x5fe   :  { %v8492_v45 = vpop.eup %8491  ;;  %v6696_v30 = vmul.f32 %v8490_v29, %v6391_v61 }
 0x5ff   :  { %v8494_v49 = vpop.eup %8493  ;;  %v6667_v40 = vmul.f32 %v8492_v45, %v11238_v48 }
 0x600   :  { %6833 = vrot.lane.b32.xlu1 %v6679_v51, %s8513_s8  ;;  %v6666_v44 = vmul.f32 %v8494_v49, %v11239_v52  ;;  %v8496_v20 = vpop.eup %8495 }
 0x601   :  { %6831 = vrot.lane.b32.xlu0 %v11230_v59, %s8513_s8  ;;  %v8498_v53 = vpop.eup %8497  ;;  %v6699_v35 = vmul.f32 %v8496_v20, %v8195_v60 }
 0x602   :  { %v8500_v19 = vpop.eup %8499  ;;  %v6698_v1 = vmul.f32 %v8498_v53, %v6478_v25 }
 0x603   :  { %v8502_v5 = vpop.eup %8501  ;;  %v6669_v24 = vmul.f32 %v8500_v19, %v11243_v3 }
 0x604   :  { %6914 = vrot.lane.b32.xlu1 %v6695_v63, %s8514_s3  ;;  %v8504_v4 = vpop.eup %8503 }
 0x605   :  { %6912 = vrot.lane.b32.xlu0 %v6694_v23, %s8514_s3  ;;  %v6701_v0 = vmul.f32 %v8504_v4, %v8202_v34  ;;  %v8506_v28 = vpop.eup %8505 }
 0x606   :  { %v6700_v13 = vmul.f32 %v8506_v28, %v6565_v62  ;;  %v7410_v62 = vld [vmem:[%s10960_s4] ss:$0 sm:$0xff] }
 0x608   :  { %6756 = vrot.lane.b32.xlu1 %v6665_v31, %s8512_s5 }
 0x609   :  { %6754 = vrot.lane.b32.xlu0 %v6664_v58, %s8512_s5 }
 0x60c   :  { %6837 = vrot.lane.b32.xlu1 %v6681_v39, %s8513_s8 }
 0x60d   :  { %6835 = vrot.lane.b32.xlu0 %v6680_v56, %s8513_s8 }
 0x610   :  { %6918 = vrot.lane.b32.xlu1 %v6697_v37, %s8514_s3 }
 0x611   :  { %6916 = vrot.lane.b32.xlu0 %v6696_v30, %s8514_s3 }
 0x614   :  { %6760 = vrot.lane.b32.xlu1 %v6667_v40, %s8512_s5 }
 0x615   :  { %6758 = vrot.lane.b32.xlu0 %v6666_v44, %s8512_s5 }
 0x618   :  { %6841 = vrot.lane.b32.xlu1 %v10673_v6, %s8513_s8  ;;  %v6668_v6 = vmul.f32 %v8502_v5, %v10675_v2 }
 0x619   :  { %6839 = vrot.lane.b32.xlu0 %v11242_v9, %s8513_s8 }
 0x61c   :  { %6922 = vrot.lane.b32.xlu1 %v6699_v35, %s8514_s3 }
 0x61d   :  { %6920 = vrot.lane.b32.xlu0 %v6698_v1, %s8514_s3 }
 0x620   :  { %6764 = vrot.lane.b32.xlu1 %v6669_v24, %s8512_s5 }
 0x621   :  { %6762 = vrot.lane.b32.xlu0 %v6668_v6, %s8512_s5 }
 0x624   :  { %6845 = vrot.lane.b32.xlu1 %v10713_v12, %s8513_s8 }
 0x625   :  { %6843 = vrot.lane.b32.xlu0 %v10717_v18, %s8513_s8 }
 0x628   :  { %6926 = vrot.lane.b32.xlu1 %v6701_v0, %s8514_s3 }
 0x629   :  { %6924 = vrot.lane.b32.xlu0 %v6700_v13, %s8514_s3 }
 0x637   :  { %v6899_v2 = vpop.permute.xlu1 %6898 }
 0x638   :  { %6946 = vst.msk [vmem:[#allocation2 + $0x8] sm:$0xff] %vm6944_vm5, %v6899_v2 }
 0x639   :  { %v6897_v11 = vpop.permute.xlu0 %6896 }
 0x63a   :  { %6945 = vst.msk [vmem:[#allocation2] sm:$0xff] %vm6944_vm5, %v6897_v11 }
 0x63b   :  { %v6741_v12 = vpop.permute.xlu1 %6740 }
 0x63c   :  { %6786 = vst.msk [vmem:[#allocation2 + $0x18] sm:$0xff] %vm6782_vm3, %v6741_v12 }
 0x63d   :  { %v6739_v43 = vpop.permute.xlu0 %6738 }
 0x63e   :  { %6785 = vst.msk [vmem:[#allocation2 + $0x10] sm:$0xff] %vm6782_vm3, %v6739_v43 }
 0x63f   :  { %v6822_v18 = vpop.permute.xlu1 %6821  ;;  %v6962_v51 = vld [vmem:[#allocation2 + $0x8] sm:$0xff] }
 0x640   :  { %6867 = vst.msk [vmem:[#allocation2 + $0x18] sm:$0xff] %vm6863_vm4, %v6822_v18 }
 0x641   :  { %v6820_v50 = vpop.permute.xlu0 %6819  ;;  %v6961_v17 = vld [vmem:[#allocation2] sm:$0xff] }
 0x642   :  { %6866 = vst.msk [vmem:[#allocation2 + $0x10] sm:$0xff] %vm6863_vm4, %v6820_v50  ;;  %8211 = vmatprep.mubr.msk.f32.mxu0 %vm50_vm0, %v6961_v17 }
 0x643   :  { %8212 = vmatmul.mubr.msk.f32.vlgmr.msra.gmra.mxu0 %vm50_vm0, %v6962_v51 }
 0x651   :  { %v6903_v42 = vpop.permute.xlu1 %6902 }
 0x652   :  { %6948 = vst.msk [vmem:[#allocation2 + $0x18] sm:$0xff] %vm6944_vm5, %v6903_v42 }
 0x653   :  { %v6901_v22 = vpop.permute.xlu0 %6900 }
 0x654   :  { %6947 = vst.msk [vmem:[#allocation2 + $0x10] sm:$0xff] %vm6944_vm5, %v6901_v22 }
 0x655   :  { %v6745_v21 = vpop.permute.xlu1 %6744 }
 0x656   :  { %6788 = vst.msk [vmem:[#allocation2 + $0x28] sm:$0xff] %vm6782_vm3, %v6745_v21 }
 0x657   :  { %v6743_v26 = vpop.permute.xlu0 %6742 }
 0x658   :  { %6787 = vst.msk [vmem:[#allocation2 + $0x20] sm:$0xff] %vm6782_vm3, %v6743_v26 }
 0x659   :  { %v6826_v36 = vpop.permute.xlu1 %6825  ;;  %v6964_v59 = vld [vmem:[#allocation2 + $0x18] sm:$0xff] }
 0x65a   :  { %6869 = vst.msk [vmem:[#allocation2 + $0x28] sm:$0xff] %vm6863_vm4, %v6826_v36 }
 0x65b   :  { %v6824_v27 = vpop.permute.xlu0 %6823  ;;  %v6963_v63 = vld [vmem:[#allocation2 + $0x10] sm:$0xff] }
 0x65c   :  { %6868 = vst.msk [vmem:[#allocation2 + $0x20] sm:$0xff] %vm6863_vm4, %v6824_v27  ;;  %8214 = vmatprep.mubr.msk.f32.mxu0 %vm50_vm0, %v6963_v63 }
 0x65d   :  { %8215 = vmatmul.mubr.msk.f32.gmra.mxu0 %vm50_vm0, %v6964_v59 }
 0x65e   :  { %v6907_v54 = vpop.permute.xlu1 %6906 }
 0x65f   :  { %6950 = vst.msk [vmem:[#allocation2 + $0x28] sm:$0xff] %vm6944_vm5, %v6907_v54  ;;  %v6905_v10 = vpop.permute.xlu0 %6904 }
 0x660   :  { %6949 = vst.msk [vmem:[#allocation2 + $0x20] sm:$0xff] %vm6944_vm5, %v6905_v10 }
 0x662   :  { %v6749_v23 = vpop.permute.xlu1 %6748 }
 0x663   :  { %6790 = vst.msk [vmem:[#allocation2 + $0x38] sm:$0xff] %vm6782_vm3, %v6749_v23  ;;  %v6747_v7 = vpop.permute.xlu0 %6746 }
 0x664   :  { %6789 = vst.msk [vmem:[#allocation2 + $0x30] sm:$0xff] %vm6782_vm3, %v6747_v7 }
 0x666   :  { %v6830_v16 = vpop.permute.xlu1 %6829  ;;  %v6966_v32 = vld [vmem:[#allocation2 + $0x28] sm:$0xff] }
 0x667   :  { %6871 = vst.msk [vmem:[#allocation2 + $0x38] sm:$0xff] %vm6863_vm4, %v6830_v16  ;;  %v6828_v31 = vpop.permute.xlu0 %6827  ;;  %v6965_v33 = vld [vmem:[#allocation2 + $0x20] sm:$0xff] }
 0x668   :  { %6870 = vst.msk [vmem:[#allocation2 + $0x30] sm:$0xff] %vm6863_vm4, %v6828_v31  ;;  %8217 = vmatprep.mubr.msk.f32.mxu0 %vm50_vm0, %v6965_v33 }
 0x669   :  { %8218 = vmatmul.mubr.msk.f32.gmra.mxu0 %vm50_vm0, %v6966_v32 }
 0x66a   :  { %v6911_v58 = vpop.permute.xlu1 %6910 }
 0x66b   :  { %6952 = vst.msk [vmem:[#allocation2 + $0x38] sm:$0xff] %vm6944_vm5, %v6911_v58  ;;  %v6909_v57 = vpop.permute.xlu0 %6908 }
 0x66c   :  { %6951 = vst.msk [vmem:[#allocation2 + $0x30] sm:$0xff] %vm6944_vm5, %v6909_v57 }
 0x66e   :  { %v6753_v39 = vpop.permute.xlu1 %6752 }
 0x66f   :  { %6792 = vst.msk [vmem:[#allocation2 + $0x48] sm:$0xff] %vm6782_vm3, %v6753_v39  ;;  %v6751_v38 = vpop.permute.xlu0 %6750 }
 0x670   :  { %6791 = vst.msk [vmem:[#allocation2 + $0x40] sm:$0xff] %vm6782_vm3, %v6751_v38 }
 0x672   :  { %v6834_v56 = vpop.permute.xlu1 %6833  ;;  %v6968_v55 = vld [vmem:[#allocation2 + $0x38] sm:$0xff] }
 0x673   :  { %6873 = vst.msk [vmem:[#allocation2 + $0x48] sm:$0xff] %vm6863_vm4, %v6834_v56  ;;  %v6832_v41 = vpop.permute.xlu0 %6831  ;;  %v6967_v14 = vld [vmem:[#allocation2 + $0x30] sm:$0xff] }
 0x674   :  { %6872 = vst.msk [vmem:[#allocation2 + $0x40] sm:$0xff] %vm6863_vm4, %v6832_v41  ;;  %8220 = vmatprep.mubr.msk.f32.mxu0 %vm50_vm0, %v6967_v14 }
 0x675   :  { %8221 = vmatmul.mubr.msk.f32.gmra.mxu0 %vm50_vm0, %v6968_v55 }
 0x676   :  { %v6915_v61 = vpop.permute.xlu1 %6914 }
 0x677   :  { %6954 = vst.msk [vmem:[#allocation2 + $0x48] sm:$0xff] %vm6944_vm5, %v6915_v61  ;;  %v6913_v29 = vpop.permute.xlu0 %6912 }
 0x678   :  { %6953 = vst.msk [vmem:[#allocation2 + $0x40] sm:$0xff] %vm6944_vm5, %v6913_v29 }
 0x67a   :  { %v6757_v46 = vpop.permute.xlu1 %6756 }
 0x67b   :  { %6794 = vst.msk [vmem:[#allocation2 + $0x58] sm:$0xff] %vm6782_vm3, %v6757_v46  ;;  %v6755_v37 = vpop.permute.xlu0 %6754 }
 0x67c   :  { %6793 = vst.msk [vmem:[#allocation2 + $0x50] sm:$0xff] %vm6782_vm3, %v6755_v37 }
 0x67e   :  { %v6838_v45 = vpop.permute.xlu1 %6837  ;;  %v6970_v49 = vld [vmem:[#allocation2 + $0x48] sm:$0xff] }
 0x67f   :  { %6875 = vst.msk [vmem:[#allocation2 + $0x58] sm:$0xff] %vm6863_vm4, %v6838_v45  ;;  %v6836_v15 = vpop.permute.xlu0 %6835  ;;  %v6969_v30 = vld [vmem:[#allocation2 + $0x40] sm:$0xff] }
 0x680   :  { %6874 = vst.msk [vmem:[#allocation2 + $0x50] sm:$0xff] %vm6863_vm4, %v6836_v15  ;;  %8223 = vmatprep.mubr.msk.f32.mxu0 %vm50_vm0, %v6969_v30 }
 0x681   :  { %8224 = vmatmul.mubr.msk.f32.gmra.mxu0 %vm50_vm0, %v6970_v49 }
 0x682   :  { %v6919_v48 = vpop.permute.xlu1 %6918 }
 0x683   :  { %6956 = vst.msk [vmem:[#allocation2 + $0x58] sm:$0xff] %vm6944_vm5, %v6919_v48  ;;  %v6917_v40 = vpop.permute.xlu0 %6916 }
 0x684   :  { %6955 = vst.msk [vmem:[#allocation2 + $0x50] sm:$0xff] %vm6944_vm5, %v6917_v40 }
 0x686   :  { %v6761_v52 = vpop.permute.xlu1 %6760 }
 0x687   :  { %6796 = vst.msk [vmem:[#allocation2 + $0x68] sm:$0xff] %vm6782_vm3, %v6761_v52  ;;  %v6759_v44 = vpop.permute.xlu0 %6758 }
 0x688   :  { %6795 = vst.msk [vmem:[#allocation2 + $0x60] sm:$0xff] %vm6782_vm3, %v6759_v44 }
 0x68a   :  { %v6842_v60 = vpop.permute.xlu1 %6841  ;;  %v6972_v25 = vld [vmem:[#allocation2 + $0x58] sm:$0xff] }
 0x68b   :  { %6877 = vst.msk [vmem:[#allocation2 + $0x68] sm:$0xff] %vm6863_vm4, %v6842_v60  ;;  %v6840_v47 = vpop.permute.xlu0 %6839  ;;  %v6971_v20 = vld [vmem:[#allocation2 + $0x50] sm:$0xff] }
 0x68c   :  { %6876 = vst.msk [vmem:[#allocation2 + $0x60] sm:$0xff] %vm6863_vm4, %v6840_v47  ;;  %8226 = vmatprep.mubr.msk.f32.mxu0 %vm50_vm0, %v6971_v20 }
 0x68d   :  { %8227 = vmatmul.mubr.msk.f32.gmra.mxu0 %vm50_vm0, %v6972_v25 }
 0x68e   :  { %v6923_v53 = vpop.permute.xlu1 %6922 }
 0x68f   :  { %6958 = vst.msk [vmem:[#allocation2 + $0x68] sm:$0xff] %vm6944_vm5, %v6923_v53  ;;  %v6921_v8 = vpop.permute.xlu0 %6920 }
 0x690   :  { %6957 = vst.msk [vmem:[#allocation2 + $0x60] sm:$0xff] %vm6944_vm5, %v6921_v8 }
 0x692   :  { %v6765_v35 = vpop.permute.xlu1 %6764 }
 0x693   :  { %6798 = vst.msk [vmem:[#allocation2 + $0x78] sm:$0xff] %vm6782_vm3, %v6765_v35  ;;  %v6763_v9 = vpop.permute.xlu0 %6762 }
 0x694   :  { %6797 = vst.msk [vmem:[#allocation2 + $0x70] sm:$0xff] %vm6782_vm3, %v6763_v9 }
 0x696   :  { %v6846_v19 = vpop.permute.xlu1 %6845  ;;  %v6974_v3 = vld [vmem:[#allocation2 + $0x68] sm:$0xff] }
 0x697   :  { %6879 = vst.msk [vmem:[#allocation2 + $0x78] sm:$0xff] %vm6863_vm4, %v6846_v19  ;;  %v6844_v1 = vpop.permute.xlu0 %6843  ;;  %v6973_v5 = vld [vmem:[#allocation2 + $0x60] sm:$0xff] }
 0x698   :  { %6878 = vst.msk [vmem:[#allocation2 + $0x70] sm:$0xff] %vm6863_vm4, %v6844_v1  ;;  %8229 = vmatprep.mubr.msk.f32.mxu0 %vm50_vm0, %v6973_v5 }
 0x699   :  { %8230 = vmatmul.mubr.msk.f32.gmra.mxu0 %vm50_vm0, %v6974_v3 }
 0x69a   :  { %v6927_v24 = vpop.permute.xlu1 %6926 }
 0x69b   :  { %6960 = vst.msk [vmem:[#allocation2 + $0x78] sm:$0xff] %vm6944_vm5, %v6927_v24  ;;  %v6925_v6 = vpop.permute.xlu0 %6924 }
 0x69c   :  { %6959 = vst.msk [vmem:[#allocation2 + $0x70] sm:$0xff] %vm6944_vm5, %v6925_v6 }
 0x6a2   :  { %v6976_v4 = vld [vmem:[#allocation2 + $0x78] sm:$0xff] }
 0x6a3   :  { %v6975_v34 = vld [vmem:[#allocation2 + $0x70] sm:$0xff] }
 0x6a4   :  { %8232 = vmatprep.mubr.msk.f32.mxu0 %vm50_vm0, %v6975_v34 }
 0x6a5   :  { %8233 = vmatmul.mubr.msk.f32.gmra.mxu0 %vm50_vm0, %v6976_v4 }
 0x703   :  { %v8213_v0 = vpop.f32.mrf.mxu0 }
 0x704   :  { %v7108_v28 = vadd.f32 %v8213_v0, %v7410_v62 }
 0x705   :  { %v7102_v13 = vpop.f32.mrf.mxu0 }
 0x706   :  { %7182 = vst.msk [vmem:[%s10961_s6 + $0x8] sm:$0xff] %vm50_vm0, %v7108_v28  ;;  %v7103_v2 = vadd.f32 %v7410_v62, %v7102_v13 }
 0x708   :  { %7181 = vst.msk [vmem:[%s10961_s6] sm:$0xff] %vm50_vm0, %v7103_v2 }
 0x71d   :  { %v8216_v11 = vpop.f32.mrf.mxu0 }
 0x71e   :  { %v7118_v12 = vadd.f32 %v8216_v11, %v7410_v62 }
 0x71f   :  { %v7112_v43 = vpop.f32.mrf.mxu0 }
 0x720   :  { %7184 = vst.msk [vmem:[%s10961_s6 + $0x18] sm:$0xff] %vm50_vm0, %v7118_v12  ;;  %v7113_v18 = vadd.f32 %v7410_v62, %v7112_v43 }
 0x722   :  { %7183 = vst.msk [vmem:[%s10961_s6 + $0x10] sm:$0xff] %vm50_vm0, %v7113_v18 }
 0x729   :  { %v8219_v50 = vpop.f32.mrf.mxu0 }
 0x72a   :  { %v7128_v17 = vadd.f32 %v8219_v50, %v7410_v62 }
 0x72b   :  { %v7122_v51 = vpop.f32.mrf.mxu0 }
 0x72c   :  { %7186 = vst.msk [vmem:[%s10961_s6 + $0x28] sm:$0xff] %vm50_vm0, %v7128_v17  ;;  %v7123_v42 = vadd.f32 %v7410_v62, %v7122_v51 }
 0x72e   :  { %7185 = vst.msk [vmem:[%s10961_s6 + $0x20] sm:$0xff] %vm50_vm0, %v7123_v42 }
 0x735   :  { %v8222_v22 = vpop.f32.mrf.mxu0 }
 0x736   :  { %v7138_v21 = vadd.f32 %v8222_v22, %v7410_v62 }
 0x737   :  { %v7132_v26 = vpop.f32.mrf.mxu0 }
 0x738   :  { %7188 = vst.msk [vmem:[%s10961_s6 + $0x38] sm:$0xff] %vm50_vm0, %v7138_v21  ;;  %v7133_v36 = vadd.f32 %v7410_v62, %v7132_v26 }
 0x73a   :  { %7187 = vst.msk [vmem:[%s10961_s6 + $0x30] sm:$0xff] %vm50_vm0, %v7133_v36 }
 0x741   :  { %v8225_v27 = vpop.f32.mrf.mxu0 }
 0x742   :  { %v7148_v63 = vadd.f32 %v8225_v27, %v7410_v62 }
 0x743   :  { %v7142_v59 = vpop.f32.mrf.mxu0 }
 0x744   :  { %7190 = vst.msk [vmem:[%s10961_s6 + $0x48] sm:$0xff] %vm50_vm0, %v7148_v63  ;;  %v7143_v54 = vadd.f32 %v7410_v62, %v7142_v59 }
 0x746   :  { %7189 = vst.msk [vmem:[%s10961_s6 + $0x40] sm:$0xff] %vm50_vm0, %v7143_v54 }
 0x74d   :  { %v8228_v10 = vpop.f32.mrf.mxu0 }
 0x74e   :  { %v7158_v23 = vadd.f32 %v8228_v10, %v7410_v62 }
 0x74f   :  { %v7152_v7 = vpop.f32.mrf.mxu0 }
 0x750   :  { %7192 = vst.msk [vmem:[%s10961_s6 + $0x58] sm:$0xff] %vm50_vm0, %v7158_v23  ;;  %v7153_v16 = vadd.f32 %v7410_v62, %v7152_v7 }
 0x752   :  { %7191 = vst.msk [vmem:[%s10961_s6 + $0x50] sm:$0xff] %vm50_vm0, %v7153_v16 }
 0x759   :  { %v8231_v31 = vpop.f32.mrf.mxu0 }
 0x75a   :  { %v7168_v33 = vadd.f32 %v8231_v31, %v7410_v62 }
 0x75b   :  { %v7162_v32 = vpop.f32.mrf.mxu0 }
 0x75c   :  { %7194 = vst.msk [vmem:[%s10961_s6 + $0x68] sm:$0xff] %vm50_vm0, %v7168_v33  ;;  %v7163_v58 = vadd.f32 %v7410_v62, %v7162_v32 }
 0x75e   :  { %7193 = vst.msk [vmem:[%s10961_s6 + $0x60] sm:$0xff] %vm50_vm0, %v7163_v58 }
 0x765   :  { %v8234_v57 = vpop.f32.mrf.mxu0 }
 0x766   :  { %v7178_v39 = vadd.f32 %v8234_v57, %v7410_v62 }
 0x767   :  { %v7172_v38 = vpop.f32.mrf.mxu0 }
 0x768   :  { %7196 = vst.msk [vmem:[%s10961_s6 + $0x78] sm:$0xff] %vm50_vm0, %v7178_v39  ;;  %v7173_v56 = vadd.f32 %v7410_v62, %v7172_v38 }
 0x76a   :  { %7195 = vst.msk [vmem:[%s10961_s6 + $0x70] sm:$0xff] %vm50_vm0, %v7173_v56 }

</bundles_post_ra>
